<compile_context>
chip_gen: v7x
topology: tpu7x:2x2x1
jax: 0.10.0
libtpu: 0.0.40
codegen_flags: <defaults>
</compile_context>

<pallas_src>
import jax
import jax.numpy as jnp
from jax.experimental import pallas as pl
from jax.experimental.pallas import tpu as pltpu

_EPS = 1e-5


# --------------------------------------------------------------------------
# In-kernel helpers
# --------------------------------------------------------------------------
def _zero_halo(pad_scr):
    """Zero only the 1-pixel halo of the padded scratch (not the interior)."""
    tn, hp, wp, c = pad_scr.shape
    zrow = jnp.zeros((tn, 1, wp, c), pad_scr.dtype)
    pad_scr[:, 0:1, :, :] = zrow
    pad_scr[:, hp - 1:hp, :, :] = zrow
    zcol = jnp.zeros((tn, hp, 1, c), pad_scr.dtype)
    pad_scr[:, :, 0:1, :] = zcol
    pad_scr[:, :, wp - 1:wp, :] = zcol


def _conv3x3_folded(pad_scr, w_ref):
    """3x3/stride-1/pad-1 conv as ONE (M, 9C) @ (9C, C) bf16 MXU matmul."""
    tn, hp, wp, c = pad_scr.shape
    h, w = hp - 2, wp - 2
    cols = [pad_scr[:, dy:dy + h, dx:dx + w, :]          # (tn, h, w, c)
            for dy in range(3) for dx in range(3)]
    patches = jnp.concatenate(cols, axis=-1)              # (tn, h, w, 9c)
    patches = patches.reshape(tn * h * w, 9 * c).astype(jnp.bfloat16)
    return jnp.dot(patches, w_ref[...],                   # w_ref: (9c, c) bf16
                   preferred_element_type=jnp.float32)    # (M, c) f32


def _partial_stats(z):
    """Per-tile [sum; sum-of-squares] over rows -> (1, 2, C) f32."""
    s = jnp.sum(z, axis=0, keepdims=True)                 # (1, C)
    ss = jnp.sum(z * z, axis=0, keepdims=True)            # (1, C)
    return jnp.concatenate([s, ss], axis=0).reshape(1, 2, z.shape[-1])


# --------------------------------------------------------------------------
# Kernels
# --------------------------------------------------------------------------
def _conv_stats_kernel(x_ref, w_ref, z_ref, st_ref, pad_scr):
    """Pass 1: z1 = conv1(x) (+ per-tile sum/sumsq for global BN1 stats)."""
    tn, h, w, c = x_ref.shape
    _zero_halo(pad_scr)
    pad_scr[:, 1:h + 1, 1:w + 1, :] = x_ref[...]
    z = _conv3x3_folded(pad_scr, w_ref)                   # (tn*h*w, c) f32
    z_ref[...] = z.reshape(tn, h, w, c)
    st_ref[...] = _partial_stats(z)


def _bn_relu_conv_stats_kernel(z1_ref, s_ref, b_ref, w_ref, z2_ref, st_ref,
                               pad_scr):
    """Pass 2: z2 = conv2(relu(bn1(z1))) (+ per-tile stats for BN2)."""
    tn, h, w, c = z1_ref.shape
    scale = s_ref[...].reshape(1, 1, 1, c)
    shift = b_ref[...].reshape(1, 1, 1, c)
    y1 = jnp.maximum(z1_ref[...] * scale + shift, 0.0)    # f32 BN + relu
    _zero_halo(pad_scr)
    pad_scr[:, 1:h + 1, 1:w + 1, :] = y1
    z2 = _conv3x3_folded(pad_scr, w_ref)
    z2_ref[...] = z2.reshape(tn, h, w, c)
    st_ref[...] = _partial_stats(z2)


def _bn_add_relu_kernel(x_ref, z2_ref, s_ref, b_ref, o_ref):
    """Pass 3 (lane-dense 2D view): out = relu(x + relu(bn2(z2)))."""
    y2 = jnp.maximum(z2_ref[...] * s_ref[...] + b_ref[...], 0.0)
    o_ref[...] = jnp.maximum(x_ref[...] + y2, 0.0)


# --------------------------------------------------------------------------
# Wrapper
# --------------------------------------------------------------------------
def _fold_weight(w_oihw):
    """OIHW (co, ci, 3, 3) -> tap-major (9*ci, co) in bfloat16 (MXU operand)."""
    co, ci, kh, kw = w_oihw.shape
    w = jnp.transpose(w_oihw.astype(jnp.float32), (2, 3, 1, 0))   # (kh, kw, ci, co)
    return w.reshape(kh * kw * ci, co).astype(jnp.bfloat16)


def _bn_scale_shift(partials, gamma, beta, m_total):
    """Fold per-tile partial sums into global BN scale/shift (tiny XLA op)."""
    tot = jnp.sum(partials, axis=0)                       # (2, C)
    mean = tot[0] / m_total
    var = jnp.maximum(tot[1] / m_total - mean * mean, 0.0)  # biased variance
    scale = gamma * jax.lax.rsqrt(var + _EPS)
    shift = beta - mean * scale
    return scale.reshape(1, -1).astype(jnp.float32), \
           shift.reshape(1, -1).astype(jnp.float32)


def residual_block_forward(x_nchw, params, *, tile_n=None):
    """NCHW in / NCHW out (matches the PyTorch module interface)."""
    N, C, H, W = x_nchw.shape
    x = jnp.transpose(x_nchw, (0, 2, 3, 1)).astype(jnp.float32)   # NHWC

    w1 = _fold_weight(params["w1"])
    w2 = _fold_weight(params["w2"])
    g1 = params["gamma1"].astype(jnp.float32)
    b1 = params["beta1"].astype(jnp.float32)
    g2 = params["gamma2"].astype(jnp.float32)
    b2 = params["beta2"].astype(jnp.float32)

    if tile_n is None:
        tile_n = 2 if N % 2 == 0 else 1
    assert N % tile_n == 0
    grid_n = N // tile_n
    m_total = float(N * H * W)

    cparams = pltpu.CompilerParams(
        dimension_semantics=("parallel",),          # megacore-shardable on v7x
        vmem_limit_bytes=48 * 1024 * 1024,          # explicit budget (< v7x 64 MiB)
    )

    act_spec = pl.BlockSpec((tile_n, H, W, C), lambda i: (i, 0, 0, 0))
    w_spec = pl.BlockSpec((9 * C, C), lambda i: (0, 0))
    vec_spec = pl.BlockSpec((1, C), lambda i: (0, 0))
    st_spec = pl.BlockSpec((1, 2, C), lambda i: (i, 0, 0))

    # ---- pass 1: conv1 + per-tile stats -----------------------------------
    z1, p1 = pl.pallas_call(
        _conv_stats_kernel,
        grid=(grid_n,),
        in_specs=[act_spec, w_spec],
        out_specs=(act_spec, st_spec),
        out_shape=(jax.ShapeDtypeStruct((N, H, W, C), jnp.float32),
                   jax.ShapeDtypeStruct((grid_n, 2, C), jnp.float32)),
        scratch_shapes=[pltpu.VMEM((tile_n, H + 2, W + 2, C), jnp.float32)],
        compiler_params=cparams,
    )(x, w1)
    s1, sh1 = _bn_scale_shift(p1, g1, b1, m_total)

    # ---- pass 2: bn1 + relu -> conv2 + per-tile stats ----------------------
    z2, p2 = pl.pallas_call(
        _bn_relu_conv_stats_kernel,
        grid=(grid_n,),
        in_specs=[act_spec, vec_spec, vec_spec, w_spec],
        out_specs=(act_spec, st_spec),
        out_shape=(jax.ShapeDtypeStruct((N, H, W, C), jnp.float32),
                   jax.ShapeDtypeStruct((grid_n, 2, C), jnp.float32)),
        scratch_shapes=[pltpu.VMEM((tile_n, H + 2, W + 2, C), jnp.float32)],
        compiler_params=cparams,
    )(z1, s1, sh1, w2)
    s2, sh2 = _bn_scale_shift(p2, g2, b2, m_total)

    # ---- pass 3: bn2 + relu + residual add + relu (lane-dense view) --------
    rows, lanes = N * H, W * C
    x2d = x.reshape(rows, lanes)                    # contiguous reshape (free)
    z2d = z2.reshape(rows, lanes)
    s2t = jnp.tile(s2, (1, W))                      # per-column (= w*C+c) scale
    sh2t = jnp.tile(sh2, (1, W))
    row_spec = pl.BlockSpec((tile_n * H, lanes), lambda i: (i, 0))
    lvec_spec = pl.BlockSpec((1, lanes), lambda i: (0, 0))

    out2d = pl.pallas_call(
        _bn_add_relu_kernel,
        grid=(grid_n,),
        in_specs=[row_spec, row_spec, lvec_spec, lvec_spec],
        out_specs=row_spec,
        out_shape=jax.ShapeDtypeStruct((rows, lanes), jnp.float32),
        compiler_params=cparams,
    )(x2d, z2d, s2t, sh2t)

    out = out2d.reshape(N, H, W, C)
    return jnp.transpose(out, (0, 3, 1, 2))         # back to NCHW


# --------------------------------------------------------------------------
# Pure-JAX reference (correctness check).  conv_dtype=bf16 mirrors the kernel's
# bf16 MXU operands (f32 accumulation, f32 BN); conv_dtype=f32 is the exact
# PyTorch-f32 semantics.
# --------------------------------------------------------------------------
def _reference_forward(x_nchw, params, conv_dtype=jnp.float32):
    def conv(x, w):
        return jax.lax.conv_general_dilated(
            x.astype(conv_dtype), w.astype(conv_dtype),
            window_strides=(1, 1), padding=((1, 1), (1, 1)),
            dimension_numbers=("NCHW", "OIHW", "NCHW"),
            preferred_element_type=jnp.float32)

    def bn(x, g, b):
        mean = x.mean(axis=(0, 2, 3), keepdims=True)
        var = ((x - mean) ** 2).mean(axis=(0, 2, 3), keepdims=True)
        return ((x - mean) * jax.lax.rsqrt(var + _EPS)
                * g.reshape(1, -1, 1, 1) + b.reshape(1, -1, 1, 1))

    out = jax.nn.relu(bn(conv(x_nchw, params["w1"]), params["gamma1"], params["beta1"]))
    out = jax.nn.relu(bn(conv(out, params["w2"]), params["gamma2"], params["beta2"]))
    return jax.nn.relu(x_nchw + out)


if __name__ == "__main__":
    # Small deterministic shapes: batch=4, channels=8, spatial=16x16 (W*C = 128
    # makes the final pass exactly lane-dense); grid tiles the batch in 2s.
    N, C, H, W = 4, 8, 16, 16
    key = jax.random.PRNGKey(0)
    k1, k2, k3, k4, k5, k6, k7 = jax.random.split(key, 7)

    params = {
        "w1": 0.1 * jax.random.normal(k1, (C, C, 3, 3), jnp.float32),   # OIHW
        "w2": 0.1 * jax.random.normal(k2, (C, C, 3, 3), jnp.float32),   # OIHW
        "gamma1": 1.0 + 0.1 * jax.random.normal(k3, (C,), jnp.float32),
        "beta1": 0.1 * jax.random.normal(k4, (C,), jnp.float32),
        "gamma2": 1.0 + 0.1 * jax.random.normal(k5, (C,), jnp.float32),
        "beta2": 0.1 * jax.random.normal(k6, (C,), jnp.float32),
    }
    x = jax.random.normal(k7, (N, C, H, W), jnp.float32)

    out = jax.jit(residual_block_forward)(x, params)
    out = jax.block_until_ready(out)
    assert out.shape == (N, C, H, W)

    ref_bf16 = _reference_forward(x, params, conv_dtype=jnp.bfloat16)
    ref_f32 = _reference_forward(x, params, conv_dtype=jnp.float32)
    err_bf16 = float(jnp.max(jnp.abs(out - ref_bf16)))
    err_f32 = float(jnp.max(jnp.abs(out - ref_f32)))
    assert err_bf16 < 2e-2, f"mismatch vs bf16-matmul reference: {err_bf16}"
    assert err_f32 < 1e-1, f"mismatch vs f32 reference: {err_f32}"
    print("KERNEL_OK")
</pallas_src>

<mosaic_0001>
module attributes {stable_mosaic.version = 11 : i64} {
  func.func @_conv_stats_kernel(%arg0: i32, %arg1: memref<2x16x16x8xf32, #tpu.memory_space<vmem>>, %arg2: memref<72x8xbf16, #tpu.memory_space<vmem>>, %arg3: memref<2x16x16x8xf32, #tpu.memory_space<vmem>>, %arg4: memref<1x2x8xf32, #tpu.memory_space<vmem>>, %arg5: memref<2x18x18x8xf32, #tpu.memory_space<vmem>>) attributes {dimension_semantics = [#tpu.dimension_semantics<parallel>], iteration_bounds = array<i64: 2>, scalar_prefetch = 0 : i64, scratch_operands = 1 : i64, tpu.core_type = #tpu.core_type<tc>, window_params = [{transform_indices = @transform_0, window_bounds = array<i64: 2, 16, 16, 8>}, {pipeline_mode = #tpu.pipeline_mode<synchronous>, transform_indices = @transform_1, window_bounds = array<i64: 72, 8>}, {transform_indices = @transform_2, window_bounds = array<i64: 2, 16, 16, 8>}, {transform_indices = @transform_3, window_bounds = array<i64: 1, 2, 8>}]} {
    %cst = arith.constant 0.000000e+00 : f32
    %0 = vector.broadcast %cst : f32 to vector<2x1x18x8xf32>
    %c0 = arith.constant 0 : index
    %c0_0 = arith.constant 0 : index
    %c0_1 = arith.constant 0 : index
    %c0_2 = arith.constant 0 : index
    %1 = vector.load %arg5[%c0, %c0_0, %c0_1, %c0_2] : memref<2x18x18x8xf32, #tpu.memory_space<vmem>>, vector<2x1x18x8xf32>
    tpu.vector_store %arg5[%c0, %c0_0, %c0_1, %c0_2], %0 {strides = array<i32>} : memref<2x18x18x8xf32, #tpu.memory_space<vmem>>, vector<2x1x18x8xf32>,
    %c0_3 = arith.constant 0 : index
    %c17 = arith.constant 17 : index
    %c0_4 = arith.constant 0 : index
    %c0_5 = arith.constant 0 : index
    %2 = vector.load %arg5[%c0_3, %c17, %c0_4, %c0_5] : memref<2x18x18x8xf32, #tpu.memory_space<vmem>>, vector<2x1x18x8xf32>
    tpu.vector_store %arg5[%c0_3, %c17, %c0_4, %c0_5], %0 {strides = array<i32>} : memref<2x18x18x8xf32, #tpu.memory_space<vmem>>, vector<2x1x18x8xf32>,
    %cst_6 = arith.constant 0.000000e+00 : f32
    %3 = vector.broadcast %cst_6 : f32 to vector<2x18x1x8xf32>
    %c0_7 = arith.constant 0 : index
    %c0_8 = arith.constant 0 : index
    %c0_9 = arith.constant 0 : index
    %c0_10 = arith.constant 0 : index
    %4 = vector.load %arg5[%c0_7, %c0_8, %c0_9, %c0_10] : memref<2x18x18x8xf32, #tpu.memory_space<vmem>>, vector<2x18x1x8xf32>
    tpu.vector_store %arg5[%c0_7, %c0_8, %c0_9, %c0_10], %3 {strides = array<i32>} : memref<2x18x18x8xf32, #tpu.memory_space<vmem>>, vector<2x18x1x8xf32>,
    %c0_11 = arith.constant 0 : index
    %c0_12 = arith.constant 0 : index
    %c17_13 = arith.constant 17 : index
    %c0_14 = arith.constant 0 : index
    %5 = vector.load %arg5[%c0_11, %c0_12, %c17_13, %c0_14] : memref<2x18x18x8xf32, #tpu.memory_space<vmem>>, vector<2x18x1x8xf32>
    tpu.vector_store %arg5[%c0_11, %c0_12, %c17_13, %c0_14], %3 {strides = array<i32>} : memref<2x18x18x8xf32, #tpu.memory_space<vmem>>, vector<2x18x1x8xf32>,
    %c0_15 = arith.constant 0 : index
    %c0_16 = arith.constant 0 : index
    %c0_17 = arith.constant 0 : index
    %c0_18 = arith.constant 0 : index
    %6 = vector.load %arg1[%c0_15, %c0_16, %c0_17, %c0_18] : memref<2x16x16x8xf32, #tpu.memory_space<vmem>>, vector<2x16x16x8xf32>
    %c0_19 = arith.constant 0 : index
    %c1 = arith.constant 1 : index
    %c1_20 = arith.constant 1 : index
    %c0_21 = arith.constant 0 : index
    %7 = vector.load %arg5[%c0_19, %c1, %c1_20, %c0_21] : memref<2x18x18x8xf32, #tpu.memory_space<vmem>>, vector<2x16x16x8xf32>
    tpu.vector_store %arg5[%c0_19, %c1, %c1_20, %c0_21], %6 {strides = array<i32>} : memref<2x18x18x8xf32, #tpu.memory_space<vmem>>, vector<2x16x16x8xf32>,
    %c0_22 = arith.constant 0 : index
    %c0_23 = arith.constant 0 : index
    %c0_24 = arith.constant 0 : index
    %c0_25 = arith.constant 0 : index
    %8 = vector.load %arg5[%c0_22, %c0_23, %c0_24, %c0_25] : memref<2x18x18x8xf32, #tpu.memory_space<vmem>>, vector<2x16x16x8xf32>
    %c0_26 = arith.constant 0 : index
    %c0_27 = arith.constant 0 : index
    %c1_28 = arith.constant 1 : index
    %c0_29 = arith.constant 0 : index
    %9 = vector.load %arg5[%c0_26, %c0_27, %c1_28, %c0_29] : memref<2x18x18x8xf32, #tpu.memory_space<vmem>>, vector<2x16x16x8xf32>
    %c0_30 = arith.constant 0 : index
    %c0_31 = arith.constant 0 : index
    %c2 = arith.constant 2 : index
    %c0_32 = arith.constant 0 : index
    %10 = vector.load %arg5[%c0_30, %c0_31, %c2, %c0_32] : memref<2x18x18x8xf32, #tpu.memory_space<vmem>>, vector<2x16x16x8xf32>
    %c0_33 = arith.constant 0 : index
    %c1_34 = arith.constant 1 : index
    %c0_35 = arith.constant 0 : index
    %c0_36 = arith.constant 0 : index
    %11 = vector.load %arg5[%c0_33, %c1_34, %c0_35, %c0_36] : memref<2x18x18x8xf32, #tpu.memory_space<vmem>>, vector<2x16x16x8xf32>
    %c0_37 = arith.constant 0 : index
    %c1_38 = arith.constant 1 : index
    %c1_39 = arith.constant 1 : index
    %c0_40 = arith.constant 0 : index
    %12 = vector.load %arg5[%c0_37, %c1_38, %c1_39, %c0_40] : memref<2x18x18x8xf32, #tpu.memory_space<vmem>>, vector<2x16x16x8xf32>
    %c0_41 = arith.constant 0 : index
    %c1_42 = arith.constant 1 : index
    %c2_43 = arith.constant 2 : index
    %c0_44 = arith.constant 0 : index
    %13 = vector.load %arg5[%c0_41, %c1_42, %c2_43, %c0_44] : memref<2x18x18x8xf32, #tpu.memory_space<vmem>>, vector<2x16x16x8xf32>
    %c0_45 = arith.constant 0 : index
    %c2_46 = arith.constant 2 : index
    %c0_47 = arith.constant 0 : index
    %c0_48 = arith.constant 0 : index
    %14 = vector.load %arg5[%c0_45, %c2_46, %c0_47, %c0_48] : memref<2x18x18x8xf32, #tpu.memory_space<vmem>>, vector<2x16x16x8xf32>
    %c0_49 = arith.constant 0 : index
    %c2_50 = arith.constant 2 : index
    %c1_51 = arith.constant 1 : index
    %c0_52 = arith.constant 0 : index
    %15 = vector.load %arg5[%c0_49, %c2_50, %c1_51, %c0_52] : memref<2x18x18x8xf32, #tpu.memory_space<vmem>>, vector<2x16x16x8xf32>
    %c0_53 = arith.constant 0 : index
    %c2_54 = arith.constant 2 : index
    %c2_55 = arith.constant 2 : index
    %c0_56 = arith.constant 0 : index
    %16 = vector.load %arg5[%c0_53, %c2_54, %c2_55, %c0_56] : memref<2x18x18x8xf32, #tpu.memory_space<vmem>>, vector<2x16x16x8xf32>
    %17 = tpu.concatenate %8, %9, %10, %11, %12, %13, %14, %15, %16 in 3 : vector<2x16x16x8xf32>, vector<2x16x16x8xf32>, vector<2x16x16x8xf32>, vector<2x16x16x8xf32>, vector<2x16x16x8xf32>, vector<2x16x16x8xf32>, vector<2x16x16x8xf32>, vector<2x16x16x8xf32>, vector<2x16x16x8xf32> -> vector<2x16x16x72xf32>
    %18 = vector.shape_cast %17 : vector<2x16x16x72xf32> to vector<512x72xf32>
    %19 = arith.truncf %18 : vector<512x72xf32> to vector<512x72xbf16>
    %c0_57 = arith.constant 0 : index
    %c0_58 = arith.constant 0 : index
    %20 = vector.load %arg2[%c0_57, %c0_58] : memref<72x8xbf16, #tpu.memory_space<vmem>>, vector<72x8xbf16>
    %cst_59 = arith.constant dense<0.000000e+00> : vector<512x8xf32>
    %21 = tpu.matmul %19, %20, %cst_59 {dimension_numbers = #tpu.dot_dimension_numbers<[1], [0], [0], [1], [0, 0, 1, 1], [], []>} : vector<512x72xbf16>, vector<72x8xbf16>, vector<512x8xf32> -> vector<512x8xf32>
    %22 = vector.shape_cast %21 : vector<512x8xf32> to vector<2x16x16x8xf32>
    %c0_60 = arith.constant 0 : index
    %c0_61 = arith.constant 0 : index
    %c0_62 = arith.constant 0 : index
    %c0_63 = arith.constant 0 : index
    %23 = vector.load %arg3[%c0_60, %c0_61, %c0_62, %c0_63] : memref<2x16x16x8xf32, #tpu.memory_space<vmem>>, vector<2x16x16x8xf32>
    tpu.vector_store %arg3[%c0_60, %c0_61, %c0_62, %c0_63], %22 {strides = array<i32>} : memref<2x16x16x8xf32, #tpu.memory_space<vmem>>, vector<2x16x16x8xf32>,
    %cst_64 = arith.constant dense<0.000000e+00> : vector<8xf32>
    %24 = vector.multi_reduction <add>, %21, %cst_64 [0] : vector<512x8xf32> to vector<8xf32>
    %25 = vector.shape_cast %24 : vector<8xf32> to vector<1x8xf32>
    %26 = arith.mulf %21, %21 : vector<512x8xf32>
    %cst_65 = arith.constant dense<0.000000e+00> : vector<8xf32>
    %27 = vector.multi_reduction <add>, %26, %cst_65 [0] : vector<512x8xf32> to vector<8xf32>
    %28 = vector.shape_cast %27 : vector<8xf32> to vector<1x8xf32>
    %29 = tpu.concatenate %25, %28 in 0 : vector<1x8xf32>, vector<1x8xf32> -> vector<2x8xf32>
    %30 = vector.shape_cast %29 : vector<2x8xf32> to vector<1x2x8xf32>
    %c0_66 = arith.constant 0 : index
    %c0_67 = arith.constant 0 : index
    %c0_68 = arith.constant 0 : index
    %31 = vector.load %arg4[%c0_66, %c0_67, %c0_68] : memref<1x2x8xf32, #tpu.memory_space<vmem>>, vector<1x2x8xf32>
    tpu.vector_store %arg4[%c0_66, %c0_67, %c0_68], %30 {strides = array<i32>} : memref<1x2x8xf32, #tpu.memory_space<vmem>>, vector<1x2x8xf32>,
    return
  }
  func.func @transform_0(%arg0: i32) -> (i32, i32, i32, i32) {
    %c0_i32 = arith.constant 0 : i32
    %c0_i32_0 = arith.constant 0 : i32
    %c0_i32_1 = arith.constant 0 : i32
    %c0_i32_2 = arith.constant 0 : i32
    return %arg0, %c0_i32, %c0_i32_0, %c0_i32_1 : i32, i32, i32, i32
  }
  func.func @transform_1(%arg0: i32) -> (i32, i32) {
    %c0_i32 = arith.constant 0 : i32
    %c0_i32_0 = arith.constant 0 : i32
    %c0_i32_1 = arith.constant 0 : i32
    return %c0_i32, %c0_i32_0 : i32, i32
  }
  func.func @transform_2(%arg0: i32) -> (i32, i32, i32, i32) {
    %c0_i32 = arith.constant 0 : i32
    %c0_i32_0 = arith.constant 0 : i32
    %c0_i32_1 = arith.constant 0 : i32
    %c0_i32_2 = arith.constant 0 : i32
    return %arg0, %c0_i32, %c0_i32_0, %c0_i32_1 : i32, i32, i32, i32
  }
  func.func @transform_3(%arg0: i32) -> (i32, i32, i32) {
    %c0_i32 = arith.constant 0 : i32
    %c0_i32_0 = arith.constant 0 : i32
    %c0_i32_1 = arith.constant 0 : i32
    return %arg0, %c0_i32, %c0_i32_0 : i32, i32, i32
  }
}

module attributes {stable_mosaic.version = 11 : i64} {
  func.func @_bn_relu_conv_stats_kernel(%arg0: i32, %arg1: memref<2x16x16x8xf32, #tpu.memory_space<vmem>>, %arg2: memref<1x8xf32, #tpu.memory_space<vmem>>, %arg3: memref<1x8xf32, #tpu.memory_space<vmem>>, %arg4: memref<72x8xbf16, #tpu.memory_space<vmem>>, %arg5: memref<2x16x16x8xf32, #tpu.memory_space<vmem>>, %arg6: memref<1x2x8xf32, #tpu.memory_space<vmem>>, %arg7: memref<2x18x18x8xf32, #tpu.memory_space<vmem>>) attributes {dimension_semantics = [#tpu.dimension_semantics<parallel>], iteration_bounds = array<i64: 2>, scalar_prefetch = 0 : i64, scratch_operands = 1 : i64, tpu.core_type = #tpu.core_type<tc>, window_params = [{transform_indices = @transform_0, window_bounds = array<i64: 2, 16, 16, 8>}, {pipeline_mode = #tpu.pipeline_mode<synchronous>, transform_indices = @transform_1, window_bounds = array<i64: 1, 8>}, {pipeline_mode = #tpu.pipeline_mode<synchronous>, transform_indices = @transform_2, window_bounds = array<i64: 1, 8>}, {pipeline_mode = #tpu.pipeline_mode<synchronous>, transform_indices = @transform_3, window_bounds = array<i64: 72, 8>}, {transform_indices = @transform_4, window_bounds = array<i64: 2, 16, 16, 8>}, {transform_indices = @transform_5, window_bounds = array<i64: 1, 2, 8>}]} {
    %c0 = arith.constant 0 : index
    %c0_0 = arith.constant 0 : index
    %0 = vector.load %arg2[%c0, %c0_0] : memref<1x8xf32, #tpu.memory_space<vmem>>, vector<1x8xf32>
    %1 = vector.shape_cast %0 : vector<1x8xf32> to vector<1x1x1x8xf32>
    %c0_1 = arith.constant 0 : index
    %c0_2 = arith.constant 0 : index
    %2 = vector.load %arg3[%c0_1, %c0_2] : memref<1x8xf32, #tpu.memory_space<vmem>>, vector<1x8xf32>
    %3 = vector.shape_cast %2 : vector<1x8xf32> to vector<1x1x1x8xf32>
    %c0_3 = arith.constant 0 : index
    %c0_4 = arith.constant 0 : index
    %c0_5 = arith.constant 0 : index
    %c0_6 = arith.constant 0 : index
    %4 = vector.load %arg1[%c0_3, %c0_4, %c0_5, %c0_6] : memref<2x16x16x8xf32, #tpu.memory_space<vmem>>, vector<2x16x16x8xf32>
    %5 = vector.broadcast %1 : vector<1x1x1x8xf32> to vector<2x16x16x8xf32>
    %6 = arith.mulf %4, %5 : vector<2x16x16x8xf32>
    %7 = vector.broadcast %3 : vector<1x1x1x8xf32> to vector<2x16x16x8xf32>
    %8 = arith.addf %6, %7 : vector<2x16x16x8xf32>
    %cst = arith.constant 0.000000e+00 : f32
    %9 = vector.broadcast %cst : f32 to vector<2x16x16x8xf32>
    %10 = arith.maximumf %8, %9 : vector<2x16x16x8xf32>
    %cst_7 = arith.constant 0.000000e+00 : f32
    %11 = vector.broadcast %cst_7 : f32 to vector<2x1x18x8xf32>
    %c0_8 = arith.constant 0 : index
    %c0_9 = arith.constant 0 : index
    %c0_10 = arith.constant 0 : index
    %c0_11 = arith.constant 0 : index
    %12 = vector.load %arg7[%c0_8, %c0_9, %c0_10, %c0_11] : memref<2x18x18x8xf32, #tpu.memory_space<vmem>>, vector<2x1x18x8xf32>
    tpu.vector_store %arg7[%c0_8, %c0_9, %c0_10, %c0_11], %11 {strides = array<i32>} : memref<2x18x18x8xf32, #tpu.memory_space<vmem>>, vector<2x1x18x8xf32>,
    %c0_12 = arith.constant 0 : index
    %c17 = arith.constant 17 : index
    %c0_13 = arith.constant 0 : index
    %c0_14 = arith.constant 0 : index
    %13 = vector.load %arg7[%c0_12, %c17, %c0_13, %c0_14] : memref<2x18x18x8xf32, #tpu.memory_space<vmem>>, vector<2x1x18x8xf32>
    tpu.vector_store %arg7[%c0_12, %c17, %c0_13, %c0_14], %11 {strides = array<i32>} : memref<2x18x18x8xf32, #tpu.memory_space<vmem>>, vector<2x1x18x8xf32>,
    %cst_15 = arith.constant 0.000000e+00 : f32
    %14 = vector.broadcast %cst_15 : f32 to vector<2x18x1x8xf32>
    %c0_16 = arith.constant 0 : index
    %c0_17 = arith.constant 0 : index
    %c0_18 = arith.constant 0 : index
    %c0_19 = arith.constant 0 : index
    %15 = vector.load %arg7[%c0_16, %c0_17, %c0_18, %c0_19] : memref<2x18x18x8xf32, #tpu.memory_space<vmem>>, vector<2x18x1x8xf32>
    tpu.vector_store %arg7[%c0_16, %c0_17, %c0_18, %c0_19], %14 {strides = array<i32>} : memref<2x18x18x8xf32, #tpu.memory_space<vmem>>, vector<2x18x1x8xf32>,
    %c0_20 = arith.constant 0 : index
    %c0_21 = arith.constant 0 : index
    %c17_22 = arith.constant 17 : index
    %c0_23 = arith.constant 0 : index
    %16 = vector.load %arg7[%c0_20, %c0_21, %c17_22, %c0_23] : memref<2x18x18x8xf32, #tpu.memory_space<vmem>>, vector<2x18x1x8xf32>
    tpu.vector_store %arg7[%c0_20, %c0_21, %c17_22, %c0_23], %14 {strides = array<i32>} : memref<2x18x18x8xf32, #tpu.memory_space<vmem>>, vector<2x18x1x8xf32>,
    %c0_24 = arith.constant 0 : index
    %c1 = arith.constant 1 : index
    %c1_25 = arith.constant 1 : index
    %c0_26 = arith.constant 0 : index
    %17 = vector.load %arg7[%c0_24, %c1, %c1_25, %c0_26] : memref<2x18x18x8xf32, #tpu.memory_space<vmem>>, vector<2x16x16x8xf32>
    tpu.vector_store %arg7[%c0_24, %c1, %c1_25, %c0_26], %10 {strides = array<i32>} : memref<2x18x18x8xf32, #tpu.memory_space<vmem>>, vector<2x16x16x8xf32>,
    %c0_27 = arith.constant 0 : index
    %c0_28 = arith.constant 0 : index
    %c0_29 = arith.constant 0 : index
    %c0_30 = arith.constant 0 : index
    %18 = vector.load %arg7[%c0_27, %c0_28, %c0_29, %c0_30] : memref<2x18x18x8xf32, #tpu.memory_space<vmem>>, vector<2x16x16x8xf32>
    %c0_31 = arith.constant 0 : index
    %c0_32 = arith.constant 0 : index
    %c1_33 = arith.constant 1 : index
    %c0_34 = arith.constant 0 : index
    %19 = vector.load %arg7[%c0_31, %c0_32, %c1_33, %c0_34] : memref<2x18x18x8xf32, #tpu.memory_space<vmem>>, vector<2x16x16x8xf32>
    %c0_35 = arith.constant 0 : index
    %c0_36 = arith.constant 0 : index
    %c2 = arith.constant 2 : index
    %c0_37 = arith.constant 0 : index
    %20 = vector.load %arg7[%c0_35, %c0_36, %c2, %c0_37] : memref<2x18x18x8xf32, #tpu.memory_space<vmem>>, vector<2x16x16x8xf32>
    %c0_38 = arith.constant 0 : index
    %c1_39 = arith.constant 1 : index
    %c0_40 = arith.constant 0 : index
    %c0_41 = arith.constant 0 : index
    %21 = vector.load %arg7[%c0_38, %c1_39, %c0_40, %c0_41] : memref<2x18x18x8xf32, #tpu.memory_space<vmem>>, vector<2x16x16x8xf32>
    %c0_42 = arith.constant 0 : index
    %c1_43 = arith.constant 1 : index
    %c1_44 = arith.constant 1 : index
    %c0_45 = arith.constant 0 : index
    %22 = vector.load %arg7[%c0_42, %c1_43, %c1_44, %c0_45] : memref<2x18x18x8xf32, #tpu.memory_space<vmem>>, vector<2x16x16x8xf32>
    %c0_46 = arith.constant 0 : index
    %c1_47 = arith.constant 1 : index
    %c2_48 = arith.constant 2 : index
    %c0_49 = arith.constant 0 : index
    %23 = vector.load %arg7[%c0_46, %c1_47, %c2_48, %c0_49] : memref<2x18x18x8xf32, #tpu.memory_space<vmem>>, vector<2x16x16x8xf32>
    %c0_50 = arith.constant 0 : index
    %c2_51 = arith.constant 2 : index
    %c0_52 = arith.constant 0 : index
    %c0_53 = arith.constant 0 : index
    %24 = vector.load %arg7[%c0_50, %c2_51, %c0_52, %c0_53] : memref<2x18x18x8xf32, #tpu.memory_space<vmem>>, vector<2x16x16x8xf32>
    %c0_54 = arith.constant 0 : index
    %c2_55 = arith.constant 2 : index
    %c1_56 = arith.constant 1 : index
    %c0_57 = arith.constant 0 : index
    %25 = vector.load %arg7[%c0_54, %c2_55, %c1_56, %c0_57] : memref<2x18x18x8xf32, #tpu.memory_space<vmem>>, vector<2x16x16x8xf32>
    %c0_58 = arith.constant 0 : index
    %c2_59 = arith.constant 2 : index
    %c2_60 = arith.constant 2 : index
    %c0_61 = arith.constant 0 : index
    %26 = vector.load %arg7[%c0_58, %c2_59, %c2_60, %c0_61] : memref<2x18x18x8xf32, #tpu.memory_space<vmem>>, vector<2x16x16x8xf32>
    %27 = tpu.concatenate %18, %19, %20, %21, %22, %23, %24, %25, %26 in 3 : vector<2x16x16x8xf32>, vector<2x16x16x8xf32>, vector<2x16x16x8xf32>, vector<2x16x16x8xf32>, vector<2x16x16x8xf32>, vector<2x16x16x8xf32>, vector<2x16x16x8xf32>, vector<2x16x16x8xf32>, vector<2x16x16x8xf32> -> vector<2x16x16x72xf32>
    %28 = vector.shape_cast %27 : vector<2x16x16x72xf32> to vector<512x72xf32>
    %29 = arith.truncf %28 : vector<512x72xf32> to vector<512x72xbf16>
    %c0_62 = arith.constant 0 : index
    %c0_63 = arith.constant 0 : index
    %30 = vector.load %arg4[%c0_62, %c0_63] : memref<72x8xbf16, #tpu.memory_space<vmem>>, vector<72x8xbf16>
    %cst_64 = arith.constant dense<0.000000e+00> : vector<512x8xf32>
    %31 = tpu.matmul %29, %30, %cst_64 {dimension_numbers = #tpu.dot_dimension_numbers<[1], [0], [0], [1], [0, 0, 1, 1], [], []>} : vector<512x72xbf16>, vector<72x8xbf16>, vector<512x8xf32> -> vector<512x8xf32>
    %32 = vector.shape_cast %31 : vector<512x8xf32> to vector<2x16x16x8xf32>
    %c0_65 = arith.constant 0 : index
    %c0_66 = arith.constant 0 : index
    %c0_67 = arith.constant 0 : index
    %c0_68 = arith.constant 0 : index
    %33 = vector.load %arg5[%c0_65, %c0_66, %c0_67, %c0_68] : memref<2x16x16x8xf32, #tpu.memory_space<vmem>>, vector<2x16x16x8xf32>
    tpu.vector_store %arg5[%c0_65, %c0_66, %c0_67, %c0_68], %32 {strides = array<i32>} : memref<2x16x16x8xf32, #tpu.memory_space<vmem>>, vector<2x16x16x8xf32>,
    %cst_69 = arith.constant dense<0.000000e+00> : vector<8xf32>
    %34 = vector.multi_reduction <add>, %31, %cst_69 [0] : vector<512x8xf32> to vector<8xf32>
    %35 = vector.shape_cast %34 : vector<8xf32> to vector<1x8xf32>
    %36 = arith.mulf %31, %31 : vector<512x8xf32>
    %cst_70 = arith.constant dense<0.000000e+00> : vector<8xf32>
    %37 = vector.multi_reduction <add>, %36, %cst_70 [0] : vector<512x8xf32> to vector<8xf32>
    %38 = vector.shape_cast %37 : vector<8xf32> to vector<1x8xf32>
    %39 = tpu.concatenate %35, %38 in 0 : vector<1x8xf32>, vector<1x8xf32> -> vector<2x8xf32>
    %40 = vector.shape_cast %39 : vector<2x8xf32> to vector<1x2x8xf32>
    %c0_71 = arith.constant 0 : index
    %c0_72 = arith.constant 0 : index
    %c0_73 = arith.constant 0 : index
    %41 = vector.load %arg6[%c0_71, %c0_72, %c0_73] : memref<1x2x8xf32, #tpu.memory_space<vmem>>, vector<1x2x8xf32>
    tpu.vector_store %arg6[%c0_71, %c0_72, %c0_73], %40 {strides = array<i32>} : memref<1x2x8xf32, #tpu.memory_space<vmem>>, vector<1x2x8xf32>,
    return
  }
  func.func @transform_0(%arg0: i32) -> (i32, i32, i32, i32) {
    %c0_i32 = arith.constant 0 : i32
    %c0_i32_0 = arith.constant 0 : i32
    %c0_i32_1 = arith.constant 0 : i32
    %c0_i32_2 = arith.constant 0 : i32
    return %arg0, %c0_i32, %c0_i32_0, %c0_i32_1 : i32, i32, i32, i32
  }
  func.func @transform_1(%arg0: i32) -> (i32, i32) {
    %c0_i32 = arith.constant 0 : i32
    %c0_i32_0 = arith.constant 0 : i32
    %c0_i32_1 = arith.constant 0 : i32
    return %c0_i32, %c0_i32_0 : i32, i32
  }
  func.func @transform_2(%arg0: i32) -> (i32, i32) {
    %c0_i32 = arith.constant 0 : i32
    %c0_i32_0 = arith.constant 0 : i32
    %c0_i32_1 = arith.constant 0 : i32
    return %c0_i32, %c0_i32_0 : i32, i32
  }
  func.func @transform_3(%arg0: i32) -> (i32, i32) {
    %c0_i32 = arith.constant 0 : i32
    %c0_i32_0 = arith.constant 0 : i32
    %c0_i32_1 = arith.constant 0 : i32
    return %c0_i32, %c0_i32_0 : i32, i32
  }
  func.func @transform_4(%arg0: i32) -> (i32, i32, i32, i32) {
    %c0_i32 = arith.constant 0 : i32
    %c0_i32_0 = arith.constant 0 : i32
    %c0_i32_1 = arith.constant 0 : i32
    %c0_i32_2 = arith.constant 0 : i32
    return %arg0, %c0_i32, %c0_i32_0, %c0_i32_1 : i32, i32, i32, i32
  }
  func.func @transform_5(%arg0: i32) -> (i32, i32, i32) {
    %c0_i32 = arith.constant 0 : i32
    %c0_i32_0 = arith.constant 0 : i32
    %c0_i32_1 = arith.constant 0 : i32
    return %arg0, %c0_i32, %c0_i32_0 : i32, i32, i32
  }
}

module attributes {stable_mosaic.version = 11 : i64} {
  func.func @_bn_add_relu_kernel(%arg0: i32, %arg1: memref<32x128xf32, #tpu.memory_space<vmem>>, %arg2: memref<32x128xf32, #tpu.memory_space<vmem>>, %arg3: memref<1x128xf32, #tpu.memory_space<vmem>>, %arg4: memref<1x128xf32, #tpu.memory_space<vmem>>, %arg5: memref<32x128xf32, #tpu.memory_space<vmem>>) attributes {dimension_semantics = [#tpu.dimension_semantics<parallel>], iteration_bounds = array<i64: 2>, scalar_prefetch = 0 : i64, scratch_operands = 0 : i64, tpu.core_type = #tpu.core_type<tc>, window_params = [{transform_indices = @transform_0, window_bounds = array<i64: 32, 128>}, {transform_indices = @transform_1, window_bounds = array<i64: 32, 128>}, {pipeline_mode = #tpu.pipeline_mode<synchronous>, transform_indices = @transform_2, window_bounds = array<i64: 1, 128>}, {pipeline_mode = #tpu.pipeline_mode<synchronous>, transform_indices = @transform_3, window_bounds = array<i64: 1, 128>}, {transform_indices = @transform_4, window_bounds = array<i64: 32, 128>}]} {
    %c0 = arith.constant 0 : index
    %c0_0 = arith.constant 0 : index
    %0 = vector.load %arg2[%c0, %c0_0] : memref<32x128xf32, #tpu.memory_space<vmem>>, vector<32x128xf32>
    %c0_1 = arith.constant 0 : index
    %c0_2 = arith.constant 0 : index
    %1 = vector.load %arg3[%c0_1, %c0_2] : memref<1x128xf32, #tpu.memory_space<vmem>>, vector<1x128xf32>
    %2 = vector.broadcast %1 : vector<1x128xf32> to vector<32x128xf32>
    %3 = arith.mulf %0, %2 : vector<32x128xf32>
    %c0_3 = arith.constant 0 : index
    %c0_4 = arith.constant 0 : index
    %4 = vector.load %arg4[%c0_3, %c0_4] : memref<1x128xf32, #tpu.memory_space<vmem>>, vector<1x128xf32>
    %5 = vector.broadcast %4 : vector<1x128xf32> to vector<32x128xf32>
    %6 = arith.addf %3, %5 : vector<32x128xf32>
    %cst = arith.constant 0.000000e+00 : f32
    %7 = vector.broadcast %cst : f32 to vector<32x128xf32>
    %8 = arith.maximumf %6, %7 : vector<32x128xf32>
    %c0_5 = arith.constant 0 : index
    %c0_6 = arith.constant 0 : index
    %9 = vector.load %arg1[%c0_5, %c0_6] : memref<32x128xf32, #tpu.memory_space<vmem>>, vector<32x128xf32>
    %10 = arith.addf %9, %8 : vector<32x128xf32>
    %cst_7 = arith.constant 0.000000e+00 : f32
    %11 = vector.broadcast %cst_7 : f32 to vector<32x128xf32>
    %12 = arith.maximumf %10, %11 : vector<32x128xf32>
    %c0_8 = arith.constant 0 : index
    %c0_9 = arith.constant 0 : index
    %13 = vector.load %arg5[%c0_8, %c0_9] : memref<32x128xf32, #tpu.memory_space<vmem>>, vector<32x128xf32>
    tpu.vector_store %arg5[%c0_8, %c0_9], %12 {strides = array<i32>} : memref<32x128xf32, #tpu.memory_space<vmem>>, vector<32x128xf32>,
    return
  }
  func.func @transform_0(%arg0: i32) -> (i32, i32) {
    %c0_i32 = arith.constant 0 : i32
    %c0_i32_0 = arith.constant 0 : i32
    return %arg0, %c0_i32 : i32, i32
  }
  func.func @transform_1(%arg0: i32) -> (i32, i32) {
    %c0_i32 = arith.constant 0 : i32
    %c0_i32_0 = arith.constant 0 : i32
    return %arg0, %c0_i32 : i32, i32
  }
  func.func @transform_2(%arg0: i32) -> (i32, i32) {
    %c0_i32 = arith.constant 0 : i32
    %c0_i32_0 = arith.constant 0 : i32
    %c0_i32_1 = arith.constant 0 : i32
    return %c0_i32, %c0_i32_0 : i32, i32
  }
  func.func @transform_3(%arg0: i32) -> (i32, i32) {
    %c0_i32 = arith.constant 0 : i32
    %c0_i32_0 = arith.constant 0 : i32
    %c0_i32_1 = arith.constant 0 : i32
    return %c0_i32, %c0_i32_0 : i32, i32
  }
  func.func @transform_4(%arg0: i32) -> (i32, i32) {
    %c0_i32 = arith.constant 0 : i32
    %c0_i32_0 = arith.constant 0 : i32
    return %arg0, %c0_i32 : i32, i32
  }
}

</mosaic_0001>

<bundles_post_ra>
// kernel: residual_block_forward.5
= control target key start
LH: loop header
LB: loop body
LE: loop exit
PB: predicated region body
PF: predicated region fallthrough
CT: control target
= control target key end

     0   :  { %s393_s15 = smov 0   ;;  %s419_s0 = inlined_call_operand.vmem [shape: f32[64,128], index: 0, kind: input, shape index: {}]   ;;  %s420_s1 = inlined_call_operand.vmem [shape: f32[64,128], index: 1, kind: input, shape index: {}]   ;;  %s421_s2 = inlined_call_operand.vmem [shape: f32[1,128], index: 2, kind: input, shape index: {}]   ;;  %s422_s3 = inlined_call_operand.vmem [shape: f32[1,128], index: 3, kind: input, shape index: {}]   ;;  %s423_s4 = inlined_call_operand.vmem [shape: f32[64,128], index: 4, kind: output, shape index: {}]  }
   0x1 LB: > { %s337_s16 = sadd.s32 4294967295, %s366_s15   ;;  %p341_p0 = scmp.ge.s32.totalorder %s366_s15, 1  ;;  %s366_s15 = sphi %s393_s15, %s14_s15  }
   0x2   : > { %p174_p1 = scmp.lt.s32.totalorder %s366_s15, 3 }
   0x4   : > { %p175_p2 = pnand %p341_p0, %p174_p1 }
   0x5   : > { %s342_s17 = sshll.u32 (!%p175_p2), %s337_s16, 2  ;;  %v348_v0 = vld [vmem:[%s421_s2] ss:$0 sm:$0xff] (!%p175_p2) }
   0x6   : > { %178 = sbr.rel (%p175_p2) target bundleno = 29 (0x1d), region = 36  ;;  %p206_p3 = scmp.lt.s32.totalorder (!%p175_p2), %s342_s17, 7  ;;  %v349_v2 = vld [vmem:[%s422_s3] ss:$0 sm:$0xff] (!%p175_p2) }
   0xd   : > { %s425_s17 = smov (!%p206_p3, %s342_s17), 7 }
   0xe   : > { %s343_s18 = sshll.u32 %s425_s17, 3 }
   0xf   : > { %s215_s23 = scalar_lea.vmem %s420_s1, %s343_s18  ;;  %s209_s28 = scalar_lea.vmem %s419_s0, %s343_s18 }
  0x10   : > { %v223_v1 = vld [vmem:[%s215_s23] sm:$0xff]  ;;  %v224_v3 = vld [vmem:[%s215_s23 + $0x8] sm:$0xff]  ;;  %v225_v6 = vld [vmem:[%s215_s23 + $0x10] sm:$0xff]  ;;  %s221_s5 = scalar_lea.vmem %s423_s4, %s343_s18 }
  0x11   : > { %v234_v4 = vmul.f32 %v348_v0, %v223_v1  ;;  %v235_v5 = vmul.f32 %v348_v0, %v224_v3  ;;  %v236_v7 = vmul.f32 %v348_v0, %v225_v6  ;;  %v226_v8 = vld [vmem:[%s215_s23 + $0x18] sm:$0xff]  ;;  %v253_v12 = vld [vmem:[%s209_s28] sm:$0xff]  ;;  %v254_v13 = vld [vmem:[%s209_s28 + $0x8] sm:$0xff] }
  0x12   : > { %v237_v11 = vmul.f32 %v348_v0, %v226_v8  ;;  %v255_v17 = vld [vmem:[%s209_s28 + $0x10] sm:$0xff]  ;;  %v256_v20 = vld [vmem:[%s209_s28 + $0x18] sm:$0xff] }
  0x13   : > { %v245_v9 = vadd.f32 %v349_v2, %v234_v4  ;;  %v246_v10 = vadd.f32 %v349_v2, %v235_v5  ;;  %v247_v14 = vadd.f32 %v349_v2, %v236_v7 }
  0x14   : > { %v248_v18 = vadd.f32 %v349_v2, %v237_v11 }
  0x15   : > { %v249_v15 = vmax.f32 %v245_v9, 0.0  ;;  %v250_v16 = vmax.f32 %v246_v10, 0.0  ;;  %v251_v19 = vmax.f32 %v247_v14, 0.0 }
  0x16   : > { %v252_v23 = vmax.f32 %v248_v18, 0.0 }
  0x17   : > { %v257_v21 = vadd.f32 %v253_v12, %v249_v15  ;;  %v258_v22 = vadd.f32 %v254_v13, %v250_v16  ;;  %v259_v24 = vadd.f32 %v255_v17, %v251_v19 }
  0x18   : > { %v260_v27 = vadd.f32 %v256_v20, %v252_v23 }
  0x19   : > { %v261_v25 = vmax.f32 %v257_v21, 0.0  ;;  %v262_v26 = vmax.f32 %v258_v22, 0.0  ;;  %v263_v28 = vmax.f32 %v259_v24, 0.0 }
  0x1a   : > { %v264_v29 = vmax.f32 %v260_v27, 0.0 }
  0x1b   : > { %265 = vst [vmem:[%s221_s5] sm:$0xff] %v261_v25  ;;  %266 = vst [vmem:[%s221_s5 + $0x8] sm:$0xff] %v262_v26 }
  0x1c   : > { %267 = vst [vmem:[%s221_s5 + $0x10] sm:$0xff] %v263_v28  ;;  %268 = vst [vmem:[%s221_s5 + $0x18] sm:$0xff] %v264_v29 }
  0x1d PF: > { %s14_s15 = sadd.s32 1, %s366_s15  }
  0x1e   : > { %p11_p4 = scmp.ge.s32.totalorder %s14_s15, 4  }
  0x20   :  { %13 = sbr.rel (!%p11_p4) target bundleno = 1 (0x1), region = 69 }

// kernel: residual_block_forward.3
= control target key start
LH: loop header
LB: loop body
LE: loop exit
PB: predicated region body
PF: predicated region fallthrough
CT: control target
= control target key end

     0   :  { %s6035_s12 = smov 0   ;;  %s8939_s0 = inlined_call_operand.vmem [shape: f32[4,16,16,8], index: 0, kind: input, shape index: {}]   ;;  %s8940_s1 = inlined_call_operand.vmem [shape: bf16[72,8], index: 1, kind: input, shape index: {}]   ;;  %s8941_s2 = inlined_call_operand.vmem [shape: f32[4,16,16,8], index: 2, kind: output, shape index: {0}]   ;;  %s8942_s3 = inlined_call_operand.vmem [shape: f32[2,2,8], index: 3, kind: output, shape index: {1}]  }
   0x1 LB: > { %s6041_s13 = sadd.s32 4294967295, %s6004_s12   ;;  %p4500_p0 = scmp.ge.s32.totalorder %s6004_s12, 1  ;;  %s6004_s12 = sphi %s6035_s12, %s14_s12  }
   0x2   : > { %p142_p1 = scmp.lt.s32.totalorder %s6004_s12, 3 }
   0x4   : > { %p143_p2 = pnand %p4500_p0, %p142_p1 }
   0x6   : > { %146 = sbr.rel (%p143_p2) target bundleno = 940 (0x3ac), region = 28 }
   0xd   : > { %vm191_vm0 = vcmask 64512   ;;  %vm194_vm1 = vcmask 58368   ;;  %vm206_vm2 = vcmask 57344   ;;  %s4501_s14 = sshll.u32 %s6041_s13, 1  ;;  %v6006_v0 = vmov 0.0   ;;  %s6007_s19 = smov 8  }
   0xe   : > { %192 = vst.msk [vmem:[#allocation2] sm:$0xff] %vm191_vm0, %v6006_v0  ;;  %193 = vst.msk [vmem:[#allocation2 + $0x8] sm:$0xff] %vm191_vm0, %v6006_v0  ;;  %p173_p3 = scmp.lt.s32.totalorder %s4501_s14, 3  ;;  %s6008_s20 = smov 16   ;;  %vm3097_vm3 = vcmask 130048   ;;  %vm3162_vm4 = vcmask 195584  }
   0xf   : > { %195 = vst.msk [vmem:[#allocation2 + $0x10] sm:$0x3] %vm194_vm1, %v6006_v0  ;;  %198 = vst.msk [vmem:[#allocation2 + $0x1c0] sm:$0x3] %vm194_vm1, %v6006_v0  ;;  %s6009_s21 = smov 24   ;;  %s6010_s22 = smov 32  }
  0x10   : > { %196 = vst.msk [vmem:[#allocation2 + $0x1b0] sm:$0xff] %vm191_vm0, %v6006_v0  ;;  %197 = vst.msk [vmem:[#allocation2 + $0x1b8] sm:$0xff] %vm191_vm0, %v6006_v0  ;;  %s9468_s14 = smov (!%p173_p3, %s4501_s14), 3  ;;  %s6011_s23 = smov 40   ;;  %vm3717_vm5 = vcmask 1043456   ;;  %vm3227_vm6 = vcmask 261120  }
  0x11   : > { %200 = vst.msk [vmem:[#allocation2 + $0x198] sm:$0xff] %vm191_vm0, %v6006_v0  ;;  %201 = vst.msk [vmem:[#allocation2 + $0x1a0] sm:$0xff] %vm191_vm0, %v6006_v0  ;;  %s4547_s15 = sshll.u32 %s9468_s14, 8  ;;  %s6012_s7 = smov 48   ;;  %vm3292_vm7 = vcmask 326656   ;;  %vm3357_vm8 = vcmask 392192  }
  0x12   : > { %202 = vst.msk [vmem:[#allocation2 + $0x1a8] sm:$0x3] %vm194_vm1, %v6006_v0  ;;  %205 = vst.msk [vmem:[#allocation2 + $0x358] sm:$0x3] %vm194_vm1, %v6006_v0  ;;  %s6226_s18 = scalar_lea.vmem %s8939_s0, %s4547_s15  ;;  %s6013_s8 = smov 56   ;;  %vm3422_vm9 = vcmask 457728  }
  0x13   : > { %203 = vst.msk [vmem:[#allocation2 + $0x348] sm:$0xff] %vm191_vm0, %v6006_v0  ;;  %204 = vst.msk [vmem:[#allocation2 + $0x350] sm:$0xff] %vm191_vm0, %v6006_v0  ;;  %v281_v1 = vld [vmem:[%s6226_s18 + $0x10] sm:$0xff]  ;;  %v282_v2 = vld [vmem:[%s6226_s18 + $0x18] sm:$0xff]  ;;  %s6014_s9 = smov 64   ;;  %vm3487_vm10 = vcmask 523264   ;;  %s8672_s16 = scalar_lea.vmem %s8941_s2, %s4547_s15 }
  0x14   : > { %208 = vst.msk [vmem:[#allocation2 + $0x18] sm:$0x1] %vm206_vm2, %v6006_v0  ;;  %209 = vst.msk [vmem:[#allocation2 + $0x30] sm:$0x1] %vm206_vm2, %v6006_v0  ;;  %v279_v3 = vld [vmem:[%s6226_s18] sm:$0xff]  ;;  %v280_v6 = vld [vmem:[%s6226_s18 + $0x8] sm:$0xff] }
  0x15   : > { %210 = vst.msk [vmem:[#allocation2 + $0x48] sm:$0x1] %vm206_vm2, %v6006_v0  ;;  %211 = vst.msk [vmem:[#allocation2 + $0x60] sm:$0x1] %vm206_vm2, %v6006_v0  ;;  %v472_v4 = vld [vmem:[#allocation2 + $0x1] sm:$0xff]  ;;  %v285_v10 = vld [vmem:[%s6226_s18 + $0x30] sm:$0xff] }
  0x16   : > { %212 = vst.msk [vmem:[#allocation2 + $0x78] sm:$0x1] %vm206_vm2, %v6006_v0  ;;  %213 = vst.msk [vmem:[#allocation2 + $0x90] sm:$0x1] %vm206_vm2, %v6006_v0  ;;  %v473_v5 = vld [vmem:[#allocation2 + $0x9] sm:$0xff]  ;;  %v283_v8 = vld [vmem:[%s6226_s18 + $0x20] sm:$0xff] }
  0x17   : > { %214 = vst.msk [vmem:[#allocation2 + $0xa8] sm:$0x1] %vm206_vm2, %v6006_v0  ;;  %215 = vst.msk [vmem:[#allocation2 + $0xc0] sm:$0x1] %vm206_vm2, %v6006_v0  ;;  %v4689_v7 = vpack.i.bf16 %v473_v5, %v472_v4  ;;  %v284_v9 = vld [vmem:[%s6226_s18 + $0x28] sm:$0xff]  ;;  %v286_v11 = vld [vmem:[%s6226_s18 + $0x38] sm:$0xff] }
  0x18   : > { %216 = vst.msk [vmem:[#allocation2 + $0xd8] sm:$0x1] %vm206_vm2, %v6006_v0  ;;  %217 = vst.msk [vmem:[#allocation2 + $0xf0] sm:$0x1] %vm206_vm2, %v6006_v0  ;;  %v287_v12 = vld [vmem:[%s6226_s18 + $0x40] sm:$0xff]  ;;  %v288_v13 = vld [vmem:[%s6226_s18 + $0x48] sm:$0xff] }
  0x19   : > { %218 = vst.msk [vmem:[#allocation2 + $0x108] sm:$0x1] %vm206_vm2, %v6006_v0  ;;  %219 = vst.msk [vmem:[#allocation2 + $0x120] sm:$0x1] %vm206_vm2, %v6006_v0  ;;  %4690 = vrot.lane.b32.xlu0 %v4689_v7, %s6007_s19  ;;  %v289_v14 = vld [vmem:[%s6226_s18 + $0x50] sm:$0xff]  ;;  %v290_v15 = vld [vmem:[%s6226_s18 + $0x58] sm:$0xff] }
  0x1a   : > { %220 = vst.msk [vmem:[#allocation2 + $0x138] sm:$0x1] %vm206_vm2, %v6006_v0  ;;  %221 = vst.msk [vmem:[#allocation2 + $0x150] sm:$0x1] %vm206_vm2, %v6006_v0  ;;  %v291_v16 = vld [vmem:[%s6226_s18 + $0x60] sm:$0xff]  ;;  %v292_v17 = vld [vmem:[%s6226_s18 + $0x68] sm:$0xff] }
  0x1b   : > { %222 = vst.msk [vmem:[#allocation2 + $0x168] sm:$0x1] %vm206_vm2, %v6006_v0  ;;  %223 = vst.msk [vmem:[#allocation2 + $0x180] sm:$0x1] %vm206_vm2, %v6006_v0  ;;  %v293_v18 = vld [vmem:[%s6226_s18 + $0x70] sm:$0xff]  ;;  %v294_v19 = vld [vmem:[%s6226_s18 + $0x78] sm:$0xff] }
  0x1c   : > { %226 = vst.msk [vmem:[#allocation2 + $0x1c8] sm:$0x1] %vm206_vm2, %v6006_v0  ;;  %227 = vst.msk [vmem:[#allocation2 + $0x1e0] sm:$0x1] %vm206_vm2, %v6006_v0  ;;  %v295_v20 = vld [vmem:[%s6226_s18 + $0x80] sm:$0xff]  ;;  %v296_v21 = vld [vmem:[%s6226_s18 + $0x88] sm:$0xff] }
  0x1d   : > { %228 = vst.msk [vmem:[#allocation2 + $0x1f8] sm:$0x1] %vm206_vm2, %v6006_v0  ;;  %229 = vst.msk [vmem:[#allocation2 + $0x210] sm:$0x1] %vm206_vm2, %v6006_v0  ;;  %v297_v22 = vld [vmem:[%s6226_s18 + $0x90] sm:$0xff]  ;;  %v298_v23 = vld [vmem:[%s6226_s18 + $0x98] sm:$0xff] }
  0x1e   : > { %230 = vst.msk [vmem:[#allocation2 + $0x228] sm:$0x1] %vm206_vm2, %v6006_v0  ;;  %231 = vst.msk [vmem:[#allocation2 + $0x240] sm:$0x1] %vm206_vm2, %v6006_v0  ;;  %v299_v24 = vld [vmem:[%s6226_s18 + $0xa0] sm:$0xff]  ;;  %v300_v25 = vld [vmem:[%s6226_s18 + $0xa8] sm:$0xff] }
  0x1f   : > { %232 = vst.msk [vmem:[#allocation2 + $0x258] sm:$0x1] %vm206_vm2, %v6006_v0  ;;  %233 = vst.msk [vmem:[#allocation2 + $0x270] sm:$0x1] %vm206_vm2, %v6006_v0  ;;  %v301_v31 = vld [vmem:[%s6226_s18 + $0xb0] sm:$0xff]  ;;  %v302_v32 = vld [vmem:[%s6226_s18 + $0xb8] sm:$0xff] }
  0x20   : > { %234 = vst.msk [vmem:[#allocation2 + $0x288] sm:$0x1] %vm206_vm2, %v6006_v0  ;;  %235 = vst.msk [vmem:[#allocation2 + $0x2a0] sm:$0x1] %vm206_vm2, %v6006_v0  ;;  %v303_v48 = vld [vmem:[%s6226_s18 + $0xc0] sm:$0xff]  ;;  %v304_v49 = vld [vmem:[%s6226_s18 + $0xc8] sm:$0xff] }
  0x21   : > { %236 = vst.msk [vmem:[#allocation2 + $0x2b8] sm:$0x1] %vm206_vm2, %v6006_v0  ;;  %237 = vst.msk [vmem:[#allocation2 + $0x2d0] sm:$0x1] %vm206_vm2, %v6006_v0  ;;  %v305_v50 = vld [vmem:[%s6226_s18 + $0xd0] sm:$0xff]  ;;  %v306_v53 = vld [vmem:[%s6226_s18 + $0xd8] sm:$0xff] }
  0x22   : > { %238 = vst.msk [vmem:[#allocation2 + $0x2e8] sm:$0x1] %vm206_vm2, %v6006_v0  ;;  %239 = vst.msk [vmem:[#allocation2 + $0x300] sm:$0x1] %vm206_vm2, %v6006_v0  ;;  %v307_v56 = vld [vmem:[%s6226_s18 + $0xe0] sm:$0xff]  ;;  %v308_v57 = vld [vmem:[%s6226_s18 + $0xe8] sm:$0xff] }
  0x23   : > { %240 = vst.msk [vmem:[#allocation2 + $0x318] sm:$0x1] %vm206_vm2, %v6006_v0  ;;  %241 = vst.msk [vmem:[#allocation2 + $0x330] sm:$0x1] %vm206_vm2, %v6006_v0  ;;  %v311_v61 = vld [vmem:[%s6226_s18 + $0x100] sm:$0xff]  ;;  %v312_v62 = vld [vmem:[%s6226_s18 + $0x108] sm:$0xff] }
  0x24   : > { %244 = vst.msk [vmem:[#allocation2 + $0x29] sm:$0x1] %vm206_vm2, %v6006_v0  ;;  %245 = vst.msk [vmem:[#allocation2 + $0x41] sm:$0x1] %vm206_vm2, %v6006_v0  ;;  %v317_v4 = vld [vmem:[%s6226_s18 + $0x130] sm:$0xff]  ;;  %v318_v5 = vld [vmem:[%s6226_s18 + $0x138] sm:$0xff] }
  0x25   : > { %246 = vst.msk [vmem:[#allocation2 + $0x59] sm:$0x1] %vm206_vm2, %v6006_v0  ;;  %247 = vst.msk [vmem:[#allocation2 + $0x71] sm:$0x1] %vm206_vm2, %v6006_v0  ;;  %v320_v7 = vld [vmem:[%s6226_s18 + $0x148] sm:$0xff]  ;;  %vm3620_vm11 = vcmask 588800  }
  0x26   : > { %248 = vst.msk [vmem:[#allocation2 + $0x89] sm:$0x1] %vm206_vm2, %v6006_v0  ;;  %249 = vst.msk [vmem:[#allocation2 + $0xa1] sm:$0x1] %vm206_vm2, %v6006_v0  ;;  %p186_p4 = scmp.lt.s32.totalorder %s6041_s13, 1  ;;  %vm4404_vm12 = vcmask 1040384  }
  0x27   : > { %250 = vst.msk [vmem:[#allocation2 + $0xb9] sm:$0x1] %vm206_vm2, %v6006_v0  ;;  %251 = vst.msk [vmem:[#allocation2 + $0xd1] sm:$0x1] %vm206_vm2, %v6006_v0 }
  0x28   : > { %252 = vst.msk [vmem:[#allocation2 + $0xe9] sm:$0x1] %vm206_vm2, %v6006_v0  ;;  %253 = vst.msk [vmem:[#allocation2 + $0x101] sm:$0x1] %vm206_vm2, %v6006_v0  ;;  %s9470_s13 = smov (!%p186_p4, %s6041_s13), 1 }
  0x29   : > { %254 = vst.msk [vmem:[#allocation2 + $0x119] sm:$0x1] %vm206_vm2, %v6006_v0  ;;  %255 = vst.msk [vmem:[#allocation2 + $0x131] sm:$0x1] %vm206_vm2, %v6006_v0  ;;  %s4507_s14 = sshll.u32 %s9470_s13, 1 }
  0x2a   : > { %256 = vst.msk [vmem:[#allocation2 + $0x149] sm:$0x1] %vm206_vm2, %v6006_v0  ;;  %257 = vst.msk [vmem:[#allocation2 + $0x161] sm:$0x1] %vm206_vm2, %v6006_v0 }
  0x2b   : > { %258 = vst.msk [vmem:[#allocation2 + $0x179] sm:$0x1] %vm206_vm2, %v6006_v0  ;;  %259 = vst.msk [vmem:[#allocation2 + $0x191] sm:$0x1] %vm206_vm2, %v6006_v0 }
  0x2c   : > { %262 = vst.msk [vmem:[#allocation2 + $0x1d9] sm:$0x1] %vm206_vm2, %v6006_v0  ;;  %263 = vst.msk [vmem:[#allocation2 + $0x1f1] sm:$0x1] %vm206_vm2, %v6006_v0 }
  0x2d   : > { %264 = vst.msk [vmem:[#allocation2 + $0x209] sm:$0x1] %vm206_vm2, %v6006_v0  ;;  %265 = vst.msk [vmem:[#allocation2 + $0x221] sm:$0x1] %vm206_vm2, %v6006_v0 }
  0x2e   : > { %266 = vst.msk [vmem:[#allocation2 + $0x239] sm:$0x1] %vm206_vm2, %v6006_v0  ;;  %267 = vst.msk [vmem:[#allocation2 + $0x251] sm:$0x1] %vm206_vm2, %v6006_v0 }
  0x2f   : > { %268 = vst.msk [vmem:[#allocation2 + $0x269] sm:$0x1] %vm206_vm2, %v6006_v0  ;;  %269 = vst.msk [vmem:[#allocation2 + $0x281] sm:$0x1] %vm206_vm2, %v6006_v0 }
  0x30   : > { %270 = vst.msk [vmem:[#allocation2 + $0x299] sm:$0x1] %vm206_vm2, %v6006_v0  ;;  %271 = vst.msk [vmem:[#allocation2 + $0x2b1] sm:$0x1] %vm206_vm2, %v6006_v0 }
  0x31   : > { %272 = vst.msk [vmem:[#allocation2 + $0x2c9] sm:$0x1] %vm206_vm2, %v6006_v0  ;;  %273 = vst.msk [vmem:[#allocation2 + $0x2e1] sm:$0x1] %vm206_vm2, %v6006_v0 }
  0x32   : > { %274 = vst.msk [vmem:[#allocation2 + $0x2f9] sm:$0x1] %vm206_vm2, %v6006_v0  ;;  %275 = vst.msk [vmem:[#allocation2 + $0x311] sm:$0x1] %vm206_vm2, %v6006_v0 }
  0x33   : > { %276 = vst.msk [vmem:[#allocation2 + $0x329] sm:$0x1] %vm206_vm2, %v6006_v0  ;;  %277 = vst.msk [vmem:[#allocation2 + $0x341] sm:$0x1] %vm206_vm2, %v6006_v0 }
  0x34   : > { %243 = vst.msk [vmem:[#allocation2 + $0x11] sm:$0x1] %vm206_vm2, %v6006_v0  ;;  %207 = vst.msk [vmem:[#allocation2] sm:$0x1] %vm206_vm2, %v6006_v0 }
  0x35   : > { %224 = vst.msk [vmem:[#allocation2 + $0x198] sm:$0x1] %vm206_vm2, %v6006_v0  ;;  %225 = vst.msk [vmem:[#allocation2 + $0x1b0] sm:$0x1] %vm206_vm2, %v6006_v0 }
  0x36   : > { %242 = vst.msk [vmem:[#allocation2 + $0x348] sm:$0x1] %vm206_vm2, %v6006_v0  ;;  %260 = vst.msk [vmem:[#allocation2 + $0x1a9] sm:$0x1] %vm206_vm2, %v6006_v0 }
  0x37   : > { %261 = vst.msk [vmem:[#allocation2 + $0x1c1] sm:$0x1] %vm206_vm2, %v6006_v0  ;;  %278 = vst.msk [vmem:[#allocation2 + $0x359] sm:$0x1] %vm206_vm2, %v6006_v0  ;;  %v313_v0 = vld [vmem:[%s6226_s18 + $0x110] sm:$0xff] }
  0x38   : > { %346 = vst.msk [vmem:[#allocation2 + $0x31] sm:$0xff] %vm191_vm0, %v281_v1  ;;  %347 = vst.msk [vmem:[#allocation2 + $0x39] sm:$0xff] %vm191_vm0, %v282_v2  ;;  %v314_v1 = vld [vmem:[%s6226_s18 + $0x118] sm:$0xff]  ;;  %v315_v2 = vld [vmem:[%s6226_s18 + $0x120] sm:$0xff] }
  0x39   : > { %344 = vst.msk [vmem:[#allocation2 + $0x19] sm:$0xff] %vm191_vm0, %v279_v3  ;;  %345 = vst.msk [vmem:[#allocation2 + $0x21] sm:$0xff] %vm191_vm0, %v280_v6  ;;  %v316_v3 = vld [vmem:[%s6226_s18 + $0x128] sm:$0xff]  ;;  %v319_v6 = vld [vmem:[%s6226_s18 + $0x140] sm:$0xff] }
  0x3a   : > { %348 = vst.msk [vmem:[#allocation2 + $0x49] sm:$0xff] %vm191_vm0, %v283_v8  ;;  %349 = vst.msk [vmem:[#allocation2 + $0x51] sm:$0xff] %vm191_vm0, %v284_v9  ;;  %v321_v8 = vld [vmem:[%s6226_s18 + $0x150] sm:$0xff] }
  0x3b   : > { %350 = vst.msk [vmem:[#allocation2 + $0x61] sm:$0xff] %vm191_vm0, %v285_v10  ;;  %351 = vst.msk [vmem:[#allocation2 + $0x69] sm:$0xff] %vm191_vm0, %v286_v11  ;;  %v322_v10 = vld [vmem:[%s6226_s18 + $0x158] sm:$0xff]  ;;  %v323_v11 = vld [vmem:[%s6226_s18 + $0x160] sm:$0xff] }
  0x3c   : > { %352 = vst.msk [vmem:[#allocation2 + $0x79] sm:$0xff] %vm191_vm0, %v287_v12  ;;  %353 = vst.msk [vmem:[#allocation2 + $0x81] sm:$0xff] %vm191_vm0, %v288_v13  ;;  %v324_v12 = vld [vmem:[%s6226_s18 + $0x168] sm:$0xff] }
  0x3d   : > { %354 = vst.msk [vmem:[#allocation2 + $0x91] sm:$0xff] %vm191_vm0, %v289_v14  ;;  %355 = vst.msk [vmem:[#allocation2 + $0x99] sm:$0xff] %vm191_vm0, %v290_v15 }
  0x3e   : > { %356 = vst.msk [vmem:[#allocation2 + $0xa9] sm:$0xff] %vm191_vm0, %v291_v16  ;;  %357 = vst.msk [vmem:[#allocation2 + $0xb1] sm:$0xff] %vm191_vm0, %v292_v17 }
  0x3f   : > { %358 = vst.msk [vmem:[#allocation2 + $0xc1] sm:$0xff] %vm191_vm0, %v293_v18  ;;  %359 = vst.msk [vmem:[#allocation2 + $0xc9] sm:$0xff] %vm191_vm0, %v294_v19  ;;  %v476_v26 = vld [vmem:[#allocation2 + $0x31] sm:$0xff]  ;;  %v477_v27 = vld [vmem:[#allocation2 + $0x39] sm:$0xff] }
  0x40   : > { %360 = vst.msk [vmem:[#allocation2 + $0xd9] sm:$0xff] %vm191_vm0, %v295_v20  ;;  %361 = vst.msk [vmem:[#allocation2 + $0xe1] sm:$0xff] %vm191_vm0, %v296_v21  ;;  %v474_v28 = vld [vmem:[#allocation2 + $0x19] sm:$0xff]  ;;  %v4699_v29 = vpack.i.bf16 %v477_v27, %v476_v26  ;;  %v475_v30 = vld [vmem:[#allocation2 + $0x21] sm:$0xff] }
  0x41   : > { %362 = vst.msk [vmem:[#allocation2 + $0xf1] sm:$0xff] %vm191_vm0, %v297_v22  ;;  %363 = vst.msk [vmem:[#allocation2 + $0xf9] sm:$0xff] %vm191_vm0, %v298_v23  ;;  %v4694_v33 = vpack.i.bf16 %v475_v30, %v474_v28  ;;  %v478_v34 = vld [vmem:[#allocation2 + $0x49] sm:$0xff]  ;;  %v479_v35 = vld [vmem:[#allocation2 + $0x51] sm:$0xff] }
  0x42   : > { %364 = vst.msk [vmem:[#allocation2 + $0x109] sm:$0xff] %vm191_vm0, %v299_v24  ;;  %365 = vst.msk [vmem:[#allocation2 + $0x111] sm:$0xff] %vm191_vm0, %v300_v25  ;;  %v480_v36 = vld [vmem:[#allocation2 + $0x61] sm:$0xff]  ;;  %4700 = vrot.lane.b32.xlu1 %v4699_v29, %s6007_s19  ;;  %v4704_v37 = vpack.i.bf16 %v479_v35, %v478_v34  ;;  %v481_v38 = vld [vmem:[#allocation2 + $0x69] sm:$0xff] }
  0x43   : > { %366 = vst.msk [vmem:[#allocation2 + $0x121] sm:$0xff] %vm191_vm0, %v301_v31  ;;  %367 = vst.msk [vmem:[#allocation2 + $0x129] sm:$0xff] %vm191_vm0, %v302_v32  ;;  %4695 = vrot.lane.b32.xlu0 %v4694_v33, %s6007_s19  ;;  %v4709_v39 = vpack.i.bf16 %v481_v38, %v480_v36  ;;  %v482_v40 = vld [vmem:[#allocation2 + $0x79] sm:$0xff]  ;;  %v483_v41 = vld [vmem:[#allocation2 + $0x81] sm:$0xff] }
  0x44   : > { %v484_v42 = vld [vmem:[#allocation2 + $0x91] sm:$0xff]  ;;  %v485_v43 = vld [vmem:[#allocation2 + $0x99] sm:$0xff]  ;;  %v4714_v44 = vpack.i.bf16 %v483_v41, %v482_v40  ;;  %368 = vst.msk [vmem:[#allocation2 + $0x139] sm:$0xff] %vm191_vm0, %v303_v48  ;;  %369 = vst.msk [vmem:[#allocation2 + $0x141] sm:$0xff] %vm191_vm0, %v304_v49 }
  0x45   : > { %v486_v45 = vld [vmem:[#allocation2 + $0xa9] sm:$0xff]  ;;  %v487_v46 = vld [vmem:[#allocation2 + $0xb1] sm:$0xff]  ;;  %v4719_v47 = vpack.i.bf16 %v485_v43, %v484_v42  ;;  %370 = vst.msk [vmem:[#allocation2 + $0x151] sm:$0xff] %vm191_vm0, %v305_v50  ;;  %371 = vst.msk [vmem:[#allocation2 + $0x159] sm:$0xff] %vm191_vm0, %v306_v53 }
  0x46   : > { %4705 = vrot.lane.b32.xlu1 %v4704_v37, %s6007_s19  ;;  %v488_v51 = vld [vmem:[#allocation2 + $0xc1] sm:$0xff]  ;;  %v489_v52 = vld [vmem:[#allocation2 + $0xc9] sm:$0xff]  ;;  %v4724_v58 = vpack.i.bf16 %v487_v46, %v486_v45  ;;  %372 = vst.msk [vmem:[#allocation2 + $0x169] sm:$0xff] %vm191_vm0, %v307_v56  ;;  %373 = vst.msk [vmem:[#allocation2 + $0x171] sm:$0xff] %vm191_vm0, %v308_v57 }
  0x47   : > { %4710 = vrot.lane.b32.xlu0 %v4709_v39, %s6007_s19  ;;  %v490_v54 = vld [vmem:[#allocation2 + $0xd9] sm:$0xff]  ;;  %v491_v55 = vld [vmem:[#allocation2 + $0xe1] sm:$0xff]  ;;  %v4729_v63 = vpack.i.bf16 %v489_v52, %v488_v51  ;;  %376 = vst.msk [vmem:[#allocation2 + $0x1c9] sm:$0xff] %vm191_vm0, %v311_v61  ;;  %377 = vst.msk [vmem:[#allocation2 + $0x1d1] sm:$0xff] %vm191_vm0, %v312_v62 }
  0x48   : > { %v492_v59 = vld [vmem:[#allocation2 + $0xf1] sm:$0xff]  ;;  %v493_v60 = vld [vmem:[#allocation2 + $0xf9] sm:$0xff]  ;;  %378 = vst.msk [vmem:[#allocation2 + $0x1e1] sm:$0xff] %vm191_vm0, %v313_v0  ;;  %379 = vst.msk [vmem:[#allocation2 + $0x1e9] sm:$0xff] %vm191_vm0, %v314_v1  ;;  %v4734_v9 = vpack.i.bf16 %v491_v55, %v490_v54 }
  0x49   : > { %380 = vst.msk [vmem:[#allocation2 + $0x1f9] sm:$0xff] %vm191_vm0, %v315_v2  ;;  %381 = vst.msk [vmem:[#allocation2 + $0x201] sm:$0xff] %vm191_vm0, %v316_v3  ;;  %v4739_v13 = vpack.i.bf16 %v493_v60, %v492_v59  ;;  %v494_v14 = vld [vmem:[#allocation2 + $0x109] sm:$0xff]  ;;  %v495_v15 = vld [vmem:[#allocation2 + $0x111] sm:$0xff] }
  0x4a   : > { %4715 = vrot.lane.b32.xlu1 %v4714_v44, %s6007_s19  ;;  %382 = vst.msk [vmem:[#allocation2 + $0x211] sm:$0xff] %vm191_vm0, %v317_v4  ;;  %383 = vst.msk [vmem:[#allocation2 + $0x219] sm:$0xff] %vm191_vm0, %v318_v5  ;;  %v496_v16 = vld [vmem:[#allocation2 + $0x121] sm:$0xff]  ;;  %v497_v17 = vld [vmem:[#allocation2 + $0x129] sm:$0xff]  ;;  %v4744_v21 = vpack.i.bf16 %v495_v15, %v494_v14 }
  0x4b   : > { %4720 = vrot.lane.b32.xlu0 %v4719_v47, %s6007_s19  ;;  %384 = vst.msk [vmem:[#allocation2 + $0x229] sm:$0xff] %vm191_vm0, %v319_v6  ;;  %385 = vst.msk [vmem:[#allocation2 + $0x231] sm:$0xff] %vm191_vm0, %v320_v7  ;;  %v325_v18 = vld [vmem:[%s6226_s18 + $0x170] sm:$0xff]  ;;  %v326_v19 = vld [vmem:[%s6226_s18 + $0x178] sm:$0xff]  ;;  %v4749_v23 = vpack.i.bf16 %v497_v17, %v496_v16 }
  0x4c   : > { %386 = vst.msk [vmem:[#allocation2 + $0x241] sm:$0xff] %vm191_vm0, %v321_v8  ;;  %387 = vst.msk [vmem:[#allocation2 + $0x249] sm:$0xff] %vm191_vm0, %v322_v10  ;;  %v327_v20 = vld [vmem:[%s6226_s18 + $0x180] sm:$0xff]  ;;  %v328_v22 = vld [vmem:[%s6226_s18 + $0x188] sm:$0xff] }
  0x4d   : > { %388 = vst.msk [vmem:[#allocation2 + $0x259] sm:$0xff] %vm191_vm0, %v323_v11  ;;  %389 = vst.msk [vmem:[#allocation2 + $0x261] sm:$0xff] %vm191_vm0, %v324_v12  ;;  %v498_v24 = vld [vmem:[#allocation2 + $0x139] sm:$0xff]  ;;  %v499_v25 = vld [vmem:[#allocation2 + $0x141] sm:$0xff] }
  0x4e   : > { %4725 = vrot.lane.b32.xlu1 %v4724_v58, %s6007_s19  ;;  %390 = vst.msk [vmem:[#allocation2 + $0x271] sm:$0xff] %vm191_vm0, %v325_v18  ;;  %391 = vst.msk [vmem:[#allocation2 + $0x279] sm:$0xff] %vm191_vm0, %v326_v19  ;;  %v500_v26 = vld [vmem:[#allocation2 + $0x151] sm:$0xff]  ;;  %v501_v27 = vld [vmem:[#allocation2 + $0x159] sm:$0xff]  ;;  %v4754_v28 = vpack.i.bf16 %v499_v25, %v498_v24 }
  0x4f   : > { %4730 = vrot.lane.b32.xlu0 %v4729_v63, %s6007_s19  ;;  %392 = vst.msk [vmem:[#allocation2 + $0x289] sm:$0xff] %vm191_vm0, %v327_v20  ;;  %393 = vst.msk [vmem:[#allocation2 + $0x291] sm:$0xff] %vm191_vm0, %v328_v22  ;;  %v502_v29 = vld [vmem:[#allocation2 + $0x169] sm:$0xff]  ;;  %v503_v30 = vld [vmem:[#allocation2 + $0x171] sm:$0xff]  ;;  %v4759_v31 = vpack.i.bf16 %v501_v27, %v500_v26 }
  0x50   : > { %v329_v32 = vld [vmem:[%s6226_s18 + $0x190] sm:$0xff]  ;;  %v330_v33 = vld [vmem:[%s6226_s18 + $0x198] sm:$0xff]  ;;  %v331_v34 = vld [vmem:[%s6226_s18 + $0x1a0] sm:$0xff]  ;;  %v4764_v41 = vpack.i.bf16 %v503_v30, %v502_v29 }
  0x51   : > { %v504_v35 = vld [vmem:[#allocation2 + $0x1b1] sm:$0xff]  ;;  %v505_v36 = vld [vmem:[#allocation2 + $0x1b9] sm:$0xff]  ;;  %394 = vst.msk [vmem:[#allocation2 + $0x2a1] sm:$0xff] %vm191_vm0, %v329_v32  ;;  %395 = vst.msk [vmem:[#allocation2 + $0x2a9] sm:$0xff] %vm191_vm0, %v330_v33 }
  0x52   : > { %4735 = vrot.lane.b32.xlu1 %v4734_v9, %s6007_s19  ;;  %v332_v37 = vld [vmem:[%s6226_s18 + $0x1a8] sm:$0xff]  ;;  %396 = vst.msk [vmem:[#allocation2 + $0x2b9] sm:$0xff] %vm191_vm0, %v331_v34  ;;  %v333_v39 = vld [vmem:[%s6226_s18 + $0x1b0] sm:$0xff]  ;;  %v334_v40 = vld [vmem:[%s6226_s18 + $0x1b8] sm:$0xff]  ;;  %v4769_v45 = vpack.i.bf16 %v505_v36, %v504_v35 }
  0x53   : > { %4740 = vrot.lane.b32.xlu0 %v4739_v13, %s6007_s19  ;;  %v506_v38 = vld [vmem:[#allocation2 + $0x1c9] sm:$0xff]  ;;  %397 = vst.msk [vmem:[#allocation2 + $0x2c1] sm:$0xff] %vm191_vm0, %v332_v37  ;;  %v507_v42 = vld [vmem:[#allocation2 + $0x1d1] sm:$0xff]  ;;  %398 = vst.msk [vmem:[#allocation2 + $0x2d1] sm:$0xff] %vm191_vm0, %v333_v39 }
  0x54   : > { %399 = vst.msk [vmem:[#allocation2 + $0x2d9] sm:$0xff] %vm191_vm0, %v334_v40  ;;  %v335_v43 = vld [vmem:[%s6226_s18 + $0x1c0] sm:$0xff]  ;;  %v336_v44 = vld [vmem:[%s6226_s18 + $0x1c8] sm:$0xff]  ;;  %v337_v46 = vld [vmem:[%s6226_s18 + $0x1d0] sm:$0xff]  ;;  %v4774_v52 = vpack.i.bf16 %v507_v42, %v506_v38 }
  0x55   : > { %400 = vst.msk [vmem:[#allocation2 + $0x2e9] sm:$0xff] %vm191_vm0, %v335_v43  ;;  %401 = vst.msk [vmem:[#allocation2 + $0x2f1] sm:$0xff] %vm191_vm0, %v336_v44  ;;  %v338_v47 = vld [vmem:[%s6226_s18 + $0x1d8] sm:$0xff]  ;;  %v339_v48 = vld [vmem:[%s6226_s18 + $0x1e0] sm:$0xff] }
  0x56   : > { %4745 = vrot.lane.b32.xlu1 %v4744_v21, %s6007_s19  ;;  %v508_v49 = vld [vmem:[#allocation2 + $0x1e1] sm:$0xff]  ;;  %v509_v50 = vld [vmem:[#allocation2 + $0x1e9] sm:$0xff]  ;;  %402 = vst.msk [vmem:[#allocation2 + $0x301] sm:$0xff] %vm191_vm0, %v337_v46  ;;  %403 = vst.msk [vmem:[#allocation2 + $0x309] sm:$0xff] %vm191_vm0, %v338_v47 }
  0x57   : > { %4750 = vrot.lane.b32.xlu0 %v4749_v23, %s6007_s19  ;;  %v340_v51 = vld [vmem:[%s6226_s18 + $0x1e8] sm:$0xff]  ;;  %404 = vst.msk [vmem:[#allocation2 + $0x319] sm:$0xff] %vm191_vm0, %v339_v48  ;;  %v4779_v53 = vpack.i.bf16 %v509_v50, %v508_v49  ;;  %v510_v54 = vld [vmem:[#allocation2 + $0x1f9] sm:$0xff]  ;;  %v512_v56 = vld [vmem:[#allocation2 + $0x211] sm:$0xff] }
  0x58   : > { %405 = vst.msk [vmem:[#allocation2 + $0x321] sm:$0xff] %vm191_vm0, %v340_v51  ;;  %v511_v55 = vld [vmem:[#allocation2 + $0x201] sm:$0xff]  ;;  %v513_v57 = vld [vmem:[#allocation2 + $0x219] sm:$0xff]  ;;  %v514_v60 = vld [vmem:[#allocation2 + $0x229] sm:$0xff] }
  0x59   : > { %v4784_v58 = vpack.i.bf16 %v511_v55, %v510_v54  ;;  %v4789_v59 = vpack.i.bf16 %v513_v57, %v512_v56  ;;  %v515_v61 = vld [vmem:[#allocation2 + $0x231] sm:$0xff]  ;;  %v516_v62 = vld [vmem:[#allocation2 + $0x241] sm:$0xff]  ;;  %v517_v63 = vld [vmem:[#allocation2 + $0x249] sm:$0xff] }
  0x5a   : > { %4755 = vrot.lane.b32.xlu1 %v4754_v28, %s6007_s19  ;;  %v4794_v0 = vpack.i.bf16 %v515_v61, %v514_v60  ;;  %v4799_v1 = vpack.i.bf16 %v517_v63, %v516_v62  ;;  %v518_v2 = vld [vmem:[#allocation2 + $0x259] sm:$0xff]  ;;  %v519_v3 = vld [vmem:[#allocation2 + $0x261] sm:$0xff]  ;;  %v520_v4 = vld [vmem:[#allocation2 + $0x271] sm:$0xff] }
  0x5b   : > { %4760 = vrot.lane.b32.xlu0 %v4759_v31, %s6007_s19  ;;  %v521_v5 = vld [vmem:[#allocation2 + $0x279] sm:$0xff]  ;;  %v4804_v6 = vpack.i.bf16 %v519_v3, %v518_v2  ;;  %v522_v8 = vld [vmem:[#allocation2 + $0x289] sm:$0xff]  ;;  %v523_v9 = vld [vmem:[#allocation2 + $0x291] sm:$0xff] }
  0x5c   : > { %v4809_v7 = vpack.i.bf16 %v521_v5, %v520_v4  ;;  %v524_v10 = vld [vmem:[#allocation2 + $0x2a1] sm:$0xff]  ;;  %v525_v11 = vld [vmem:[#allocation2 + $0x2a9] sm:$0xff]  ;;  %v4814_v12 = vpack.i.bf16 %v523_v9, %v522_v8  ;;  %v526_v14 = vld [vmem:[#allocation2 + $0x2b9] sm:$0xff] }
  0x5d   : > { %v4819_v13 = vpack.i.bf16 %v525_v11, %v524_v10  ;;  %v527_v15 = vld [vmem:[#allocation2 + $0x2c1] sm:$0xff]  ;;  %v528_v16 = vld [vmem:[#allocation2 + $0x2d1] sm:$0xff]  ;;  %v529_v17 = vld [vmem:[#allocation2 + $0x2d9] sm:$0xff] }
  0x5e   : > { %4765 = vrot.lane.b32.xlu1 %v4764_v41, %s6007_s19  ;;  %v4824_v18 = vpack.i.bf16 %v527_v15, %v526_v14  ;;  %v4829_v19 = vpack.i.bf16 %v529_v17, %v528_v16  ;;  %v530_v20 = vld [vmem:[#allocation2 + $0x2e9] sm:$0xff]  ;;  %v531_v21 = vld [vmem:[#allocation2 + $0x2f1] sm:$0xff]  ;;  %v532_v22 = vld [vmem:[#allocation2 + $0x301] sm:$0xff] }
  0x5f   : > { %4770 = vrot.lane.b32.xlu0 %v4769_v45, %s6007_s19  ;;  %v533_v23 = vld [vmem:[#allocation2 + $0x309] sm:$0xff]  ;;  %v4834_v24 = vpack.i.bf16 %v531_v21, %v530_v20  ;;  %v534_v26 = vld [vmem:[#allocation2 + $0x319] sm:$0xff]  ;;  %v535_v27 = vld [vmem:[#allocation2 + $0x321] sm:$0xff] }
  0x60   : > { %v4839_v25 = vpack.i.bf16 %v533_v23, %v532_v22  ;;  %v536_v28 = vld [vmem:[#allocation2 + $0x2] sm:$0xff]  ;;  %v537_v29 = vld [vmem:[#allocation2 + $0xa] sm:$0xff]  ;;  %v4844_v30 = vpack.i.bf16 %v535_v27, %v534_v26  ;;  %v538_v32 = vld [vmem:[#allocation2 + $0x1a] sm:$0xff] }
  0x61   : > { %v4849_v31 = vpack.i.bf16 %v537_v29, %v536_v28  ;;  %v539_v33 = vld [vmem:[#allocation2 + $0x22] sm:$0xff]  ;;  %v540_v34 = vld [vmem:[#allocation2 + $0x32] sm:$0xff]  ;;  %v541_v35 = vld [vmem:[#allocation2 + $0x3a] sm:$0xff] }
  0x62   : > { %4775 = vrot.lane.b32.xlu1 %v4774_v52, %s6007_s19  ;;  %v4854_v36 = vpack.i.bf16 %v539_v33, %v538_v32  ;;  %v4859_v37 = vpack.i.bf16 %v541_v35, %v540_v34  ;;  %v542_v38 = vld [vmem:[#allocation2 + $0x4a] sm:$0xff]  ;;  %v543_v39 = vld [vmem:[#allocation2 + $0x52] sm:$0xff]  ;;  %v544_v40 = vld [vmem:[#allocation2 + $0x62] sm:$0xff] }
  0x63   : > { %4780 = vrot.lane.b32.xlu0 %v4779_v53, %s6007_s19  ;;  %v545_v41 = vld [vmem:[#allocation2 + $0x6a] sm:$0xff]  ;;  %v4864_v42 = vpack.i.bf16 %v543_v39, %v542_v38  ;;  %v546_v44 = vld [vmem:[#allocation2 + $0x7a] sm:$0xff]  ;;  %v547_v45 = vld [vmem:[#allocation2 + $0x82] sm:$0xff] }
  0x64   : > { %v4869_v43 = vpack.i.bf16 %v545_v41, %v544_v40  ;;  %v548_v46 = vld [vmem:[#allocation2 + $0x92] sm:$0xff]  ;;  %v549_v47 = vld [vmem:[#allocation2 + $0x9a] sm:$0xff]  ;;  %v4874_v50 = vpack.i.bf16 %v547_v45, %v546_v44  ;;  %v550_v52 = vld [vmem:[#allocation2 + $0xaa] sm:$0xff] }
  0x65   : > { %v309_v48 = vld [vmem:[%s6226_s18 + $0xf0] sm:$0xff]  ;;  %v310_v49 = vld [vmem:[%s6226_s18 + $0xf8] sm:$0xff]  ;;  %v4879_v51 = vpack.i.bf16 %v549_v47, %v548_v46  ;;  %v552_v54 = vld [vmem:[#allocation2 + $0xc2] sm:$0xff] }
  0x66   : > { %4785 = vrot.lane.b32.xlu1 %v4784_v58, %s6007_s19  ;;  %374 = vst.msk [vmem:[#allocation2 + $0x181] sm:$0xff] %vm191_vm0, %v309_v48  ;;  %375 = vst.msk [vmem:[#allocation2 + $0x189] sm:$0xff] %vm191_vm0, %v310_v49  ;;  %v551_v53 = vld [vmem:[#allocation2 + $0xb2] sm:$0xff]  ;;  %v553_v55 = vld [vmem:[#allocation2 + $0xca] sm:$0xff] }
  0x67   : > { %4790 = vrot.lane.b32.xlu0 %v4789_v59, %s6007_s19  ;;  %v4884_v56 = vpack.i.bf16 %v551_v53, %v550_v52  ;;  %v4889_v57 = vpack.i.bf16 %v553_v55, %v552_v54  ;;  %v554_v58 = vld [vmem:[#allocation2 + $0xda] sm:$0xff]  ;;  %v555_v59 = vld [vmem:[#allocation2 + $0xe2] sm:$0xff]  ;;  %v341_v60 = vld [vmem:[%s6226_s18 + $0x1f0] sm:$0xff] }
  0x68   : > { %v556_v61 = vld [vmem:[#allocation2 + $0xf2] sm:$0xff]  ;;  %v557_v62 = vld [vmem:[#allocation2 + $0xfa] sm:$0xff]  ;;  %406 = vst.msk [vmem:[#allocation2 + $0x331] sm:$0xff] %vm191_vm0, %v341_v60  ;;  %v558_v2 = vld [vmem:[#allocation2 + $0x10a] sm:$0xff] }
  0x69   : > { %v342_v63 = vld [vmem:[%s6226_s18 + $0x1f8] sm:$0xff]  ;;  %v560_v4 = vld [vmem:[#allocation2 + $0x122] sm:$0xff]  ;;  %v561_v5 = vld [vmem:[#allocation2 + $0x12a] sm:$0xff]  ;;  %s189_s18 = scalar_lea.vmem %s8942_s3, %s4507_s14 }
  0x6a   : > { %4795 = vrot.lane.b32.xlu1 %v4794_v0, %s6007_s19  ;;  %407 = vst.msk [vmem:[#allocation2 + $0x339] sm:$0xff] %vm191_vm0, %v342_v63  ;;  %v4894_v0 = vpack.i.bf16 %v555_v59, %v554_v58  ;;  %v559_v3 = vld [vmem:[#allocation2 + $0x112] sm:$0xff]  ;;  %v562_v8 = vld [vmem:[#allocation2 + $0x13a] sm:$0xff]  ;;  %v563_v9 = vld [vmem:[#allocation2 + $0x142] sm:$0xff] }
  0x6b   : > { %4800 = vrot.lane.b32.xlu0 %v4799_v1, %s6007_s19  ;;  %v4899_v1 = vpack.i.bf16 %v557_v62, %v556_v61  ;;  %v564_v10 = vld [vmem:[#allocation2 + $0x152] sm:$0xff]  ;;  %v565_v11 = vld [vmem:[#allocation2 + $0x15a] sm:$0xff]  ;;  %v566_v14 = vld [vmem:[#allocation2 + $0x16a] sm:$0xff] }
  0x6c   : > { %v567_v15 = vld [vmem:[#allocation2 + $0x172] sm:$0xff]  ;;  %v569_v17 = vld [vmem:[#allocation2 + $0x1ba] sm:$0xff]  ;;  %v570_v20 = vld [vmem:[#allocation2 + $0x1ca] sm:$0xff] }
  0x6d   : > { %v568_v16 = vld [vmem:[#allocation2 + $0x1b2] sm:$0xff]  ;;  %v572_v22 = vld [vmem:[#allocation2 + $0x1e2] sm:$0xff]  ;;  %v573_v23 = vld [vmem:[#allocation2 + $0x1ea] sm:$0xff] }
  0x6e   : > { %4805 = vrot.lane.b32.xlu1 %v4804_v6, %s6007_s19  ;;  %v4904_v6 = vpack.i.bf16 %v559_v3, %v558_v2  ;;  %v571_v21 = vld [vmem:[#allocation2 + $0x1d2] sm:$0xff]  ;;  %v574_v26 = vld [vmem:[#allocation2 + $0x1fa] sm:$0xff]  ;;  %v575_v27 = vld [vmem:[#allocation2 + $0x202] sm:$0xff] }
  0x6f   : > { %4810 = vrot.lane.b32.xlu0 %v4809_v7, %s6007_s19  ;;  %v4909_v7 = vpack.i.bf16 %v561_v5, %v560_v4  ;;  %v576_v28 = vld [vmem:[#allocation2 + $0x212] sm:$0xff]  ;;  %v577_v29 = vld [vmem:[#allocation2 + $0x21a] sm:$0xff]  ;;  %v578_v32 = vld [vmem:[#allocation2 + $0x22a] sm:$0xff] }
  0x70   : > { %v579_v33 = vld [vmem:[#allocation2 + $0x232] sm:$0xff]  ;;  %v580_v34 = vld [vmem:[#allocation2 + $0x242] sm:$0xff]  ;;  %v581_v35 = vld [vmem:[#allocation2 + $0x24a] sm:$0xff] }
  0x71   : > { %v582_v38 = vld [vmem:[#allocation2 + $0x25a] sm:$0xff]  ;;  %v583_v39 = vld [vmem:[#allocation2 + $0x262] sm:$0xff]  ;;  %v584_v40 = vld [vmem:[#allocation2 + $0x272] sm:$0xff] }
  0x72   : > { %4815 = vrot.lane.b32.xlu1 %v4814_v12, %s6007_s19  ;;  %v4914_v12 = vpack.i.bf16 %v563_v9, %v562_v8  ;;  %v585_v41 = vld [vmem:[#allocation2 + $0x27a] sm:$0xff]  ;;  %v586_v44 = vld [vmem:[#allocation2 + $0x28a] sm:$0xff]  ;;  %v587_v45 = vld [vmem:[#allocation2 + $0x292] sm:$0xff] }
  0x73   : > { %4820 = vrot.lane.b32.xlu0 %v4819_v13, %s6007_s19  ;;  %v4919_v13 = vpack.i.bf16 %v565_v11, %v564_v10  ;;  %v588_v46 = vld [vmem:[#allocation2 + $0x2a2] sm:$0xff]  ;;  %v589_v47 = vld [vmem:[#allocation2 + $0x2aa] sm:$0xff]  ;;  %v4974_v48 = vpack.i.bf16 %v587_v45, %v586_v44  ;;  %v592_v53 = vld [vmem:[#allocation2 + $0x2d2] sm:$0xff] }
  0x74   : > { %v591_v52 = vld [vmem:[#allocation2 + $0x2c2] sm:$0xff]  ;;  %v593_v54 = vld [vmem:[#allocation2 + $0x2da] sm:$0xff]  ;;  %v595_v58 = vld [vmem:[#allocation2 + $0x2f2] sm:$0xff] }
  0x75   : > { %v596_v60 = vld [vmem:[#allocation2 + $0x302] sm:$0xff]  ;;  %v597_v61 = vld [vmem:[#allocation2 + $0x30a] sm:$0xff]  ;;  %v410_v5 = vld [vmem:[#allocation2 + $0x18] sm:$0xff] }
  0x76   : > { %4825 = vrot.lane.b32.xlu1 %v4824_v18, %s6007_s19  ;;  %v4924_v18 = vpack.i.bf16 %v567_v15, %v566_v14  ;;  %v599_v2 = vld [vmem:[#allocation2 + $0x322] sm:$0xff]  ;;  %v412_v10 = vld [vmem:[#allocation2 + $0x30] sm:$0xff]  ;;  %v413_v11 = vld [vmem:[#allocation2 + $0x38] sm:$0xff] }
  0x77   : > { %4830 = vrot.lane.b32.xlu0 %v4829_v19, %s6007_s19  ;;  %v4929_v19 = vpack.i.bf16 %v569_v17, %v568_v16  ;;  %v415_v14 = vld [vmem:[#allocation2 + $0x50] sm:$0xff]  ;;  %v5014_v15 = vpack.i.bf16 %v413_v11, %v412_v10  ;;  %v430_v45 = vld [vmem:[#allocation2 + $0x108] sm:$0xff] }
  0x78   : > { %v6499_v11 = vld [vmem:[#allocation2 + $0x1c8] sm:$0xff] }
  0x7a   : > { %4835 = vrot.lane.b32.xlu1 %v4834_v24, %s6007_s19  ;;  %v4934_v24 = vpack.i.bf16 %v571_v21, %v570_v20  ;;  %v418_v21 = vld [vmem:[#allocation2 + $0x78] sm:$0xff] }
  0x7b   : > { %4840 = vrot.lane.b32.xlu0 %v4839_v25, %s6007_s19  ;;  %v4939_v25 = vpack.i.bf16 %v573_v23, %v572_v22  ;;  %v419_v22 = vld [vmem:[#allocation2 + $0x80] sm:$0xff] }
  0x7e   : > { %4845 = vrot.lane.b32.xlu1 %v4844_v30, %s6007_s19  ;;  %v4944_v30 = vpack.i.bf16 %v575_v27, %v574_v26  ;;  %v420_v26 = vld [vmem:[#allocation2 + $0x90] sm:$0xff]  ;;  %v421_v27 = vld [vmem:[#allocation2 + $0x98] sm:$0xff] }
  0x7f   : > { %4850 = vrot.lane.b32.xlu0 %v4849_v31, %s6008_s20  ;;  %v4949_v31 = vpack.i.bf16 %v577_v29, %v576_v28  ;;  %v422_v29 = vld [vmem:[#allocation2 + $0xa8] sm:$0xff] }
  0x82   : > { %4855 = vrot.lane.b32.xlu1 %v4854_v36, %s6008_s20  ;;  %v4954_v36 = vpack.i.bf16 %v579_v33, %v578_v32 }
  0x83   : > { %4860 = vrot.lane.b32.xlu0 %v4859_v37, %s6008_s20  ;;  %v4959_v37 = vpack.i.bf16 %v581_v35, %v580_v34  ;;  %v424_v34 = vld [vmem:[#allocation2 + $0xc0] sm:$0xff]  ;;  %v425_v35 = vld [vmem:[#allocation2 + $0xc8] sm:$0xff] }
  0x86   : > { %4865 = vrot.lane.b32.xlu1 %v4864_v42, %s6008_s20  ;;  %v4964_v42 = vpack.i.bf16 %v583_v39, %v582_v38  ;;  %v427_v38 = vld [vmem:[#allocation2 + $0xe0] sm:$0xff]  ;;  %v5044_v39 = vpack.i.bf16 %v425_v35, %v424_v34  ;;  %v6535_v34 = vld [vmem:[#allocation2 + $0x230] sm:$0xff] }
  0x87   : > { %4870 = vrot.lane.b32.xlu0 %v4869_v43, %s6008_s20  ;;  %v4969_v43 = vpack.i.bf16 %v585_v41, %v584_v40  ;;  %9093 = vst [vmem:[#allocation18_spill] sm:$0xff] %v6535_v34 }
  0x8a   : > { %4875 = vrot.lane.b32.xlu1 %v4874_v50, %s6008_s20  ;;  %v4979_v50 = vpack.i.bf16 %v589_v47, %v588_v46  ;;  %v431_v46 = vld [vmem:[#allocation2 + $0x110] sm:$0xff] }
  0x8b   : > { %4880 = vrot.lane.b32.xlu0 %v4879_v51, %s6008_s20  ;;  %v6413_v49 = vpop.permute.xlu0 %4690  ;;  %v590_v51 = vld [vmem:[#allocation2 + $0x2ba] sm:$0xff] }
  0x8c   : > { %9078 = vst [vmem:[#allocation3_spill] sm:$0xff] %v6413_v49  ;;  %v4984_v55 = vpack.i.bf16 %v591_v52, %v590_v51  ;;  %v6461_v51 = vld [vmem:[#allocation2 + $0x120] sm:$0xff]  ;;  %v6463_v52 = vld [vmem:[#allocation2 + $0x128] sm:$0xff] }
  0x8d   : > { %v471_v49 = vld [vmem:[#allocation2 + $0x320] sm:$0xff] }
  0x8e   : > { %4885 = vrot.lane.b32.xlu1 %v4884_v56, %s6008_s20  ;;  %v4989_v56 = vpack.i.bf16 %v593_v54, %v592_v53  ;;  %v6467_v54 = vld [vmem:[#allocation2 + $0x138] sm:$0xff] }
  0x8f   : > { %4890 = vrot.lane.b32.xlu0 %v4889_v57, %s6008_s20  ;;  %v594_v57 = vld [vmem:[#allocation2 + $0x2ea] sm:$0xff] }
  0x90   : > { %v4994_v63 = vpack.i.bf16 %v595_v58, %v594_v57 }
  0x92   : > { %4895 = vrot.lane.b32.xlu1 %v4894_v0, %s6008_s20  ;;  %v4999_v0 = vpack.i.bf16 %v597_v61, %v596_v60  ;;  %v6479_v60 = vld [vmem:[#allocation2 + $0x150] sm:$0xff]  ;;  %v6481_v61 = vld [vmem:[#allocation2 + $0x158] sm:$0xff] }
  0x93   : > { %4900 = vrot.lane.b32.xlu0 %v4899_v1, %s6008_s20  ;;  %v598_v1 = vld [vmem:[#allocation2 + $0x31a] sm:$0xff] }
  0x96   : > { %4905 = vrot.lane.b32.xlu1 %v4904_v6, %s6008_s20  ;;  %v411_v6 = vld [vmem:[#allocation2 + $0x20] sm:$0xff] }
  0x97   : > { %4910 = vrot.lane.b32.xlu0 %v4909_v7, %s6008_s20  ;;  %v5004_v7 = vpack.i.bf16 %v599_v2, %v598_v1  ;;  %v5009_v8 = vpack.i.bf16 %v411_v6, %v410_v5  ;;  %v6487_v1 = vld [vmem:[#allocation2 + $0x170] sm:$0xff]  ;;  %v5074_v2 = vpack.i.bf16 %v6481_v61, %v6479_v60  ;;  %v630_v6 = vld [vmem:[#allocation2 + $0x180] sm:$0xff] }
  0x9a   : > { %4915 = vrot.lane.b32.xlu1 %v4914_v12, %s6008_s20 }
  0x9b   : > { %4920 = vrot.lane.b32.xlu0 %v4919_v13, %s6008_s20  ;;  %v414_v13 = vld [vmem:[#allocation2 + $0x48] sm:$0xff] }
  0x9c   : > { %v5019_v16 = vpack.i.bf16 %v415_v14, %v414_v13  ;;  %v6501_v13 = vld [vmem:[#allocation2 + $0x1d0] sm:$0xff] }
  0x9e   : > { %4925 = vrot.lane.b32.xlu1 %v4924_v18, %s6008_s20  ;;  %v416_v18 = vld [vmem:[#allocation2 + $0x60] sm:$0xff] }
  0x9f   : > { %4930 = vrot.lane.b32.xlu0 %v4929_v19, %s6008_s20  ;;  %v417_v19 = vld [vmem:[#allocation2 + $0x68] sm:$0xff] }
  0xa0   : > { %v5024_v23 = vpack.i.bf16 %v417_v19, %v416_v18  ;;  %v6509_v18 = vld [vmem:[#allocation2 + $0x1e0] sm:$0xff]  ;;  %v6511_v19 = vld [vmem:[#allocation2 + $0x1e8] sm:$0xff] }
  0xa2   : > { %4935 = vrot.lane.b32.xlu1 %v4934_v24, %s6008_s20  ;;  %v5029_v24 = vpack.i.bf16 %v419_v22, %v418_v21  ;;  %v6515_v22 = vld [vmem:[#allocation2 + $0x1f8] sm:$0xff] }
  0xa3   : > { %4940 = vrot.lane.b32.xlu0 %v4939_v25, %s6008_s20 }
  0xa6   : > { %4945 = vrot.lane.b32.xlu1 %v4944_v30, %s6008_s20  ;;  %v423_v30 = vld [vmem:[#allocation2 + $0xb0] sm:$0xff] }
  0xa7   : > { %4950 = vrot.lane.b32.xlu0 %v4949_v31, %s6008_s20  ;;  %v5034_v31 = vpack.i.bf16 %v421_v27, %v420_v26  ;;  %v5039_v32 = vpack.i.bf16 %v423_v30, %v422_v29  ;;  %v6527_v29 = vld [vmem:[#allocation2 + $0x210] sm:$0xff]  ;;  %v6529_v30 = vld [vmem:[#allocation2 + $0x218] sm:$0xff] }
  0xa8   : > { %v5104_v35 = vpack.i.bf16 %v6529_v30, %v6527_v29 }
  0xaa   : > { %4955 = vrot.lane.b32.xlu1 %v4954_v36, %s6008_s20 }
  0xab   : > { %4960 = vrot.lane.b32.xlu0 %v4959_v37, %s6008_s20  ;;  %v426_v37 = vld [vmem:[#allocation2 + $0xd8] sm:$0xff] }
  0xac   : > { %v5049_v40 = vpack.i.bf16 %v427_v38, %v426_v37 }
  0xae   : > { %4965 = vrot.lane.b32.xlu1 %v4964_v42, %s6008_s20  ;;  %v428_v42 = vld [vmem:[#allocation2 + $0xf0] sm:$0xff] }
  0xaf   : > { %4970 = vrot.lane.b32.xlu0 %v4969_v43, %s6008_s20  ;;  %v429_v43 = vld [vmem:[#allocation2 + $0xf8] sm:$0xff] }
  0xb0   : > { %v5054_v47 = vpack.i.bf16 %v429_v43, %v428_v42  ;;  %v6551_v43 = vld [vmem:[#allocation2 + $0x258] sm:$0xff] }
  0xb1   : > { %9098 = vst [vmem:[#allocation23_spill] sm:$0xff] %v6551_v43 }
  0xb2   : > { %4975 = vrot.lane.b32.xlu1 %v4974_v48, %s6008_s20  ;;  %v5059_v48 = vpack.i.bf16 %v431_v46, %v430_v45  ;;  %v6553_v45 = vld [vmem:[#allocation2 + $0x260] sm:$0xff] }
  0xb3   : > { %4980 = vrot.lane.b32.xlu0 %v4979_v50, %s6008_s20  ;;  %9099 = vst [vmem:[#allocation24_spill] sm:$0xff] %v6553_v45 }
  0xb4   : > { %v6417_v59 = vpop.permute.xlu1 %4700 }
  0xb5   : > { %9079 = vst [vmem:[#allocation4_spill] sm:$0xff] %v6417_v59  ;;  %v6419_v62 = vpop.permute.xlu0 %4695  ;;  %v470_v59 = vld [vmem:[#allocation2 + $0x318] sm:$0xff] }
  0xb6   : > { %9080 = vst [vmem:[#allocation5_spill] sm:$0xff] %v6419_v62  ;;  %4985 = vrot.lane.b32.xlu1 %v4984_v55, %s6008_s20  ;;  %v6469_v55 = vld [vmem:[#allocation2 + $0x140] sm:$0xff]  ;;  %v6619_v62 = vld [vmem:[#allocation2 + $0x308] sm:$0xff] }
  0xb7   : > { %4990 = vrot.lane.b32.xlu0 %v4989_v56, %s6008_s20  ;;  %v5064_v56 = vpack.i.bf16 %v6463_v52, %v6461_v51  ;;  %v5069_v57 = vpack.i.bf16 %v6469_v55, %v6467_v54  ;;  %9120 = vst [vmem:[#allocation45_spill] sm:$0xff] %v6619_v62 }
  0xb8   : > { %v6423_v3 = vpop.permute.xlu1 %4705 }
  0xb9   : > { %9081 = vst [vmem:[#allocation6_spill] sm:$0xff] %v6423_v3  ;;  %v6425_v4 = vpop.permute.xlu0 %4710  ;;  %v6617_v3 = vld [vmem:[#allocation2 + $0x300] sm:$0xff] }
  0xba   : > { %9082 = vst [vmem:[#allocation7_spill] sm:$0xff] %v6425_v4  ;;  %4995 = vrot.lane.b32.xlu1 %v4994_v63, %s6008_s20  ;;  %9119 = vst [vmem:[#allocation44_spill] sm:$0xff] %v6617_v3 }
  0xbb   : > { %5000 = vrot.lane.b32.xlu0 %v4999_v0, %s6008_s20  ;;  %v6485_v0 = vld [vmem:[#allocation2 + $0x168] sm:$0xff] }
  0xbc   : > { %v6429_v9 = vpop.permute.xlu1 %4715  ;;  %v5079_v5 = vpack.i.bf16 %v6487_v1, %v6485_v0 }
  0xbd   : > { %9083 = vst [vmem:[#allocation8_spill] sm:$0xff] %v6429_v9  ;;  %v6431_v12 = vpop.permute.xlu0 %4720  ;;  %v6607_v9 = vld [vmem:[#allocation2 + $0x2f0] sm:$0xff] }
  0xbe   : > { %9084 = vst [vmem:[#allocation9_spill] sm:$0xff] %v6431_v12  ;;  %5005 = vrot.lane.b32.xlu1 %v5004_v7, %s6008_s20  ;;  %v631_v7 = vld [vmem:[#allocation2 + $0x188] sm:$0xff]  ;;  %9117 = vst [vmem:[#allocation42_spill] sm:$0xff] %v6607_v9 }
  0xbf   : > { %5010 = vrot.lane.b32.xlu0 %v5009_v8, %s6009_s21  ;;  %v5084_v14 = vpack.i.bf16 %v631_v7, %v630_v6  ;;  %v6571_v6 = vld [vmem:[#allocation2 + $0x290] sm:$0xff]  ;;  %v6605_v12 = vld [vmem:[#allocation2 + $0x2e8] sm:$0xff] }
  0xc0   : > { %v6435_v17 = vpop.permute.xlu1 %4725  ;;  %9105 = vst [vmem:[#allocation30_spill] sm:$0xff] %v6571_v6  ;;  %9116 = vst [vmem:[#allocation41_spill] sm:$0xff] %v6605_v12 }
  0xc1   : > { %9085 = vst [vmem:[#allocation10_spill] sm:$0xff] %v6435_v17  ;;  %v6437_v20 = vpop.permute.xlu0 %4730 }
  0xc2   : > { %9086 = vst [vmem:[#allocation11_spill] sm:$0xff] %v6437_v20  ;;  %5015 = vrot.lane.b32.xlu1 %v5014_v15, %s6009_s21  ;;  %v5089_v15 = vpack.i.bf16 %v6501_v13, %v6499_v11  ;;  %v6601_v20 = vld [vmem:[#allocation2 + $0x2d8] sm:$0xff] }
  0xc3   : > { %5020 = vrot.lane.b32.xlu0 %v5019_v16, %s6009_s21  ;;  %9114 = vst [vmem:[#allocation39_spill] sm:$0xff] %v6601_v20 }
  0xc4   : > { %v6441_v25 = vpop.permute.xlu1 %4735 }
  0xc5   : > { %9087 = vst [vmem:[#allocation12_spill] sm:$0xff] %v6441_v25  ;;  %v6443_v28 = vpop.permute.xlu0 %4740  ;;  %v6599_v25 = vld [vmem:[#allocation2 + $0x2d0] sm:$0xff] }
  0xc6   : > { %9088 = vst [vmem:[#allocation13_spill] sm:$0xff] %v6443_v28  ;;  %5025 = vrot.lane.b32.xlu1 %v5024_v23, %s6009_s21  ;;  %v6517_v23 = vld [vmem:[#allocation2 + $0x200] sm:$0xff]  ;;  %9113 = vst [vmem:[#allocation38_spill] sm:$0xff] %v6599_v25 }
  0xc7   : > { %5030 = vrot.lane.b32.xlu0 %v5029_v24, %s6009_s21  ;;  %v5094_v24 = vpack.i.bf16 %v6511_v19, %v6509_v18  ;;  %v5099_v26 = vpack.i.bf16 %v6517_v23, %v6515_v22 }
  0xc8   : > { %v6447_v33 = vpop.permute.xlu1 %4745 }
  0xc9   : > { %9089 = vst [vmem:[#allocation14_spill] sm:$0xff] %v6447_v33  ;;  %v6449_v36 = vpop.permute.xlu0 %4750  ;;  %v6589_v33 = vld [vmem:[#allocation2 + $0x2c0] sm:$0xff] }
  0xca   : > { %5035 = vrot.lane.b32.xlu1 %v5034_v31, %s6009_s21  ;;  %9111 = vst [vmem:[#allocation36_spill] sm:$0xff] %v6589_v33 }
  0xcb   : > { %5040 = vrot.lane.b32.xlu0 %v5039_v32, %s6009_s21  ;;  %v6533_v32 = vld [vmem:[#allocation2 + $0x228] sm:$0xff] }
  0xcc   : > { %v6453_v41 = vpop.permute.xlu1 %4755  ;;  %9092 = vst [vmem:[#allocation17_spill] sm:$0xff] %v6533_v32  ;;  %v5109_v37 = vpack.i.bf16 %v6535_v34, %v6533_v32  ;;  %v742_v32 = vld [vmem:[#allocation2 + $0xc2] sm:$0xff] }
  0xcd   : > { %v6455_v44 = vpop.permute.xlu0 %4760 }
  0xce   : > { %5045 = vrot.lane.b32.xlu1 %v5044_v39, %s6009_s21  ;;  %v6545_v39 = vld [vmem:[#allocation2 + $0x240] sm:$0xff]  ;;  %v4763_v34 = vunpack.i.h.bf16 %v6455_v44 }
  0xcf   : > { %5050 = vrot.lane.b32.xlu0 %v5049_v40, %s6009_s21  ;;  %9095 = vst [vmem:[#allocation20_spill] sm:$0xff] %v6545_v39  ;;  %v6547_v40 = vld [vmem:[#allocation2 + $0x248] sm:$0xff] }
  0xd0   : > { %v6459_v50 = vpop.permute.xlu1 %4765  ;;  %9096 = vst [vmem:[#allocation21_spill] sm:$0xff] %v6547_v40  ;;  %v5114_v46 = vpack.i.bf16 %v6547_v40, %v6545_v39  ;;  %v738_v39 = vld [vmem:[#allocation2 + $0x92] sm:$0xff]  ;;  %v4752_v40 = vunpack.i.l.bf16 %v6449_v36 }
  0xd1   : > { %v6465_v53 = vpop.permute.xlu0 %4770 }
  0xd2   : > { %5055 = vrot.lane.b32.xlu1 %v5054_v47, %s6009_s21  ;;  %v5119_v47 = vpack.i.bf16 %v6553_v45, %v6551_v43  ;;  %v734_v43 = vld [vmem:[#allocation2 + $0x62] sm:$0xff]  ;;  %v735_v45 = vld [vmem:[#allocation2 + $0x6a] sm:$0xff] }
  0xd3   : > { %5060 = vrot.lane.b32.xlu0 %v5059_v48, %s6009_s21 }
  0xd4   : > { %v6477_v58 = vpop.permute.xlu1 %4775 }
  0xd5   : > { %v6483_v63 = vpop.permute.xlu0 %4780 }
  0xd6   : > { %5065 = vrot.lane.b32.xlu1 %v5064_v56, %s6009_s21  ;;  %v6563_v56 = vld [vmem:[#allocation2 + $0x270] sm:$0xff] }
  0xd7   : > { %5070 = vrot.lane.b32.xlu0 %v5069_v57, %s6009_s21  ;;  %9101 = vst [vmem:[#allocation26_spill] sm:$0xff] %v6563_v56  ;;  %v6565_v57 = vld [vmem:[#allocation2 + $0x278] sm:$0xff] }
  0xd8   : > { %v6495_v8 = vpop.permute.xlu1 %4785  ;;  %9102 = vst [vmem:[#allocation27_spill] sm:$0xff] %v6565_v57  ;;  %v5124_v7 = vpack.i.bf16 %v6565_v57, %v6563_v56  ;;  %v733_v57 = vld [vmem:[#allocation2 + $0x52] sm:$0xff] }
  0xd9   : > { %v6497_v10 = vpop.permute.xlu0 %4790 }
  0xda   : > { %5075 = vrot.lane.b32.xlu1 %v5074_v2, %s6009_s21 }
  0xdb   : > { %5080 = vrot.lane.b32.xlu0 %v5079_v5, %s6009_s21  ;;  %v6569_v5 = vld [vmem:[#allocation2 + $0x288] sm:$0xff] }
  0xdc   : > { %v6507_v16 = vpop.permute.xlu1 %4795  ;;  %9104 = vst [vmem:[#allocation29_spill] sm:$0xff] %v6569_v5 }
  0xdd   : > { %v6513_v21 = vpop.permute.xlu0 %4800 }
  0xde   : > { %5085 = vrot.lane.b32.xlu1 %v5084_v14, %s6009_s21  ;;  %v5129_v14 = vpack.i.bf16 %v6571_v6, %v6569_v5  ;;  %v6733_v5 = vld [vmem:[#allocation2 + $0x339] sm:$0xff] }
  0xdf   : > { %5090 = vrot.lane.b32.xlu0 %v5089_v15, %s6009_s21  ;;  %v6735_v6 = vld [vmem:[#allocation2 + $0x1a] sm:$0xff] }
  0xe0   : > { %v6525_v27 = vpop.permute.xlu1 %4805 }
  0xe1   : > { %9090 = vst [vmem:[#allocation15_spill] sm:$0xff] %v6525_v27  ;;  %v6531_v31 = vpop.permute.xlu0 %4810  ;;  %v743_v27 = vld [vmem:[#allocation2 + $0xca] sm:$0xff] }
  0xe2   : > { %9091 = vst [vmem:[#allocation16_spill] sm:$0xff] %v6531_v31  ;;  %5095 = vrot.lane.b32.xlu1 %v5094_v24, %s6009_s21  ;;  %v6581_v24 = vld [vmem:[#allocation2 + $0x2a0] sm:$0xff]  ;;  %v4762_v31 = vunpack.i.l.bf16 %v6455_v44  ;;  %v6788_v44 = vsel %vm191_vm0, %v6461_v51, %v4752_v40  ;;  %v748_v51 = vld [vmem:[#allocation2 + $0x10a] sm:$0xff]  ;;  %v749_v40 = vld [vmem:[#allocation2 + $0x112] sm:$0xff] }
  0xe3   : > { %5100 = vrot.lane.b32.xlu0 %v5099_v26, %s6009_s21  ;;  %9107 = vst [vmem:[#allocation32_spill] sm:$0xff] %v6581_v24  ;;  %v6583_v26 = vld [vmem:[#allocation2 + $0x2a8] sm:$0xff] }
  0xe4   : > { %v6543_v38 = vpop.permute.xlu1 %4815  ;;  %9108 = vst [vmem:[#allocation33_spill] sm:$0xff] %v6583_v26 }
  0xe5   : > { %9094 = vst [vmem:[#allocation19_spill] sm:$0xff] %v6543_v38  ;;  %v6549_v42 = vpop.permute.xlu0 %4820  ;;  %v737_v38 = vld [vmem:[#allocation2 + $0x82] sm:$0xff] }
  0xe6   : > { %9097 = vst [vmem:[#allocation22_spill] sm:$0xff] %v6549_v42  ;;  %5105 = vrot.lane.b32.xlu1 %v5104_v35, %s6009_s21  ;;  %v736_v42 = vld [vmem:[#allocation2 + $0x7a] sm:$0xff] }
  0xe7   : > { %5110 = vrot.lane.b32.xlu0 %v5109_v37, %s6009_s21  ;;  %v6587_v37 = vld [vmem:[#allocation2 + $0x2b8] sm:$0xff] }
  0xe8   : > { %v6561_v48 = vpop.permute.xlu1 %4825  ;;  %9110 = vst [vmem:[#allocation35_spill] sm:$0xff] %v6587_v37 }
  0xe9   : > { %9100 = vst [vmem:[#allocation25_spill] sm:$0xff] %v6561_v48  ;;  %v6567_v2 = vpop.permute.xlu0 %4830  ;;  %v732_v48 = vld [vmem:[#allocation2 + $0x4a] sm:$0xff] }
  0xea   : > { %9103 = vst [vmem:[#allocation28_spill] sm:$0xff] %v6567_v2  ;;  %5115 = vrot.lane.b32.xlu1 %v5114_v46, %s6009_s21  ;;  %v5134_v46 = vpack.i.bf16 %v6583_v26, %v6581_v24  ;;  %v6711_v24 = vld [vmem:[#allocation2 + $0x2c1] sm:$0xff]  ;;  %v6731_v26 = vld [vmem:[#allocation2 + $0x331] sm:$0xff] }
  0xeb   : > { %5120 = vrot.lane.b32.xlu0 %v5119_v47, %s6009_s21  ;;  %v5139_v47 = vpack.i.bf16 %v6589_v33, %v6587_v37  ;;  %v666_v37 = vld [vmem:[#allocation2 + $0x31] sm:$0xff]  ;;  %v667_v33 = vld [vmem:[#allocation2 + $0x39] sm:$0xff]  ;;  %9150 = vst [vmem:[#allocation75_spill] sm:$0xff] %v6731_v26  ;;  %v6737_v2 = vld [vmem:[#allocation2 + $0x22] sm:$0xff] }
  0xec   : > { %v6579_v15 = vpop.permute.xlu1 %4835  ;;  %v745_v26 = vld [vmem:[#allocation2 + $0xe2] sm:$0xff] }
  0xed   : > { %9106 = vst [vmem:[#allocation31_spill] sm:$0xff] %v6579_v15  ;;  %v6585_v35 = vpop.permute.xlu0 %4840 }
  0xee   : > { %9109 = vst [vmem:[#allocation34_spill] sm:$0xff] %v6585_v35  ;;  %5125 = vrot.lane.b32.xlu1 %v5124_v7, %s6009_s21  ;;  %v5144_v7 = vpack.i.bf16 %v6601_v20, %v6599_v25  ;;  %v665_v25 = vld [vmem:[#allocation2 + $0x21] sm:$0xff]  ;;  %v6709_v35 = vld [vmem:[#allocation2 + $0x2b9] sm:$0xff] }
  0xef   : > { %5130 = vrot.lane.b32.xlu0 %v5129_v14, %s6009_s21  ;;  %v5149_v14 = vpack.i.bf16 %v6607_v9, %v6605_v12  ;;  %v663_v12 = vld [vmem:[#allocation2 + $0x338] sm:$0xff] }
  0xf0   : > { %v6597_v28 = vpop.permute.xlu1 %4845 }
  0xf1   : > { %9112 = vst [vmem:[#allocation37_spill] sm:$0xff] %v6597_v28  ;;  %v6603_v17 = vpop.permute.xlu0 %4850  ;;  %v662_v28 = vld [vmem:[#allocation2 + $0x330] sm:$0xff] }
  0xf2   : > { %9115 = vst [vmem:[#allocation40_spill] sm:$0xff] %v6603_v17  ;;  %5135 = vrot.lane.b32.xlu1 %v5134_v46, %s6009_s21  ;;  %v5154_v46 = vpack.i.bf16 %v6619_v62, %v6617_v3  ;;  %v682_v62 = vld [vmem:[#allocation2 + $0xf1] sm:$0xff] }
  0xf3   : > { %5140 = vrot.lane.b32.xlu0 %v5139_v47, %s6009_s21  ;;  %v5159_v47 = vpack.i.bf16 %v471_v49, %v470_v59  ;;  %v669_v49 = vld [vmem:[#allocation2 + $0x51] sm:$0xff] }
  0xf4   : > { %v6615_v4 = vpop.permute.xlu1 %4855 }
  0xf5   : > { %9118 = vst [vmem:[#allocation43_spill] sm:$0xff] %v6615_v4  ;;  %v6621_v17 = vpop.permute.xlu0 %4860  ;;  %v664_v4 = vld [vmem:[#allocation2 + $0x19] sm:$0xff] }
  0xf6   : > { %9121 = vst [vmem:[#allocation46_spill] sm:$0xff] %v6621_v17  ;;  %5145 = vrot.lane.b32.xlu1 %v5144_v7, %s6009_s21  ;;  %v5164_v17 = vpack.i.bf16 %v663_v12, %v662_v28  ;;  %v5169_v7 = vpack.i.bf16 %v665_v25, %v664_v4  ;;  %v670_v12 = vld [vmem:[#allocation2 + $0x61] sm:$0xff]  ;;  %v671_v28 = vld [vmem:[#allocation2 + $0x69] sm:$0xff]  ;;  %v672_v25 = vld [vmem:[#allocation2 + $0x79] sm:$0xff] }
  0xf7   : > { %5150 = vrot.lane.b32.xlu0 %v5149_v14, %s6009_s21  ;;  %v668_v14 = vld [vmem:[#allocation2 + $0x49] sm:$0xff] }
  0xf8   : > { %v6627_v9 = vpop.permute.xlu1 %4865 }
  0xf9   : > { %9122 = vst [vmem:[#allocation47_spill] sm:$0xff] %v6627_v9  ;;  %v6629_v20 = vpop.permute.xlu0 %4870  ;;  %v6638_v9 = vpack.i.bf16 %v667_v33, %v666_v37  ;;  %v674_v33 = vld [vmem:[#allocation2 + $0x91] sm:$0xff]  ;;  %v675_v37 = vld [vmem:[#allocation2 + $0x99] sm:$0xff] }
  0xfa   : > { %9123 = vst [vmem:[#allocation48_spill] sm:$0xff] %v6629_v20  ;;  %5155 = vrot.lane.b32.xlu1 %v5154_v46, %s6009_s21  ;;  %v6641_v46 = vpack.i.bf16 %v669_v49, %v668_v14  ;;  %v676_v14 = vld [vmem:[#allocation2 + $0xa9] sm:$0xff]  ;;  %v677_v49 = vld [vmem:[#allocation2 + $0xb1] sm:$0xff] }
  0xfb   : > { %5160 = vrot.lane.b32.xlu0 %v5159_v47, %s6009_s21  ;;  %9126 = vst [vmem:[#allocation51_spill] sm:$0xff] %v6638_v9  ;;  %v673_v47 = vld [vmem:[#allocation2 + $0x81] sm:$0xff] }
  0xfc   : > { %v6633_v3 = vpop.permute.xlu1 %4875  ;;  %9127 = vst [vmem:[#allocation52_spill] sm:$0xff] %v6641_v46 }
  0xfd   : > { %9124 = vst [vmem:[#allocation49_spill] sm:$0xff] %v6633_v3  ;;  %v6635_v59 = vpop.permute.xlu0 %4880 }
  0xfe   : > { %9125 = vst [vmem:[#allocation50_spill] sm:$0xff] %v6635_v59  ;;  %5165 = vrot.lane.b32.xlu1 %v5164_v17, %s6009_s21  ;;  %v5184_v59 = vpack.i.bf16 %v671_v28, %v670_v12  ;;  %v5189_v17 = vpack.i.bf16 %v673_v47, %v672_v25  ;;  %v679_v12 = vld [vmem:[#allocation2 + $0xc9] sm:$0xff]  ;;  %v681_v25 = vld [vmem:[#allocation2 + $0xe1] sm:$0xff] }
  0xff   : > { %5170 = vrot.lane.b32.xlu0 %v5169_v7, %s6010_s22 }
 0x100   : > { %v6643_v4 = vpop.permute.xlu1 %4885 }
 0x101   : > { %9128 = vst [vmem:[#allocation53_spill] sm:$0xff] %v6643_v4  ;;  %v6645_v3 = vpop.permute.xlu0 %4890  ;;  %v5194_v4 = vpack.i.bf16 %v675_v37, %v674_v33  ;;  %v685_v37 = vld [vmem:[#allocation2 + $0x111] sm:$0xff] }
 0x102   : > { %9129 = vst [vmem:[#allocation54_spill] sm:$0xff] %v6645_v3  ;;  %5175 = vrot.lane.b32.xlu1 %v6638_v9, %s6010_s22  ;;  %v5199_v3 = vpack.i.bf16 %v677_v49, %v676_v14  ;;  %v678_v9 = vld [vmem:[#allocation2 + $0xc1] sm:$0xff] }
 0x103   : > { %5180 = vrot.lane.b32.xlu0 %v6641_v46, %s6010_s22  ;;  %v680_v46 = vld [vmem:[#allocation2 + $0xd9] sm:$0xff] }
 0x104   : > { %v6651_v7 = vpop.permute.xlu1 %4895 }
 0x105   : > { %9130 = vst [vmem:[#allocation55_spill] sm:$0xff] %v6651_v7  ;;  %v6653_v20 = vpop.permute.xlu0 %4900  ;;  %v5204_v7 = vpack.i.bf16 %v679_v12, %v678_v9 }
 0x106   : > { %9131 = vst [vmem:[#allocation56_spill] sm:$0xff] %v6653_v20  ;;  %5185 = vrot.lane.b32.xlu1 %v5184_v59, %s6010_s22  ;;  %v5209_v20 = vpack.i.bf16 %v681_v25, %v680_v46  ;;  %v683_v59 = vld [vmem:[#allocation2 + $0xf9] sm:$0xff]  ;;  %v689_v46 = vld [vmem:[#allocation2 + $0x141] sm:$0xff] }
 0x107   : > { %5190 = vrot.lane.b32.xlu0 %v5189_v17, %s6010_s22  ;;  %v684_v17 = vld [vmem:[#allocation2 + $0x109] sm:$0xff]  ;;  %v5214_v49 = vpack.i.bf16 %v683_v59, %v682_v62  ;;  %v693_v59 = vld [vmem:[#allocation2 + $0x171] sm:$0xff] }
 0x108   : > { %v6657_v28 = vpop.permute.xlu1 %4905 }
 0x109   : > { %9132 = vst [vmem:[#allocation57_spill] sm:$0xff] %v6657_v28  ;;  %v6659_v47 = vpop.permute.xlu0 %4910  ;;  %v5219_v28 = vpack.i.bf16 %v685_v37, %v684_v17 }
 0x10a   : > { %9133 = vst [vmem:[#allocation58_spill] sm:$0xff] %v6659_v47  ;;  %5195 = vrot.lane.b32.xlu1 %v5194_v4, %s6010_s22  ;;  %v686_v47 = vld [vmem:[#allocation2 + $0x121] sm:$0xff]  ;;  %v687_v4 = vld [vmem:[#allocation2 + $0x129] sm:$0xff] }
 0x10b   : > { %5200 = vrot.lane.b32.xlu0 %v5199_v3, %s6010_s22  ;;  %v688_v3 = vld [vmem:[#allocation2 + $0x139] sm:$0xff]  ;;  %v5224_v25 = vpack.i.bf16 %v687_v4, %v686_v47  ;;  %v697_v4 = vld [vmem:[#allocation2 + $0x1d1] sm:$0xff] }
 0x10c   : > { %v6663_v33 = vpop.permute.xlu1 %4915 }
 0x10d   : > { %9134 = vst [vmem:[#allocation59_spill] sm:$0xff] %v6663_v33  ;;  %v6665_v14 = vpop.permute.xlu0 %4920  ;;  %v690_v33 = vld [vmem:[#allocation2 + $0x151] sm:$0xff] }
 0x10e   : > { %9135 = vst [vmem:[#allocation60_spill] sm:$0xff] %v6665_v14  ;;  %5205 = vrot.lane.b32.xlu1 %v5204_v7, %s6010_s22  ;;  %v5229_v14 = vpack.i.bf16 %v689_v46, %v688_v3  ;;  %v691_v7 = vld [vmem:[#allocation2 + $0x159] sm:$0xff] }
 0x10f   : > { %5210 = vrot.lane.b32.xlu0 %v5209_v20, %s6010_s22  ;;  %v692_v20 = vld [vmem:[#allocation2 + $0x169] sm:$0xff]  ;;  %v5234_v37 = vpack.i.bf16 %v691_v7, %v690_v33  ;;  %v701_v7 = vld [vmem:[#allocation2 + $0x201] sm:$0xff] }
 0x110   : > { %v6669_v9 = vpop.permute.xlu1 %4925 }
 0x111   : > { %9136 = vst [vmem:[#allocation61_spill] sm:$0xff] %v6669_v9  ;;  %v6671_v12 = vpop.permute.xlu0 %4930  ;;  %v694_v9 = vld [vmem:[#allocation2 + $0x181] sm:$0xff] }
 0x112   : > { %9137 = vst [vmem:[#allocation62_spill] sm:$0xff] %v6671_v12  ;;  %5215 = vrot.lane.b32.xlu1 %v5214_v49, %s6010_s22  ;;  %v5239_v12 = vpack.i.bf16 %v693_v59, %v692_v20  ;;  %v695_v49 = vld [vmem:[#allocation2 + $0x189] sm:$0xff] }
 0x113   : > { %5220 = vrot.lane.b32.xlu0 %v5219_v28, %s6010_s22  ;;  %v696_v28 = vld [vmem:[#allocation2 + $0x1c9] sm:$0xff]  ;;  %v5244_v46 = vpack.i.bf16 %v695_v49, %v694_v9  ;;  %v705_v49 = vld [vmem:[#allocation2 + $0x231] sm:$0xff] }
 0x114   : > { %v6675_v62 = vpop.permute.xlu1 %4935 }
 0x115   : > { %9138 = vst [vmem:[#allocation63_spill] sm:$0xff] %v6675_v62  ;;  %v6677_v17 = vpop.permute.xlu0 %4940  ;;  %v698_v62 = vld [vmem:[#allocation2 + $0x1e1] sm:$0xff] }
 0x116   : > { %9139 = vst [vmem:[#allocation64_spill] sm:$0xff] %v6677_v17  ;;  %5225 = vrot.lane.b32.xlu1 %v5224_v25, %s6010_s22  ;;  %v5249_v17 = vpack.i.bf16 %v697_v4, %v696_v28  ;;  %v699_v25 = vld [vmem:[#allocation2 + $0x1e9] sm:$0xff] }
 0x117   : > { %5230 = vrot.lane.b32.xlu0 %v5229_v14, %s6010_s22  ;;  %v700_v14 = vld [vmem:[#allocation2 + $0x1f9] sm:$0xff]  ;;  %v5254_v59 = vpack.i.bf16 %v699_v25, %v698_v62  ;;  %v709_v25 = vld [vmem:[#allocation2 + $0x261] sm:$0xff] }
 0x118   : > { %v6681_v47 = vpop.permute.xlu1 %4945 }
 0x119   : > { %9140 = vst [vmem:[#allocation65_spill] sm:$0xff] %v6681_v47  ;;  %v6683_v3 = vpop.permute.xlu0 %4950  ;;  %v702_v47 = vld [vmem:[#allocation2 + $0x211] sm:$0xff] }
 0x11a   : > { %9141 = vst [vmem:[#allocation66_spill] sm:$0xff] %v6683_v3  ;;  %5235 = vrot.lane.b32.xlu1 %v5234_v37, %s6010_s22  ;;  %v5259_v3 = vpack.i.bf16 %v701_v7, %v700_v14  ;;  %v703_v37 = vld [vmem:[#allocation2 + $0x219] sm:$0xff] }
 0x11b   : > { %5240 = vrot.lane.b32.xlu0 %v5239_v12, %s6010_s22  ;;  %v704_v12 = vld [vmem:[#allocation2 + $0x229] sm:$0xff]  ;;  %v5264_v4 = vpack.i.bf16 %v703_v37, %v702_v47  ;;  %v713_v37 = vld [vmem:[#allocation2 + $0x291] sm:$0xff] }
 0x11c   : > { %v6687_v33 = vpop.permute.xlu1 %4955 }
 0x11d   : > { %9142 = vst [vmem:[#allocation67_spill] sm:$0xff] %v6687_v33  ;;  %v6689_v20 = vpop.permute.xlu0 %4960  ;;  %v706_v33 = vld [vmem:[#allocation2 + $0x241] sm:$0xff] }
 0x11e   : > { %9143 = vst [vmem:[#allocation68_spill] sm:$0xff] %v6689_v20  ;;  %5245 = vrot.lane.b32.xlu1 %v5244_v46, %s6010_s22  ;;  %v5269_v20 = vpack.i.bf16 %v705_v49, %v704_v12  ;;  %v707_v46 = vld [vmem:[#allocation2 + $0x249] sm:$0xff]  ;;  %v714_v49 = vld [vmem:[#allocation2 + $0x2a1] sm:$0xff] }
 0x11f   : > { %5250 = vrot.lane.b32.xlu0 %v5249_v17, %s6010_s22  ;;  %v708_v17 = vld [vmem:[#allocation2 + $0x259] sm:$0xff]  ;;  %v5274_v7 = vpack.i.bf16 %v707_v46, %v706_v33 }
 0x120   : > { %v6693_v9 = vpop.permute.xlu1 %4965  ;;  %v6715_v33 = vld [vmem:[#allocation2 + $0x2d9] sm:$0xff] }
 0x121   : > { %9144 = vst [vmem:[#allocation69_spill] sm:$0xff] %v6693_v9  ;;  %v6695_v28 = vpop.permute.xlu0 %4970  ;;  %v710_v9 = vld [vmem:[#allocation2 + $0x271] sm:$0xff] }
 0x122   : > { %9145 = vst [vmem:[#allocation70_spill] sm:$0xff] %v6695_v28  ;;  %5255 = vrot.lane.b32.xlu1 %v5254_v59, %s6010_s22  ;;  %v5279_v28 = vpack.i.bf16 %v709_v25, %v708_v17  ;;  %v711_v59 = vld [vmem:[#allocation2 + $0x279] sm:$0xff]  ;;  %v6722_v17 = vld [vmem:[#allocation2 + $0x301] sm:$0xff]  ;;  %v6724_v25 = vld [vmem:[#allocation2 + $0x309] sm:$0xff] }
 0x123   : > { %5260 = vrot.lane.b32.xlu0 %v5259_v3, %s6010_s22  ;;  %v712_v3 = vld [vmem:[#allocation2 + $0x289] sm:$0xff]  ;;  %v5284_v46 = vpack.i.bf16 %v711_v59, %v710_v9  ;;  %v731_v59 = vld [vmem:[#allocation2 + $0x3a] sm:$0xff] }
 0x124   : > { %v6699_v62 = vpop.permute.xlu1 %4975  ;;  %v5289_v15 = vpack.i.bf16 %v713_v37, %v712_v3  ;;  %v5299_v3 = vpack.i.bf16 %v6711_v24, %v6709_v35  ;;  %v739_v35 = vld [vmem:[#allocation2 + $0x9a] sm:$0xff]  ;;  %v4757_v24 = vunpack.i.l.bf16 %v6453_v41 }
 0x125   : > { %9146 = vst [vmem:[#allocation71_spill] sm:$0xff] %v6699_v62  ;;  %v6701_v14 = vpop.permute.xlu0 %4980  ;;  %v715_v62 = vld [vmem:[#allocation2 + $0x2a9] sm:$0xff] }
 0x126   : > { %9147 = vst [vmem:[#allocation72_spill] sm:$0xff] %v6701_v14  ;;  %5265 = vrot.lane.b32.xlu1 %v5264_v4, %s6010_s22  ;;  %v6713_v14 = vld [vmem:[#allocation2 + $0x2d1] sm:$0xff] }
 0x127   : > { %5270 = vrot.lane.b32.xlu0 %v5269_v20, %s6010_s22  ;;  %v6717_v20 = vld [vmem:[#allocation2 + $0x2e9] sm:$0xff]  ;;  %v6719_v4 = vld [vmem:[#allocation2 + $0x2f1] sm:$0xff]  ;;  %v5304_v37 = vpack.i.bf16 %v6715_v33, %v6713_v14 }
 0x128   : > { %v6705_v47 = vpop.permute.xlu1 %4985  ;;  %v740_v14 = vld [vmem:[#allocation2 + $0xaa] sm:$0xff] }
 0x129   : > { %9148 = vst [vmem:[#allocation73_spill] sm:$0xff] %v6705_v47  ;;  %v6707_v12 = vpop.permute.xlu0 %4990  ;;  %v6728_v47 = vld [vmem:[#allocation2 + $0x321] sm:$0xff] }
 0x12a   : > { %9149 = vst [vmem:[#allocation74_spill] sm:$0xff] %v6707_v12  ;;  %5275 = vrot.lane.b32.xlu1 %v5274_v7, %s6010_s22  ;;  %v6726_v12 = vld [vmem:[#allocation2 + $0x319] sm:$0xff] }
 0x12b   : > { %5280 = vrot.lane.b32.xlu0 %v5279_v28, %s6010_s22  ;;  %v730_v7 = vld [vmem:[#allocation2 + $0x32] sm:$0xff]  ;;  %v5294_v28 = vpack.i.bf16 %v715_v62, %v714_v49  ;;  %v4758_v62 = vunpack.i.h.bf16 %v6453_v41 }
 0x12c   : > { %v6739_v9 = vpop.permute.xlu1 %4995  ;;  %v741_v49 = vld [vmem:[#allocation2 + $0xb2] sm:$0xff] }
 0x12d   : > { %9151 = vst [vmem:[#allocation76_spill] sm:$0xff] %v6739_v9  ;;  %v6741_v56 = vpop.permute.xlu0 %5000  ;;  %v4768_v9 = vunpack.i.h.bf16 %v6459_v50 }
 0x12e   : > { %9152 = vst [vmem:[#allocation77_spill] sm:$0xff] %v6741_v56  ;;  %5285 = vrot.lane.b32.xlu1 %v5284_v46, %s6010_s22  ;;  %v4753_v56 = vunpack.i.h.bf16 %v6449_v36  ;;  %v6763_v36 = vpack.i.bf16 %v731_v59, %v730_v7  ;;  %v744_v46 = vld [vmem:[#allocation2 + $0xda] sm:$0xff]  ;;  %v6774_v7 = vpack.i.bf16 %v735_v45, %v734_v43  ;;  %v6780_v59 = vpack.i.bf16 %v741_v49, %v740_v14  ;;  %v750_v14 = vld [vmem:[#allocation2 + $0x122] sm:$0xff] }
 0x12f   : > { %5290 = vrot.lane.b32.xlu0 %v5289_v15, %s6010_s22  ;;  %v6765_v15 = vpack.i.bf16 %v733_v57, %v732_v48  ;;  %v6776_v48 = vpack.i.bf16 %v737_v38, %v736_v42  ;;  %v6778_v57 = vpack.i.bf16 %v739_v35, %v738_v39  ;;  %v746_v38 = vld [vmem:[#allocation2 + $0xf2] sm:$0xff]  ;;  %v4773_v39 = vunpack.i.h.bf16 %v6465_v53  ;;  %v753_v49 = vld [vmem:[#allocation2 + $0x142] sm:$0xff] }
 0x130   : > { %v6757_v33 = vpop.permute.xlu1 %5005  ;;  %9154 = vst [vmem:[#allocation79_spill] sm:$0xff] %v6763_v36  ;;  %9157 = vst [vmem:[#allocation82_spill] sm:$0xff] %v6774_v7  ;;  %v6784_v41 = vsel %vm191_vm0, %v6463_v52, %v4753_v56  ;;  %v4772_v42 = vunpack.i.l.bf16 %v6465_v53  ;;  %v6797_v45 = vpack.i.bf16 %v743_v27, %v742_v32  ;;  %v6799_v52 = vpack.i.bf16 %v745_v26, %v744_v46  ;;  %v747_v56 = vld [vmem:[#allocation2 + $0xfa] sm:$0xff]  ;;  %v440_v32 = vld [vmem:[#allocation2 + $0x1b0] sm:$0xff] }
 0x131   : > { %9153 = vst [vmem:[#allocation78_spill] sm:$0xff] %v6757_v33  ;;  %9155 = vst [vmem:[#allocation80_spill] sm:$0xff] %v6765_v15  ;;  %v6771_v33 = vpop.permute.xlu0 %5010  ;;  %v6803_v35 = vsel %vm191_vm0, %v6469_v55, %v4758_v62  ;;  %v6811_v53 = vsel %vm191_vm0, %v6481_v61, %v4763_v34  ;;  %v6815_v27 = vsel %vm191_vm0, %v6479_v60, %v4762_v31  ;;  %v441_v26 = vld [vmem:[#allocation2 + $0x1b8] sm:$0xff]  ;;  %v4778_v55 = vunpack.i.h.bf16 %v6477_v58  ;;  %v751_v61 = vld [vmem:[#allocation2 + $0x12a] sm:$0xff] }
 0x132   : > { %9156 = vst [vmem:[#allocation81_spill] sm:$0xff] %v6771_v33  ;;  %5295 = vrot.lane.b32.xlu1 %v5294_v28, %s6010_s22  ;;  %9158 = vst [vmem:[#allocation83_spill] sm:$0xff] %v6776_v48  ;;  %v4767_v28 = vunpack.i.l.bf16 %v6459_v50  ;;  %v6807_v50 = vsel %vm191_vm0, %v6467_v54, %v4757_v24  ;;  %v4777_v62 = vunpack.i.l.bf16 %v6477_v58  ;;  %v4783_v54 = vunpack.i.h.bf16 %v6483_v63  ;;  %v752_v34 = vld [vmem:[#allocation2 + $0x13a] sm:$0xff] }
 0x133   : > { %9159 = vst [vmem:[#allocation84_spill] sm:$0xff] %v6778_v57  ;;  %9160 = vst [vmem:[#allocation85_spill] sm:$0xff] %v6780_v59  ;;  %5300 = vrot.lane.b32.xlu0 %v5299_v3, %s6010_s22  ;;  %v4782_v24 = vunpack.i.l.bf16 %v6483_v63  ;;  %v6826_v60 = vsel %vm191_vm0, %v6487_v1, %v4768_v9  ;;  %v9163_v58 = vpack.i.bf16 %v6719_v4, %v6717_v20  ;;  %v4788_v1 = vunpack.i.h.bf16 %v6495_v8 }
 0x134   : > { %v6795_v43 = vpop.permute.xlu1 %5015  ;;  %v6830_v31 = vsel %vm191_vm0, %v6485_v0, %v4767_v28  ;;  %v6836_v46 = vpack.i.bf16 %v747_v56, %v746_v38  ;;  %v6838_v63 = vpack.i.bf16 %v749_v40, %v748_v51  ;;  %v4787_v0 = vunpack.i.l.bf16 %v6495_v8  ;;  %v754_v28 = vld [vmem:[#allocation2 + $0x152] sm:$0xff]  ;;  %v755_v51 = vld [vmem:[#allocation2 + $0x15a] sm:$0xff] }
 0x135   : > { %9161 = vst [vmem:[#allocation86_spill] sm:$0xff] %v6795_v43  ;;  %v6817_v3 = vpop.permute.xlu0 %5020  ;;  %v4793_v20 = vunpack.i.h.bf16 %v6497_v10  ;;  %v4792_v4 = vunpack.i.l.bf16 %v6497_v10  ;;  %v6854_v56 = vpack.i.bf16 %v751_v61, %v750_v14  ;;  %v757_v40 = vld [vmem:[#allocation2 + $0x172] sm:$0xff]  ;;  %v6864_v8 = vsel %vm191_vm0, %v6499_v11, %v4777_v62  ;;  %v758_v61 = vld [vmem:[#allocation2 + $0x182] sm:$0xff] }
 0x136   : > { %9162 = vst [vmem:[#allocation87_spill] sm:$0xff] %v6817_v3  ;;  %5305 = vrot.lane.b32.xlu1 %v5304_v37, %s6010_s22  ;;  %v6841_v37 = vsel %vm191_vm0, %v441_v26, %v4773_v39  ;;  %v6844_v3 = vsel %vm191_vm0, %v440_v32, %v4772_v42  ;;  %v6856_v39 = vpack.i.bf16 %v753_v49, %v752_v34  ;;  %v756_v42 = vld [vmem:[#allocation2 + $0x16a] sm:$0xff]  ;;  %v4803_v11 = vunpack.i.h.bf16 %v6513_v21  ;;  %v9198_v43 = vld [vmem:[#allocation27_spill] sm:$0xff] }
 0x137   : > { %5310 = vrot.lane.b32.xlu0 %v9163_v58, %s6010_s22  ;;  %9166 = vst [vmem:[#allocation90_spill] sm:$0xff] %v6854_v56  ;;  %v6860_v32 = vsel %vm191_vm0, %v6501_v13, %v4778_v55  ;;  %v6868_v10 = vsel %vm191_vm0, %v6511_v19, %v4783_v54  ;;  %v6872_v26 = vsel %vm191_vm0, %v6509_v18, %v4782_v24  ;;  %v4798_v13 = vunpack.i.h.bf16 %v6507_v16  ;;  %v759_v18 = vld [vmem:[#allocation2 + $0x18a] sm:$0xff]  ;;  %v6888_v24 = vld [vmem:[#allocation2 + $0x1d2] sm:$0xff] }
 0x138   : > { %v6848_v9 = vpop.permute.xlu1 %5025  ;;  %9167 = vst [vmem:[#allocation91_spill] sm:$0xff] %v6856_v39  ;;  %v9168_v14 = vpack.i.bf16 %v6724_v25, %v6722_v17  ;;  %v4797_v55 = vunpack.i.l.bf16 %v6507_v16  ;;  %v4802_v62 = vunpack.i.l.bf16 %v6513_v21  ;;  %v9169_v19 = vpack.i.bf16 %v6728_v47, %v6726_v12  ;;  %v6886_v54 = vld [vmem:[#allocation2 + $0x1ca] sm:$0xff] }
 0x139   : > { %9164 = vst [vmem:[#allocation88_spill] sm:$0xff] %v6848_v9  ;;  %v6852_v38 = vpop.permute.xlu0 %5030  ;;  %v6892_v17 = vsel %vm191_vm0, %v6517_v23, %v4788_v1  ;;  %v6896_v16 = vsel %vm191_vm0, %v6515_v22, %v4787_v0  ;;  %v6900_v21 = vpack.i.bf16 %v755_v51, %v754_v28  ;;  %v6902_v34 = vpack.i.bf16 %v757_v40, %v756_v42  ;;  %v9173_v23 = vld [vmem:[#allocation15_spill] sm:$0xff]  ;;  %v6918_v0 = vld [vmem:[#allocation2 + $0x1ea] sm:$0xff] }
 0x13a   : > { %9165 = vst [vmem:[#allocation89_spill] sm:$0xff] %v6852_v38  ;;  %5315 = vrot.lane.b32.xlu1 %v9168_v14, %s6010_s22  ;;  %v6906_v47 = vsel %vm191_vm0, %v6529_v30, %v4793_v20  ;;  %v6910_v12 = vsel %vm191_vm0, %v6527_v29, %v4792_v4  ;;  %v4808_v49 = vunpack.i.h.bf16 %v9173_v23  ;;  %v4807_v58 = vunpack.i.l.bf16 %v9173_v23  ;;  %v6916_v1 = vld [vmem:[#allocation2 + $0x1e2] sm:$0xff]  ;;  %9176 = vst [vmem:[#allocation96_spill] sm:$0xff] %v6918_v0  ;;  %v6930_v40 = vld [vmem:[#allocation2 + $0x1fa] sm:$0xff] }
 0x13b   : > { %5320 = vrot.lane.b32.xlu0 %v9169_v19, %s6010_s22  ;;  %9171 = vst [vmem:[#allocation93_spill] sm:$0xff] %v6900_v21  ;;  %9172 = vst [vmem:[#allocation94_spill] sm:$0xff] %v6902_v34  ;;  %v9177_v28 = vld [vmem:[#allocation16_spill] sm:$0xff]  ;;  %v9178_v30 = vld [vmem:[#allocation75_spill] sm:$0xff]  ;;  %v6926_v29 = vpack.i.bf16 %v759_v18, %v758_v61 }
 0x13c   : > { %v6898_v25 = vpop.permute.xlu1 %5035  ;;  %9175 = vst [vmem:[#allocation95_spill] sm:$0xff] %v6916_v1  ;;  %v4813_v51 = vunpack.i.h.bf16 %v9177_v28  ;;  %v4812_v42 = vunpack.i.l.bf16 %v9177_v28  ;;  %v9179_v20 = vpack.i.bf16 %v6733_v5, %v9178_v30  ;;  %9181 = vst [vmem:[#allocation75_spill] sm:$0xff] %v6930_v40  ;;  %v6932_v14 = vld [vmem:[#allocation2 + $0x202] sm:$0xff]  ;;  %v9183_v19 = vld [vmem:[#allocation18_spill] sm:$0xff]  ;;  %v9187_v30 = vpack.i.bf16 %v6737_v2, %v6735_v6 }
 0x13d   : > { %9170 = vst [vmem:[#allocation92_spill] sm:$0xff] %v6898_v25  ;;  %v6914_v22 = vpop.permute.xlu0 %5040  ;;  %9180 = vst [vmem:[#allocation16_spill] sm:$0xff] %v6926_v29  ;;  %v6936_v23 = vsel %vm191_vm0, %v9183_v19, %v4798_v13  ;;  %v9185_v25 = vld [vmem:[#allocation21_spill] sm:$0xff]  ;;  %v9186_v61 = vld [vmem:[#allocation20_spill] sm:$0xff] }
 0x13e   : > { %9174 = vst [vmem:[#allocation15_spill] sm:$0xff] %v6914_v22  ;;  %5325 = vrot.lane.b32.xlu1 %v9179_v20, %s6010_s22  ;;  %9182 = vst [vmem:[#allocation97_spill] sm:$0xff] %v6932_v14  ;;  %v9184_v22 = vld [vmem:[#allocation17_spill] sm:$0xff]  ;;  %v6944_v5 = vsel %vm191_vm0, %v9185_v25, %v4803_v11  ;;  %v6948_v18 = vsel %vm191_vm0, %v9186_v61, %v4802_v62  ;;  %v9189_v20 = vld [vmem:[#allocation19_spill] sm:$0xff]  ;;  %v6984_v33 = vsel %vm191_vm0, %v9198_v43, %v4813_v51 }
 0x13f   : > { %v6940_v28 = vsel %vm191_vm0, %v9184_v22, %v4797_v55  ;;  %5330 = vrot.lane.b32.xlu0 %v9187_v30, %s6011_s23  ;;  %v6954_v13 = vld [vmem:[#allocation2 + $0x212] sm:$0xff]  ;;  %v4818_v19 = vunpack.i.h.bf16 %v9189_v20  ;;  %v4817_v55 = vunpack.i.l.bf16 %v9189_v20  ;;  %v6963_v25 = vld [vmem:[#allocation2 + $0x21a] sm:$0xff]  ;;  %v6965_v61 = vld [vmem:[#allocation2 + $0x22a] sm:$0xff] }
 0x140   : > { %9188 = vst [vmem:[#allocation18_spill] sm:$0xff] %v6954_v13  ;;  %v9190_v22 = vld [vmem:[#allocation22_spill] sm:$0xff]  ;;  %v6959_v11 = vpop.permute.xlu1 %5045  ;;  %9192 = vst [vmem:[#allocation21_spill] sm:$0xff] %v6963_v25  ;;  %v9195_v2 = vld [vmem:[#allocation24_spill] sm:$0xff] }
 0x141   : > { %v4823_v4 = vunpack.i.h.bf16 %v9190_v22  ;;  %9191 = vst [vmem:[#allocation17_spill] sm:$0xff] %v6959_v11  ;;  %9193 = vst [vmem:[#allocation20_spill] sm:$0xff] %v6965_v61  ;;  %v6967_v38 = vld [vmem:[#allocation2 + $0x232] sm:$0xff]  ;;  %v6971_v6 = vsel %vm191_vm0, %v9195_v2, %v4808_v49  ;;  %v9196_v30 = vld [vmem:[#allocation23_spill] sm:$0xff]  ;;  %v4822_v9 = vunpack.i.l.bf16 %v9190_v22  ;;  %v6978_v11 = vpop.permute.xlu0 %5050 }
 0x142   : > { %9194 = vst [vmem:[#allocation19_spill] sm:$0xff] %v6967_v38  ;;  %v6975_v20 = vsel %vm191_vm0, %v9196_v30, %v4807_v58  ;;  %9197 = vst [vmem:[#allocation22_spill] sm:$0xff] %v6978_v11  ;;  %v9200_v1 = vld [vmem:[#allocation26_spill] sm:$0xff]  ;;  %v9201_v49 = vld [vmem:[#allocation25_spill] sm:$0xff]  ;;  %5335 = vrot.lane.b32.xlu1 %v6763_v36, %s6011_s23 }
 0x143   : > { %9199 = vst [vmem:[#allocation24_spill] sm:$0xff] %v6984_v33  ;;  %v6988_v0 = vsel %vm191_vm0, %v9200_v1, %v4812_v42  ;;  %v4828_v2 = vunpack.i.h.bf16 %v9201_v49  ;;  %v4827_v58 = vunpack.i.l.bf16 %v9201_v49  ;;  %v6994_v22 = vld [vmem:[#allocation2 + $0x242] sm:$0xff]  ;;  %v6996_v30 = vld [vmem:[#allocation2 + $0x24a] sm:$0xff]  ;;  %5340 = vrot.lane.b32.xlu0 %v6765_v15, %s6011_s23  ;;  %v7006_v42 = vld [vmem:[#allocation2 + $0x25a] sm:$0xff] }
 0x144   : > { %9202 = vst [vmem:[#allocation23_spill] sm:$0xff] %v6994_v22  ;;  %9203 = vst [vmem:[#allocation27_spill] sm:$0xff] %v6996_v30  ;;  %v9204_v62 = vld [vmem:[#allocation28_spill] sm:$0xff]  ;;  %v9207_v36 = vld [vmem:[#allocation30_spill] sm:$0xff]  ;;  %v7023_v25 = vpop.permute.xlu1 %5055 }
 0x145   : > { %v4833_v11 = vunpack.i.h.bf16 %v9204_v62  ;;  %v4832_v43 = vunpack.i.l.bf16 %v9204_v62  ;;  %9205 = vst [vmem:[#allocation26_spill] sm:$0xff] %v7006_v42  ;;  %v7008_v49 = vld [vmem:[#allocation2 + $0x262] sm:$0xff]  ;;  %v7012_v40 = vsel %vm191_vm0, %v9207_v36, %v4818_v19  ;;  %v9209_v14 = vld [vmem:[#allocation29_spill] sm:$0xff]  ;;  %v9216_v19 = vld [vmem:[#allocation34_spill] sm:$0xff] }
 0x146   : > { %9206 = vst [vmem:[#allocation25_spill] sm:$0xff] %v7008_v49  ;;  %9208 = vst [vmem:[#allocation28_spill] sm:$0xff] %v7012_v40  ;;  %v7016_v62 = vsel %vm191_vm0, %v9209_v14, %v4817_v55  ;;  %v9211_v33 = vld [vmem:[#allocation33_spill] sm:$0xff]  ;;  %v9213_v1 = vld [vmem:[#allocation31_spill] sm:$0xff]  ;;  %v4843_v40 = vunpack.i.h.bf16 %v9216_v19  ;;  %v7033_v14 = vpop.permute.xlu0 %5060  ;;  %5345 = vrot.lane.b32.xlu1 %v6774_v7, %s6011_s23 }
 0x147   : > { %9210 = vst [vmem:[#allocation30_spill] sm:$0xff] %v7016_v62  ;;  %v7020_v15 = vsel %vm191_vm0, %v9211_v33, %v4823_v4  ;;  %v4838_v13 = vunpack.i.h.bf16 %v9213_v1  ;;  %9214 = vst [vmem:[#allocation33_spill] sm:$0xff] %v7023_v25  ;;  %v7025_v51 = vld [vmem:[#allocation2 + $0x30] sm:$0xff]  ;;  %v9215_v61 = vld [vmem:[#allocation32_spill] sm:$0xff]  ;;  %v4837_v36 = vunpack.i.l.bf16 %v9213_v1  ;;  %v4842_v1 = vunpack.i.l.bf16 %v9216_v19  ;;  %5350 = vrot.lane.b32.xlu0 %v6776_v48, %s6011_s23 }
 0x148   : > { %9212 = vst [vmem:[#allocation29_spill] sm:$0xff] %v7020_v15  ;;  %v7029_v38 = vsel %vm191_vm0, %v9215_v61, %v4822_v9  ;;  %9217 = vst [vmem:[#allocation31_spill] sm:$0xff] %v7033_v14  ;;  %v7037_v4 = vld [vmem:[#allocation2 + $0x38] sm:$0xff]  ;;  %v7039_v55 = vld [vmem:[#allocation2 + $0x48] sm:$0xff]  ;;  %v7073_v42 = vpop.permute.xlu1 %5065 }
 0x149   : > { %9218 = vst [vmem:[#allocation32_spill] sm:$0xff] %v7039_v55  ;;  %v7041_v25 = vld [vmem:[#allocation2 + $0x50] sm:$0xff]  ;;  %v9219_v15 = vld [vmem:[#allocation36_spill] sm:$0xff]  ;;  %v9221_v9 = vld [vmem:[#allocation35_spill] sm:$0xff] }
 0x14a   : > { %v7045_v62 = vsel %vm191_vm0, %v9219_v15, %v4828_v2  ;;  %v7049_v61 = vsel %vm191_vm0, %v9221_v9, %v4827_v58  ;;  %v9222_v14 = vld [vmem:[#allocation39_spill] sm:$0xff]  ;;  %v9224_v30 = vld [vmem:[#allocation38_spill] sm:$0xff]  ;;  %v5071_v49 = vpop.permute.xlu0 %5070  ;;  %5355 = vrot.lane.b32.xlu1 %v6778_v57, %s6011_s23 }
 0x14b   : > { %9220 = vst [vmem:[#allocation34_spill] sm:$0xff] %v7045_v62  ;;  %v7058_v22 = vsel %vm191_vm0, %v9222_v14, %v4833_v11  ;;  %v7062_v15 = vsel %vm191_vm0, %v9224_v30, %v4832_v43  ;;  %v9225_v2 = vld [vmem:[#allocation58_spill] sm:$0xff]  ;;  %v9228_v33 = vld [vmem:[#allocation59_spill] sm:$0xff]  ;;  %9229 = vst [vmem:[#allocation39_spill] sm:$0xff] %v7073_v42  ;;  %v5073_v30 = vunpack.i.h.bf16 %v5071_v49  ;;  %v5072_v55 = vunpack.i.l.bf16 %v5071_v49  ;;  %5360 = vrot.lane.b32.xlu0 %v6780_v59, %s6011_s23 }
 0x14c   : > { %9223 = vst [vmem:[#allocation36_spill] sm:$0xff] %v7058_v22  ;;  %v4913_v62 = vunpack.i.h.bf16 %v9225_v2  ;;  %v4912_v58 = vunpack.i.l.bf16 %v9225_v2  ;;  %v9226_v19 = vld [vmem:[#allocation42_spill] sm:$0xff]  ;;  %v4918_v7 = vunpack.i.h.bf16 %v9228_v33  ;;  %v9230_v43 = vld [vmem:[#allocation41_spill] sm:$0xff]  ;;  %v9233_v42 = vld [vmem:[#allocation44_spill] sm:$0xff] }
 0x14d   : > { %v7070_v9 = vsel %vm191_vm0, %v9226_v19, %v4838_v13  ;;  %v7081_v14 = vsel %vm191_vm0, %v9230_v43, %v4837_v36  ;;  %v9231_v2 = vld [vmem:[#allocation45_spill] sm:$0xff]  ;;  %v4917_v13 = vunpack.i.l.bf16 %v9228_v33  ;;  %v9232_v19 = vld [vmem:[#allocation60_spill] sm:$0xff]  ;;  %v7091_v22 = vsel %vm191_vm0, %v9233_v42, %v4842_v1  ;;  %v9235_v49 = vld [vmem:[#allocation62_spill] sm:$0xff] }
 0x14e   : > { %9227 = vst [vmem:[#allocation35_spill] sm:$0xff] %v7070_v9  ;;  %v7085_v48 = vsel %vm191_vm0, %v9231_v2, %v4843_v40  ;;  %v4922_v9 = vunpack.i.l.bf16 %v9232_v19  ;;  %v4923_v11 = vunpack.i.h.bf16 %v9232_v19  ;;  %v3122_v40 = vsel %vm3097_vm3, %v6788_v44, %v4912_v58  ;;  %v9234_v33 = vld [vmem:[#allocation61_spill] sm:$0xff]  ;;  %v5076_v58 = vpop.permute.xlu1 %5075  ;;  %v5081_v57 = vpop.permute.xlu0 %5080  ;;  %5365 = vrot.lane.b32.xlu1 %v6797_v45, %s6011_s23 }
 0x14f   : > { %v3123_v36 = vsel %vm3097_vm3, %v6784_v41, %v4913_v62  ;;  %v4928_v43 = vunpack.i.h.bf16 %v9234_v33  ;;  %v4927_v2 = vunpack.i.l.bf16 %v9234_v33  ;;  %v3125_v42 = vsel %vm3097_vm3, %v6803_v35, %v4918_v7  ;;  %5370 = vrot.lane.b32.xlu0 %v6799_v52, %s6011_s23 }
 0x150   : > { %v4932_v1 = vunpack.i.l.bf16 %v9235_v49  ;;  %v7108_v19 = vsel %vm3162_vm4, %v3122_v40, %v5072_v55  ;;  %v7111_v44 = vsel %vm3162_vm4, %v3123_v36, %v5073_v30  ;;  %v3124_v41 = vsel %vm3097_vm3, %v6807_v50, %v4917_v13  ;;  %v9237_v36 = vld [vmem:[#allocation64_spill] sm:$0xff] }
 0x151   : > { %v3126_v62 = vsel %vm3097_vm3, %v6815_v27, %v4922_v9  ;;  %v5078_v33 = vunpack.i.h.bf16 %v5076_v58  ;;  %v5077_v59 = vunpack.i.l.bf16 %v5076_v58  ;;  %v3127_v7 = vsel %vm3097_vm3, %v6811_v53, %v4923_v11  ;;  %v9236_v53 = vld [vmem:[#allocation63_spill] sm:$0xff] }
 0x152   : > { %v4933_v35 = vunpack.i.h.bf16 %v9235_v49  ;;  %v5083_v55 = vunpack.i.h.bf16 %v5081_v57  ;;  %v5082_v40 = vunpack.i.l.bf16 %v5081_v57  ;;  %v3129_v30 = vsel %vm3097_vm3, %v6826_v60, %v4928_v43  ;;  %v5091_v49 = vpop.permute.xlu0 %5090  ;;  %5375 = vrot.lane.b32.xlu1 %v6836_v46, %s6011_s23 }
 0x153   : > { %v3128_v50 = vsel %vm3097_vm3, %v6830_v31, %v4927_v2  ;;  %v7127_v27 = vsel %vm3162_vm4, %v3124_v41, %v5077_v59  ;;  %v7130_v9 = vsel %vm3162_vm4, %v3125_v42, %v5078_v33  ;;  %v3130_v57 = vsel %vm3097_vm3, %v6844_v3, %v4932_v1  ;;  %v5086_v31 = vpop.permute.xlu1 %5085  ;;  %5380 = vrot.lane.b32.xlu0 %v6838_v63, %s6011_s23 }
 0x154   : > { %v4938_v11 = vunpack.i.h.bf16 %v9236_v53  ;;  %v7138_v13 = vsel %vm3162_vm4, %v3126_v62, %v5082_v40  ;;  %v7141_v60 = vsel %vm3162_vm4, %v3127_v7, %v5083_v55  ;;  %v4937_v59 = vunpack.i.l.bf16 %v9236_v53  ;;  %v9238_v62 = vld [vmem:[#allocation65_spill] sm:$0xff] }
 0x155   : > { %v4942_v43 = vunpack.i.l.bf16 %v9237_v36  ;;  %v5088_v2 = vunpack.i.h.bf16 %v5086_v31  ;;  %v5087_v42 = vunpack.i.l.bf16 %v5086_v31  ;;  %v3131_v58 = vsel %vm3097_vm3, %v6841_v37, %v4933_v35  ;;  %v9239_v35 = vld [vmem:[#allocation66_spill] sm:$0xff] }
 0x156   : > { %v4943_v3 = vunpack.i.h.bf16 %v9237_v36  ;;  %v5093_v1 = vunpack.i.h.bf16 %v5091_v49  ;;  %v5092_v41 = vunpack.i.l.bf16 %v5091_v49  ;;  %v4948_v33 = vunpack.i.h.bf16 %v9238_v62  ;;  %5385 = vrot.lane.b32.xlu1 %v6854_v56, %s6011_s23 }
 0x157   : > { %v4947_v7 = vunpack.i.l.bf16 %v9238_v62  ;;  %v7153_v55 = vsel %vm3162_vm4, %v3128_v50, %v5087_v42  ;;  %v7156_v40 = vsel %vm3162_vm4, %v3129_v30, %v5088_v2  ;;  %v3133_v37 = vsel %vm3097_vm3, %v6860_v32, %v4938_v11  ;;  %v5096_v49 = vpop.permute.xlu1 %5095  ;;  %v5101_v62 = vpop.permute.xlu0 %5100  ;;  %5390 = vrot.lane.b32.xlu0 %v6856_v39, %s6011_s23 }
 0x158   : > { %v4952_v53 = vunpack.i.l.bf16 %v9239_v35  ;;  %v7164_v31 = vsel %vm3162_vm4, %v3130_v57, %v5092_v41  ;;  %v7167_v36 = vsel %vm3162_vm4, %v3131_v58, %v5093_v1  ;;  %v3132_v50 = vsel %vm3097_vm3, %v6864_v8, %v4937_v59 }
 0x159   : > { %v3134_v30 = vsel %vm3097_vm3, %v6872_v26, %v4942_v43  ;;  %v5098_v2 = vunpack.i.h.bf16 %v5096_v49  ;;  %v5097_v42 = vunpack.i.l.bf16 %v5096_v49  ;;  %v3135_v32 = vsel %vm3097_vm3, %v6868_v10, %v4943_v3  ;;  %v9240_v43 = vld [vmem:[#allocation67_spill] sm:$0xff] }
 0x15a   : > { %v4953_v11 = vunpack.i.h.bf16 %v9239_v35  ;;  %v5103_v57 = vunpack.i.h.bf16 %v5101_v62  ;;  %v5102_v41 = vunpack.i.l.bf16 %v5101_v62  ;;  %v3137_v58 = vsel %vm3097_vm3, %v6892_v17, %v4948_v33  ;;  %5395 = vrot.lane.b32.xlu1 %v6900_v21, %s6011_s23  ;;  %v9242_v62 = vld [vmem:[#allocation69_spill] sm:$0xff]  ;;  %v9260_v21 = vld [vmem:[#allocation18_spill] sm:$0xff] }
 0x15b   : > { %v3136_v8 = vsel %vm3097_vm3, %v6896_v16, %v4947_v7  ;;  %v7183_v26 = vsel %vm3162_vm4, %v3132_v50, %v5097_v42  ;;  %v7186_v59 = vsel %vm3162_vm4, %v3133_v37, %v5098_v2  ;;  %v3138_v10 = vsel %vm3097_vm3, %v6910_v12, %v4952_v53  ;;  %v5106_v16 = vpop.permute.xlu1 %5105  ;;  %v9241_v7 = vld [vmem:[#allocation68_spill] sm:$0xff]  ;;  %v5111_v50 = vpop.permute.xlu0 %5110  ;;  %5400 = vrot.lane.b32.xlu0 %v6902_v34, %s6011_s23 }
 0x15c   : > { %v4958_v3 = vunpack.i.h.bf16 %v9240_v43  ;;  %v7194_v1 = vsel %vm3162_vm4, %v3134_v30, %v5102_v41  ;;  %v7197_v17 = vsel %vm3162_vm4, %v3135_v32, %v5103_v57  ;;  %v4957_v33 = vunpack.i.l.bf16 %v9240_v43  ;;  %v5969_v30 = vld [vmem:[%s8940_s1] sm:$0xff]   ;;  %v9243_v43 = vld [vmem:[#allocation70_spill] sm:$0xff] }
 0x15d   : > { %v4962_v37 = vunpack.i.l.bf16 %v9241_v7  ;;  %v5108_v35 = vunpack.i.h.bf16 %v5106_v16  ;;  %v5107_v49 = vunpack.i.l.bf16 %v5106_v16  ;;  %v3139_v2 = vsel %vm3097_vm3, %v6906_v47, %v4953_v11  ;;  %4586 = vmatprep.subr.bf16.mxu0 %v5969_v30  ;;  %4660 = vmatprep.subr.bf16.mxu1 %v5969_v30 }
 0x15e   : > { %v4963_v12 = vunpack.i.h.bf16 %v9241_v7  ;;  %v5113_v53 = vunpack.i.h.bf16 %v5111_v50  ;;  %v5112_v42 = vunpack.i.l.bf16 %v5111_v50  ;;  %v4968_v32 = vunpack.i.h.bf16 %v9242_v62  ;;  %4587 = vmatpush3.bf16.msra.mxu0 %v5969_v30  ;;  %4665 = vmatpush3.bf16.msra.mxu1 %v5969_v30  ;;  %v9245_v30 = vld [vmem:[#allocation71_spill] sm:$0xff] }
 0x15f   : > { %v4967_v57 = vunpack.i.l.bf16 %v9242_v62  ;;  %v7212_v41 = vsel %vm3162_vm4, %v3136_v8, %v5107_v49  ;;  %v7215_v47 = vsel %vm3162_vm4, %v3137_v58, %v5108_v35  ;;  %v3141_v11 = vsel %vm3097_vm3, %v6936_v23, %v4958_v3  ;;  %v5116_v62 = vpop.permute.xlu1 %5115  ;;  %v5121_v23 = vpop.permute.xlu0 %5120  ;;  %5405 = vrot.lane.b32.xlu1 %v6926_v29, %s6011_s23 }
 0x160   : > { %v4972_v16 = vunpack.i.l.bf16 %v9243_v43  ;;  %v7223_v7 = vsel %vm3162_vm4, %v3138_v10, %v5112_v42  ;;  %v7226_v50 = vsel %vm3162_vm4, %v3139_v2, %v5113_v53  ;;  %v3140_v58 = vsel %vm3097_vm3, %v6940_v28, %v4957_v33  ;;  %v5970_v28 = vld [vmem:[%s8940_s1 + $0x8] sm:$0xff]  }
 0x161   : > { %v3142_v8 = vsel %vm3097_vm3, %v6948_v18, %v4962_v37  ;;  %v5118_v35 = vunpack.i.h.bf16 %v5116_v62  ;;  %v5117_v49 = vunpack.i.l.bf16 %v5116_v62  ;;  %v3143_v10 = vsel %vm3097_vm3, %v6944_v5, %v4963_v12  ;;  %4588 = vmatprep.subr.bf16.mxu0 %v5970_v28  ;;  %4661 = vmatprep.subr.bf16.mxu1 %v5970_v28 }
 0x162   : > { %v4973_v3 = vunpack.i.h.bf16 %v9243_v43  ;;  %v5123_v2 = vunpack.i.h.bf16 %v5121_v23  ;;  %v5122_v53 = vunpack.i.l.bf16 %v5121_v23  ;;  %v3145_v18 = vsel %vm3097_vm3, %v6971_v6, %v4968_v32  ;;  %4589 = vmatpush3.bf16.msra.mxu0 %v5970_v28  ;;  %4666 = vmatpush3.bf16.msra.mxu1 %v5970_v28  ;;  %v9248_v23 = vld [vmem:[#allocation96_spill] sm:$0xff] }
 0x163   : > { %v3144_v33 = vsel %vm3097_vm3, %v6975_v20, %v4967_v57  ;;  %v7245_v37 = vsel %vm3162_vm4, %v3140_v58, %v5117_v49  ;;  %v7248_v5 = vsel %vm3162_vm4, %v3141_v11, %v5118_v35  ;;  %v9244_v12 = vpack.i.bf16 %v6888_v24, %v6886_v54  ;;  %v5126_v32 = vpop.permute.xlu1 %5125  ;;  %v9246_v11 = vld [vmem:[#allocation72_spill] sm:$0xff]  ;;  %v5131_v58 = vpop.permute.xlu0 %5130 }
 0x164   : > { %v3146_v42 = vsel %vm3097_vm3, %v6988_v0, %v4972_v16  ;;  %v4978_v43 = vunpack.i.h.bf16 %v9245_v30  ;;  %v7258_v6 = vsel %vm3162_vm4, %v3142_v8, %v5122_v53  ;;  %v7261_v20 = vsel %vm3162_vm4, %v3143_v10, %v5123_v2  ;;  %v9247_v0 = vld [vmem:[#allocation24_spill] sm:$0xff]  ;;  %v9249_v10 = vld [vmem:[#allocation95_spill] sm:$0xff]  ;;  %v5971_v53 = vld [vmem:[%s8940_s1 + $0x10] sm:$0xff]  }
 0x165   : > { %5410 = vrot.lane.b32.xlu0 %v9244_v12, %s6011_s23  ;;  %v4977_v57 = vunpack.i.l.bf16 %v9245_v30  ;;  %v4982_v62 = vunpack.i.l.bf16 %v9246_v11  ;;  %v5128_v54 = vunpack.i.h.bf16 %v5126_v32  ;;  %v5127_v24 = vunpack.i.l.bf16 %v5126_v32  ;;  %v9251_v12 = vld [vmem:[#allocation73_spill] sm:$0xff]  ;;  %4590 = vmatprep.subr.bf16.mxu0 %v5971_v53 }
 0x166   : > { %v3147_v16 = vsel %vm3097_vm3, %v9247_v0, %v4973_v3  ;;  %v4983_v8 = vunpack.i.h.bf16 %v9246_v11  ;;  %v5133_v35 = vunpack.i.h.bf16 %v5131_v58  ;;  %v5132_v49 = vunpack.i.l.bf16 %v5131_v58  ;;  %v9252_v11 = vld [vmem:[#allocation97_spill] sm:$0xff]  ;;  %v9253_v58 = vld [vmem:[#allocation75_spill] sm:$0xff]  ;;  %4662 = vmatprep.subr.bf16.mxu1 %v5971_v53  ;;  %4591 = vmatpush3.bf16.msra.mxu0 %v5971_v53 }
 0x167   : > { %v9250_v2 = vpack.i.bf16 %v9248_v23, %v9249_v10  ;;  %v4988_v30 = vunpack.i.h.bf16 %v9251_v12  ;;  %v4987_v28 = vunpack.i.l.bf16 %v9251_v12  ;;  %v7278_v32 = vsel %vm3162_vm4, %v3144_v33, %v5127_v24  ;;  %v9255_v23 = vld [vmem:[#allocation28_spill] sm:$0xff]  ;;  %v5136_v33 = vpop.permute.xlu1 %5135  ;;  %4667 = vmatpush3.bf16.msra.mxu1 %v5971_v53 }
 0x168   : > { %v7281_v3 = vsel %vm3162_vm4, %v3145_v18, %v5128_v54  ;;  %v9254_v0 = vpack.i.bf16 %v9252_v11, %v9253_v58  ;;  %v3149_v10 = vsel %vm3097_vm3, %v9255_v23, %v4978_v43  ;;  %v7291_v34 = vsel %vm3162_vm4, %v3146_v42, %v5132_v49  ;;  %v9257_v18 = vld [vmem:[#allocation30_spill] sm:$0xff]  ;;  %v5141_v43 = vpop.permute.xlu0 %5140  ;;  %v9259_v23 = vld [vmem:[#allocation21_spill] sm:$0xff] }
 0x169   : > { %5415 = vrot.lane.b32.xlu1 %v9250_v2, %s6011_s23  ;;  %v9256_v2 = vld [vmem:[#allocation74_spill] sm:$0xff]  ;;  %v7294_v12 = vsel %vm3162_vm4, %v3147_v16, %v5133_v35  ;;  %v3148_v54 = vsel %vm3097_vm3, %v9257_v18, %v4977_v57  ;;  %v3150_v24 = vsel %vm3097_vm3, %v7029_v38, %v4982_v62  ;;  %v5138_v11 = vunpack.i.h.bf16 %v5136_v33  ;;  %v9266_v18 = vld [vmem:[#allocation37_spill] sm:$0xff] }
 0x16a   : > { %5420 = vrot.lane.b32.xlu0 %v9254_v0, %s6011_s23  ;;  %v4992_v29 = vunpack.i.l.bf16 %v9256_v2  ;;  %v5137_v58 = vunpack.i.l.bf16 %v5136_v33  ;;  %v9258_v0 = vld [vmem:[#allocation29_spill] sm:$0xff]  ;;  %v4993_v16 = vunpack.i.h.bf16 %v9256_v2  ;;  %v5143_v35 = vunpack.i.h.bf16 %v5141_v43  ;;  %v5972_v38 = vld [vmem:[%s8940_s1 + $0x18] sm:$0xff]   ;;  %v9263_v33 = vld [vmem:[#allocation19_spill] sm:$0xff] }
 0x16b   : > { %v3151_v42 = vsel %vm3097_vm3, %v9258_v0, %v4983_v8  ;;  %v5142_v49 = vunpack.i.l.bf16 %v5141_v43  ;;  %v9261_v39 = vpack.i.bf16 %v9259_v23, %v9260_v21  ;;  %v9262_v57 = vld [vmem:[#allocation34_spill] sm:$0xff]  ;;  %v3152_v53 = vsel %vm3097_vm3, %v7049_v61, %v4987_v28  ;;  %v9264_v21 = vld [vmem:[#allocation20_spill] sm:$0xff]  ;;  %v5146_v28 = vpop.permute.xlu1 %5145  ;;  %4592 = vmatprep.subr.bf16.mxu0 %v5972_v38  ;;  %4663 = vmatprep.subr.bf16.mxu1 %v5972_v38 }
 0x16c   : > { %v3153_v62 = vsel %vm3097_vm3, %v9262_v57, %v4988_v30  ;;  %v7315_v8 = vsel %vm3162_vm4, %v3148_v54, %v5137_v58  ;;  %v7318_v2 = vsel %vm3162_vm4, %v3149_v10, %v5138_v11  ;;  %v4848_v43 = vunpack.i.h.bf16 %v9266_v18  ;;  %v9267_v10 = vld [vmem:[#allocation76_spill] sm:$0xff]  ;;  %v5151_v57 = vpop.permute.xlu0 %5150  ;;  %4593 = vmatpush3.bf16.msra.mxu0 %v5972_v38  ;;  %4668 = vmatpush3.bf16.msra.mxu1 %v5972_v38 }
 0x16d   : > { %5425 = vrot.lane.b32.xlu1 %v9261_v39, %s6011_s23  ;;  %v9265_v39 = vpack.i.bf16 %v9263_v33, %v9264_v21  ;;  %v3154_v0 = vsel %vm3097_vm3, %v7062_v15, %v4992_v29  ;;  %v7328_v30 = vsel %vm3162_vm4, %v3150_v24, %v5142_v49  ;;  %v7331_v61 = vsel %vm3162_vm4, %v3151_v42, %v5143_v35  ;;  %v9268_v33 = vld [vmem:[#allocation36_spill] sm:$0xff]  ;;  %v9269_v15 = vld [vmem:[#allocation77_spill] sm:$0xff]  ;;  %v9270_v35 = vld [vmem:[#allocation27_spill] sm:$0xff] }
 0x16e   : > { %v4998_v54 = vunpack.i.h.bf16 %v9267_v10  ;;  %v4997_v11 = vunpack.i.l.bf16 %v9267_v10  ;;  %v5148_v58 = vunpack.i.h.bf16 %v5146_v28  ;;  %v5147_v23 = vunpack.i.l.bf16 %v5146_v28  ;;  %v9271_v21 = vld [vmem:[#allocation23_spill] sm:$0xff] }
 0x16f   : > { %5430 = vrot.lane.b32.xlu0 %v9265_v39, %s6011_s23  ;;  %v3155_v29 = vsel %vm3097_vm3, %v9268_v33, %v4993_v16  ;;  %v5003_v24 = vunpack.i.h.bf16 %v9269_v15  ;;  %v5153_v49 = vunpack.i.h.bf16 %v5151_v57  ;;  %v5152_v42 = vunpack.i.l.bf16 %v5151_v57  ;;  %v5973_v10 = vld [vmem:[%s8940_s1 + $0x20] ss:$0 sps:$4 sm:$0xff]   ;;  %v9273_v33 = vld [vmem:[#allocation25_spill] sm:$0xff]  ;;  %v9274_v57 = vld [vmem:[#allocation26_spill] sm:$0xff] }
 0x170   : > { %v9272_v39 = vpack.i.bf16 %v9270_v35, %v9271_v21  ;;  %v5002_v28 = vunpack.i.l.bf16 %v9269_v15  ;;  %v7347_v38 = vsel %vm3162_vm4, %v3152_v53, %v5147_v23  ;;  %v7350_v16 = vsel %vm3162_vm4, %v3153_v62, %v5148_v58  ;;  %v5156_v15 = vpop.permute.xlu1 %5155  ;;  %4670 = vmatprep.subr.msk.bf16.mxu0 %vm3717_vm5, %v5973_v10  ;;  %4671 = vmatprep.subr.msk.bf16.mxu1 %vm3717_vm5, %v5973_v10  ;;  %v9276_v62 = vld [vmem:[#allocation35_spill] sm:$0xff] }
 0x171   : > { %v9275_v56 = vpack.i.bf16 %v9273_v33, %v9274_v57  ;;  %v4847_v35 = vunpack.i.l.bf16 %v9266_v18  ;;  %v7358_v21 = vsel %vm3162_vm4, %v3154_v0, %v5152_v42  ;;  %v3719_v53 = vsel %vm3717_vm5, %v5973_v10, 0  ;;  %v5161_v57 = vpop.permute.xlu0 %5160  ;;  %v9277_v18 = vld [vmem:[#allocation78_spill] sm:$0xff] }
 0x172   : > { %5435 = vrot.lane.b32.xlu1 %v9272_v39, %s6011_s23  ;;  %v7361_v39 = vsel %vm3162_vm4, %v3155_v29, %v5153_v49  ;;  %v3157_v58 = vsel %vm3097_vm3, %v9276_v62, %v4998_v54  ;;  %v3156_v23 = vsel %vm3097_vm3, %v7081_v14, %v4997_v11  ;;  %v5157_v33 = vunpack.i.l.bf16 %v5156_v15  ;;  %4595 = vmatpush3.bf16.msra.mxu0 %v3719_v53 }
 0x173   : > { %5440 = vrot.lane.b32.xlu0 %v9275_v56, %s6011_s23  ;;  %v5158_v56 = vunpack.i.h.bf16 %v5156_v15  ;;  %4669 = vmatpush3.bf16.msra.mxu1 %v3719_v53  ;;  %v5008_v0 = vunpack.i.h.bf16 %v9277_v18  ;;  %v5007_v29 = vunpack.i.l.bf16 %v9277_v18  ;;  %v5163_v49 = vunpack.i.h.bf16 %v5161_v57  ;;  %v9279_v53 = vld [vmem:[#allocation32_spill] sm:$0xff]  ;;  %v9281_v18 = vld [vmem:[#allocation51_spill] sm:$0xff] }
 0x174   : > { %v5162_v42 = vunpack.i.l.bf16 %v5161_v57  ;;  %v9278_v10 = vpack.i.bf16 %v7037_v4, %v7025_v51  ;;  %v3158_v14 = vsel %vm3097_vm3, %v7091_v22, %v5002_v28  ;;  %v3159_v54 = vsel %vm3097_vm3, %v7085_v48, %v5003_v24  ;;  %v5166_v22 = vpop.permute.xlu1 %5165  ;;  %v5974_v28 = vld [vmem:[#allocation2 + $0x320] sm:$0xff]  ;;  %v5975_v24 = vld [vmem:[#allocation2 + $0x318] sm:$0xff] }
 0x175   : > { %v7378_v11 = vsel %vm3162_vm4, %v3156_v23, %v5157_v33  ;;  %v7381_v15 = vsel %vm3162_vm4, %v3157_v58, %v5158_v56  ;;  %v9280_v62 = vpack.i.bf16 %v7041_v25, %v9279_v53  ;;  %v7391_v4 = vsel %vm3162_vm4, %v3159_v54, %v5163_v49  ;;  %v7395_v33 = vpop.permute.xlu0 %5170  ;;  %v800_v54 = vld [vmem:[#allocation2 + $0x80] sm:$0xff] }
 0x176   : > { %5445 = vrot.lane.b32.xlu1 %v9278_v10, %s6012_s7  ;;  %v7388_v51 = vsel %vm3162_vm4, %v3158_v14, %v5162_v42  ;;  %v3096_v48 = vsel %vm191_vm0, %v5974_v28, %v4848_v43  ;;  %v3095_v23 = vsel %vm191_vm0, %v5975_v24, %v4847_v35  ;;  %v5168_v58 = vunpack.i.h.bf16 %v5166_v22  ;;  %v9282_v35 = vld [vmem:[#allocation52_spill] sm:$0xff]  ;;  %v797_v42 = vld [vmem:[#allocation2 + $0x60] sm:$0xff] }
 0x177   : > { %5450 = vrot.lane.b32.xlu0 %v9280_v62, %s6012_s7  ;;  %v5167_v56 = vunpack.i.l.bf16 %v5166_v22  ;;  %v3161_v25 = vsel %vm3097_vm3, %v3096_v48, %v5008_v0  ;;  %v3160_v57 = vsel %vm3097_vm3, %v3095_v23, %v5007_v29  ;;  %v798_v10 = vld [vmem:[#allocation2 + $0x68] sm:$0xff]  ;;  %v799_v0 = vld [vmem:[#allocation2 + $0x78] sm:$0xff]  ;;  %v9283_v53 = vld [vmem:[#allocation79_spill] sm:$0xff] }
 0x178   : > { %v7405_v43 = vsel %vm3162_vm4, %v3161_v25, %v5168_v58  ;;  %v7409_v14 = vpop.permute.xlu1 %5175  ;;  %v5474_v62 = vpack.i.bf16 %v798_v10, %v797_v42  ;;  %v9284_v22 = vld [vmem:[#allocation80_spill] sm:$0xff]  ;;  %v5479_v28 = vpack.i.bf16 %v800_v54, %v799_v0  ;;  %v863_v58 = vld [vmem:[#allocation2 + $0x79] sm:$0xff]  ;;  %v801_v10 = vld [vmem:[#allocation2 + $0x90] sm:$0xff] }
 0x179   : > { %v7402_v49 = vsel %vm3162_vm4, %v3160_v57, %v5167_v56  ;;  %v7411_v29 = vpop.permute.xlu0 %5180  ;;  %v861_v48 = vld [vmem:[#allocation2 + $0x61] sm:$0xff]  ;;  %v862_v24 = vld [vmem:[#allocation2 + $0x69] sm:$0xff]  ;;  %v802_v0 = vld [vmem:[#allocation2 + $0x98] sm:$0xff] }
 0x17a   : > { %5455 = vrot.lane.b32.xlu1 %v9281_v18, %s6013_s8  ;;  %v864_v56 = vld [vmem:[#allocation2 + $0x81] sm:$0xff]  ;;  %v5484_v57 = vpack.i.bf16 %v862_v24, %v861_v48 }
 0x17b   : > { %5460 = vrot.lane.b32.xlu0 %v9282_v35, %s6013_s8  ;;  %v5489_v18 = vpack.i.bf16 %v864_v56, %v863_v58  ;;  %v9291_v48 = vld [vmem:[#allocation83_spill] sm:$0xff]  ;;  %v865_v58 = vld [vmem:[#allocation2 + $0x91] sm:$0xff] }
 0x17c   : > { %v7417_v23 = vpop.permute.xlu1 %5185  ;;  %v866_v56 = vld [vmem:[#allocation2 + $0x99] sm:$0xff] }
 0x17d   : > { %v7419_v25 = vpop.permute.xlu0 %5190 }
 0x17e   : > { %5465 = vrot.lane.b32.xlu1 %v9283_v53, %s6014_s9  ;;  %9285 = vst [vmem:[#allocation38_spill] sm:$0xff] %v7419_v25  ;;  %v803_v53 = vld [vmem:[#allocation2 + $0xa8] sm:$0xff] }
 0x17f   : > { %5470 = vrot.lane.b32.xlu0 %v9284_v22, %s6014_s9  ;;  %v804_v22 = vld [vmem:[#allocation2 + $0xb0] sm:$0xff] }
 0x180   : > { %v7423_v35 = vpop.permute.xlu1 %5195  ;;  %v5509_v24 = vpack.i.bf16 %v804_v22, %v803_v53  ;;  %v805_v53 = vld [vmem:[#allocation2 + $0xc0] sm:$0xff]  ;;  %v806_v22 = vld [vmem:[#allocation2 + $0xc8] sm:$0xff] }
 0x181   : > { %9286 = vst [vmem:[#allocation58_spill] sm:$0xff] %v7423_v35  ;;  %v7425_v42 = vpop.permute.xlu0 %5200 }
 0x182   : > { %5475 = vrot.lane.b32.xlu1 %v5474_v62, %s6012_s7  ;;  %9287 = vst [vmem:[#allocation42_spill] sm:$0xff] %v7425_v42  ;;  %v9290_v62 = vld [vmem:[#allocation82_spill] sm:$0xff] }
 0x183   : > { %5480 = vrot.lane.b32.xlu0 %v5479_v28, %s6012_s7  ;;  %v5504_v28 = vpack.i.bf16 %v802_v0, %v801_v10  ;;  %v868_v42 = vld [vmem:[#allocation2 + $0xb1] sm:$0xff] }
 0x184   : > { %v7429_v54 = vpop.permute.xlu1 %5205 }
 0x185   : > { %9288 = vst [vmem:[#allocation59_spill] sm:$0xff] %v7429_v54  ;;  %v7431_v25 = vpop.permute.xlu0 %5210  ;;  %v5514_v54 = vpack.i.bf16 %v866_v56, %v865_v58  ;;  %v808_v58 = vld [vmem:[#allocation2 + $0xe0] sm:$0xff] }
 0x186   : > { %5485 = vrot.lane.b32.xlu1 %v5484_v57, %s6013_s8  ;;  %9289 = vst [vmem:[#allocation41_spill] sm:$0xff] %v7431_v25 }
 0x187   : > { %5490 = vrot.lane.b32.xlu0 %v5489_v18, %s6013_s8  ;;  %v867_v18 = vld [vmem:[#allocation2 + $0xa9] sm:$0xff] }
 0x188   : > { %v7437_v57 = vpop.permute.xlu1 %5215  ;;  %v5519_v25 = vpack.i.bf16 %v868_v42, %v867_v18 }
 0x189   : > { %9292 = vst [vmem:[#allocation45_spill] sm:$0xff] %v7437_v57  ;;  %v7439_v35 = vpop.permute.xlu0 %5220  ;;  %v5534_v57 = vpack.i.bf16 %v806_v22, %v805_v53  ;;  %v871_v22 = vld [vmem:[#allocation2 + $0xd9] sm:$0xff] }
 0x18a   : > { %5495 = vrot.lane.b32.xlu1 %v9290_v62, %s6014_s9  ;;  %9293 = vst [vmem:[#allocation60_spill] sm:$0xff] %v7439_v35 }
 0x18b   : > { %5500 = vrot.lane.b32.xlu0 %v9291_v48, %s6014_s9 }
 0x18c   : > { %v7443_v62 = vpop.permute.xlu1 %5225 }
 0x18d   : > { %9294 = vst [vmem:[#allocation44_spill] sm:$0xff] %v7443_v62  ;;  %v5231_v10 = vpop.permute.xlu0 %5230 }
 0x18e   : > { %5505 = vrot.lane.b32.xlu1 %v5504_v28, %s6012_s7  ;;  %v5233_v0 = vunpack.i.h.bf16 %v5231_v10  ;;  %v5232_v48 = vunpack.i.l.bf16 %v5231_v10 }
 0x18f   : > { %5510 = vrot.lane.b32.xlu0 %v5509_v24, %s6012_s7  ;;  %v807_v24 = vld [vmem:[#allocation2 + $0xd8] sm:$0xff] }
 0x190   : > { %v7449_v35 = vsel %vm3227_vm6, %v7108_v19, %v5232_v48  ;;  %v7453_v28 = vsel %vm3227_vm6, %v7111_v44, %v5233_v0  ;;  %v5236_v42 = vpop.permute.xlu1 %5235  ;;  %v9300_v0 = vld [vmem:[#allocation85_spill] sm:$0xff]  ;;  %v5539_v48 = vpack.i.bf16 %v808_v58, %v807_v24 }
 0x191   : > { %9295 = vst [vmem:[#allocation61_spill] sm:$0xff] %v7449_v35  ;;  %9296 = vst [vmem:[#allocation62_spill] sm:$0xff] %v7453_v28  ;;  %v5238_v56 = vunpack.i.h.bf16 %v5236_v42  ;;  %v5237_v18 = vunpack.i.l.bf16 %v5236_v42  ;;  %v5241_v10 = vpop.permute.xlu0 %5240  ;;  %v869_v42 = vld [vmem:[#allocation2 + $0xc1] sm:$0xff]  ;;  %v870_v28 = vld [vmem:[#allocation2 + $0xc9] sm:$0xff] }
 0x192   : > { %5515 = vrot.lane.b32.xlu1 %v5514_v54, %s6013_s8  ;;  %v5243_v54 = vunpack.i.h.bf16 %v5241_v10  ;;  %v5242_v62 = vunpack.i.l.bf16 %v5241_v10  ;;  %v5544_v24 = vpack.i.bf16 %v870_v28, %v869_v42 }
 0x193   : > { %5520 = vrot.lane.b32.xlu0 %v5519_v25, %s6013_s8  ;;  %v9297_v25 = vld [vmem:[#allocation84_spill] sm:$0xff]  ;;  %v7459_v19 = vsel %vm3227_vm6, %v7127_v27, %v5237_v18  ;;  %v7463_v44 = vsel %vm3227_vm6, %v7130_v9, %v5238_v56 }
 0x194   : > { %9298 = vst [vmem:[#allocation63_spill] sm:$0xff] %v7459_v19  ;;  %9299 = vst [vmem:[#allocation64_spill] sm:$0xff] %v7463_v44  ;;  %v7469_v10 = vsel %vm3227_vm6, %v7138_v13, %v5242_v62  ;;  %v7473_v53 = vsel %vm3227_vm6, %v7141_v60, %v5243_v54  ;;  %v5246_v27 = vpop.permute.xlu1 %5245  ;;  %v872_v18 = vld [vmem:[#allocation2 + $0xe1] sm:$0xff] }
 0x195   : > { %9301 = vst [vmem:[#allocation65_spill] sm:$0xff] %v7469_v10  ;;  %9302 = vst [vmem:[#allocation66_spill] sm:$0xff] %v7473_v53  ;;  %v5247_v9 = vunpack.i.l.bf16 %v5246_v27  ;;  %v5251_v56 = vpop.permute.xlu0 %5250  ;;  %v5549_v60 = vpack.i.bf16 %v872_v18, %v871_v22  ;;  %v811_v18 = vld [vmem:[#allocation2 + $0x108] sm:$0xff]  ;;  %v9364_v10 = vld [vmem:[#allocation50_spill] sm:$0xff] }
 0x196   : > { %5525 = vrot.lane.b32.xlu1 %v9297_v25, %s6014_s9  ;;  %v5248_v25 = vunpack.i.h.bf16 %v5246_v27  ;;  %v5253_v44 = vunpack.i.h.bf16 %v5251_v56  ;;  %v5252_v19 = vunpack.i.l.bf16 %v5251_v56  ;;  %v4883_v35 = vunpack.i.h.bf16 %v9364_v10 }
 0x197   : > { %5530 = vrot.lane.b32.xlu0 %v9300_v0, %s6014_s9  ;;  %v7478_v58 = vsel %vm3227_vm6, %v7153_v55, %v5247_v9 }
 0x198   : > { %9303 = vst [vmem:[#allocation67_spill] sm:$0xff] %v7478_v58  ;;  %v7482_v13 = vsel %vm3227_vm6, %v7156_v40, %v5248_v25  ;;  %v7487_v62 = vsel %vm3227_vm6, %v7164_v31, %v5252_v19  ;;  %v7491_v54 = vsel %vm3227_vm6, %v7167_v36, %v5253_v44  ;;  %v809_v36 = vld [vmem:[#allocation2 + $0xf0] sm:$0xff]  ;;  %v810_v19 = vld [vmem:[#allocation2 + $0xf8] sm:$0xff]  ;;  %v828_v58 = vld [vmem:[#allocation2 + $0x200] sm:$0xff] }
 0x199   : > { %9304 = vst [vmem:[#allocation68_spill] sm:$0xff] %v7482_v13  ;;  %9305 = vst [vmem:[#allocation69_spill] sm:$0xff] %v7487_v62  ;;  %v5261_v55 = vpop.permute.xlu0 %5260  ;;  %v827_v13 = vld [vmem:[#allocation2 + $0x1f8] sm:$0xff] }
 0x19a   : > { %5535 = vrot.lane.b32.xlu1 %v5534_v57, %s6012_s7  ;;  %9306 = vst [vmem:[#allocation70_spill] sm:$0xff] %v7491_v54  ;;  %v5256_v57 = vpop.permute.xlu1 %5255  ;;  %v5263_v42 = vunpack.i.h.bf16 %v5261_v55  ;;  %v5262_v27 = vunpack.i.l.bf16 %v5261_v55  ;;  %v9359_v54 = vld [vmem:[#allocation47_spill] sm:$0xff] }
 0x19b   : > { %5540 = vrot.lane.b32.xlu0 %v5539_v48, %s6012_s7  ;;  %v5258_v28 = vunpack.i.h.bf16 %v5256_v57  ;;  %v5257_v0 = vunpack.i.l.bf16 %v5256_v57 }
 0x19c   : > { %v7505_v44 = vsel %vm3227_vm6, %v7194_v1, %v5262_v27  ;;  %v7509_v48 = vsel %vm3227_vm6, %v7197_v17, %v5263_v42  ;;  %v875_v42 = vld [vmem:[#allocation2 + $0x109] sm:$0xff]  ;;  %v876_v27 = vld [vmem:[#allocation2 + $0x111] sm:$0xff] }
 0x19d   : > { %v7496_v40 = vsel %vm3227_vm6, %v7183_v26, %v5257_v0  ;;  %v7500_v31 = vsel %vm3227_vm6, %v7186_v59, %v5258_v28  ;;  %9309 = vst [vmem:[#allocation24_spill] sm:$0xff] %v7505_v44  ;;  %9310 = vst [vmem:[#allocation96_spill] sm:$0xff] %v7509_v48  ;;  %v812_v26 = vld [vmem:[#allocation2 + $0x110] sm:$0xff]  ;;  %v5271_v56 = vpop.permute.xlu0 %5270  ;;  %v874_v0 = vld [vmem:[#allocation2 + $0xf9] sm:$0xff] }
 0x19e   : > { %5545 = vrot.lane.b32.xlu1 %v5544_v24, %s6013_s8  ;;  %9307 = vst [vmem:[#allocation71_spill] sm:$0xff] %v7496_v40  ;;  %9308 = vst [vmem:[#allocation72_spill] sm:$0xff] %v7500_v31  ;;  %v5266_v22 = vpop.permute.xlu1 %5265  ;;  %v5273_v59 = vunpack.i.h.bf16 %v5271_v56  ;;  %v5272_v24 = vunpack.i.l.bf16 %v5271_v56  ;;  %v5569_v57 = vpack.i.bf16 %v812_v26, %v811_v18  ;;  %v873_v28 = vld [vmem:[#allocation2 + $0xf1] sm:$0xff] }
 0x19f   : > { %5550 = vrot.lane.b32.xlu0 %v5549_v60, %s6013_s8  ;;  %v5268_v25 = vunpack.i.h.bf16 %v5266_v22  ;;  %v5267_v9 = vunpack.i.l.bf16 %v5266_v22  ;;  %v5564_v60 = vpack.i.bf16 %v810_v19, %v809_v36  ;;  %v5996_v48 = vld [vmem:[#allocation2 + $0x110] sm:$0xff]  ;;  %v9358_v31 = vld [vmem:[#allocation46_spill] sm:$0xff] }
 0x1a0   : > { %v7525_v55 = vsel %vm3227_vm6, %v7223_v7, %v5272_v24  ;;  %v4863_v40 = vunpack.i.h.bf16 %v9358_v31 }
 0x1a1   : > { %v7515_v1 = vsel %vm3227_vm6, %v7212_v41, %v5267_v9  ;;  %v7519_v17 = vsel %vm3227_vm6, %v7215_v47, %v5268_v25  ;;  %9313 = vst [vmem:[#allocation97_spill] sm:$0xff] %v7525_v55  ;;  %v5281_v19 = vpop.permute.xlu0 %5280  ;;  %v5987_v55 = vld [vmem:[#allocation2 + $0x90] sm:$0xff] }
 0x1a2   : > { %5555 = vrot.lane.b32.xlu1 %v6797_v45, %s6014_s9  ;;  %9311 = vst [vmem:[#allocation95_spill] sm:$0xff] %v7515_v1  ;;  %9312 = vst [vmem:[#allocation73_spill] sm:$0xff] %v7519_v17  ;;  %v7529_v45 = vsel %vm3227_vm6, %v7226_v50, %v5273_v59  ;;  %v5276_v41 = vpop.permute.xlu1 %5275  ;;  %v5283_v22 = vunpack.i.h.bf16 %v5281_v19  ;;  %v5282_v25 = vunpack.i.l.bf16 %v5281_v19  ;;  %v5579_v50 = vpack.i.bf16 %v876_v27, %v875_v42  ;;  %v815_v27 = vld [vmem:[#allocation2 + $0x138] sm:$0xff]  ;;  %v5988_v1 = vld [vmem:[#allocation2 + $0xb0] sm:$0xff] }
 0x1a3   : > { %5560 = vrot.lane.b32.xlu0 %v6799_v52, %s6014_s9  ;;  %9314 = vst [vmem:[#allocation75_spill] sm:$0xff] %v7529_v45  ;;  %v5278_v36 = vunpack.i.h.bf16 %v5276_v41  ;;  %v5277_v47 = vunpack.i.l.bf16 %v5276_v41  ;;  %v5574_v52 = vpack.i.bf16 %v874_v0, %v873_v28  ;;  %v5985_v45 = vld [vmem:[#allocation2 + $0x78] sm:$0xff] }
 0x1a4   : > { %v7543_v26 = vsel %vm3227_vm6, %v7258_v6, %v5282_v25  ;;  %v7547_v9 = vsel %vm3227_vm6, %v7261_v20, %v5283_v22  ;;  %v813_v20 = vld [vmem:[#allocation2 + $0x120] sm:$0xff] }
 0x1a5   : > { %v7534_v18 = vsel %vm3227_vm6, %v7245_v37, %v5277_v47  ;;  %v7538_v7 = vsel %vm3227_vm6, %v7248_v5, %v5278_v36  ;;  %9317 = vst [vmem:[#allocation30_spill] sm:$0xff] %v7543_v26  ;;  %9318 = vst [vmem:[#allocation29_spill] sm:$0xff] %v7547_v9  ;;  %v5291_v37 = vpop.permute.xlu0 %5290  ;;  %v9353_v26 = vld [vmem:[#allocation14_spill] sm:$0xff] }
 0x1a6   : > { %5565 = vrot.lane.b32.xlu1 %v5564_v60, %s6012_s7  ;;  %9315 = vst [vmem:[#allocation28_spill] sm:$0xff] %v7534_v18  ;;  %9316 = vst [vmem:[#allocation74_spill] sm:$0xff] %v7538_v7  ;;  %v5286_v56 = vpop.permute.xlu1 %5285  ;;  %v5293_v60 = vunpack.i.h.bf16 %v5291_v37  ;;  %v5292_v28 = vunpack.i.l.bf16 %v5291_v37  ;;  %v880_v37 = vld [vmem:[#allocation2 + $0x141] sm:$0xff]  ;;  %v4747_v7 = vunpack.i.l.bf16 %v9353_v26 }
 0x1a7   : > { %5570 = vrot.lane.b32.xlu0 %v5569_v57, %s6012_s7  ;;  %v5288_v59 = vunpack.i.h.bf16 %v5286_v56  ;;  %v5287_v24 = vunpack.i.l.bf16 %v5286_v56  ;;  %v814_v57 = vld [vmem:[#allocation2 + $0x128] sm:$0xff] }
 0x1a8   : > { %v7561_v0 = vsel %vm3227_vm6, %v7291_v34, %v5292_v28  ;;  %v7565_v41 = vsel %vm3227_vm6, %v7294_v12, %v5293_v60  ;;  %v5594_v25 = vpack.i.bf16 %v814_v57, %v813_v20  ;;  %v878_v56 = vld [vmem:[#allocation2 + $0x129] sm:$0xff] }
 0x1a9   : > { %v7552_v5 = vsel %vm3227_vm6, %v7278_v32, %v5287_v24  ;;  %v7556_v6 = vsel %vm3227_vm6, %v7281_v3, %v5288_v59  ;;  %9321 = vst [vmem:[#allocation34_spill] sm:$0xff] %v7561_v0  ;;  %9322 = vst [vmem:[#allocation19_spill] sm:$0xff] %v7565_v41  ;;  %v816_v32 = vld [vmem:[#allocation2 + $0x140] sm:$0xff]  ;;  %v5301_v19 = vpop.permute.xlu0 %5300 }
 0x1aa   : > { %5575 = vrot.lane.b32.xlu1 %v5574_v52, %s6013_s8  ;;  %9319 = vst [vmem:[#allocation21_spill] sm:$0xff] %v7552_v5  ;;  %9320 = vst [vmem:[#allocation18_spill] sm:$0xff] %v7556_v6  ;;  %v5296_v42 = vpop.permute.xlu1 %5295  ;;  %v5303_v3 = vunpack.i.h.bf16 %v5301_v19  ;;  %v5302_v22 = vunpack.i.l.bf16 %v5301_v19  ;;  %v5599_v52 = vpack.i.bf16 %v816_v32, %v815_v27  ;;  %v879_v24 = vld [vmem:[#allocation2 + $0x139] sm:$0xff]  ;;  %v9351_v6 = vld [vmem:[#allocation13_spill] sm:$0xff] }
 0x1ab   : > { %5580 = vrot.lane.b32.xlu0 %v5579_v50, %s6013_s8  ;;  %v5298_v36 = vunpack.i.h.bf16 %v5296_v42  ;;  %v5297_v47 = vunpack.i.l.bf16 %v5296_v42  ;;  %v877_v50 = vld [vmem:[#allocation2 + $0x121] sm:$0xff]  ;;  %v4743_v5 = vunpack.i.h.bf16 %v9351_v6 }
 0x1ac   : > { %v7581_v59 = vsel %vm3227_vm6, %v7328_v30, %v5302_v22  ;;  %v5984_v0 = vld [vmem:[#allocation2 + $0x80] sm:$0xff] }
 0x1ad   : > { %v7571_v34 = vsel %vm3227_vm6, %v7315_v8, %v5297_v47  ;;  %v7575_v12 = vsel %vm3227_vm6, %v7318_v2, %v5298_v36  ;;  %9325 = vst [vmem:[#allocation76_spill] sm:$0xff] %v7581_v59  ;;  %v5311_v28 = vpop.permute.xlu0 %5310 }
 0x1ae   : > { %5585 = vrot.lane.b32.xlu1 %v6836_v46, %s6014_s9  ;;  %9323 = vst [vmem:[#allocation20_spill] sm:$0xff] %v7571_v34  ;;  %9324 = vst [vmem:[#allocation37_spill] sm:$0xff] %v7575_v12  ;;  %v7585_v46 = vsel %vm3227_vm6, %v7331_v61, %v5303_v3  ;;  %v5306_v8 = vpop.permute.xlu1 %5305  ;;  %v5313_v20 = vunpack.i.h.bf16 %v5311_v28  ;;  %v5312_v57 = vunpack.i.l.bf16 %v5311_v28  ;;  %v5609_v61 = vpack.i.bf16 %v880_v37, %v879_v24  ;;  %v9348_v12 = vld [vmem:[#allocation10_spill] sm:$0xff] }
 0x1af   : > { %5590 = vrot.lane.b32.xlu0 %v6838_v63, %s6014_s9  ;;  %9326 = vst [vmem:[#allocation36_spill] sm:$0xff] %v7585_v46  ;;  %v5308_v60 = vunpack.i.h.bf16 %v5306_v8  ;;  %v5307_v2 = vunpack.i.l.bf16 %v5306_v8  ;;  %v5604_v63 = vpack.i.bf16 %v878_v56, %v877_v50  ;;  %v819_v8 = vld [vmem:[#allocation2 + $0x168] sm:$0xff]  ;;  %v4728_v34 = vunpack.i.h.bf16 %v9348_v12 }
 0x1b0   : > { %v7599_v27 = vsel %vm3227_vm6, %v7358_v21, %v5312_v57  ;;  %v7603_v32 = vsel %vm3227_vm6, %v7361_v39, %v5313_v20  ;;  %v817_v39 = vld [vmem:[#allocation2 + $0x150] sm:$0xff] }
 0x1b1   : > { %v7590_v42 = vsel %vm3227_vm6, %v7347_v38, %v5307_v2  ;;  %v7594_v30 = vsel %vm3227_vm6, %v7350_v16, %v5308_v60  ;;  %9329 = vst [vmem:[#allocation23_spill] sm:$0xff] %v7599_v27  ;;  %9330 = vst [vmem:[#allocation25_spill] sm:$0xff] %v7603_v32  ;;  %v5321_v38 = vpop.permute.xlu0 %5320  ;;  %v881_v57 = vld [vmem:[#allocation2 + $0x151] sm:$0xff] }
 0x1b2   : > { %5595 = vrot.lane.b32.xlu1 %v5594_v25, %s6012_s7  ;;  %9327 = vst [vmem:[#allocation77_spill] sm:$0xff] %v7590_v42  ;;  %9328 = vst [vmem:[#allocation27_spill] sm:$0xff] %v7594_v30  ;;  %v5316_v36 = vpop.permute.xlu1 %5315  ;;  %v5323_v3 = vunpack.i.h.bf16 %v5321_v38  ;;  %v5322_v22 = vunpack.i.l.bf16 %v5321_v38  ;;  %v818_v25 = vld [vmem:[#allocation2 + $0x158] sm:$0xff]  ;;  %v5982_v30 = vld [vmem:[#allocation2 + $0x68] sm:$0xff] }
 0x1b3   : > { %5600 = vrot.lane.b32.xlu0 %v5599_v52, %s6012_s7  ;;  %v5318_v47 = vunpack.i.h.bf16 %v5316_v36  ;;  %v5317_v19 = vunpack.i.l.bf16 %v5316_v36  ;;  %v5624_v2 = vpack.i.bf16 %v818_v25, %v817_v39  ;;  %v883_v36 = vld [vmem:[#allocation2 + $0x169] sm:$0xff] }
 0x1b4   : > { %v7617_v52 = vsel %vm3227_vm6, %v7388_v51, %v5322_v22  ;;  %v7621_v50 = vsel %vm3227_vm6, %v7391_v4, %v5323_v3  ;;  %v9338_v4 = vld [vmem:[#allocation91_spill] sm:$0xff]  ;;  %v9340_v39 = vld [vmem:[#allocation4_spill] sm:$0xff]  ;;  %v9346_v42 = vld [vmem:[#allocation9_spill] sm:$0xff] }
 0x1b5   : > { %v7608_v16 = vsel %vm3227_vm6, %v7378_v11, %v5317_v19  ;;  %v7612_v21 = vsel %vm3227_vm6, %v7381_v15, %v5318_v47  ;;  %9333 = vst [vmem:[#allocation78_spill] sm:$0xff] %v7617_v52  ;;  %9334 = vst [vmem:[#allocation32_spill] sm:$0xff] %v7621_v50  ;;  %v820_v11 = vld [vmem:[#allocation2 + $0x170] sm:$0xff]  ;;  %v7623_v60 = vpop.permute.xlu0 %5330  ;;  %v9335_v15 = vld [vmem:[#allocation90_spill] sm:$0xff]  ;;  %v4703_v25 = vunpack.i.h.bf16 %v9340_v39  ;;  %v4723_v46 = vunpack.i.h.bf16 %v9346_v42 }
 0x1b6   : > { %5605 = vrot.lane.b32.xlu1 %v5604_v63, %s6013_s8  ;;  %9331 = vst [vmem:[#allocation26_spill] sm:$0xff] %v7608_v16  ;;  %9332 = vst [vmem:[#allocation35_spill] sm:$0xff] %v7612_v21  ;;  %v5326_v56 = vpop.permute.xlu1 %5325  ;;  %v5629_v20 = vpack.i.bf16 %v820_v11, %v819_v8  ;;  %v882_v63 = vld [vmem:[#allocation2 + $0x159] sm:$0xff]  ;;  %v884_v47 = vld [vmem:[#allocation2 + $0x171] sm:$0xff]  ;;  %v4722_v59 = vunpack.i.l.bf16 %v9346_v42 }
 0x1b7   : > { %5610 = vrot.lane.b32.xlu0 %v5609_v61, %s6013_s8  ;;  %v5328_v24 = vunpack.i.h.bf16 %v5326_v56  ;;  %v5327_v37 = vunpack.i.l.bf16 %v5326_v56  ;;  %v5639_v38 = vpack.i.bf16 %v884_v47, %v883_v36  ;;  %v4702_v56 = vunpack.i.l.bf16 %v9340_v39  ;;  %v409_v11 = vld [vmem:[#allocation2 + $0x8] sm:$0xff]  ;;  %v9343_v36 = vld [vmem:[#allocation7_spill] sm:$0xff]  ;;  %v5976_v50 = vld [vmem:[#allocation2 + $0x30] sm:$0xff] }
 0x1b8   : > { %v4713_v47 = vunpack.i.h.bf16 %v9343_v36  ;;  %v821_v39 = vld [vmem:[#allocation2 + $0x180] sm:$0xff]  ;;  %v5978_v16 = vld [vmem:[#allocation2 + $0x18] sm:$0xff]  ;;  %v7726_v17 = vsel %vm191_vm0, %v5987_v55, %v4722_v59 }
 0x1b9   : > { %v7629_v28 = vsel %vm3227_vm6, %v7402_v49, %v5327_v37  ;;  %v7633_v51 = vsel %vm3227_vm6, %v7405_v43, %v5328_v24  ;;  %v7639_v19 = vpop.permute.xlu0 %5340  ;;  %v5634_v49 = vpack.i.bf16 %v882_v63, %v881_v57  ;;  %v9339_v43 = vld [vmem:[#allocation3_spill] sm:$0xff]  ;;  %v9341_v37 = vld [vmem:[#allocation5_spill] sm:$0xff]  ;;  %v7666_v52 = vsel %vm191_vm0, %v5976_v50, %v4702_v56  ;;  %v9344_v56 = vld [vmem:[#allocation8_spill] sm:$0xff] }
 0x1ba   : > { %5615 = vrot.lane.b32.xlu1 %v9335_v15, %s6014_s9  ;;  %9336 = vst [vmem:[#allocation51_spill] sm:$0xff] %v7629_v28  ;;  %9337 = vst [vmem:[#allocation52_spill] sm:$0xff] %v7633_v51  ;;  %v7637_v61 = vpop.permute.xlu1 %5335  ;;  %v4693_v3 = vunpack.i.h.bf16 %v9339_v43  ;;  %v4692_v22 = vunpack.i.l.bf16 %v9339_v43  ;;  %v408_v24 = vld [vmem:[#allocation2] sm:$0xff]  ;;  %v4698_v15 = vunpack.i.h.bf16 %v9341_v37  ;;  %v4712_v43 = vunpack.i.l.bf16 %v9343_v36  ;;  %v822_v51 = vld [vmem:[#allocation2 + $0x188] sm:$0xff] }
 0x1bb   : > { %5620 = vrot.lane.b32.xlu0 %v9338_v4, %s6014_s9  ;;  %v9342_v4 = vld [vmem:[#allocation6_spill] sm:$0xff] }
 0x1bc   : > { %v4708_v57 = vunpack.i.h.bf16 %v9342_v4  ;;  %v4707_v63 = vunpack.i.l.bf16 %v9342_v4  ;;  %v7660_v28 = vsel %vm191_vm0, %v409_v11, %v4693_v3  ;;  %v5977_v4 = vld [vmem:[#allocation2 + $0x38] sm:$0xff]  ;;  %v5979_v3 = vld [vmem:[#allocation2 + $0x20] sm:$0xff]  ;;  %v5980_v11 = vld [vmem:[#allocation2 + $0x50] sm:$0xff] }
 0x1bd   : > { %v7669_v21 = vsel %vm191_vm0, %v5977_v4, %v4703_v25  ;;  %v5981_v4 = vld [vmem:[#allocation2 + $0x48] sm:$0xff]  ;;  %v951_v59 = vld [vmem:[#allocation2 + $0x19a] sm:$0xff] }
 0x1be   : > { %5625 = vrot.lane.b32.xlu1 %v5624_v2, %s6012_s7  ;;  %v7647_v8 = vpop.permute.xlu1 %5345  ;;  %v4697_v2 = vunpack.i.l.bf16 %v9341_v37  ;;  %v7663_v37 = vsel %vm191_vm0, %v408_v24, %v4692_v22  ;;  %v7677_v22 = vsel %vm191_vm0, %v5979_v3, %v4698_v15  ;;  %v7680_v50 = vsel %vm191_vm0, %v5980_v11, %v4708_v57  ;;  %v9345_v3 = vld [vmem:[#allocation93_spill] sm:$0xff] }
 0x1bf   : > { %5630 = vrot.lane.b32.xlu0 %v5629_v20, %s6012_s7  ;;  %v7652_v20 = vpop.permute.xlu0 %5350  ;;  %v4718_v24 = vunpack.i.h.bf16 %v9344_v56  ;;  %v7686_v27 = vsel %vm191_vm0, %v5981_v4, %v4707_v63  ;;  %v5654_v57 = vpack.i.bf16 %v822_v51, %v821_v39  ;;  %v4717_v11 = vunpack.i.l.bf16 %v9344_v56  ;;  %v9347_v63 = vld [vmem:[#allocation94_spill] sm:$0xff] }
 0x1c0   : > { %v7674_v32 = vsel %vm191_vm0, %v5978_v16, %v4697_v2  ;;  %v7689_v16 = vsel %vm191_vm0, %v5982_v30, %v4713_v47  ;;  %v5983_v2 = vld [vmem:[#allocation2 + $0x60] sm:$0xff]  ;;  %v886_v47 = vld [vmem:[#allocation2 + $0x189] sm:$0xff] }
 0x1c1   : > { %v7692_v15 = vsel %vm191_vm0, %v5983_v2, %v4712_v43  ;;  %v885_v30 = vld [vmem:[#allocation2 + $0x181] sm:$0xff]  ;;  %v4727_v43 = vunpack.i.l.bf16 %v9348_v12  ;;  %v887_v56 = vld [vmem:[#allocation2 + $0x199] sm:$0xff]  ;;  %v7708_v42 = vsel %vm191_vm0, %v5984_v0, %v4718_v24  ;;  %v4742_v12 = vunpack.i.l.bf16 %v9351_v6 }
 0x1c2   : > { %5635 = vrot.lane.b32.xlu1 %v5634_v49, %s6013_s8  ;;  %v7671_v36 = vpop.permute.xlu1 %5355  ;;  %v823_v49 = vld [vmem:[#allocation2 + $0x198] sm:$0xff]  ;;  %v9349_v2 = vld [vmem:[#allocation11_spill] sm:$0xff]  ;;  %v5664_v18 = vpack.i.bf16 %v886_v47, %v885_v30  ;;  %v7720_v0 = vsel %vm191_vm0, %v5985_v45, %v4717_v11  ;;  %v5990_v45 = vld [vmem:[#allocation2 + $0xc8] sm:$0xff] }
 0x1c3   : > { %5640 = vrot.lane.b32.xlu0 %v5639_v38, %s6013_s8  ;;  %v824_v38 = vld [vmem:[#allocation2 + $0x1a0] sm:$0xff]  ;;  %v7683_v25 = vpop.permute.xlu0 %5360  ;;  %v4733_v41 = vunpack.i.h.bf16 %v9349_v2  ;;  %v4732_v51 = vunpack.i.l.bf16 %v9349_v2  ;;  %v4748_v2 = vunpack.i.h.bf16 %v9353_v26  ;;  %v5986_v24 = vld [vmem:[#allocation2 + $0x98] sm:$0xff]  ;;  %v7730_v26 = vsel %vm191_vm0, %v5988_v1, %v4728_v34 }
 0x1c4   : > { %v5659_v4 = vpack.i.bf16 %v824_v38, %v823_v49  ;;  %v5993_v34 = vld [vmem:[#allocation2 + $0xd8] sm:$0xff] }
 0x1c5   : > { %v7736_v11 = vsel %vm191_vm0, %v5990_v45, %v4733_v41  ;;  %v5995_v45 = vld [vmem:[#allocation2 + $0xf0] sm:$0xff] }
 0x1c6   : > { %5645 = vrot.lane.b32.xlu1 %v9345_v3, %s6014_s9  ;;  %v7705_v39 = vpop.permute.xlu1 %5365  ;;  %v888_v3 = vld [vmem:[#allocation2 + $0x1a1] sm:$0xff] }
 0x1c7   : > { %5650 = vrot.lane.b32.xlu0 %v9347_v63, %s6014_s9  ;;  %v9350_v63 = vld [vmem:[#allocation12_spill] sm:$0xff]  ;;  %v7713_v9 = vpop.permute.xlu0 %5370  ;;  %v5669_v6 = vpack.i.bf16 %v888_v3, %v887_v56  ;;  %v5992_v56 = vld [vmem:[#allocation2 + $0xe0] sm:$0xff]  ;;  %v5994_v3 = vld [vmem:[#allocation2 + $0xf8] sm:$0xff] }
 0x1c8   : > { %v4738_v49 = vunpack.i.h.bf16 %v9350_v63  ;;  %v4737_v38 = vunpack.i.l.bf16 %v9350_v63  ;;  %9352 = vst [vmem:[#allocation79_spill] sm:$0xff] %v7713_v9  ;;  %v7723_v63 = vsel %vm191_vm0, %v5986_v24, %v4723_v46  ;;  %v5991_v46 = vld [vmem:[#allocation2 + $0xc0] sm:$0xff]  ;;  %v7750_v41 = vsel %vm191_vm0, %v5994_v3, %v4743_v5  ;;  %v9355_v24 = vld [vmem:[#allocation40_spill] sm:$0xff] }
 0x1c9   : > { %v7739_v47 = vsel %vm191_vm0, %v5991_v46, %v4732_v51  ;;  %v7756_v46 = vsel %vm191_vm0, %v5995_v45, %v4742_v12  ;;  %v9357_v5 = vld [vmem:[#allocation43_spill] sm:$0xff] }
 0x1ca   : > { %5655 = vrot.lane.b32.xlu1 %v5654_v57, %s6012_s7  ;;  %v5989_v57 = vld [vmem:[#allocation2 + $0xa8] sm:$0xff]  ;;  %v7741_v55 = vpop.permute.xlu1 %5375  ;;  %v7744_v1 = vsel %vm191_vm0, %v5992_v56, %v4738_v49  ;;  %v7759_v49 = vsel %vm191_vm0, %v5996_v48, %v4748_v2  ;;  %v4858_v3 = vunpack.i.h.bf16 %v9357_v5  ;;  %v4857_v44 = vunpack.i.l.bf16 %v9357_v5  ;;  %v825_v45 = vld [vmem:[#allocation2 + $0x1e0] sm:$0xff] }
 0x1cb   : > { %5660 = vrot.lane.b32.xlu0 %v5659_v4, %s6012_s7  ;;  %v7733_v30 = vsel %vm191_vm0, %v5989_v57, %v4727_v43  ;;  %9354 = vst [vmem:[#allocation80_spill] sm:$0xff] %v7741_v55  ;;  %v952_v4 = vld [vmem:[#allocation2 + $0x1a2] sm:$0xff]  ;;  %v7747_v43 = vsel %vm191_vm0, %v5993_v34, %v4737_v38  ;;  %v4853_v57 = vunpack.i.h.bf16 %v9355_v24  ;;  %v7753_v51 = vpop.permute.xlu0 %5380  ;;  %v4852_v34 = vunpack.i.l.bf16 %v9355_v24 }
 0x1cc   : > { %9356 = vst [vmem:[#allocation82_spill] sm:$0xff] %v7753_v51  ;;  %v5997_v56 = vld [vmem:[#allocation2 + $0x108] sm:$0xff]  ;;  %v5679_v12 = vpack.i.bf16 %v952_v4, %v951_v59  ;;  %v4862_v2 = vunpack.i.l.bf16 %v9358_v31  ;;  %v9362_v59 = vld [vmem:[#allocation49_spill] sm:$0xff] }
 0x1cd   : > { %v7762_v38 = vsel %vm191_vm0, %v5997_v56, %v4747_v7  ;;  %v826_v48 = vld [vmem:[#allocation2 + $0x1e8] sm:$0xff]  ;;  %v4868_v7 = vunpack.i.h.bf16 %v9359_v54  ;;  %v4867_v56 = vunpack.i.l.bf16 %v9359_v54  ;;  %v7778_v5 = vsel %vm3097_vm3, %v7660_v28, %v4853_v57 }
 0x1ce   : > { %5665 = vrot.lane.b32.xlu1 %v5664_v18, %s6013_s8  ;;  %v9360_v24 = vld [vmem:[#allocation48_spill] sm:$0xff]  ;;  %v7774_v18 = vpop.permute.xlu1 %5385  ;;  %v4878_v4 = vunpack.i.h.bf16 %v9362_v59  ;;  %v4877_v31 = vunpack.i.l.bf16 %v9362_v59  ;;  %v7787_v54 = vsel %vm3097_vm3, %v7663_v37, %v4852_v34  ;;  %v5684_v28 = vpack.i.bf16 %v826_v48, %v825_v45  ;;  %v9369_v45 = vld [vmem:[#allocation54_spill] sm:$0xff] }
 0x1cf   : > { %5670 = vrot.lane.b32.xlu0 %v5669_v6, %s6013_s8  ;;  %v4872_v62 = vunpack.i.l.bf16 %v9360_v24  ;;  %9361 = vst [vmem:[#allocation83_spill] sm:$0xff] %v7774_v18  ;;  %v4873_v6 = vunpack.i.h.bf16 %v9360_v24  ;;  %v7783_v53 = vpop.permute.xlu0 %5390  ;;  %v4882_v18 = vunpack.i.l.bf16 %v9364_v10  ;;  %v9365_v51 = vld [vmem:[#allocation16_spill] sm:$0xff]  ;;  %v7795_v57 = vsel %vm3097_vm3, %v7674_v32, %v4857_v44 }
 0x1d0   : > { %9363 = vst [vmem:[#allocation84_spill] sm:$0xff] %v7783_v53  ;;  %v7799_v24 = vsel %vm3097_vm3, %v7677_v22, %v4858_v3  ;;  %v7803_v37 = vsel %vm3097_vm3, %v7669_v21, %v4863_v40  ;;  %v5689_v34 = vpack.i.bf16 %v828_v58, %v827_v13  ;;  %v889_v10 = vld [vmem:[#allocation2 + $0x1e1] sm:$0xff]  ;;  %v890_v59 = vld [vmem:[#allocation2 + $0x1e9] sm:$0xff]  ;;  %v7812_v44 = vsel %vm3097_vm3, %v7680_v50, %v4868_v7  ;;  %v891_v58 = vld [vmem:[#allocation2 + $0x1f9] sm:$0xff] }
 0x1d1   : > { %v7816_v32 = vsel %vm3097_vm3, %v7686_v27, %v4867_v56  ;;  %v7820_v40 = vsel %vm3097_vm3, %v7692_v15, %v4872_v62  ;;  %v892_v13 = vld [vmem:[#allocation2 + $0x201] sm:$0xff]  ;;  %v7830_v22 = vsel %vm3097_vm3, %v7708_v42, %v4878_v4  ;;  %v7834_v27 = vsel %vm3097_vm3, %v7720_v0, %v4877_v31  ;;  %v9367_v50 = vld [vmem:[#allocation53_spill] sm:$0xff] }
 0x1d2   : > { %5675 = vrot.lane.b32.xlu1 %v9365_v51, %s6014_s9  ;;  %v7808_v51 = vsel %vm3097_vm3, %v7666_v52, %v4862_v2  ;;  %v7822_v21 = vpop.permute.xlu1 %5395  ;;  %v7826_v52 = vsel %vm3097_vm3, %v7689_v16, %v4873_v6  ;;  %v4888_v3 = vunpack.i.h.bf16 %v9367_v50  ;;  %v7841_v15 = vsel %vm3097_vm3, %v7726_v17, %v4882_v18  ;;  %v9370_v2 = vld [vmem:[#allocation55_spill] sm:$0xff]  ;;  %v954_v18 = vld [vmem:[#allocation2 + $0x1ea] sm:$0xff] }
 0x1d3   : > { %5680 = vrot.lane.b32.xlu0 %v5679_v12, %s6014_s9  ;;  %9366 = vst [vmem:[#allocation85_spill] sm:$0xff] %v7822_v21  ;;  %v7837_v62 = vpop.permute.xlu0 %5400  ;;  %v7845_v16 = vsel %vm3097_vm3, %v7723_v63, %v4883_v35  ;;  %v4887_v12 = vunpack.i.l.bf16 %v9367_v50  ;;  %v5694_v42 = vpack.i.bf16 %v890_v59, %v889_v10  ;;  %v4893_v0 = vunpack.i.h.bf16 %v9369_v45  ;;  %v953_v17 = vld [vmem:[#allocation2 + $0x1e2] sm:$0xff]  ;;  %v9372_v31 = vld [vmem:[#allocation57_spill] sm:$0xff]  ;;  %v955_v59 = vld [vmem:[#allocation2 + $0x1fa] sm:$0xff] }
 0x1d4   : > { %9368 = vst [vmem:[#allocation90_spill] sm:$0xff] %v7837_v62  ;;  %v4892_v48 = vunpack.i.l.bf16 %v9369_v45  ;;  %v4898_v7 = vunpack.i.h.bf16 %v9370_v2  ;;  %v5699_v56 = vpack.i.bf16 %v892_v13, %v891_v58  ;;  %v4897_v6 = vunpack.i.l.bf16 %v9370_v2  ;;  %v9371_v35 = vld [vmem:[#allocation56_spill] sm:$0xff]  ;;  %v9374_v58 = vld [vmem:[#allocation81_spill] sm:$0xff]  ;;  %v9376_v21 = vld [vmem:[#allocation86_spill] sm:$0xff] }
 0x1d5   : > { %v4903_v63 = vunpack.i.h.bf16 %v9371_v35  ;;  %v4902_v4 = vunpack.i.l.bf16 %v9371_v35  ;;  %v956_v50 = vld [vmem:[#allocation2 + $0x202] sm:$0xff]  ;;  %v7861_v45 = vsel %vm3097_vm3, %v7730_v26, %v4888_v3  ;;  %v5013_v13 = vunpack.i.h.bf16 %v9374_v58 }
 0x1d6   : > { %5685 = vrot.lane.b32.xlu1 %v5684_v28, %s6012_s7  ;;  %v4908_v28 = vunpack.i.h.bf16 %v9372_v31  ;;  %v7857_v10 = vpop.permute.xlu1 %5405  ;;  %v5012_v2 = vunpack.i.l.bf16 %v9374_v58  ;;  %v7870_v35 = vsel %vm3097_vm3, %v7733_v30, %v4887_v12  ;;  %v5017_v53 = vunpack.i.l.bf16 %v9376_v21  ;;  %v829_v12 = vld [vmem:[#allocation2 + $0x210] sm:$0xff] }
 0x1d7   : > { %5690 = vrot.lane.b32.xlu0 %v5689_v34, %s6012_s7  ;;  %9373 = vst [vmem:[#allocation91_spill] sm:$0xff] %v7857_v10  ;;  %v4907_v34 = vunpack.i.l.bf16 %v9372_v31  ;;  %v7866_v62 = vpop.permute.xlu0 %5410  ;;  %v5018_v10 = vunpack.i.h.bf16 %v9376_v21  ;;  %v5704_v26 = vpack.i.bf16 %v954_v18, %v953_v17  ;;  %v7877_v3 = vsel %vm3097_vm3, %v7739_v47, %v4892_v48  ;;  %v830_v21 = vld [vmem:[#allocation2 + $0x218] sm:$0xff]  ;;  %v831_v48 = vld [vmem:[#allocation2 + $0x228] sm:$0xff] }
 0x1d8   : > { %9375 = vst [vmem:[#allocation3_spill] sm:$0xff] %v7866_v62  ;;  %v7881_v31 = vsel %vm3097_vm3, %v7736_v11, %v4893_v0  ;;  %v7885_v58 = vsel %vm3097_vm3, %v7744_v1, %v4898_v7  ;;  %v5709_v30 = vpack.i.bf16 %v956_v50, %v955_v59  ;;  %v7894_v47 = vsel %vm3097_vm3, %v7756_v46, %v4902_v4  ;;  %v832_v7 = vld [vmem:[#allocation2 + $0x230] sm:$0xff] }
 0x1d9   : > { %v7898_v11 = vsel %vm3097_vm3, %v7750_v41, %v4903_v63  ;;  %v7902_v1 = vsel %vm3097_vm3, %v7759_v49, %v4908_v28  ;;  %v7912_v46 = vsel %vm3162_vm4, %v7787_v54, %v5012_v2  ;;  %v7916_v41 = vsel %vm3162_vm4, %v7778_v5, %v5013_v13  ;;  %v9383_v63 = vld [vmem:[#allocation88_spill] sm:$0xff]  ;;  %v9384_v28 = vld [vmem:[#allocation89_spill] sm:$0xff]  ;;  %v9386_v2 = vld [vmem:[#allocation15_spill] sm:$0xff] }
 0x1da   : > { %5695 = vrot.lane.b32.xlu1 %v5694_v42, %s6013_s8  ;;  %v7890_v42 = vsel %vm3097_vm3, %v7747_v43, %v4897_v6  ;;  %9377 = vst [vmem:[#allocation4_spill] sm:$0xff] %v7898_v11  ;;  %9378 = vst [vmem:[#allocation5_spill] sm:$0xff] %v7902_v1  ;;  %v7908_v43 = vsel %vm3097_vm3, %v7762_v38, %v4907_v34  ;;  %v7923_v18 = vsel %vm3162_vm4, %v7795_v57, %v5017_v53  ;;  %v893_v53 = vld [vmem:[#allocation2 + $0x211] sm:$0xff]  ;;  %v894_v57 = vld [vmem:[#allocation2 + $0x219] sm:$0xff] }
 0x1db   : > { %5700 = vrot.lane.b32.xlu0 %v5699_v56, %s6013_s8  ;;  %v7904_v0 = vpop.permute.xlu1 %5415  ;;  %9380 = vst [vmem:[#allocation7_spill] sm:$0xff] %v7908_v43  ;;  %v9381_v56 = vld [vmem:[#allocation87_spill] sm:$0xff]  ;;  %v7927_v38 = vsel %vm3162_vm4, %v7799_v24, %v5018_v10  ;;  %v5714_v54 = vpack.i.bf16 %v830_v21, %v829_v12  ;;  %v5028_v5 = vunpack.i.h.bf16 %v9383_v63  ;;  %v5027_v4 = vunpack.i.l.bf16 %v9383_v63  ;;  %v9385_v24 = vld [vmem:[#allocation92_spill] sm:$0xff]  ;;  %v960_v11 = vld [vmem:[#allocation2 + $0x232] sm:$0xff] }
 0x1dc   : > { %9379 = vst [vmem:[#allocation6_spill] sm:$0xff] %v7904_v0  ;;  %v5023_v17 = vunpack.i.h.bf16 %v9381_v56  ;;  %v7919_v49 = vpop.permute.xlu0 %5420  ;;  %v5022_v6 = vunpack.i.l.bf16 %v9381_v56  ;;  %v5032_v59 = vunpack.i.l.bf16 %v9384_v28  ;;  %v5719_v50 = vpack.i.bf16 %v832_v7, %v831_v48  ;;  %v895_v21 = vld [vmem:[#allocation2 + $0x229] sm:$0xff]  ;;  %v896_v56 = vld [vmem:[#allocation2 + $0x231] sm:$0xff] }
 0x1dd   : > { %9382 = vst [vmem:[#allocation8_spill] sm:$0xff] %v7919_v49  ;;  %v5033_v34 = vunpack.i.h.bf16 %v9384_v28  ;;  %v5038_v10 = vunpack.i.h.bf16 %v9385_v24  ;;  %v5037_v13 = vunpack.i.l.bf16 %v9385_v24  ;;  %v5043_v63 = vunpack.i.h.bf16 %v9386_v2  ;;  %v9388_v49 = vld [vmem:[#allocation17_spill] sm:$0xff]  ;;  %v9389_v48 = vld [vmem:[#allocation22_spill] sm:$0xff] }
 0x1de   : > { %5705 = vrot.lane.b32.xlu1 %v5704_v26, %s6014_s9  ;;  %v5042_v26 = vunpack.i.l.bf16 %v9386_v2  ;;  %v5048_v0 = vunpack.i.h.bf16 %v9388_v49  ;;  %v5052_v7 = vunpack.i.l.bf16 %v9389_v48  ;;  %v7947_v28 = vld [vmem:[#allocation2 + $0x212] sm:$0xff]  ;;  %v7951_v24 = vsel %vm3162_vm4, %v7808_v51, %v5022_v6  ;;  %v7959_v43 = vld [vmem:[#allocation2 + $0x22a] sm:$0xff]  ;;  %v7974_v6 = vld [vmem:[#allocation2 + $0x240] sm:$0xff] }
 0x1df   : > { %5710 = vrot.lane.b32.xlu0 %v5709_v30, %s6014_s9  ;;  %v7939_v12 = vpop.permute.xlu1 %5425  ;;  %v5047_v30 = vunpack.i.l.bf16 %v9388_v49  ;;  %v5053_v2 = vunpack.i.h.bf16 %v9389_v48  ;;  %v5724_v1 = vpack.i.bf16 %v894_v57, %v893_v53  ;;  %v958_v49 = vld [vmem:[#allocation2 + $0x21a] sm:$0xff]  ;;  %v7967_v51 = vsel %vm3162_vm4, %v7812_v44, %v5028_v5 }
 0x1e0   : > { %9387 = vst [vmem:[#allocation93_spill] sm:$0xff] %v7939_v12  ;;  %v7955_v12 = vsel %vm3162_vm4, %v7803_v37, %v5023_v17  ;;  %v7971_v37 = vsel %vm3162_vm4, %v7820_v40, %v5032_v59  ;;  %v5729_v17 = vpack.i.bf16 %v896_v56, %v895_v21  ;;  %v7978_v53 = vld [vmem:[#allocation2 + $0x258] sm:$0xff]  ;;  %v7980_v57 = vld [vmem:[#allocation2 + $0x260] sm:$0xff]  ;;  %v7988_v44 = vsel %vm3162_vm4, %v7834_v27, %v5037_v13  ;;  %v9393_v21 = vld [vmem:[#allocation33_spill] sm:$0xff] }
 0x1e1   : > { %v7945_v62 = vpop.permute.xlu0 %5430  ;;  %v7992_v40 = vsel %vm3162_vm4, %v7830_v22, %v5038_v10  ;;  %v7996_v5 = vsel %vm3162_vm4, %v7841_v15, %v5042_v26  ;;  %v8000_v59 = vld [vmem:[#allocation2 + $0x241] sm:$0xff]  ;;  %v8008_v27 = vsel %vm3162_vm4, %v7845_v16, %v5043_v63  ;;  %v8012_v22 = vsel %vm3162_vm4, %v7870_v35, %v5047_v30  ;;  %v8028_v16 = vld [vmem:[#allocation2 + $0x24a] sm:$0xff]  ;;  %v774_v30 = vld [vmem:[#allocation2 + $0x272] sm:$0xff] }
 0x1e2   : > { %9390 = vst [vmem:[#allocation9_spill] sm:$0xff] %v7945_v62  ;;  %5715 = vrot.lane.b32.xlu1 %v5714_v54, %s6012_s7  ;;  %v7963_v62 = vsel %vm3162_vm4, %v7816_v32, %v5027_v4  ;;  %v7976_v54 = vld [vmem:[#allocation2 + $0x248] sm:$0xff]  ;;  %v7984_v32 = vsel %vm3162_vm4, %v7826_v52, %v5033_v34  ;;  %v8004_v52 = vld [vmem:[#allocation2 + $0x259] sm:$0xff]  ;;  %v8016_v15 = vsel %vm3162_vm4, %v7861_v45, %v5048_v0  ;;  %v5173_v48 = vunpack.i.h.bf16 %v7395_v33  ;;  %v8046_v56 = vld [vmem:[#allocation2 + $0x270] sm:$0xff] }
 0x1e3   : > { %5720 = vrot.lane.b32.xlu0 %v5719_v50, %s6012_s7  ;;  %v8002_v50 = vld [vmem:[#allocation2 + $0x249] sm:$0xff]  ;;  %v8020_v34 = vsel %vm3162_vm4, %v7877_v3, %v5052_v7  ;;  %v8024_v13 = vld [vmem:[#allocation2 + $0x261] sm:$0xff]  ;;  %v8032_v35 = vsel %vm3162_vm4, %v7881_v31, %v5053_v2  ;;  %v5734_v3 = vpack.i.bf16 %v958_v49, %v7947_v28  ;;  %v5172_v7 = vunpack.i.l.bf16 %v7395_v33 }
 0x1e4   : > { %v7998_v4 = vpop.permute.xlu1 %5435  ;;  %v8026_v26 = vld [vmem:[#allocation2 + $0x242] sm:$0xff]  ;;  %v8038_v0 = vld [vmem:[#allocation2 + $0x25a] sm:$0xff]  ;;  %v5739_v31 = vpack.i.bf16 %v960_v11, %v7959_v43  ;;  %v5744_v49 = vpack.i.bf16 %v7976_v54, %v7974_v6  ;;  %v5749_v45 = vpack.i.bf16 %v7980_v57, %v7978_v53  ;;  %v5759_v11 = vpack.i.bf16 %v8024_v13, %v8004_v52 }
 0x1e5   : > { %9391 = vst [vmem:[#allocation94_spill] sm:$0xff] %v7998_v4  ;;  %v8022_v10 = vpop.permute.xlu0 %5440  ;;  %v8040_v63 = vld [vmem:[#allocation2 + $0x262] sm:$0xff]  ;;  %v775_v2 = vld [vmem:[#allocation2 + $0x27a] sm:$0xff]  ;;  %v5178_v4 = vunpack.i.h.bf16 %v7409_v14  ;;  %v5177_v6 = vunpack.i.l.bf16 %v7409_v14  ;;  %v3228_v57 = vsel %vm3227_vm6, %v7912_v46, %v5172_v7  ;;  %v5332_v52 = vunpack.i.l.bf16 %v7623_v60 }
 0x1e6   : > { %9392 = vst [vmem:[#allocation10_spill] sm:$0xff] %v8022_v10  ;;  %5725 = vrot.lane.b32.xlu1 %v5724_v1, %s6013_s8  ;;  %v8048_v1 = vld [vmem:[#allocation2 + $0x278] sm:$0xff]  ;;  %v8065_v54 = vpack.i.bf16 %v775_v2, %v774_v30  ;;  %v5338_v14 = vunpack.i.h.bf16 %v7637_v61  ;;  %v5337_v13 = vunpack.i.l.bf16 %v7637_v61  ;;  %v5183_v53 = vunpack.i.h.bf16 %v7411_v29 }
 0x1e7   : > { %5730 = vrot.lane.b32.xlu0 %v5729_v17, %s6013_s8  ;;  %v5754_v17 = vpack.i.bf16 %v8002_v50, %v8000_v59  ;;  %v3229_v59 = vsel %vm3227_vm6, %v7916_v41, %v5173_v48  ;;  %v5333_v50 = vunpack.i.h.bf16 %v7623_v60  ;;  %v5182_v46 = vunpack.i.l.bf16 %v7411_v29 }
 0x1e8   : > { %v5446_v28 = vpop.permute.xlu1 %5445  ;;  %v3230_v60 = vsel %vm3227_vm6, %v7923_v18, %v5177_v6  ;;  %v3293_v61 = vsel %vm3292_vm7, %v3228_v57, %v5332_v52 }
 0x1e9   : > { %v5451_v33 = vpop.permute.xlu0 %5450  ;;  %v5447_v30 = vunpack.i.l.bf16 %v5446_v28  ;;  %v3295_v29 = vsel %vm3292_vm7, %v3230_v60, %v5337_v13 }
 0x1ea   : > { %5735 = vrot.lane.b32.xlu1 %v5734_v3, %s6014_s9  ;;  %v5448_v3 = vunpack.i.h.bf16 %v5446_v28  ;;  %v5453_v7 = vunpack.i.h.bf16 %v5451_v33  ;;  %v5452_v41 = vunpack.i.l.bf16 %v5451_v33  ;;  %v3294_v28 = vsel %vm3292_vm7, %v3229_v59, %v5333_v50  ;;  %v8094_v50 = vld [vmem:[#allocation2 + $0x288] sm:$0xff] }
 0x1eb   : > { %5740 = vrot.lane.b32.xlu0 %v5739_v31, %s6014_s9  ;;  %v3231_v31 = vsel %vm3227_vm6, %v7927_v38, %v5178_v4  ;;  %v3358_v6 = vsel %vm3357_vm8, %v3293_v61, %v5447_v30  ;;  %v8110_v61 = vld [vmem:[#allocation2 + $0x289] sm:$0xff] }
 0x1ec   : > { %v5456_v2 = vpop.permute.xlu1 %5455  ;;  %v3296_v33 = vsel %vm3292_vm7, %v3231_v31, %v5338_v14  ;;  %v3359_v38 = vsel %vm3357_vm8, %v3294_v28, %v5448_v3  ;;  %v3360_v4 = vsel %vm3357_vm8, %v3295_v29, %v5452_v41  ;;  %v8101_v3 = vld [vmem:[#allocation2 + $0x271] sm:$0xff]  ;;  %v8103_v41 = vld [vmem:[#allocation2 + $0x279] sm:$0xff] }
 0x1ed   : > { %v5461_v48 = vpop.permute.xlu0 %5460  ;;  %v5458_v10 = vunpack.i.h.bf16 %v5456_v2  ;;  %v5457_v43 = vunpack.i.l.bf16 %v5456_v2  ;;  %v8096_v2 = vld [vmem:[#allocation2 + $0x290] sm:$0xff] }
 0x1ee   : > { %5745 = vrot.lane.b32.xlu1 %v5744_v49, %s6012_s7  ;;  %v5463_v55 = vunpack.i.h.bf16 %v5461_v48  ;;  %v5462_v9 = vunpack.i.l.bf16 %v5461_v48  ;;  %v3361_v49 = vsel %vm3357_vm8, %v3296_v33, %v5453_v7 }
 0x1ef   : > { %5750 = vrot.lane.b32.xlu0 %v5749_v45, %s6012_s7  ;;  %v3423_v14 = vsel %vm3422_vm9, %v3358_v6, %v5457_v43  ;;  %v3424_v30 = vsel %vm3422_vm9, %v3359_v38, %v5458_v10  ;;  %v5789_v6 = vpack.i.bf16 %v8103_v41, %v8101_v3  ;;  %v9394_v38 = vld [vmem:[#allocation31_spill] sm:$0xff] }
 0x1f0   : > { %v5466_v18 = vpop.permute.xlu1 %5465  ;;  %v3425_v7 = vsel %vm3422_vm9, %v3360_v4, %v5462_v9  ;;  %v3426_v48 = vsel %vm3422_vm9, %v3361_v49, %v5463_v55  ;;  %v5784_v9 = vpack.i.bf16 %v8096_v2, %v8094_v50  ;;  %v5188_v55 = vunpack.i.h.bf16 %v7417_v23 }
 0x1f1   : > { %v5468_v57 = vunpack.i.h.bf16 %v5466_v18  ;;  %v5467_v52 = vunpack.i.l.bf16 %v5466_v18  ;;  %v5471_v59 = vpop.permute.xlu0 %5470  ;;  %v5063_v4 = vunpack.i.h.bf16 %v9394_v38  ;;  %v3232_v49 = vsel %vm3227_vm6, %v7951_v24, %v5182_v46 }
 0x1f2   : > { %v5473_v45 = vunpack.i.h.bf16 %v5471_v59  ;;  %v5472_v13 = vunpack.i.l.bf16 %v5471_v59  ;;  %5755 = vrot.lane.b32.xlu1 %v5754_v17, %s6013_s8  ;;  %v8112_v17 = vld [vmem:[#allocation2 + $0x291] sm:$0xff]  ;;  %v5342_v24 = vunpack.i.l.bf16 %v7639_v19 }
 0x1f3   : > { %5760 = vrot.lane.b32.xlu0 %v5759_v11, %s6013_s8  ;;  %v3488_v60 = vsel %vm3487_vm10, %v3423_v14, %v5467_v52  ;;  %v3489_v31 = vsel %vm3487_vm10, %v3424_v30, %v5468_v57  ;;  %v5187_v11 = vunpack.i.l.bf16 %v7417_v23  ;;  %v3233_v57 = vsel %vm3227_vm6, %v7955_v12, %v5183_v53  ;;  %v9396_v59 = vld [vmem:[#allocation38_spill] sm:$0xff] }
 0x1f4   : > { %v3490_v10 = vsel %vm3487_vm10, %v3425_v7, %v5472_v13  ;;  %v3491_v43 = vsel %vm3487_vm10, %v3426_v48, %v5473_v45  ;;  %v5476_v28 = vpop.permute.xlu1 %5475  ;;  %v3552_v29 = vpack.c.bf16 %v3489_v31, %v3488_v60  ;;  %v9395_v52 = vpack.i.bf16 %v8028_v16, %v8026_v26 }
 0x1f5   : > { %v5481_v33 = vpop.permute.xlu0 %5480  ;;  %v3553_v18 = vpack.c.bf16 %v3491_v43, %v3490_v10  ;;  %v5794_v23 = vpack.i.bf16 %v8112_v17, %v8110_v61  ;;  %v5193_v50 = vunpack.i.h.bf16 %v9396_v59  ;;  %v5192_v2 = vunpack.i.l.bf16 %v9396_v59  ;;  %v844_v61 = vld [vmem:[#allocation2 + $0x2c0] sm:$0xff] }
 0x1f6   : > { %5765 = vrot.lane.b32.xlu1 %v9395_v52, %s6014_s9  ;;  %4596 = vmatprep.mubr.msk.bf16.mxu0 %vm3620_vm11, %v3552_v29  ;;  %v5343_v45 = vunpack.i.h.bf16 %v7639_v19  ;;  %v9397_v12 = vpack.i.bf16 %v8040_v63, %v8038_v0  ;;  %v5348_v26 = vunpack.i.h.bf16 %v7647_v8  ;;  %v5347_v16 = vunpack.i.l.bf16 %v7647_v8  ;;  %v9398_v0 = vld [vmem:[#allocation58_spill] sm:$0xff]  ;;  %v8200_v17 = vld [vmem:[#allocation2 + $0x2a1] sm:$0xff] }
 0x1f7   : > { %4597 = vmatmul.mubr.msk.bf16.vlgmr.msra.gmra.mrb[0].mxu0 %vm3620_vm11, %v3553_v18  ;;  %v5478_v53 = vunpack.i.h.bf16 %v5476_v28  ;;  %v5477_v46 = vunpack.i.l.bf16 %v5476_v28  ;;  %v3234_v14 = vsel %vm3227_vm6, %v7963_v62, %v5187_v11  ;;  %v3235_v19 = vsel %vm3227_vm6, %v7967_v51, %v5188_v55 }
 0x1f8   : > { %5770 = vrot.lane.b32.xlu0 %v9397_v12, %s6014_s9  ;;  %v5486_v13 = vpop.permute.xlu1 %5485  ;;  %v5483_v30 = vunpack.i.h.bf16 %v5481_v33  ;;  %v5482_v3 = vunpack.i.l.bf16 %v5481_v33  ;;  %v5198_v63 = vunpack.i.h.bf16 %v9398_v0  ;;  %v5197_v7 = vunpack.i.l.bf16 %v9398_v0  ;;  %v968_v12 = vld [vmem:[#allocation2 + $0x292] sm:$0xff] }
 0x1f9   : > { %v5491_v41 = vpop.permute.xlu0 %5490  ;;  %v5488_v48 = vunpack.i.h.bf16 %v5486_v13  ;;  %v5487_v60 = vunpack.i.l.bf16 %v5486_v13  ;;  %v3297_v8 = vsel %vm3292_vm7, %v3232_v49, %v5342_v24  ;;  %v3298_v31 = vsel %vm3292_vm7, %v3233_v57, %v5343_v45  ;;  %v967_v24 = vld [vmem:[#allocation2 + $0x28a] sm:$0xff] }
 0x1fa   : > { %5775 = vrot.lane.b32.xlu1 %v8065_v54, %s6011_s23  ;;  %v5493_v62 = vunpack.i.h.bf16 %v5491_v41  ;;  %v5492_v10 = vunpack.i.l.bf16 %v5491_v41  ;;  %v9399_v51 = vpack.i.bf16 %v8048_v1, %v8046_v56  ;;  %v3299_v43 = vsel %vm3292_vm7, %v3234_v14, %v5347_v16 }
 0x1fb   : > { %v3300_v28 = vsel %vm3292_vm7, %v3235_v19, %v5348_v26  ;;  %v3362_v29 = vsel %vm3357_vm8, %v3297_v8, %v5477_v46  ;;  %v3363_v55 = vsel %vm3357_vm8, %v3298_v31, %v5478_v53  ;;  %v3364_v18 = vsel %vm3357_vm8, %v3299_v43, %v5482_v3  ;;  %v778_v8 = vld [vmem:[#allocation2 + $0x2a2] sm:$0xff]  ;;  %v779_v31 = vld [vmem:[#allocation2 + $0x2aa] sm:$0xff] }
 0x1fc   : > { %5780 = vrot.lane.b32.xlu0 %v9399_v51, %s6012_s7  ;;  %v5496_v11 = vpop.permute.xlu1 %5495  ;;  %v3365_v33 = vsel %vm3357_vm8, %v3300_v28, %v5483_v30  ;;  %v3427_v59 = vsel %vm3422_vm9, %v3362_v29, %v5487_v60  ;;  %v3428_v56 = vsel %vm3422_vm9, %v3363_v55, %v5488_v48  ;;  %v3429_v26 = vsel %vm3422_vm9, %v3364_v18, %v5492_v10  ;;  %v9400_v10 = vld [vmem:[#allocation42_spill] sm:$0xff] }
 0x1fd   : > { %v5498_v49 = vunpack.i.h.bf16 %v5496_v11  ;;  %v5497_v57 = vunpack.i.l.bf16 %v5496_v11  ;;  %v5501_v52 = vpop.permute.xlu0 %5500  ;;  %v3430_v16 = vsel %vm3422_vm9, %v3365_v33, %v5493_v62  ;;  %v5062_v13 = vunpack.i.l.bf16 %v9394_v38 }
 0x1fe   : > { %v5503_v1 = vunpack.i.h.bf16 %v5501_v52  ;;  %v5502_v45 = vunpack.i.l.bf16 %v5501_v52  ;;  %5785 = vrot.lane.b32.xlu1 %v5784_v9, %s6012_s7  ;;  %v3236_v3 = vsel %vm3227_vm6, %v7971_v37, %v5192_v2  ;;  %v3237_v41 = vsel %vm3227_vm6, %v7984_v32, %v5193_v50  ;;  %v841_v37 = vld [vmem:[#allocation2 + $0x2a0] sm:$0xff]  ;;  %v842_v32 = vld [vmem:[#allocation2 + $0x2a8] sm:$0xff]  ;;  %v8191_v50 = vld [vmem:[#allocation2 + $0x2b8] sm:$0xff] }
 0x1ff   : > { %v3492_v53 = vsel %vm3487_vm10, %v3427_v59, %v5497_v57  ;;  %v3493_v46 = vsel %vm3487_vm10, %v3428_v56, %v5498_v49  ;;  %v5804_v60 = vpack.i.bf16 %v968_v12, %v967_v24  ;;  %v3239_v62 = vsel %vm3227_vm6, %v7992_v40, %v5198_v63  ;;  %v9401_v2 = vld [vmem:[#allocation59_spill] sm:$0xff] }
 0x200   : > { %5790 = vrot.lane.b32.xlu0 %v5789_v6, %s6013_s8  ;;  %v3554_v14 = vpack.c.bf16 %v3493_v46, %v3492_v53  ;;  %v3494_v19 = vsel %vm3487_vm10, %v3429_v26, %v5502_v45  ;;  %v3495_v30 = vsel %vm3487_vm10, %v3430_v16, %v5503_v1  ;;  %v5506_v9 = vpop.permute.xlu1 %5505  ;;  %v3238_v6 = vsel %vm3227_vm6, %v7988_v44, %v5197_v7 }
 0x201   : > { %v3555_v0 = vpack.c.bf16 %v3495_v30, %v3494_v19  ;;  %v5511_v48 = vpop.permute.xlu0 %5510  ;;  %v5203_v51 = vunpack.i.h.bf16 %v9400_v10  ;;  %v5202_v43 = vunpack.i.l.bf16 %v9400_v10  ;;  %v5208_v44 = vunpack.i.h.bf16 %v9401_v2 }
 0x202   : > { %5795 = vrot.lane.b32.xlu1 %v5794_v23, %s6013_s8  ;;  %4600 = vmatprep.mubr.msk.bf16.mxu0 %vm3620_vm11, %v3554_v14  ;;  %v5207_v7 = vunpack.i.l.bf16 %v9401_v2  ;;  %v5353_v40 = vunpack.i.h.bf16 %v7652_v20  ;;  %v5352_v63 = vunpack.i.l.bf16 %v7652_v20  ;;  %v8202_v23 = vld [vmem:[#allocation2 + $0x2a9] sm:$0xff]  ;;  %v5358_v28 = vunpack.i.h.bf16 %v7671_v36 }
 0x203   : > { %4601 = vmatmul.mubr.msk.bf16.gmra.mrb[4].mxu0 %vm3620_vm11, %v3555_v0  ;;  %v5357_v29 = vunpack.i.l.bf16 %v7671_v36  ;;  %v5508_v55 = vunpack.i.h.bf16 %v5506_v9  ;;  %v5507_v11 = vunpack.i.l.bf16 %v5506_v9  ;;  %v5513_v18 = vunpack.i.h.bf16 %v5511_v48 }
 0x204   : > { %5800 = vrot.lane.b32.xlu0 %v8065_v54, %s6014_s9  ;;  %v5516_v33 = vpop.permute.xlu1 %5515  ;;  %v5512_v49 = vunpack.i.l.bf16 %v5511_v48  ;;  %v8206_v57 = vpack.i.bf16 %v779_v31, %v778_v8  ;;  %v5819_v54 = vpack.i.bf16 %v842_v32, %v841_v37  ;;  %v5824_v56 = vpack.i.bf16 %v844_v61, %v8191_v50  ;;  %v907_v32 = vld [vmem:[#allocation2 + $0x2b9] sm:$0xff]  ;;  %v908_v50 = vld [vmem:[#allocation2 + $0x2c1] sm:$0xff] }
 0x205   : > { %v5521_v20 = vpop.permute.xlu0 %5520  ;;  %v5518_v52 = vunpack.i.h.bf16 %v5516_v33  ;;  %v5517_v59 = vunpack.i.l.bf16 %v5516_v33  ;;  %v5829_v1 = vpack.i.bf16 %v8202_v23, %v8200_v17  ;;  %v3301_v36 = vsel %vm3292_vm7, %v3236_v3, %v5352_v63 }
 0x206   : > { %5805 = vrot.lane.b32.xlu1 %v5804_v60, %s6014_s9  ;;  %v3302_v45 = vsel %vm3292_vm7, %v3237_v41, %v5353_v40  ;;  %v5523_v24 = vunpack.i.h.bf16 %v5521_v20  ;;  %v5522_v12 = vunpack.i.l.bf16 %v5521_v20  ;;  %v3303_v26 = vsel %vm3292_vm7, %v3238_v6, %v5357_v29 }
 0x207   : > { %v3304_v16 = vsel %vm3292_vm7, %v3239_v62, %v5358_v28  ;;  %v3366_v53 = vsel %vm3357_vm8, %v3301_v36, %v5507_v11  ;;  %v3367_v46 = vsel %vm3357_vm8, %v3302_v45, %v5508_v55  ;;  %v3368_v30 = vsel %vm3357_vm8, %v3303_v26, %v5512_v49 }
 0x208   : > { %5810 = vrot.lane.b32.xlu0 %v5804_v60, %s6011_s23  ;;  %v5526_v14 = vpop.permute.xlu1 %5525  ;;  %v3369_v19 = vsel %vm3357_vm8, %v3304_v16, %v5513_v18  ;;  %v3431_v0 = vsel %vm3422_vm9, %v3366_v53, %v5517_v59  ;;  %v3432_v48 = vsel %vm3422_vm9, %v3367_v46, %v5518_v52  ;;  %v3433_v31 = vsel %vm3422_vm9, %v3368_v30, %v5522_v12  ;;  %v782_v52 = vld [vmem:[#allocation2 + $0x2d2] sm:$0xff] }
 0x209   : > { %v5528_v9 = vunpack.i.h.bf16 %v5526_v14  ;;  %v5527_v3 = vunpack.i.l.bf16 %v5526_v14  ;;  %v5531_v41 = vpop.permute.xlu0 %5530  ;;  %v3434_v6 = vsel %vm3422_vm9, %v3369_v19, %v5523_v24  ;;  %v9402_v40 = vunpack.i.l.bf16 %v9393_v21  ;;  %v8274_v59 = vld [vmem:[#allocation2 + $0x2d0] sm:$0xff] }
 0x20a   : > { %v5533_v60 = vunpack.i.h.bf16 %v5531_v41  ;;  %v5532_v8 = vunpack.i.l.bf16 %v5531_v41  ;;  %5815 = vrot.lane.b32.xlu1 %v8206_v57, %s6011_s23  ;;  %v9403_v29 = vunpack.i.h.bf16 %v9393_v21  ;;  %v8248_v11 = vsel %vm3162_vm4, %v7894_v47, %v5062_v13  ;;  %v971_v13 = vld [vmem:[#allocation2 + $0x2ba] sm:$0xff] }
 0x20b   : > { %v3496_v62 = vsel %vm3487_vm10, %v3431_v0, %v5527_v3  ;;  %v3497_v37 = vsel %vm3487_vm10, %v3432_v48, %v5528_v9  ;;  %v8234_v63 = vsel %vm3162_vm4, %v7890_v42, %v9402_v40  ;;  %v3240_v42 = vsel %vm3227_vm6, %v7996_v5, %v5202_v43  ;;  %v783_v43 = vld [vmem:[#allocation2 + $0x2da] sm:$0xff] }
 0x20c   : > { %5820 = vrot.lane.b32.xlu0 %v5819_v54, %s6012_s7  ;;  %v3556_v61 = vpack.c.bf16 %v3497_v37, %v3496_v62  ;;  %v3498_v17 = vsel %vm3487_vm10, %v3433_v31, %v5532_v8  ;;  %v3499_v23 = vsel %vm3487_vm10, %v3434_v6, %v5533_v60  ;;  %v5536_v28 = vpop.permute.xlu1 %5535  ;;  %v8242_v55 = vsel %vm3162_vm4, %v7885_v58, %v9403_v29  ;;  %v9404_v58 = vld [vmem:[#allocation41_spill] sm:$0xff]  ;;  %v972_v54 = vld [vmem:[#allocation2 + $0x2c2] sm:$0xff] }
 0x20d   : > { %v3557_v33 = vpack.c.bf16 %v3499_v23, %v3498_v17  ;;  %v5541_v18 = vpop.permute.xlu0 %5540  ;;  %v3241_v21 = vsel %vm3227_vm6, %v8008_v27, %v5203_v51  ;;  %v5213_v49 = vunpack.i.h.bf16 %v9404_v58  ;;  %v5212_v20 = vunpack.i.l.bf16 %v9404_v58  ;;  %v848_v29 = vld [vmem:[#allocation2 + $0x2f0] sm:$0xff] }
 0x20e   : > { %5825 = vrot.lane.b32.xlu1 %v5824_v56, %s6012_s7  ;;  %4604 = vmatprep.mubr.msk.bf16.mxu0 %vm3620_vm11, %v3556_v61  ;;  %v5834_v47 = vpack.i.bf16 %v908_v50, %v907_v32  ;;  %v3242_v5 = vsel %vm3227_vm6, %v8012_v22, %v5207_v7  ;;  %v3243_v27 = vsel %vm3227_vm6, %v8016_v15, %v5208_v44  ;;  %v5363_v10 = vunpack.i.h.bf16 %v7683_v25  ;;  %v8276_v56 = vld [vmem:[#allocation2 + $0x2d8] sm:$0xff]  ;;  %v9405_v44 = vld [vmem:[#allocation45_spill] sm:$0xff] }
 0x20f   : > { %v5362_v51 = vunpack.i.l.bf16 %v7683_v25  ;;  %4605 = vmatmul.mubr.msk.bf16.gmra.mrb[8].mxu0 %vm3620_vm11, %v3557_v33  ;;  %v5368_v22 = vunpack.i.h.bf16 %v7705_v39  ;;  %v5367_v2 = vunpack.i.l.bf16 %v7705_v39  ;;  %v5538_v7 = vunpack.i.h.bf16 %v5536_v28 }
 0x210   : > { %5830 = vrot.lane.b32.xlu0 %v5829_v1, %s6013_s8  ;;  %v5537_v36 = vunpack.i.l.bf16 %v5536_v28  ;;  %v5546_v15 = vpop.permute.xlu1 %5545  ;;  %v5217_v45 = vunpack.i.l.bf16 %v9405_v44  ;;  %v5543_v24 = vunpack.i.h.bf16 %v5541_v18  ;;  %v5542_v25 = vunpack.i.l.bf16 %v5541_v18  ;;  %v847_v28 = vld [vmem:[#allocation2 + $0x2e8] sm:$0xff] }
 0x211   : > { %v5551_v12 = vpop.permute.xlu0 %5550  ;;  %v5844_v1 = vpack.i.bf16 %v972_v54, %v971_v13  ;;  %v5548_v26 = vunpack.i.h.bf16 %v5546_v15  ;;  %v5547_v16 = vunpack.i.l.bf16 %v5546_v15  ;;  %v8282_v53 = vpack.i.bf16 %v783_v43, %v782_v52  ;;  %v909_v54 = vld [vmem:[#allocation2 + $0x2d1] sm:$0xff]  ;;  %v910_v52 = vld [vmem:[#allocation2 + $0x2d9] sm:$0xff] }
 0x212   : > { %5835 = vrot.lane.b32.xlu1 %v5834_v47, %s6013_s8  ;;  %v5859_v46 = vpack.i.bf16 %v8276_v56, %v8274_v59  ;;  %v3305_v39 = vsel %vm3292_vm7, %v3240_v42, %v5362_v51  ;;  %v3306_v14 = vsel %vm3292_vm7, %v3241_v21, %v5363_v10  ;;  %v5553_v19 = vunpack.i.h.bf16 %v5551_v12  ;;  %v9406_v42 = vld [vmem:[#allocation39_spill] sm:$0xff]  ;;  %v9407_v56 = vld [vmem:[#allocation60_spill] sm:$0xff] }
 0x213   : > { %v5552_v30 = vunpack.i.l.bf16 %v5551_v12  ;;  %v3307_v9 = vsel %vm3292_vm7, %v3242_v5, %v5367_v2  ;;  %v3308_v3 = vsel %vm3292_vm7, %v3243_v27, %v5368_v22  ;;  %v3370_v41 = vsel %vm3357_vm8, %v3305_v39, %v5537_v36  ;;  %v9408_v36 = vld [vmem:[#allocation79_spill] sm:$0xff] }
 0x214   : > { %5840 = vrot.lane.b32.xlu0 %v8206_v57, %s6014_s9  ;;  %v3371_v0 = vsel %vm3357_vm8, %v3306_v14, %v5538_v7  ;;  %v5556_v48 = vpop.permute.xlu1 %5555  ;;  %v3373_v60 = vsel %vm3357_vm8, %v3308_v3, %v5543_v24  ;;  %v3372_v8 = vsel %vm3357_vm8, %v3307_v9, %v5542_v25  ;;  %v3435_v37 = vsel %vm3422_vm9, %v3370_v41, %v5547_v16  ;;  %v976_v24 = vld [vmem:[#allocation2 + $0x2f2] sm:$0xff]  ;;  %v9409_v25 = vld [vmem:[#allocation80_spill] sm:$0xff] }
 0x215   : > { %v5558_v31 = vunpack.i.h.bf16 %v5556_v48  ;;  %v5557_v6 = vunpack.i.l.bf16 %v5556_v48  ;;  %v5561_v62 = vpop.permute.xlu0 %5560  ;;  %v3436_v57 = vsel %vm3422_vm9, %v3371_v0, %v5548_v26  ;;  %v3437_v40 = vsel %vm3422_vm9, %v3372_v8, %v5552_v30 }
 0x216   : > { %v5563_v32 = vunpack.i.h.bf16 %v5561_v62  ;;  %v5562_v50 = vunpack.i.l.bf16 %v5561_v62  ;;  %5845 = vrot.lane.b32.xlu1 %v5844_v1, %s6014_s9  ;;  %v3438_v61 = vsel %vm3422_vm9, %v3373_v60, %v5553_v19  ;;  %v5068_v33 = vunpack.i.h.bf16 %v9406_v42 }
 0x217   : > { %v3500_v17 = vsel %vm3487_vm10, %v3435_v37, %v5557_v6  ;;  %v3501_v23 = vsel %vm3487_vm10, %v3436_v57, %v5558_v31  ;;  %v5067_v5 = vunpack.i.l.bf16 %v9406_v42  ;;  %v3244_v27 = vsel %vm3227_vm6, %v8020_v34, %v5212_v20  ;;  %v911_v34 = vld [vmem:[#allocation2 + $0x2e9] sm:$0xff] }
 0x218   : > { %5850 = vrot.lane.b32.xlu0 %v5844_v1, %s6011_s23  ;;  %v3558_v18 = vpack.c.bf16 %v3501_v23, %v3500_v17  ;;  %v3502_v21 = vsel %vm3487_vm10, %v3437_v40, %v5562_v50  ;;  %v3503_v47 = vsel %vm3487_vm10, %v3438_v61, %v5563_v32  ;;  %v5566_v13 = vpop.permute.xlu1 %5565  ;;  %v5218_v10 = vunpack.i.h.bf16 %v9405_v44  ;;  %v975_v44 = vld [vmem:[#allocation2 + $0x2ea] sm:$0xff] }
 0x219   : > { %v3559_v51 = vpack.c.bf16 %v3503_v47, %v3502_v21  ;;  %v5571_v43 = vpop.permute.xlu0 %5570  ;;  %v3245_v59 = vsel %vm3227_vm6, %v8032_v35, %v5213_v49  ;;  %v5223_v22 = vunpack.i.h.bf16 %v9407_v56  ;;  %v5222_v2 = vunpack.i.l.bf16 %v9407_v56  ;;  %v912_v49 = vld [vmem:[#allocation2 + $0x2f1] sm:$0xff]  ;;  %v914_v56 = vld [vmem:[#allocation2 + $0x309] sm:$0xff] }
 0x21a   : > { %5855 = vrot.lane.b32.xlu1 %v8282_v53, %s6011_s23  ;;  %4608 = vmatprep.mubr.msk.bf16.mxu0 %vm3620_vm11, %v3558_v18  ;;  %v5864_v7 = vpack.i.bf16 %v848_v29, %v847_v28  ;;  %v3246_v20 = vsel %vm3227_vm6, %v8234_v63, %v5217_v45  ;;  %v5373_v15 = vunpack.i.h.bf16 %v9408_v36  ;;  %v5372_v58 = vunpack.i.l.bf16 %v9408_v36  ;;  %v9410_v45 = vld [vmem:[#allocation44_spill] sm:$0xff] }
 0x21b   : > { %4609 = vmatmul.mubr.msk.bf16.gmra.mrb[12].mxu0 %vm3620_vm11, %v3559_v51  ;;  %v5869_v35 = vpack.i.bf16 %v910_v52, %v909_v54  ;;  %v5378_v12 = vunpack.i.h.bf16 %v9409_v25  ;;  %v5377_v1 = vunpack.i.l.bf16 %v9409_v25  ;;  %v5568_v26 = vunpack.i.h.bf16 %v5566_v13  ;;  %v786_v52 = vld [vmem:[#allocation2 + $0x302] sm:$0xff] }
 0x21c   : > { %5860 = vrot.lane.b32.xlu0 %v5859_v46, %s6012_s7  ;;  %v5567_v16 = vunpack.i.l.bf16 %v5566_v13  ;;  %v5576_v39 = vpop.permute.xlu1 %5575  ;;  %v3247_v63 = vsel %vm3227_vm6, %v8242_v55, %v5218_v10  ;;  %v5227_v14 = vunpack.i.l.bf16 %v9410_v45  ;;  %v5573_v19 = vunpack.i.h.bf16 %v5571_v43  ;;  %v9411_v10 = vld [vmem:[#allocation4_spill] sm:$0xff] }
 0x21d   : > { %v5572_v46 = vunpack.i.l.bf16 %v5571_v43  ;;  %v5581_v30 = vpop.permute.xlu0 %5580  ;;  %v5578_v9 = vunpack.i.h.bf16 %v5576_v39  ;;  %v5577_v3 = vunpack.i.l.bf16 %v5576_v39  ;;  %v5874_v41 = vpack.i.bf16 %v912_v49, %v911_v34  ;;  %v850_v36 = vld [vmem:[#allocation2 + $0x308] sm:$0xff]  ;;  %v9415_v39 = vld [vmem:[#allocation83_spill] sm:$0xff] }
 0x21e   : > { %5865 = vrot.lane.b32.xlu1 %v5864_v7, %s6012_s7  ;;  %v5884_v0 = vpack.i.bf16 %v976_v24, %v975_v44  ;;  %v3309_v48 = vsel %vm3292_vm7, %v3244_v27, %v5372_v58  ;;  %v3310_v60 = vsel %vm3292_vm7, %v3245_v59, %v5373_v15  ;;  %v5583_v8 = vunpack.i.h.bf16 %v5581_v30  ;;  %v787_v27 = vld [vmem:[#allocation2 + $0x30a] sm:$0xff]  ;;  %v9412_v15 = vld [vmem:[#allocation7_spill] sm:$0xff] }
 0x21f   : > { %v5582_v31 = vunpack.i.l.bf16 %v5581_v30  ;;  %v3311_v55 = vsel %vm3292_vm7, %v3246_v20, %v5377_v1  ;;  %v3312_v6 = vsel %vm3292_vm7, %v3247_v63, %v5378_v12  ;;  %v3374_v62 = vsel %vm3357_vm8, %v3309_v48, %v5567_v16  ;;  %v849_v20 = vld [vmem:[#allocation2 + $0x300] sm:$0xff]  ;;  %v9413_v58 = vld [vmem:[#allocation5_spill] sm:$0xff]  ;;  %v9414_v1 = vld [vmem:[#allocation82_spill] sm:$0xff] }
 0x220   : > { %5870 = vrot.lane.b32.xlu0 %v5869_v35, %s6013_s8  ;;  %v3375_v37 = vsel %vm3357_vm8, %v3310_v60, %v5568_v26  ;;  %v5586_v57 = vpop.permute.xlu1 %5585  ;;  %v3377_v32 = vsel %vm3357_vm8, %v3312_v6, %v5573_v19  ;;  %v3376_v50 = vsel %vm3357_vm8, %v3311_v55, %v5572_v46  ;;  %v3439_v23 = vsel %vm3422_vm9, %v3374_v62, %v5577_v3  ;;  %v913_v25 = vld [vmem:[#allocation2 + $0x301] sm:$0xff] }
 0x221   : > { %v5588_v40 = vunpack.i.h.bf16 %v5586_v57  ;;  %v5587_v61 = vunpack.i.l.bf16 %v5586_v57  ;;  %v5591_v17 = vpop.permute.xlu0 %5590  ;;  %v3440_v28 = vsel %vm3422_vm9, %v3375_v37, %v5578_v9  ;;  %v3441_v21 = vsel %vm3422_vm9, %v3376_v50, %v5582_v31 }
 0x222   : > { %v5593_v29 = vunpack.i.h.bf16 %v5591_v17  ;;  %v5592_v18 = vunpack.i.l.bf16 %v5591_v17  ;;  %5875 = vrot.lane.b32.xlu1 %v5874_v41, %s6013_s8  ;;  %v3442_v47 = vsel %vm3422_vm9, %v3377_v32, %v5583_v8  ;;  %v3184_v51 = vsel %vm3162_vm4, %v9411_v10, %v5063_v4 }
 0x223   : > { %v3504_v13 = vsel %vm3487_vm10, %v3439_v23, %v5587_v61  ;;  %v3505_v54 = vsel %vm3487_vm10, %v3440_v28, %v5588_v40  ;;  %v3186_v38 = vsel %vm3162_vm4, %v9413_v58, %v5068_v33  ;;  %v5228_v4 = vunpack.i.h.bf16 %v9410_v45  ;;  %v851_v33 = vld [vmem:[#allocation2 + $0x318] sm:$0xff] }
 0x224   : > { %5880 = vrot.lane.b32.xlu0 %v8282_v53, %s6014_s9  ;;  %v3560_v43 = vpack.c.bf16 %v3505_v54, %v3504_v13  ;;  %v3506_v59 = vsel %vm3487_vm10, %v3441_v21, %v5592_v18  ;;  %v3507_v7 = vsel %vm3487_vm10, %v3442_v47, %v5593_v29  ;;  %v5596_v34 = vpop.permute.xlu1 %5595  ;;  %v3185_v53 = vsel %vm3162_vm4, %v9412_v15, %v5067_v5  ;;  %v852_v5 = vld [vmem:[#allocation2 + $0x320] sm:$0xff]  ;;  %v790_v58 = vld [vmem:[#allocation2 + $0x332] sm:$0xff] }
 0x225   : > { %v3561_v35 = vpack.c.bf16 %v3507_v7, %v3506_v59  ;;  %v5601_v49 = vpop.permute.xlu0 %5600  ;;  %v3248_v44 = vsel %vm3227_vm6, %v8248_v11, %v5222_v2  ;;  %v3249_v24 = vsel %vm3227_vm6, %v3184_v51, %v5223_v22  ;;  %v8376_v42 = vpack.i.bf16 %v787_v27, %v786_v52  ;;  %v915_v22 = vld [vmem:[#allocation2 + $0x319] sm:$0xff]  ;;  %v916_v2 = vld [vmem:[#allocation2 + $0x321] sm:$0xff] }
 0x226   : > { %5885 = vrot.lane.b32.xlu1 %v5884_v0, %s6014_s9  ;;  %4612 = vmatprep.mubr.msk.bf16.mxu0 %vm3620_vm11, %v3560_v43  ;;  %v3250_v12 = vsel %vm3227_vm6, %v3185_v53, %v5227_v14  ;;  %v5383_v26 = vunpack.i.h.bf16 %v9414_v1  ;;  %v5382_v16 = vunpack.i.l.bf16 %v9414_v1  ;;  %v5899_v11 = vpack.i.bf16 %v850_v36, %v849_v20  ;;  %v979_v43 = vld [vmem:[#allocation2 + $0x31a] sm:$0xff]  ;;  %v980_v59 = vld [vmem:[#allocation2 + $0x322] sm:$0xff] }
 0x227   : > { %4613 = vmatmul.mubr.msk.bf16.gmra.mrb[16].mxu0 %vm3620_vm11, %v3561_v35  ;;  %v5388_v63 = vunpack.i.h.bf16 %v9415_v39  ;;  %v5387_v45 = vunpack.i.l.bf16 %v9415_v39  ;;  %v5598_v19 = vunpack.i.h.bf16 %v5596_v34  ;;  %v5597_v46 = vunpack.i.l.bf16 %v5596_v34  ;;  %v853_v35 = vld [vmem:[#allocation2 + $0x330] sm:$0xff]  ;;  %v918_v1 = vld [vmem:[#allocation2 + $0x339] sm:$0xff] }
 0x228   : > { %5890 = vrot.lane.b32.xlu0 %v5884_v0, %s6011_s23  ;;  %v5606_v30 = vpop.permute.xlu1 %5605  ;;  %v3251_v14 = vsel %vm3227_vm6, %v3186_v38, %v5228_v4  ;;  %v5603_v9 = vunpack.i.h.bf16 %v5601_v49  ;;  %v5602_v3 = vunpack.i.l.bf16 %v5601_v49  ;;  %v5904_v48 = vpack.i.bf16 %v852_v5, %v851_v33  ;;  %v791_v38 = vld [vmem:[#allocation2 + $0x33a] sm:$0xff] }
 0x229   : > { %v5611_v41 = vpop.permute.xlu0 %5610  ;;  %v5608_v0 = vunpack.i.h.bf16 %v5606_v30  ;;  %v5607_v60 = vunpack.i.l.bf16 %v5606_v30  ;;  %v5909_v8 = vpack.i.bf16 %v914_v56, %v913_v25  ;;  %v5914_v31 = vpack.i.bf16 %v916_v2, %v915_v22  ;;  %v854_v49 = vld [vmem:[#allocation2 + $0x338] sm:$0xff]  ;;  %v856_v25 = vld [vmem:[#allocation2 + $0x350] sm:$0xff] }
 0x22a   : > { %5895 = vrot.lane.b32.xlu1 %v8376_v42, %s6011_s23  ;;  %v3313_v55 = vsel %vm3292_vm7, %v3248_v44, %v5382_v16  ;;  %v3314_v6 = vsel %vm3292_vm7, %v3249_v24, %v5383_v26  ;;  %v5613_v62 = vunpack.i.h.bf16 %v5611_v41  ;;  %v5612_v37 = vunpack.i.l.bf16 %v5611_v41  ;;  %v855_v44 = vld [vmem:[#allocation2 + $0x348] sm:$0xff]  ;;  %v9417_v26 = vld [vmem:[#allocation85_spill] sm:$0xff] }
 0x22b   : > { %v3315_v57 = vsel %vm3292_vm7, %v3250_v12, %v5387_v45  ;;  %v3316_v32 = vsel %vm3292_vm7, %v3251_v14, %v5388_v63  ;;  %v3378_v50 = vsel %vm3357_vm8, %v3313_v55, %v5597_v46  ;;  %v3379_v40 = vsel %vm3357_vm8, %v3314_v6, %v5598_v19  ;;  %v9416_v24 = vld [vmem:[#allocation84_spill] sm:$0xff]  ;;  %v917_v12 = vld [vmem:[#allocation2 + $0x331] sm:$0xff] }
 0x22c   : > { %5900 = vrot.lane.b32.xlu0 %v5899_v11, %s6012_s7  ;;  %v5616_v61 = vpop.permute.xlu1 %5615  ;;  %v3381_v17 = vsel %vm3357_vm8, %v3316_v32, %v5603_v9  ;;  %v3380_v23 = vsel %vm3357_vm8, %v3315_v57, %v5602_v3  ;;  %v3443_v21 = vsel %vm3422_vm9, %v3378_v50, %v5607_v60  ;;  %v3444_v47 = vsel %vm3422_vm9, %v3379_v40, %v5608_v0  ;;  %v9418_v3 = vld [vmem:[#allocation61_spill] sm:$0xff]  ;;  %v9421_v6 = vld [vmem:[#allocation64_spill] sm:$0xff] }
 0x22d   : > { %v5618_v28 = vunpack.i.h.bf16 %v5616_v61  ;;  %v5617_v29 = vunpack.i.l.bf16 %v5616_v61  ;;  %v5621_v18 = vpop.permute.xlu0 %5620  ;;  %v3445_v52 = vsel %vm3422_vm9, %v3380_v23, %v5612_v37  ;;  %v3446_v27 = vsel %vm3422_vm9, %v3381_v17, %v5613_v62 }
 0x22e   : > { %v5623_v13 = vunpack.i.h.bf16 %v5621_v18  ;;  %v5622_v54 = vunpack.i.l.bf16 %v5621_v18  ;;  %5905 = vrot.lane.b32.xlu1 %v5904_v48, %s6012_s7  ;;  %v5924_v4 = vpack.i.bf16 %v980_v59, %v979_v43  ;;  %v5393_v33 = vunpack.i.h.bf16 %v9416_v24  ;;  %v9419_v48 = vld [vmem:[#allocation62_spill] sm:$0xff] }
 0x22f   : > { %v3508_v10 = vsel %vm3487_vm10, %v3443_v21, %v5617_v29  ;;  %v3509_v51 = vsel %vm3487_vm10, %v3444_v47, %v5618_v28  ;;  %v5392_v5 = vunpack.i.l.bf16 %v9416_v24  ;;  %v5398_v16 = vunpack.i.h.bf16 %v9417_v26 }
 0x230   : > { %5910 = vrot.lane.b32.xlu0 %v5909_v8, %s6013_s8  ;;  %v3562_v7 = vpack.c.bf16 %v3509_v51, %v3508_v10  ;;  %v3510_v34 = vsel %vm3487_vm10, %v3445_v52, %v5622_v54  ;;  %v3511_v20 = vsel %vm3487_vm10, %v3446_v27, %v5623_v13  ;;  %v5626_v36 = vpop.permute.xlu1 %5625  ;;  %v5397_v11 = vunpack.i.l.bf16 %v9417_v26  ;;  %v919_v27 = vld [vmem:[#allocation2 + $0x349] sm:$0xff]  ;;  %v920_v10 = vld [vmem:[#allocation2 + $0x351] sm:$0xff] }
 0x231   : > { %v3563_v15 = vpack.c.bf16 %v3511_v20, %v3510_v34  ;;  %v5631_v53 = vpop.permute.xlu0 %5630  ;;  %v5628_v56 = vunpack.i.h.bf16 %v5626_v36  ;;  %v5627_v22 = vunpack.i.l.bf16 %v5626_v36  ;;  %v8416_v19 = vpack.i.bf16 %v791_v38, %v790_v58  ;;  %v983_v38 = vld [vmem:[#allocation2 + $0x34a] sm:$0xff] }
 0x232   : > { %5915 = vrot.lane.b32.xlu1 %v5914_v31, %s6013_s8  ;;  %4616 = vmatprep.mubr.msk.bf16.mxu0 %vm3620_vm11, %v3562_v7  ;;  %v5633_v39 = vunpack.i.h.bf16 %v5631_v53  ;;  %v5632_v63 = vunpack.i.l.bf16 %v5631_v53  ;;  %v5939_v46 = vpack.i.bf16 %v854_v49, %v853_v35  ;;  %v5944_v14 = vpack.i.bf16 %v856_v25, %v855_v44  ;;  %v9420_v31 = vld [vmem:[#allocation63_spill] sm:$0xff] }
 0x233   : > { %4617 = vmatmul.mubr.msk.bf16.gmra.mrb[20].mxu0 %vm3620_vm11, %v3563_v15  ;;  %v5949_v9 = vpack.i.bf16 %v918_v1, %v917_v12  ;;  %v3317_v41 = vsel %vm3292_vm7, %v9418_v3, %v5392_v5  ;;  %v3318_v0 = vsel %vm3292_vm7, %v9419_v48, %v5393_v33  ;;  %v3319_v55 = vsel %vm3292_vm7, %v9420_v31, %v5397_v11  ;;  %v9422_v15 = vld [vmem:[#allocation90_spill] sm:$0xff]  ;;  %v9423_v35 = vld [vmem:[#allocation91_spill] sm:$0xff] }
 0x234   : > { %5920 = vrot.lane.b32.xlu0 %v8376_v42, %s6014_s9  ;;  %v5636_v2 = vpop.permute.xlu1 %5635  ;;  %v3320_v62 = vsel %vm3292_vm7, %v9421_v6, %v5398_v16  ;;  %v3382_v37 = vsel %vm3357_vm8, %v3317_v41, %v5627_v22  ;;  %v3383_v57 = vsel %vm3357_vm8, %v3318_v0, %v5628_v56  ;;  %v3384_v40 = vsel %vm3357_vm8, %v3319_v55, %v5632_v63  ;;  %v9424_v56 = vld [vmem:[#allocation65_spill] sm:$0xff] }
 0x235   : > { %v5641_v45 = vpop.permute.xlu0 %5640  ;;  %v5638_v30 = vunpack.i.h.bf16 %v5636_v2  ;;  %v5637_v42 = vunpack.i.l.bf16 %v5636_v2  ;;  %v3385_v50 = vsel %vm3357_vm8, %v3320_v62, %v5633_v39  ;;  %v5954_v36 = vpack.i.bf16 %v920_v10, %v919_v27  ;;  %v9425_v2 = vld [vmem:[#allocation66_spill] sm:$0xff] }
 0x236   : > { %5925 = vrot.lane.b32.xlu1 %v5924_v4, %s6014_s9  ;;  %v5643_v60 = vunpack.i.h.bf16 %v5641_v45  ;;  %v5642_v8 = vunpack.i.l.bf16 %v5641_v45  ;;  %v5403_v53 = vunpack.i.h.bf16 %v9422_v15  ;;  %v5402_v58 = vunpack.i.l.bf16 %v9422_v15 }
 0x237   : > { %v3447_v28 = vsel %vm3422_vm9, %v3382_v37, %v5637_v42  ;;  %v3448_v29 = vsel %vm3422_vm9, %v3383_v57, %v5638_v30  ;;  %v5408_v49 = vunpack.i.h.bf16 %v9423_v35  ;;  %v5407_v44 = vunpack.i.l.bf16 %v9423_v35  ;;  %v9427_v42 = vld [vmem:[#allocation68_spill] sm:$0xff]  ;;  %v9432_v35 = vld [vmem:[#allocation71_spill] sm:$0xff] }
 0x238   : > { %5930 = vrot.lane.b32.xlu0 %v5924_v4, %s6011_s23  ;;  %v5646_v32 = vpop.permute.xlu1 %5645  ;;  %v3449_v47 = vsel %vm3422_vm9, %v3384_v40, %v5642_v8  ;;  %v3450_v13 = vsel %vm3422_vm9, %v3385_v50, %v5643_v60  ;;  %v984_v4 = vld [vmem:[#allocation2 + $0x352] sm:$0xff]  ;;  %v3321_v22 = vsel %vm3292_vm7, %v9424_v56, %v5402_v58  ;;  %v3322_v39 = vsel %vm3292_vm7, %v9425_v2, %v5403_v53 }
 0x239   : > { %v5648_v61 = vunpack.i.h.bf16 %v5646_v32  ;;  %v5647_v17 = vunpack.i.l.bf16 %v5646_v32  ;;  %v5651_v23 = vpop.permute.xlu0 %5650  ;;  %v5964_v11 = vpack.i.bf16 %v984_v4, %v983_v38  ;;  %v9431_v53 = vld [vmem:[#allocation70_spill] sm:$0xff] }
 0x23a   : > { %v5653_v18 = vunpack.i.h.bf16 %v5651_v23  ;;  %v5652_v21 = vunpack.i.l.bf16 %v5651_v23  ;;  %5935 = vrot.lane.b32.xlu1 %v8416_v19, %s6011_s23 }
 0x23b   : > { %v3512_v54 = vsel %vm3487_vm10, %v3447_v28, %v5647_v17  ;;  %v3513_v52 = vsel %vm3487_vm10, %v3448_v29, %v5648_v61 }
 0x23c   : > { %5940 = vrot.lane.b32.xlu0 %v5939_v46, %s6012_s7  ;;  %v3564_v51 = vpack.c.bf16 %v3513_v52, %v3512_v54  ;;  %v3514_v43 = vsel %vm3487_vm10, %v3449_v47, %v5652_v21  ;;  %v3515_v59 = vsel %vm3487_vm10, %v3450_v13, %v5653_v18  ;;  %v5656_v7 = vpop.permute.xlu1 %5655  ;;  %v9426_v46 = vld [vmem:[#allocation67_spill] sm:$0xff]  ;;  %v9429_v13 = vld [vmem:[#allocation6_spill] sm:$0xff] }
 0x23d   : > { %v3565_v34 = vpack.c.bf16 %v3515_v59, %v3514_v43  ;;  %v5661_v20 = vpop.permute.xlu0 %5660  ;;  %v5658_v24 = vunpack.i.h.bf16 %v5656_v7  ;;  %v5657_v33 = vunpack.i.l.bf16 %v5656_v7  ;;  %v3323_v30 = vsel %vm3292_vm7, %v9426_v46, %v5407_v44  ;;  %v9428_v18 = vld [vmem:[#allocation3_spill] sm:$0xff]  ;;  %v9433_v44 = vld [vmem:[#allocation72_spill] sm:$0xff] }
 0x23e   : > { %5945 = vrot.lane.b32.xlu1 %v5944_v14, %s6012_s7  ;;  %4620 = vmatprep.mubr.msk.bf16.mxu0 %vm3620_vm11, %v3564_v51  ;;  %v5663_v25 = vunpack.i.h.bf16 %v5661_v20  ;;  %v5662_v12 = vunpack.i.l.bf16 %v5661_v20  ;;  %v3324_v14 = vsel %vm3292_vm7, %v9427_v42, %v5408_v49  ;;  %v5413_v21 = vunpack.i.h.bf16 %v9428_v18 }
 0x23f   : > { %4621 = vmatmul.mubr.msk.bf16.gmra.mrb[24].mxu0 %vm3620_vm11, %v3565_v34  ;;  %v3387_v3 = vsel %vm3357_vm8, %v3322_v39, %v5658_v24  ;;  %v5412_v47 = vunpack.i.l.bf16 %v9428_v18  ;;  %v5418_v54 = vunpack.i.h.bf16 %v9429_v13  ;;  %v5417_v52 = vunpack.i.l.bf16 %v9429_v13 }
 0x240   : > { %5950 = vrot.lane.b32.xlu0 %v5949_v9, %s6013_s8  ;;  %v5666_v5 = vpop.permute.xlu1 %5665  ;;  %v3386_v9 = vsel %vm3357_vm8, %v3321_v22, %v5657_v33  ;;  %v3389_v48 = vsel %vm3357_vm8, %v3324_v14, %v5663_v25  ;;  %v3388_v0 = vsel %vm3357_vm8, %v3323_v30, %v5662_v12  ;;  %v3326_v58 = vsel %vm3292_vm7, %v9431_v53, %v5413_v21 }
 0x241   : > { %v5671_v1 = vpop.permute.xlu0 %5670  ;;  %v5668_v26 = vunpack.i.h.bf16 %v5666_v5  ;;  %v5667_v16 = vunpack.i.l.bf16 %v5666_v5  ;;  %v3327_v49 = vsel %vm3292_vm7, %v9432_v35, %v5417_v52  ;;  %v3328_v24 = vsel %vm3292_vm7, %v9433_v44, %v5418_v54  ;;  %v9439_v54 = vld [vmem:[#allocation73_spill] sm:$0xff] }
 0x242   : > { %5955 = vrot.lane.b32.xlu1 %v5954_v36, %s6013_s8  ;;  %v5673_v63 = vunpack.i.h.bf16 %v5671_v1  ;;  %v5672_v45 = vunpack.i.l.bf16 %v5671_v1  ;;  %v9430_v36 = vld [vmem:[#allocation69_spill] sm:$0xff] }
 0x243   : > { %v3452_v55 = vsel %vm3422_vm9, %v3387_v3, %v5668_v26  ;;  %v3325_v15 = vsel %vm3292_vm7, %v9430_v36, %v5412_v47  ;;  %v9438_v47 = vld [vmem:[#allocation95_spill] sm:$0xff] }
 0x244   : > { %5960 = vrot.lane.b32.xlu0 %v8416_v19, %s6014_s9  ;;  %v5676_v41 = vpop.permute.xlu1 %5675  ;;  %v3451_v19 = vsel %vm3422_vm9, %v3386_v9, %v5667_v16  ;;  %v3453_v37 = vsel %vm3422_vm9, %v3388_v0, %v5672_v45  ;;  %v3454_v57 = vsel %vm3422_vm9, %v3389_v48, %v5673_v63  ;;  %v9434_v0 = vld [vmem:[#allocation8_spill] sm:$0xff] }
 0x245   : > { %v5678_v60 = vunpack.i.h.bf16 %v5676_v41  ;;  %v5677_v8 = vunpack.i.l.bf16 %v5676_v41  ;;  %v5681_v31 = vpop.permute.xlu0 %5680 }
 0x246   : > { %v5683_v6 = vunpack.i.h.bf16 %v5681_v31  ;;  %v5682_v62 = vunpack.i.l.bf16 %v5681_v31  ;;  %5965 = vrot.lane.b32.xlu1 %v5964_v11, %s6014_s9  ;;  %v9435_v31 = vld [vmem:[#allocation93_spill] sm:$0xff] }
 0x247   : > { %v3516_v32 = vsel %vm3487_vm10, %v3451_v19, %v5677_v8  ;;  %v3517_v50 = vsel %vm3487_vm10, %v3452_v55, %v5678_v60  ;;  %v5423_v60 = vunpack.i.h.bf16 %v9434_v0  ;;  %v5422_v8 = vunpack.i.l.bf16 %v9434_v0 }
 0x248   : > { %v3566_v40 = vpack.c.bf16 %v3517_v50, %v3516_v32  ;;  %v3518_v61 = vsel %vm3487_vm10, %v3453_v37, %v5682_v62  ;;  %v3519_v17 = vsel %vm3487_vm10, %v3454_v57, %v5683_v6  ;;  %v5686_v23 = vpop.permute.xlu1 %5685  ;;  %v5428_v19 = vunpack.i.h.bf16 %v9435_v31 }
 0x249   : > { %v3567_v28 = vpack.c.bf16 %v3519_v17, %v3518_v61  ;;  %v5691_v29 = vpop.permute.xlu0 %5690  ;;  %v5688_v27 = vunpack.i.h.bf16 %v5686_v23  ;;  %v5687_v10 = vunpack.i.l.bf16 %v5686_v23  ;;  %v5427_v55 = vunpack.i.l.bf16 %v9435_v31  ;;  %v9436_v17 = vld [vmem:[#allocation24_spill] sm:$0xff] }
 0x24a   : > { %4624 = vmatprep.mubr.msk.bf16.mxu0 %vm3620_vm11, %v3566_v40  ;;  %v5693_v43 = vunpack.i.h.bf16 %v5691_v29  ;;  %v5692_v59 = vunpack.i.l.bf16 %v5691_v29  ;;  %v3329_v23 = vsel %vm3292_vm7, %v9436_v17, %v5422_v8  ;;  %v3332_v52 = vsel %vm3292_vm7, %v9439_v54, %v5428_v19  ;;  %v9444_v8 = vld [vmem:[#allocation28_spill] sm:$0xff]  ;;  %v9445_v19 = vld [vmem:[#allocation74_spill] sm:$0xff] }
 0x24b   : > { %4625 = vmatmul.mubr.msk.bf16.gmra.mrb[28].mxu0 %vm3620_vm11, %v3567_v28  ;;  %v3390_v33 = vsel %vm3357_vm8, %v3325_v15, %v5687_v10  ;;  %v3391_v5 = vsel %vm3357_vm8, %v3326_v58, %v5688_v27  ;;  %v9437_v28 = vld [vmem:[#allocation96_spill] sm:$0xff]  ;;  %v3331_v13 = vsel %vm3292_vm7, %v9438_v47, %v5427_v55 }
 0x24c   : > { %v5696_v51 = vpop.permute.xlu1 %5695  ;;  %v3393_v12 = vsel %vm3357_vm8, %v3328_v24, %v5693_v43  ;;  %v3392_v1 = vsel %vm3357_vm8, %v3327_v49, %v5692_v59  ;;  %v3330_v29 = vsel %vm3292_vm7, %v9437_v28, %v5423_v60 }
 0x24d   : > { %v5701_v7 = vpop.permute.xlu0 %5700  ;;  %v5698_v34 = vunpack.i.h.bf16 %v5696_v51  ;;  %v5697_v20 = vunpack.i.l.bf16 %v5696_v51 }
 0x24e   : > { %v5703_v38 = vunpack.i.h.bf16 %v5701_v7  ;;  %v5702_v4 = vunpack.i.l.bf16 %v5701_v7 }
 0x24f   : > { %v3455_v2 = vsel %vm3422_vm9, %v3390_v33, %v5697_v20  ;;  %v3456_v39 = vsel %vm3422_vm9, %v3391_v5, %v5698_v34 }
 0x250   : > { %v5706_v25 = vpop.permute.xlu1 %5705  ;;  %v3457_v63 = vsel %vm3422_vm9, %v3392_v1, %v5702_v4  ;;  %v3458_v45 = vsel %vm3422_vm9, %v3393_v12, %v5703_v38  ;;  %v9440_v1 = vld [vmem:[#allocation9_spill] sm:$0xff] }
 0x251   : > { %v5708_v26 = vunpack.i.h.bf16 %v5706_v25  ;;  %v5707_v16 = vunpack.i.l.bf16 %v5706_v25  ;;  %v5711_v11 = vpop.permute.xlu0 %5710 }
 0x252   : > { %v5713_v56 = vunpack.i.h.bf16 %v5711_v11  ;;  %v5712_v22 = vunpack.i.l.bf16 %v5711_v11  ;;  %v9441_v11 = vld [vmem:[#allocation94_spill] sm:$0xff] }
 0x253   : > { %v3520_v46 = vsel %vm3487_vm10, %v3455_v2, %v5707_v16  ;;  %v3521_v30 = vsel %vm3487_vm10, %v3456_v39, %v5708_v26  ;;  %v5433_v26 = vunpack.i.h.bf16 %v9440_v1  ;;  %v5432_v16 = vunpack.i.l.bf16 %v9440_v1 }
 0x254   : > { %v3522_v42 = vsel %vm3487_vm10, %v3457_v63, %v5712_v22  ;;  %v3523_v14 = vsel %vm3487_vm10, %v3458_v45, %v5713_v56  ;;  %v5716_v9 = vpop.permute.xlu1 %5715  ;;  %v3568_v3 = vpack.c.bf16 %v3521_v30, %v3520_v46  ;;  %v5438_v56 = vunpack.i.h.bf16 %v9441_v11 }
 0x255   : > { %v3569_v41 = vpack.c.bf16 %v3523_v14, %v3522_v42  ;;  %v5721_v48 = vpop.permute.xlu0 %5720  ;;  %v5718_v6 = vunpack.i.h.bf16 %v5716_v9  ;;  %v5717_v62 = vunpack.i.l.bf16 %v5716_v9  ;;  %v5437_v22 = vunpack.i.l.bf16 %v9441_v11  ;;  %v9442_v9 = vld [vmem:[#allocation97_spill] sm:$0xff] }
 0x256   : > { %4628 = vmatprep.mubr.msk.bf16.mxu1 %vm3620_vm11, %v3568_v3  ;;  %v5723_v57 = vunpack.i.h.bf16 %v5721_v48  ;;  %v5722_v32 = vunpack.i.l.bf16 %v5721_v48  ;;  %v3333_v3 = vsel %vm3292_vm7, %v9442_v9, %v5432_v16  ;;  %v3336_v55 = vsel %vm3292_vm7, %v9445_v19, %v5438_v56 }
 0x257   : > { %4629 = vmatmul.mubr.msk.bf16.vlgmr.msra.gmra.mrb[0].mxu1 %vm3620_vm11, %v3569_v41  ;;  %v3394_v27 = vsel %vm3357_vm8, %v3329_v23, %v5717_v62  ;;  %v3395_v10 = vsel %vm3357_vm8, %v3330_v29, %v5718_v6  ;;  %v9443_v41 = vld [vmem:[#allocation75_spill] sm:$0xff]  ;;  %v3335_v31 = vsel %vm3292_vm7, %v9444_v8, %v5437_v22 }
 0x258   : > { %v5726_v37 = vpop.permute.xlu1 %5725  ;;  %v3397_v43 = vsel %vm3357_vm8, %v3332_v52, %v5723_v57  ;;  %v3396_v59 = vsel %vm3357_vm8, %v3331_v13, %v5722_v32  ;;  %v3334_v48 = vsel %vm3292_vm7, %v9443_v41, %v5433_v26 }
 0x259   : > { %v5731_v50 = vpop.permute.xlu0 %5730  ;;  %v5728_v40 = vunpack.i.h.bf16 %v5726_v37  ;;  %v5727_v61 = vunpack.i.l.bf16 %v5726_v37 }
 0x25a   : > { %v5733_v18 = vunpack.i.h.bf16 %v5731_v50  ;;  %v5732_v21 = vunpack.i.l.bf16 %v5731_v50 }
 0x25b   : > { %v3459_v36 = vsel %vm3422_vm9, %v3394_v27, %v5727_v61  ;;  %v3460_v15 = vsel %vm3422_vm9, %v3395_v10, %v5728_v40 }
 0x25c   : > { %v5736_v51 = vpop.permute.xlu1 %5735  ;;  %v3461_v38 = vsel %vm3422_vm9, %v3396_v59, %v5732_v21  ;;  %v3462_v4 = vsel %vm3422_vm9, %v3397_v43, %v5733_v18  ;;  %v9446_v59 = vld [vmem:[#allocation10_spill] sm:$0xff] }
 0x25d   : > { %v5738_v7 = vunpack.i.h.bf16 %v5736_v51  ;;  %v5737_v34 = vunpack.i.l.bf16 %v5736_v51  ;;  %v5741_v20 = vpop.permute.xlu0 %5740 }
 0x25e   : > { %v5743_v53 = vunpack.i.h.bf16 %v5741_v20  ;;  %v5742_v58 = vunpack.i.l.bf16 %v5741_v20 }
 0x25f   : > { %v3524_v35 = vsel %vm3487_vm10, %v3459_v36, %v5737_v34  ;;  %v3525_v49 = vsel %vm3487_vm10, %v3460_v15, %v5738_v7  ;;  %v5443_v7 = vunpack.i.h.bf16 %v9446_v59  ;;  %v5442_v34 = vunpack.i.l.bf16 %v9446_v59 }
 0x260   : > { %v3570_v44 = vpack.c.bf16 %v3525_v49, %v3524_v35  ;;  %v3526_v24 = vsel %vm3487_vm10, %v3461_v38, %v5742_v58  ;;  %v3527_v33 = vsel %vm3487_vm10, %v3462_v4, %v5743_v53  ;;  %v5746_v5 = vpop.permute.xlu1 %5745  ;;  %v9447_v35 = vld [vmem:[#allocation30_spill] sm:$0xff] }
 0x261   : > { %v3571_v25 = vpack.c.bf16 %v3527_v33, %v3526_v24  ;;  %v5751_v12 = vpop.permute.xlu0 %5750  ;;  %v5748_v2 = vunpack.i.h.bf16 %v5746_v5  ;;  %v5747_v39 = vunpack.i.l.bf16 %v5746_v5  ;;  %v3337_v49 = vsel %vm3292_vm7, %v9447_v35, %v5442_v34 }
 0x262   : > { %4632 = vmatprep.mubr.msk.bf16.mxu1 %vm3620_vm11, %v3570_v44  ;;  %v5753_v45 = vunpack.i.h.bf16 %v5751_v12  ;;  %v5752_v46 = vunpack.i.l.bf16 %v5751_v12  ;;  %v9448_v44 = vld [vmem:[#allocation29_spill] sm:$0xff] }
 0x263   : > { %4633 = vmatmul.mubr.msk.bf16.gmra.mrb[4].mxu1 %vm3620_vm11, %v3571_v25  ;;  %v3398_v6 = vsel %vm3357_vm8, %v3333_v3, %v5747_v39  ;;  %v3399_v62 = vsel %vm3357_vm8, %v3334_v48, %v5748_v2  ;;  %v3338_v24 = vsel %vm3292_vm7, %v9448_v44, %v5443_v7  ;;  %v9449_v39 = vld [vmem:[#allocation21_spill] sm:$0xff] }
 0x264   : > { %v5756_v63 = vpop.permute.xlu1 %5755  ;;  %v3401_v57 = vsel %vm3357_vm8, %v3336_v55, %v5753_v45  ;;  %v3400_v32 = vsel %vm3357_vm8, %v3335_v31, %v5752_v46 }
 0x265   : > { %v5761_v30 = vpop.permute.xlu0 %5760  ;;  %v5758_v42 = vunpack.i.h.bf16 %v5756_v63  ;;  %v5757_v14 = vunpack.i.l.bf16 %v5756_v63 }
 0x266   : > { %v5763_v0 = vunpack.i.h.bf16 %v5761_v30  ;;  %v5762_v60 = vunpack.i.l.bf16 %v5761_v30  ;;  %v9450_v30 = vld [vmem:[#allocation18_spill] sm:$0xff] }
 0x267   : > { %v3463_v17 = vsel %vm3422_vm9, %v3398_v6, %v5757_v14  ;;  %v3464_v23 = vsel %vm3422_vm9, %v3399_v62, %v5758_v42 }
 0x268   : > { %v5766_v37 = vpop.permute.xlu1 %5765  ;;  %v3465_v18 = vsel %vm3422_vm9, %v3400_v32, %v5762_v60  ;;  %v3466_v21 = vsel %vm3422_vm9, %v3401_v57, %v5763_v0 }
 0x269   : > { %v5768_v50 = vunpack.i.h.bf16 %v5766_v37  ;;  %v5767_v40 = vunpack.i.l.bf16 %v5766_v37 }
 0x26a   : > { %v5771_v61 = vpop.permute.xlu0 %5770 }
 0x26b   : > { %v5773_v28 = vunpack.i.h.bf16 %v5771_v61  ;;  %v5772_v29 = vunpack.i.l.bf16 %v5771_v61  ;;  %v3528_v47 = vsel %vm3487_vm10, %v3463_v17, %v5767_v40  ;;  %v3529_v13 = vsel %vm3487_vm10, %v3464_v23, %v5768_v50 }
 0x26c   : > { %v3572_v54 = vpack.c.bf16 %v3529_v13, %v3528_v47  ;;  %v5776_v10 = vpop.permute.xlu1 %5775  ;;  %v9451_v47 = vld [vmem:[#allocation34_spill] sm:$0xff] }
 0x26d   : > { %v3530_v52 = vsel %vm3487_vm10, %v3465_v18, %v5772_v29  ;;  %v3531_v27 = vsel %vm3487_vm10, %v3466_v21, %v5773_v28  ;;  %v5777_v58 = vunpack.i.l.bf16 %v5776_v10  ;;  %v5778_v33 = vunpack.i.h.bf16 %v5776_v10 }
 0x26e   : > { %v3573_v51 = vpack.c.bf16 %v3531_v27, %v3530_v52  ;;  %v5781_v43 = vpop.permute.xlu0 %5780  ;;  %4636 = vmatprep.mubr.msk.bf16.mxu1 %vm3620_vm11, %v3572_v54  ;;  %v9452_v54 = vld [vmem:[#allocation19_spill] sm:$0xff] }
 0x26f   : > { %v5783_v36 = vunpack.i.h.bf16 %v5781_v43  ;;  %v5782_v15 = vunpack.i.l.bf16 %v5781_v43  ;;  %v3339_v63 = vsel %vm3292_vm7, %v9449_v39, %v5777_v58  ;;  %v3340_v42 = vsel %vm3292_vm7, %v9450_v30, %v5778_v33  ;;  %v9453_v58 = vld [vmem:[#allocation20_spill] sm:$0xff] }
 0x270   : > { %4637 = vmatmul.mubr.msk.bf16.gmra.mrb[8].mxu1 %vm3620_vm11, %v3573_v51  ;;  %v5786_v20 = vpop.permute.xlu1 %5785 }
 0x271   : > { %v5787_v5 = vunpack.i.l.bf16 %v5786_v20  ;;  %v3402_v12 = vsel %vm3357_vm8, %v3337_v49, %v5782_v15  ;;  %v3403_v1 = vsel %vm3357_vm8, %v3338_v24, %v5783_v36  ;;  %v5788_v26 = vunpack.i.h.bf16 %v5786_v20  ;;  %v9454_v49 = vld [vmem:[#allocation37_spill] sm:$0xff] }
 0x272   : > { %v5791_v53 = vpop.permute.xlu0 %5790 }
 0x273   : > { %v5793_v38 = vunpack.i.h.bf16 %v5791_v53  ;;  %v5792_v4 = vunpack.i.l.bf16 %v5791_v53  ;;  %v3404_v14 = vsel %vm3357_vm8, %v3339_v63, %v5787_v5  ;;  %v3405_v48 = vsel %vm3357_vm8, %v3340_v42, %v5788_v26 }
 0x274   : > { %v5796_v25 = vpop.permute.xlu1 %5795 }
 0x275   : > { %v5798_v11 = vunpack.i.h.bf16 %v5796_v25  ;;  %v5797_v56 = vunpack.i.l.bf16 %v5796_v25  ;;  %v3467_v45 = vsel %vm3422_vm9, %v3402_v12, %v5792_v4  ;;  %v3468_v46 = vsel %vm3422_vm9, %v3403_v1, %v5793_v38 }
 0x276   : > { %v5801_v16 = vpop.permute.xlu0 %5800 }
 0x277   : > { %v5803_v22 = vunpack.i.h.bf16 %v5801_v16  ;;  %v5802_v2 = vunpack.i.l.bf16 %v5801_v16  ;;  %v3469_v19 = vsel %vm3422_vm9, %v3404_v14, %v5797_v56  ;;  %v3470_v55 = vsel %vm3422_vm9, %v3405_v48, %v5798_v11 }
 0x278   : > { %v5806_v41 = vpop.permute.xlu1 %5805 }
 0x279   : > { %v3532_v9 = vsel %vm3487_vm10, %v3467_v45, %v5802_v2  ;;  %v3533_v3 = vsel %vm3487_vm10, %v3468_v46, %v5803_v22  ;;  %v5808_v60 = vunpack.i.h.bf16 %v5806_v41  ;;  %v5807_v8 = vunpack.i.l.bf16 %v5806_v41 }
 0x27a   : > { %v3574_v0 = vpack.c.bf16 %v3533_v3, %v3532_v9  ;;  %v5811_v31 = vpop.permute.xlu0 %5810 }
 0x27b   : > { %v3534_v6 = vsel %vm3487_vm10, %v3469_v19, %v5807_v8  ;;  %v3535_v62 = vsel %vm3487_vm10, %v3470_v55, %v5808_v60  ;;  %v5813_v50 = vunpack.i.h.bf16 %v5811_v31  ;;  %v5812_v40 = vunpack.i.l.bf16 %v5811_v31  ;;  %v9455_v8 = vld [vmem:[#allocation76_spill] sm:$0xff] }
 0x27c   : > { %4640 = vmatprep.mubr.msk.bf16.mxu1 %vm3620_vm11, %v3574_v0  ;;  %v3575_v37 = vpack.c.bf16 %v3535_v62, %v3534_v6  ;;  %v5816_v57 = vpop.permute.xlu1 %5815  ;;  %v9456_v19 = vld [vmem:[#allocation36_spill] sm:$0xff] }
 0x27d   : > { %v5817_v29 = vunpack.i.l.bf16 %v5816_v57  ;;  %v3341_v13 = vsel %vm3292_vm7, %v9451_v47, %v5812_v40  ;;  %v3342_v52 = vsel %vm3292_vm7, %v9452_v54, %v5813_v50  ;;  %v5818_v27 = vunpack.i.h.bf16 %v5816_v57 }
 0x27e   : > { %v5821_v32 = vpop.permute.xlu0 %5820  ;;  %4641 = vmatmul.mubr.msk.bf16.gmra.mrb[12].mxu1 %vm3620_vm11, %v3575_v37 }
 0x27f   : > { %v5823_v17 = vunpack.i.h.bf16 %v5821_v32  ;;  %v5822_v23 = vunpack.i.l.bf16 %v5821_v32  ;;  %v3343_v38 = vsel %vm3292_vm7, %v9453_v58, %v5817_v29  ;;  %v3344_v44 = vsel %vm3292_vm7, %v9454_v49, %v5818_v27  ;;  %v9457_v29 = vld [vmem:[#allocation77_spill] sm:$0xff] }
 0x280   : > { %v5826_v61 = vpop.permute.xlu1 %5825 }
 0x281   : > { %v5827_v10 = vunpack.i.l.bf16 %v5826_v61  ;;  %v3406_v43 = vsel %vm3357_vm8, %v3341_v13, %v5822_v23  ;;  %v3407_v59 = vsel %vm3357_vm8, %v3342_v52, %v5823_v17  ;;  %v5828_v7 = vunpack.i.h.bf16 %v5826_v61  ;;  %v9458_v13 = vld [vmem:[#allocation27_spill] sm:$0xff] }
 0x282   : > { %v5831_v28 = vpop.permute.xlu0 %5830 }
 0x283   : > { %v5833_v18 = vunpack.i.h.bf16 %v5831_v28  ;;  %v5832_v21 = vunpack.i.l.bf16 %v5831_v28  ;;  %v3408_v24 = vsel %vm3357_vm8, %v3343_v38, %v5827_v10  ;;  %v3409_v12 = vsel %vm3357_vm8, %v3344_v44, %v5828_v7 }
 0x284   : > { %v5836_v51 = vpop.permute.xlu1 %5835 }
 0x285   : > { %v5838_v20 = vunpack.i.h.bf16 %v5836_v51  ;;  %v5837_v36 = vunpack.i.l.bf16 %v5836_v51  ;;  %v3471_v4 = vsel %vm3422_vm9, %v3406_v43, %v5832_v21  ;;  %v3472_v35 = vsel %vm3422_vm9, %v3407_v59, %v5833_v18 }
 0x286   : > { %v5841_v34 = vpop.permute.xlu0 %5840 }
 0x287   : > { %v5843_v15 = vunpack.i.h.bf16 %v5841_v34  ;;  %v5842_v53 = vunpack.i.l.bf16 %v5841_v34  ;;  %v3473_v56 = vsel %vm3422_vm9, %v3408_v24, %v5837_v36  ;;  %v3474_v22 = vsel %vm3422_vm9, %v3409_v12, %v5838_v20 }
 0x288   : > { %v5846_v25 = vpop.permute.xlu1 %5845 }
 0x289   : > { %v3536_v33 = vsel %vm3487_vm10, %v3471_v4, %v5842_v53  ;;  %v3537_v5 = vsel %vm3487_vm10, %v3472_v35, %v5843_v15  ;;  %v5848_v26 = vunpack.i.h.bf16 %v5846_v25  ;;  %v5847_v16 = vunpack.i.l.bf16 %v5846_v25 }
 0x28a   : > { %v3576_v1 = vpack.c.bf16 %v3537_v5, %v3536_v33  ;;  %v5851_v11 = vpop.permute.xlu0 %5850 }
 0x28b   : > { %v3538_v2 = vsel %vm3487_vm10, %v3473_v56, %v5847_v16  ;;  %v3539_v39 = vsel %vm3487_vm10, %v3474_v22, %v5848_v26  ;;  %v5853_v30 = vunpack.i.h.bf16 %v5851_v11  ;;  %v5852_v42 = vunpack.i.l.bf16 %v5851_v11  ;;  %v9459_v16 = vld [vmem:[#allocation23_spill] sm:$0xff]  ;;  %v9460_v56 = vld [vmem:[#allocation25_spill] sm:$0xff] }
 0x28c   : > { %4644 = vmatprep.mubr.msk.bf16.mxu1 %vm3620_vm11, %v3576_v1  ;;  %v3577_v63 = vpack.c.bf16 %v3539_v39, %v3538_v2  ;;  %v5856_v45 = vpop.permute.xlu1 %5855 }
 0x28d   : > { %v5857_v48 = vunpack.i.l.bf16 %v5856_v45  ;;  %v3345_v31 = vsel %vm3292_vm7, %v9455_v8, %v5852_v42  ;;  %v3346_v55 = vsel %vm3292_vm7, %v9456_v19, %v5853_v30  ;;  %v5858_v6 = vunpack.i.h.bf16 %v5856_v45 }
 0x28e   : > { %v5861_v46 = vpop.permute.xlu0 %5860  ;;  %4645 = vmatmul.mubr.msk.bf16.gmra.mrb[16].mxu1 %vm3620_vm11, %v3577_v63 }
 0x28f   : > { %v5863_v9 = vunpack.i.h.bf16 %v5861_v46  ;;  %v5862_v3 = vunpack.i.l.bf16 %v5861_v46  ;;  %v3347_v18 = vsel %vm3292_vm7, %v9457_v29, %v5857_v48  ;;  %v3348_v54 = vsel %vm3292_vm7, %v9458_v13, %v5858_v6  ;;  %v9461_v48 = vld [vmem:[#allocation26_spill] sm:$0xff] }
 0x290   : > { %v5866_v14 = vpop.permute.xlu1 %5865 }
 0x291   : > { %v5867_v62 = vunpack.i.l.bf16 %v5866_v14  ;;  %v3410_v57 = vsel %vm3357_vm8, %v3345_v31, %v5862_v3  ;;  %v3411_v32 = vsel %vm3357_vm8, %v3346_v55, %v5863_v9  ;;  %v5868_v50 = vunpack.i.h.bf16 %v5866_v14  ;;  %v9462_v31 = vld [vmem:[#allocation35_spill] sm:$0xff] }
 0x292   : > { %v5871_v41 = vpop.permute.xlu0 %5870 }
 0x293   : > { %v5873_v0 = vunpack.i.h.bf16 %v5871_v41  ;;  %v5872_v60 = vunpack.i.l.bf16 %v5871_v41  ;;  %v3412_v52 = vsel %vm3357_vm8, %v3347_v18, %v5867_v62  ;;  %v3413_v43 = vsel %vm3357_vm8, %v3348_v54, %v5868_v50 }
 0x294   : > { %v5876_v37 = vpop.permute.xlu1 %5875 }
 0x295   : > { %v5878_v61 = vunpack.i.h.bf16 %v5876_v37  ;;  %v5877_v17 = vunpack.i.l.bf16 %v5876_v37  ;;  %v3475_v21 = vsel %vm3422_vm9, %v3410_v57, %v5872_v60  ;;  %v3476_v47 = vsel %vm3422_vm9, %v3411_v32, %v5873_v0 }
 0x296   : > { %v5881_v40 = vpop.permute.xlu0 %5880 }
 0x297   : > { %v5883_v23 = vunpack.i.h.bf16 %v5881_v40  ;;  %v5882_v28 = vunpack.i.l.bf16 %v5881_v40  ;;  %v3477_v36 = vsel %vm3422_vm9, %v3412_v52, %v5877_v17  ;;  %v3478_v15 = vsel %vm3422_vm9, %v3413_v43, %v5878_v61 }
 0x298   : > { %v5886_v51 = vpop.permute.xlu1 %5885 }
 0x299   : > { %v3540_v27 = vsel %vm3487_vm10, %v3475_v21, %v5882_v28  ;;  %v3541_v10 = vsel %vm3487_vm10, %v3476_v47, %v5883_v23  ;;  %v5888_v7 = vunpack.i.h.bf16 %v5886_v51  ;;  %v5887_v34 = vunpack.i.l.bf16 %v5886_v51 }
 0x29a   : > { %v3578_v59 = vpack.c.bf16 %v3541_v10, %v3540_v27  ;;  %v5891_v20 = vpop.permute.xlu0 %5890 }
 0x29b   : > { %v3542_v53 = vsel %vm3487_vm10, %v3477_v36, %v5887_v34  ;;  %v3543_v58 = vsel %vm3487_vm10, %v3478_v15, %v5888_v7  ;;  %v5893_v49 = vunpack.i.h.bf16 %v5891_v20  ;;  %v5892_v44 = vunpack.i.l.bf16 %v5891_v20  ;;  %v9463_v34 = vld [vmem:[#allocation78_spill] sm:$0xff]  ;;  %v9464_v36 = vld [vmem:[#allocation32_spill] sm:$0xff] }
 0x29c   : > { %4648 = vmatprep.mubr.msk.bf16.mxu1 %vm3620_vm11, %v3578_v59  ;;  %v3579_v38 = vpack.c.bf16 %v3543_v58, %v3542_v53  ;;  %v5896_v4 = vpop.permute.xlu1 %5895 }
 0x29d   : > { %v5897_v12 = vunpack.i.l.bf16 %v5896_v4  ;;  %v3349_v11 = vsel %vm3292_vm7, %v9459_v16, %v5892_v44  ;;  %v3350_v22 = vsel %vm3292_vm7, %v9460_v56, %v5893_v49  ;;  %v5898_v2 = vunpack.i.h.bf16 %v5896_v4 }
 0x29e   : > { %v5901_v35 = vpop.permute.xlu0 %5900  ;;  %4649 = vmatmul.mubr.msk.bf16.gmra.mrb[20].mxu1 %vm3620_vm11, %v3579_v38 }
 0x29f   : > { %v5903_v33 = vunpack.i.h.bf16 %v5901_v35  ;;  %v5902_v5 = vunpack.i.l.bf16 %v5901_v35  ;;  %v3351_v0 = vsel %vm3292_vm7, %v9461_v48, %v5897_v12  ;;  %v3352_v19 = vsel %vm3292_vm7, %v9462_v31, %v5898_v2  ;;  %v9465_v12 = vld [vmem:[#allocation51_spill] sm:$0xff] }
 0x2a0   : > { %v5906_v24 = vpop.permute.xlu1 %5905 }
 0x2a1   : > { %v5907_v39 = vunpack.i.l.bf16 %v5906_v24  ;;  %v3414_v45 = vsel %vm3357_vm8, %v3349_v11, %v5902_v5  ;;  %v3415_v46 = vsel %vm3357_vm8, %v3350_v22, %v5903_v33  ;;  %v5908_v30 = vunpack.i.h.bf16 %v5906_v24  ;;  %v9466_v11 = vld [vmem:[#allocation52_spill] sm:$0xff] }
 0x2a2   : > { %v5911_v25 = vpop.permute.xlu0 %5910 }
 0x2a3   : > { %v5913_v1 = vunpack.i.h.bf16 %v5911_v25  ;;  %v5912_v26 = vunpack.i.l.bf16 %v5911_v25  ;;  %v3416_v55 = vsel %vm3357_vm8, %v3351_v0, %v5907_v39  ;;  %v3417_v57 = vsel %vm3357_vm8, %v3352_v19, %v5908_v30 }
 0x2a4   : > { %v5916_v63 = vpop.permute.xlu1 %5915 }
 0x2a5   : > { %v5918_v14 = vunpack.i.h.bf16 %v5916_v63  ;;  %v5917_v9 = vunpack.i.l.bf16 %v5916_v63  ;;  %v3479_v60 = vsel %vm3422_vm9, %v3414_v45, %v5912_v26  ;;  %v3480_v8 = vsel %vm3422_vm9, %v3415_v46, %v5913_v1 }
 0x2a6   : > { %v5921_v42 = vpop.permute.xlu0 %5920 }
 0x2a7   : > { %v5923_v3 = vunpack.i.h.bf16 %v5921_v42  ;;  %v5922_v41 = vunpack.i.l.bf16 %v5921_v42  ;;  %v3481_v17 = vsel %vm3422_vm9, %v3416_v55, %v5917_v9  ;;  %v3482_v23 = vsel %vm3422_vm9, %v3417_v57, %v5918_v14 }
 0x2a8   : > { %v5926_v37 = vpop.permute.xlu1 %5925 }
 0x2a9   : > { %v3544_v6 = vsel %vm3487_vm10, %v3479_v60, %v5922_v41  ;;  %v3545_v62 = vsel %vm3487_vm10, %v3480_v8, %v5923_v3  ;;  %v5928_v50 = vunpack.i.h.bf16 %v5926_v37  ;;  %v5927_v40 = vunpack.i.l.bf16 %v5926_v37 }
 0x2aa   : > { %v3580_v32 = vpack.c.bf16 %v3545_v62, %v3544_v6  ;;  %v5931_v61 = vpop.permute.xlu0 %5930 }
 0x2ab   : > { %v3546_v28 = vsel %vm3487_vm10, %v3481_v17, %v5927_v40  ;;  %v3547_v29 = vsel %vm3487_vm10, %v3482_v23, %v5928_v50  ;;  %v5933_v13 = vunpack.i.h.bf16 %v5931_v61  ;;  %v5932_v54 = vunpack.i.l.bf16 %v5931_v61 }
 0x2ac   : > { %4652 = vmatprep.mubr.msk.bf16.mxu1 %vm3620_vm11, %v3580_v32  ;;  %v3581_v18 = vpack.c.bf16 %v3547_v29, %v3546_v28  ;;  %v5936_v21 = vpop.permute.xlu1 %5935 }
 0x2ad   : > { %v5937_v43 = vunpack.i.l.bf16 %v5936_v21  ;;  %v3353_v20 = vsel %vm3292_vm7, %v9463_v34, %v5932_v54  ;;  %v3354_v15 = vsel %vm3292_vm7, %v9464_v36, %v5933_v13  ;;  %v5938_v53 = vunpack.i.h.bf16 %v5936_v21 }
 0x2ae   : > { %v5941_v47 = vpop.permute.xlu0 %5940  ;;  %4653 = vmatmul.mubr.msk.bf16.gmra.mrb[24].mxu1 %vm3620_vm11, %v3581_v18 }
 0x2af   : > { %v5943_v27 = vunpack.i.h.bf16 %v5941_v47  ;;  %v5942_v10 = vunpack.i.l.bf16 %v5941_v47  ;;  %v3355_v1 = vsel %vm3292_vm7, %v9465_v12, %v5937_v43  ;;  %v3356_v56 = vsel %vm3292_vm7, %v9466_v11, %v5938_v53 }
 0x2b0   : > { %v5946_v52 = vpop.permute.xlu1 %5945 }
 0x2b1   : > { %v5947_v58 = vunpack.i.l.bf16 %v5946_v52  ;;  %v3418_v4 = vsel %vm3357_vm8, %v3353_v20, %v5942_v10  ;;  %v3419_v35 = vsel %vm3357_vm8, %v3354_v15, %v5943_v27  ;;  %v5948_v49 = vunpack.i.h.bf16 %v5946_v52 }
 0x2b2   : > { %v5951_v51 = vpop.permute.xlu0 %5950 }
 0x2b3   : > { %v5953_v59 = vunpack.i.h.bf16 %v5951_v51  ;;  %v5952_v7 = vunpack.i.l.bf16 %v5951_v51  ;;  %v3420_v22 = vsel %vm3357_vm8, %v3355_v1, %v5947_v58  ;;  %v3421_v45 = vsel %vm3357_vm8, %v3356_v56, %v5948_v49 }
 0x2b4   : > { %v5956_v38 = vpop.permute.xlu1 %5955 }
 0x2b5   : > { %v5958_v24 = vunpack.i.h.bf16 %v5956_v38  ;;  %v5957_v33 = vunpack.i.l.bf16 %v5956_v38  ;;  %v3483_v26 = vsel %vm3422_vm9, %v3418_v4, %v5952_v7  ;;  %v3484_v16 = vsel %vm3422_vm9, %v3419_v35, %v5953_v59 }
 0x2b6   : > { %v5961_v44 = vpop.permute.xlu0 %5960 }
 0x2b7   : > { %v5963_v5 = vunpack.i.h.bf16 %v5961_v44  ;;  %v5962_v25 = vunpack.i.l.bf16 %v5961_v44  ;;  %v3485_v14 = vsel %vm3422_vm9, %v3420_v22, %v5957_v33  ;;  %v3486_v9 = vsel %vm3422_vm9, %v3421_v45, %v5958_v24 }
 0x2b8   : > { %v5966_v63 = vpop.permute.xlu1 %5965 }
 0x2b9   : > { %v3548_v2 = vsel %vm3487_vm10, %v3483_v26, %v5962_v25  ;;  %v3549_v39 = vsel %vm3487_vm10, %v3484_v16, %v5963_v5  ;;  %v5968_v30 = vunpack.i.h.bf16 %v5966_v63  ;;  %v5967_v42 = vunpack.i.l.bf16 %v5966_v63 }
 0x2ba   : > { %v3582_v46 = vpack.c.bf16 %v3549_v39, %v3548_v2 }
 0x2bb   : > { %v3550_v3 = vsel %vm3487_vm10, %v3485_v14, %v5967_v42  ;;  %v3551_v41 = vsel %vm3487_vm10, %v3486_v9, %v5968_v30 }
 0x2bc   : > { %4656 = vmatprep.mubr.msk.bf16.mxu1 %vm3620_vm11, %v3582_v46  ;;  %v3583_v48 = vpack.c.bf16 %v3551_v41, %v3550_v3 }
 0x2be   : > { %4657 = vmatmul.mubr.msk.bf16.gmra.mrb[28].mxu1 %vm3620_vm11, %v3583_v48 }
 0x2ca   : > { %v4598_v0 = vpop.f32.mrb[0].mxu0 }
 0x2cb   : > { %4012 = vst.msk [vmem:[%s8672_s16 + $0x10] sm:$0xff] %vm191_vm0, %v4598_v0  ;;  %v3755_v60 = vpop.f32.mrb[1].mxu0  ;;  %v4209_v55 = vmul.f32 %v4598_v0, %v4598_v0  ;;  %v4077_v32 = vsel %vm191_vm0, %v4598_v0, 0.0 }
 0x2cc   : > { %4010 = vst.msk [vmem:[%s8672_s16] sm:$0xff] %vm191_vm0, %v3755_v60  ;;  %v4207_v8 = vmul.f32 %v3755_v60, %v3755_v60  ;;  %v4599_v31 = vpop.f32.mrb[2].mxu0  ;;  %v4074_v6 = vsel %vm191_vm0, %v3755_v60, 0.0 }
 0x2cd   : > { %4013 = vst.msk [vmem:[%s8672_s16 + $0x18] sm:$0xff] %vm191_vm0, %v4599_v31  ;;  %v3758_v19 = vpop.f32.mrb[3].mxu0  ;;  %v4210_v40 = vmul.f32 %v4599_v31, %v4599_v31  ;;  %v4274_v28 = vsel %vm191_vm0, %v4209_v55, 0.0  ;;  %v4079_v29 = vsel %vm191_vm0, %v4599_v31, 0.0 }
 0x2ce   : > { %4011 = vst.msk [vmem:[%s8672_s16 + $0x8] sm:$0xff] %vm191_vm0, %v3758_v19  ;;  %v4075_v62 = vsel %vm191_vm0, %v3758_v19, 0.0  ;;  %v4208_v37 = vmul.f32 %v3758_v19, %v3758_v19  ;;  %v4271_v50 = vsel %vm191_vm0, %v4207_v8, 0.0 }
 0x2cf   : > { %v4076_v57 = vadd.f32 %v4075_v62, %v4074_v6  ;;  %v4276_v47 = vsel %vm191_vm0, %v4210_v40, 0.0 }
 0x2d0   : > { %v4272_v61 = vsel %vm191_vm0, %v4208_v37, 0.0 }
 0x2d1   : > { %v4078_v17 = vadd.f32 %v4077_v32, %v4076_v57  ;;  %v4273_v23 = vadd.f32 %v4272_v61, %v4271_v50 }
 0x2d3   : > { %v4275_v18 = vadd.f32 %v4274_v28, %v4273_v23  ;;  %v4080_v21 = vadd.f32 %v4079_v29, %v4078_v17 }
 0x2d5   : > { %v4277_v13 = vadd.f32 %v4276_v47, %v4275_v18 }
 0x2d6   : > { %v4602_v54 = vpop.f32.mrb[4].mxu0 }
 0x2d7   : > { %4016 = vst.msk [vmem:[%s8672_s16 + $0x30] sm:$0xff] %vm191_vm0, %v4602_v54  ;;  %v3771_v52 = vpop.f32.mrb[5].mxu0  ;;  %v4213_v7 = vmul.f32 %v4602_v54, %v4602_v54  ;;  %v4085_v58 = vsel %vm191_vm0, %v4602_v54, 0.0 }
 0x2d8   : > { %4014 = vst.msk [vmem:[%s8672_s16 + $0x20] sm:$0xff] %vm191_vm0, %v3771_v52  ;;  %v4081_v27 = vsel %vm191_vm0, %v3771_v52, 0.0  ;;  %v4211_v10 = vmul.f32 %v3771_v52, %v3771_v52  ;;  %v4603_v51 = vpop.f32.mrb[6].mxu0 }
 0x2d9   : > { %v4082_v43 = vadd.f32 %v4081_v27, %v4080_v21  ;;  %4017 = vst.msk [vmem:[%s8672_s16 + $0x38] sm:$0xff] %vm191_vm0, %v4603_v51  ;;  %v3774_v59 = vpop.f32.mrb[7].mxu0  ;;  %v4214_v38 = vmul.f32 %v4603_v51, %v4603_v51  ;;  %v4282_v44 = vsel %vm191_vm0, %v4213_v7, 0.0  ;;  %v4087_v24 = vsel %vm191_vm0, %v4603_v51, 0.0 }
 0x2da   : > { %v4278_v34 = vsel %vm191_vm0, %v4211_v10, 0.0  ;;  %4015 = vst.msk [vmem:[%s8672_s16 + $0x28] sm:$0xff] %vm191_vm0, %v3774_v59  ;;  %v4083_v20 = vsel %vm191_vm0, %v3774_v59, 0.0  ;;  %v4212_v36 = vmul.f32 %v3774_v59, %v3774_v59 }
 0x2db   : > { %v4279_v15 = vadd.f32 %v4278_v34, %v4277_v13  ;;  %v4084_v53 = vadd.f32 %v4083_v20, %v4082_v43  ;;  %v4284_v25 = vsel %vm191_vm0, %v4214_v38, 0.0 }
 0x2dc   : > { %v4280_v4 = vsel %vm191_vm0, %v4212_v36, 0.0 }
 0x2dd   : > { %v4086_v35 = vadd.f32 %v4085_v58, %v4084_v53  ;;  %v4281_v49 = vadd.f32 %v4280_v4, %v4279_v15 }
 0x2df   : > { %v4283_v33 = vadd.f32 %v4282_v44, %v4281_v49  ;;  %v4088_v5 = vadd.f32 %v4087_v24, %v4086_v35 }
 0x2e1   : > { %v4285_v12 = vadd.f32 %v4284_v25, %v4283_v33 }
 0x2e2   : > { %v4606_v1 = vpop.f32.mrb[8].mxu0 }
 0x2e3   : > { %4020 = vst.msk [vmem:[%s8672_s16 + $0x50] sm:$0xff] %vm191_vm0, %v4606_v1  ;;  %v3787_v26 = vpop.f32.mrb[9].mxu0  ;;  %v4217_v39 = vmul.f32 %v4606_v1, %v4606_v1  ;;  %v4093_v14 = vsel %vm191_vm0, %v4606_v1, 0.0 }
 0x2e4   : > { %4018 = vst.msk [vmem:[%s8672_s16 + $0x40] sm:$0xff] %vm191_vm0, %v3787_v26  ;;  %v4089_v16 = vsel %vm191_vm0, %v3787_v26, 0.0  ;;  %v4215_v11 = vmul.f32 %v3787_v26, %v3787_v26  ;;  %v4607_v56 = vpop.f32.mrb[10].mxu0 }
 0x2e5   : > { %v4090_v22 = vadd.f32 %v4089_v16, %v4088_v5  ;;  %4021 = vst.msk [vmem:[%s8672_s16 + $0x58] sm:$0xff] %vm191_vm0, %v4607_v56  ;;  %v3790_v2 = vpop.f32.mrb[11].mxu0  ;;  %v4218_v9 = vmul.f32 %v4607_v56, %v4607_v56  ;;  %v4290_v0 = vsel %vm191_vm0, %v4217_v39, 0.0  ;;  %v4095_v60 = vsel %vm191_vm0, %v4607_v56, 0.0 }
 0x2e6   : > { %v4286_v63 = vsel %vm191_vm0, %v4215_v11, 0.0  ;;  %4019 = vst.msk [vmem:[%s8672_s16 + $0x48] sm:$0xff] %vm191_vm0, %v3790_v2  ;;  %v4091_v45 = vsel %vm191_vm0, %v3790_v2, 0.0  ;;  %v4216_v46 = vmul.f32 %v3790_v2, %v3790_v2 }
 0x2e7   : > { %v4287_v30 = vadd.f32 %v4286_v63, %v4285_v12  ;;  %v4092_v42 = vadd.f32 %v4091_v45, %v4090_v22  ;;  %v4292_v19 = vsel %vm191_vm0, %v4218_v9, 0.0 }
 0x2e8   : > { %v4288_v3 = vsel %vm191_vm0, %v4216_v46, 0.0 }
 0x2e9   : > { %v4094_v41 = vadd.f32 %v4093_v14, %v4092_v42  ;;  %v4289_v48 = vadd.f32 %v4288_v3, %v4287_v30 }
 0x2eb   : > { %v4291_v8 = vadd.f32 %v4290_v0, %v4289_v48  ;;  %v4096_v31 = vadd.f32 %v4095_v60, %v4094_v41 }
 0x2ed   : > { %v4293_v55 = vadd.f32 %v4292_v19, %v4291_v8 }
 0x2ee   : > { %v4610_v6 = vpop.f32.mrb[12].mxu0 }
 0x2ef   : > { %4024 = vst.msk [vmem:[%s8672_s16 + $0x70] sm:$0xff] %vm191_vm0, %v4610_v6  ;;  %v3803_v62 = vpop.f32.mrb[13].mxu0  ;;  %v4221_v61 = vmul.f32 %v4610_v6, %v4610_v6  ;;  %v4101_v21 = vsel %vm191_vm0, %v4610_v6, 0.0 }
 0x2f0   : > { %4022 = vst.msk [vmem:[%s8672_s16 + $0x60] sm:$0xff] %vm191_vm0, %v3803_v62  ;;  %v4097_v37 = vsel %vm191_vm0, %v3803_v62, 0.0  ;;  %v4219_v57 = vmul.f32 %v3803_v62, %v3803_v62  ;;  %v4611_v32 = vpop.f32.mrb[14].mxu0 }
 0x2f1   : > { %v4098_v50 = vadd.f32 %v4097_v37, %v4096_v31  ;;  %4025 = vst.msk [vmem:[%s8672_s16 + $0x78] sm:$0xff] %vm191_vm0, %v4611_v32  ;;  %v3806_v40 = vpop.f32.mrb[15].mxu0  ;;  %v4222_v47 = vmul.f32 %v4611_v32, %v4611_v32  ;;  %v4298_v27 = vsel %vm191_vm0, %v4221_v61, 0.0  ;;  %v4103_v10 = vsel %vm191_vm0, %v4611_v32, 0.0 }
 0x2f2   : > { %v4294_v17 = vsel %vm191_vm0, %v4219_v57, 0.0  ;;  %4023 = vst.msk [vmem:[%s8672_s16 + $0x68] sm:$0xff] %vm191_vm0, %v3806_v40  ;;  %v4099_v23 = vsel %vm191_vm0, %v3806_v40, 0.0  ;;  %v4220_v28 = vmul.f32 %v3806_v40, %v3806_v40 }
 0x2f3   : > { %v4295_v29 = vadd.f32 %v4294_v17, %v4293_v55  ;;  %v4100_v18 = vadd.f32 %v4099_v23, %v4098_v50  ;;  %v4300_v59 = vsel %vm191_vm0, %v4222_v47, 0.0 }
 0x2f4   : > { %v4296_v13 = vsel %vm191_vm0, %v4220_v28, 0.0 }
 0x2f5   : > { %v4102_v54 = vadd.f32 %v4101_v21, %v4100_v18  ;;  %v4297_v52 = vadd.f32 %v4296_v13, %v4295_v29 }
 0x2f7   : > { %v4299_v51 = vadd.f32 %v4298_v27, %v4297_v52  ;;  %v4104_v43 = vadd.f32 %v4103_v10, %v4102_v54 }
 0x2f9   : > { %v4301_v7 = vadd.f32 %v4300_v59, %v4299_v51 }
 0x2fa   : > { %v4614_v34 = vpop.f32.mrb[16].mxu0 }
 0x2fb   : > { %4028 = vst.msk [vmem:[%s8672_s16 + $0x90] sm:$0xff] %vm191_vm0, %v4614_v34  ;;  %v3819_v20 = vpop.f32.mrb[17].mxu0  ;;  %v4225_v4 = vmul.f32 %v4614_v34, %v4614_v34  ;;  %v4109_v5 = vsel %vm191_vm0, %v4614_v34, 0.0 }
 0x2fc   : > { %4026 = vst.msk [vmem:[%s8672_s16 + $0x80] sm:$0xff] %vm191_vm0, %v3819_v20  ;;  %v4105_v36 = vsel %vm191_vm0, %v3819_v20, 0.0  ;;  %v4223_v15 = vmul.f32 %v3819_v20, %v3819_v20  ;;  %v4615_v53 = vpop.f32.mrb[18].mxu0 }
 0x2fd   : > { %v4106_v58 = vadd.f32 %v4105_v36, %v4104_v43  ;;  %4029 = vst.msk [vmem:[%s8672_s16 + $0x98] sm:$0xff] %vm191_vm0, %v4615_v53  ;;  %v3822_v38 = vpop.f32.mrb[19].mxu0  ;;  %v4226_v25 = vmul.f32 %v4615_v53, %v4615_v53  ;;  %v4306_v16 = vsel %vm191_vm0, %v4225_v4, 0.0  ;;  %v4111_v11 = vsel %vm191_vm0, %v4615_v53, 0.0 }
 0x2fe   : > { %v4302_v35 = vsel %vm191_vm0, %v4223_v15, 0.0  ;;  %4027 = vst.msk [vmem:[%s8672_s16 + $0x88] sm:$0xff] %vm191_vm0, %v3822_v38  ;;  %v4107_v49 = vsel %vm191_vm0, %v3822_v38, 0.0  ;;  %v4224_v44 = vmul.f32 %v3822_v38, %v3822_v38 }
 0x2ff   : > { %v4303_v24 = vadd.f32 %v4302_v35, %v4301_v7  ;;  %v4108_v33 = vadd.f32 %v4107_v49, %v4106_v58  ;;  %v4308_v2 = vsel %vm191_vm0, %v4226_v25, 0.0 }
 0x300   : > { %v4304_v12 = vsel %vm191_vm0, %v4224_v44, 0.0 }
 0x301   : > { %v4110_v1 = vadd.f32 %v4109_v5, %v4108_v33  ;;  %v4305_v26 = vadd.f32 %v4304_v12, %v4303_v24 }
 0x303   : > { %v4307_v56 = vadd.f32 %v4306_v16, %v4305_v26  ;;  %v4112_v22 = vadd.f32 %v4111_v11, %v4110_v1 }
 0x305   : > { %v4309_v39 = vadd.f32 %v4308_v2, %v4307_v56 }
 0x306   : > { %v4618_v63 = vpop.f32.mrb[20].mxu0 }
 0x307   : > { %4032 = vst.msk [vmem:[%s8672_s16 + $0xb0] sm:$0xff] %vm191_vm0, %v4618_v63  ;;  %v3835_v45 = vpop.f32.mrb[21].mxu0  ;;  %v4229_v3 = vmul.f32 %v4618_v63, %v4618_v63  ;;  %v4117_v31 = vsel %vm191_vm0, %v4618_v63, 0.0 }
 0x308   : > { %4030 = vst.msk [vmem:[%s8672_s16 + $0xa0] sm:$0xff] %vm191_vm0, %v3835_v45  ;;  %v4113_v46 = vsel %vm191_vm0, %v3835_v45, 0.0  ;;  %v4227_v30 = vmul.f32 %v3835_v45, %v3835_v45  ;;  %v4619_v42 = vpop.f32.mrb[22].mxu0 }
 0x309   : > { %v4114_v14 = vadd.f32 %v4113_v46, %v4112_v22  ;;  %4033 = vst.msk [vmem:[%s8672_s16 + $0xb8] sm:$0xff] %vm191_vm0, %v4619_v42  ;;  %v3838_v9 = vpop.f32.mrb[23].mxu0  ;;  %v4230_v19 = vmul.f32 %v4619_v42, %v4619_v42  ;;  %v4314_v37 = vsel %vm191_vm0, %v4229_v3, 0.0  ;;  %v4119_v57 = vsel %vm191_vm0, %v4619_v42, 0.0 }
 0x30a   : > { %v4310_v41 = vsel %vm191_vm0, %v4227_v30, 0.0  ;;  %4031 = vst.msk [vmem:[%s8672_s16 + $0xa8] sm:$0xff] %vm191_vm0, %v3838_v9  ;;  %v4115_v48 = vsel %vm191_vm0, %v3838_v9, 0.0  ;;  %v4228_v0 = vmul.f32 %v3838_v9, %v3838_v9 }
 0x30b   : > { %v4311_v60 = vadd.f32 %v4310_v41, %v4309_v39  ;;  %v4116_v8 = vadd.f32 %v4115_v48, %v4114_v14  ;;  %v4316_v40 = vsel %vm191_vm0, %v4230_v19, 0.0 }
 0x30c   : > { %v4312_v55 = vsel %vm191_vm0, %v4228_v0, 0.0 }
 0x30d   : > { %v4118_v6 = vadd.f32 %v4117_v31, %v4116_v8  ;;  %v4313_v62 = vadd.f32 %v4312_v55, %v4311_v60 }
 0x30f   : > { %v4315_v32 = vadd.f32 %v4314_v37, %v4313_v62  ;;  %v4120_v50 = vadd.f32 %v4119_v57, %v4118_v6 }
 0x311   : > { %v4317_v61 = vadd.f32 %v4316_v40, %v4315_v32 }
 0x312   : > { %v4622_v17 = vpop.f32.mrb[24].mxu0 }
 0x313   : > { %4036 = vst.msk [vmem:[%s8672_s16 + $0xd0] sm:$0xff] %vm191_vm0, %v4622_v17  ;;  %v3851_v23 = vpop.f32.mrb[25].mxu0  ;;  %v4233_v13 = vmul.f32 %v4622_v17, %v4622_v17  ;;  %v4125_v43 = vsel %vm191_vm0, %v4622_v17, 0.0 }
 0x314   : > { %4034 = vst.msk [vmem:[%s8672_s16 + $0xc0] sm:$0xff] %vm191_vm0, %v3851_v23  ;;  %v4121_v28 = vsel %vm191_vm0, %v3851_v23, 0.0  ;;  %v4231_v29 = vmul.f32 %v3851_v23, %v3851_v23  ;;  %v4623_v18 = vpop.f32.mrb[26].mxu0 }
 0x315   : > { %v4122_v21 = vadd.f32 %v4121_v28, %v4120_v50  ;;  %4037 = vst.msk [vmem:[%s8672_s16 + $0xd8] sm:$0xff] %vm191_vm0, %v4623_v18  ;;  %v3854_v47 = vpop.f32.mrb[27].mxu0  ;;  %v4234_v59 = vmul.f32 %v4623_v18, %v4623_v18  ;;  %v4322_v36 = vsel %vm191_vm0, %v4233_v13, 0.0  ;;  %v4127_v15 = vsel %vm191_vm0, %v4623_v18, 0.0 }
 0x316   : > { %v4318_v54 = vsel %vm191_vm0, %v4231_v29, 0.0  ;;  %4035 = vst.msk [vmem:[%s8672_s16 + $0xc8] sm:$0xff] %vm191_vm0, %v3854_v47  ;;  %v4123_v52 = vsel %vm191_vm0, %v3854_v47, 0.0  ;;  %v4232_v27 = vmul.f32 %v3854_v47, %v3854_v47 }
 0x317   : > { %v4319_v10 = vadd.f32 %v4318_v54, %v4317_v61  ;;  %v4124_v51 = vadd.f32 %v4123_v52, %v4122_v21  ;;  %v4324_v38 = vsel %vm191_vm0, %v4234_v59, 0.0 }
 0x318   : > { %v4320_v7 = vsel %vm191_vm0, %v4232_v27, 0.0 }
 0x319   : > { %v4126_v34 = vadd.f32 %v4125_v43, %v4124_v51  ;;  %v4321_v20 = vadd.f32 %v4320_v7, %v4319_v10 }
 0x31b   : > { %v4323_v53 = vadd.f32 %v4322_v36, %v4321_v20  ;;  %v4128_v58 = vadd.f32 %v4127_v15, %v4126_v34 }
 0x31d   : > { %v4325_v4 = vadd.f32 %v4324_v38, %v4323_v53 }
 0x31e   : > { %v4626_v35 = vpop.f32.mrb[28].mxu0 }
 0x31f   : > { %4040 = vst.msk [vmem:[%s8672_s16 + $0xf0] sm:$0xff] %vm191_vm0, %v4626_v35  ;;  %v3867_v49 = vpop.f32.mrb[29].mxu0  ;;  %v4237_v12 = vmul.f32 %v4626_v35, %v4626_v35  ;;  %v4133_v22 = vsel %vm191_vm0, %v4626_v35, 0.0 }
 0x320   : > { %4038 = vst.msk [vmem:[%s8672_s16 + $0xe0] sm:$0xff] %vm191_vm0, %v3867_v49  ;;  %v4129_v44 = vsel %vm191_vm0, %v3867_v49, 0.0  ;;  %v4235_v24 = vmul.f32 %v3867_v49, %v3867_v49  ;;  %v4627_v33 = vpop.f32.mrb[30].mxu0 }
 0x321   : > { %v4130_v5 = vadd.f32 %v4129_v44, %v4128_v58  ;;  %4041 = vst.msk [vmem:[%s8672_s16 + $0xf8] sm:$0xff] %vm191_vm0, %v4627_v33  ;;  %v3870_v25 = vpop.f32.mrb[31].mxu0  ;;  %v4238_v2 = vmul.f32 %v4627_v33, %v4627_v33  ;;  %v4330_v46 = vsel %vm191_vm0, %v4237_v12, 0.0  ;;  %v4135_v30 = vsel %vm191_vm0, %v4627_v33, 0.0 }
 0x322   : > { %v4326_v1 = vsel %vm191_vm0, %v4235_v24, 0.0  ;;  %4039 = vst.msk [vmem:[%s8672_s16 + $0xe8] sm:$0xff] %vm191_vm0, %v3870_v25  ;;  %v4131_v26 = vsel %vm191_vm0, %v3870_v25, 0.0  ;;  %v4236_v16 = vmul.f32 %v3870_v25, %v3870_v25 }
 0x323   : > { %v4327_v11 = vadd.f32 %v4326_v1, %v4325_v4  ;;  %v4132_v56 = vadd.f32 %v4131_v26, %v4130_v5  ;;  %v4332_v9 = vsel %vm191_vm0, %v4238_v2, 0.0 }
 0x324   : > { %v4328_v39 = vsel %vm191_vm0, %v4236_v16, 0.0 }
 0x325   : > { %v4134_v63 = vadd.f32 %v4133_v22, %v4132_v56  ;;  %v4329_v45 = vadd.f32 %v4328_v39, %v4327_v11 }
 0x327   : > { %v4331_v42 = vadd.f32 %v4330_v46, %v4329_v45  ;;  %v4136_v14 = vadd.f32 %v4135_v30, %v4134_v63 }
 0x329   : > { %v4333_v3 = vadd.f32 %v4332_v9, %v4331_v42 }
 0x32a   : > { %v4630_v41 = vpop.f32.mrb[0].mxu1 }
 0x32b   : > { %4044 = vst.msk [vmem:[%s8672_s16 + $0x110] sm:$0xff] %vm191_vm0, %v4630_v41  ;;  %v3883_v48 = vpop.f32.mrb[1].mxu1  ;;  %v4241_v55 = vmul.f32 %v4630_v41, %v4630_v41  ;;  %v4141_v50 = vsel %vm191_vm0, %v4630_v41, 0.0 }
 0x32c   : > { %4042 = vst.msk [vmem:[%s8672_s16 + $0x100] sm:$0xff] %vm191_vm0, %v3883_v48  ;;  %v4137_v0 = vsel %vm191_vm0, %v3883_v48, 0.0  ;;  %v4239_v60 = vmul.f32 %v3883_v48, %v3883_v48  ;;  %v4631_v8 = vpop.f32.mrb[2].mxu1 }
 0x32d   : > { %v4138_v31 = vadd.f32 %v4137_v0, %v4136_v14  ;;  %4045 = vst.msk [vmem:[%s8672_s16 + $0x118] sm:$0xff] %vm191_vm0, %v4631_v8  ;;  %v3886_v19 = vpop.f32.mrb[3].mxu1  ;;  %v4242_v40 = vmul.f32 %v4631_v8, %v4631_v8  ;;  %v4338_v28 = vsel %vm191_vm0, %v4241_v55, 0.0  ;;  %v4143_v29 = vsel %vm191_vm0, %v4631_v8, 0.0 }
 0x32e   : > { %v4334_v6 = vsel %vm191_vm0, %v4239_v60, 0.0  ;;  %4043 = vst.msk [vmem:[%s8672_s16 + $0x108] sm:$0xff] %vm191_vm0, %v3886_v19  ;;  %v4139_v62 = vsel %vm191_vm0, %v3886_v19, 0.0  ;;  %v4240_v37 = vmul.f32 %v3886_v19, %v3886_v19 }
 0x32f   : > { %v4335_v57 = vadd.f32 %v4334_v6, %v4333_v3  ;;  %v4140_v32 = vadd.f32 %v4139_v62, %v4138_v31  ;;  %v4340_v47 = vsel %vm191_vm0, %v4242_v40, 0.0 }
 0x330   : > { %v4336_v61 = vsel %vm191_vm0, %v4240_v37, 0.0 }
 0x331   : > { %v4142_v17 = vadd.f32 %v4141_v50, %v4140_v32  ;;  %v4337_v23 = vadd.f32 %v4336_v61, %v4335_v57 }
 0x333   : > { %v4339_v18 = vadd.f32 %v4338_v28, %v4337_v23  ;;  %v4144_v21 = vadd.f32 %v4143_v29, %v4142_v17 }
 0x335   : > { %v4341_v13 = vadd.f32 %v4340_v47, %v4339_v18 }
 0x336   : > { %v4634_v54 = vpop.f32.mrb[4].mxu1 }
 0x337   : > { %4048 = vst.msk [vmem:[%s8672_s16 + $0x130] sm:$0xff] %vm191_vm0, %v4634_v54  ;;  %v3899_v52 = vpop.f32.mrb[5].mxu1  ;;  %v4245_v7 = vmul.f32 %v4634_v54, %v4634_v54  ;;  %v4149_v58 = vsel %vm191_vm0, %v4634_v54, 0.0 }
 0x338   : > { %4046 = vst.msk [vmem:[%s8672_s16 + $0x120] sm:$0xff] %vm191_vm0, %v3899_v52  ;;  %v4145_v27 = vsel %vm191_vm0, %v3899_v52, 0.0  ;;  %v4243_v10 = vmul.f32 %v3899_v52, %v3899_v52  ;;  %v4635_v51 = vpop.f32.mrb[6].mxu1 }
 0x339   : > { %v4146_v43 = vadd.f32 %v4145_v27, %v4144_v21  ;;  %4049 = vst.msk [vmem:[%s8672_s16 + $0x138] sm:$0xff] %vm191_vm0, %v4635_v51  ;;  %v3902_v59 = vpop.f32.mrb[7].mxu1  ;;  %v4246_v38 = vmul.f32 %v4635_v51, %v4635_v51  ;;  %v4346_v44 = vsel %vm191_vm0, %v4245_v7, 0.0  ;;  %v4151_v24 = vsel %vm191_vm0, %v4635_v51, 0.0 }
 0x33a   : > { %v4342_v34 = vsel %vm191_vm0, %v4243_v10, 0.0  ;;  %4047 = vst.msk [vmem:[%s8672_s16 + $0x128] sm:$0xff] %vm191_vm0, %v3902_v59  ;;  %v4147_v20 = vsel %vm191_vm0, %v3902_v59, 0.0  ;;  %v4244_v36 = vmul.f32 %v3902_v59, %v3902_v59 }
 0x33b   : > { %v4343_v15 = vadd.f32 %v4342_v34, %v4341_v13  ;;  %v4148_v53 = vadd.f32 %v4147_v20, %v4146_v43  ;;  %v4348_v25 = vsel %vm191_vm0, %v4246_v38, 0.0 }
 0x33c   : > { %v4344_v4 = vsel %vm191_vm0, %v4244_v36, 0.0 }
 0x33d   : > { %v4150_v35 = vadd.f32 %v4149_v58, %v4148_v53  ;;  %v4345_v49 = vadd.f32 %v4344_v4, %v4343_v15 }
 0x33f   : > { %v4347_v33 = vadd.f32 %v4346_v44, %v4345_v49  ;;  %v4152_v5 = vadd.f32 %v4151_v24, %v4150_v35 }
 0x341   : > { %v4349_v12 = vadd.f32 %v4348_v25, %v4347_v33 }
 0x343   : > { %v4638_v1 = vpop.f32.mrb[8].mxu1 }
 0x344   : > { %4052 = vst.msk [vmem:[%s8672_s16 + $0x150] sm:$0xff] %vm191_vm0, %v4638_v1  ;;  %v3915_v26 = vpop.f32.mrb[9].mxu1  ;;  %v4249_v39 = vmul.f32 %v4638_v1, %v4638_v1  ;;  %v4157_v14 = vsel %vm191_vm0, %v4638_v1, 0.0 }
 0x345   : > { %4050 = vst.msk [vmem:[%s8672_s16 + $0x140] sm:$0xff] %vm191_vm0, %v3915_v26  ;;  %v4153_v16 = vsel %vm191_vm0, %v3915_v26, 0.0  ;;  %v4247_v11 = vmul.f32 %v3915_v26, %v3915_v26  ;;  %v4639_v56 = vpop.f32.mrb[10].mxu1 }
 0x346   : > { %v4154_v22 = vadd.f32 %v4153_v16, %v4152_v5  ;;  %4053 = vst.msk [vmem:[%s8672_s16 + $0x158] sm:$0xff] %vm191_vm0, %v4639_v56  ;;  %v3918_v2 = vpop.f32.mrb[11].mxu1  ;;  %v4250_v9 = vmul.f32 %v4639_v56, %v4639_v56  ;;  %v4354_v0 = vsel %vm191_vm0, %v4249_v39, 0.0  ;;  %v4159_v60 = vsel %vm191_vm0, %v4639_v56, 0.0 }
 0x347   : > { %v4350_v63 = vsel %vm191_vm0, %v4247_v11, 0.0  ;;  %4051 = vst.msk [vmem:[%s8672_s16 + $0x148] sm:$0xff] %vm191_vm0, %v3918_v2  ;;  %v4155_v45 = vsel %vm191_vm0, %v3918_v2, 0.0  ;;  %v4248_v46 = vmul.f32 %v3918_v2, %v3918_v2 }
 0x348   : > { %v4351_v30 = vadd.f32 %v4350_v63, %v4349_v12  ;;  %v4156_v42 = vadd.f32 %v4155_v45, %v4154_v22  ;;  %v4356_v19 = vsel %vm191_vm0, %v4250_v9, 0.0 }
 0x349   : > { %v4352_v3 = vsel %vm191_vm0, %v4248_v46, 0.0 }
 0x34a   : > { %v4158_v41 = vadd.f32 %v4157_v14, %v4156_v42  ;;  %v4353_v48 = vadd.f32 %v4352_v3, %v4351_v30 }
 0x34c   : > { %v4355_v8 = vadd.f32 %v4354_v0, %v4353_v48  ;;  %v4160_v31 = vadd.f32 %v4159_v60, %v4158_v41 }
 0x34e   : > { %v4357_v55 = vadd.f32 %v4356_v19, %v4355_v8 }
 0x351   : > { %v4642_v6 = vpop.f32.mrb[12].mxu1 }
 0x352   : > { %4056 = vst.msk [vmem:[%s8672_s16 + $0x170] sm:$0xff] %vm191_vm0, %v4642_v6  ;;  %v3931_v62 = vpop.f32.mrb[13].mxu1  ;;  %v4253_v61 = vmul.f32 %v4642_v6, %v4642_v6  ;;  %v4165_v21 = vsel %vm191_vm0, %v4642_v6, 0.0 }
 0x353   : > { %4054 = vst.msk [vmem:[%s8672_s16 + $0x160] sm:$0xff] %vm191_vm0, %v3931_v62  ;;  %v4161_v37 = vsel %vm191_vm0, %v3931_v62, 0.0  ;;  %v4251_v57 = vmul.f32 %v3931_v62, %v3931_v62  ;;  %v4643_v32 = vpop.f32.mrb[14].mxu1 }
 0x354   : > { %v4162_v50 = vadd.f32 %v4161_v37, %v4160_v31  ;;  %4057 = vst.msk [vmem:[%s8672_s16 + $0x178] sm:$0xff] %vm191_vm0, %v4643_v32  ;;  %v3934_v40 = vpop.f32.mrb[15].mxu1  ;;  %v4254_v47 = vmul.f32 %v4643_v32, %v4643_v32  ;;  %v4362_v27 = vsel %vm191_vm0, %v4253_v61, 0.0  ;;  %v4167_v10 = vsel %vm191_vm0, %v4643_v32, 0.0 }
 0x355   : > { %v4358_v17 = vsel %vm191_vm0, %v4251_v57, 0.0  ;;  %4055 = vst.msk [vmem:[%s8672_s16 + $0x168] sm:$0xff] %vm191_vm0, %v3934_v40  ;;  %v4163_v23 = vsel %vm191_vm0, %v3934_v40, 0.0  ;;  %v4252_v28 = vmul.f32 %v3934_v40, %v3934_v40 }
 0x356   : > { %v4359_v29 = vadd.f32 %v4358_v17, %v4357_v55  ;;  %v4164_v18 = vadd.f32 %v4163_v23, %v4162_v50  ;;  %v4364_v59 = vsel %vm191_vm0, %v4254_v47, 0.0 }
 0x357   : > { %v4360_v13 = vsel %vm191_vm0, %v4252_v28, 0.0 }
 0x358   : > { %v4166_v54 = vadd.f32 %v4165_v21, %v4164_v18  ;;  %v4361_v52 = vadd.f32 %v4360_v13, %v4359_v29 }
 0x35a   : > { %v4363_v51 = vadd.f32 %v4362_v27, %v4361_v52  ;;  %v4168_v43 = vadd.f32 %v4167_v10, %v4166_v54 }
 0x35c   : > { %v4365_v7 = vadd.f32 %v4364_v59, %v4363_v51 }
 0x361   : > { %v4646_v34 = vpop.f32.mrb[16].mxu1 }
 0x362   : > { %4060 = vst.msk [vmem:[%s8672_s16 + $0x190] sm:$0xff] %vm191_vm0, %v4646_v34  ;;  %v3947_v20 = vpop.f32.mrb[17].mxu1  ;;  %v4257_v4 = vmul.f32 %v4646_v34, %v4646_v34  ;;  %v4173_v5 = vsel %vm191_vm0, %v4646_v34, 0.0 }
 0x363   : > { %4058 = vst.msk [vmem:[%s8672_s16 + $0x180] sm:$0xff] %vm191_vm0, %v3947_v20  ;;  %v4169_v36 = vsel %vm191_vm0, %v3947_v20, 0.0  ;;  %v4255_v15 = vmul.f32 %v3947_v20, %v3947_v20  ;;  %v4647_v53 = vpop.f32.mrb[18].mxu1 }
 0x364   : > { %v4170_v58 = vadd.f32 %v4169_v36, %v4168_v43  ;;  %4061 = vst.msk [vmem:[%s8672_s16 + $0x198] sm:$0xff] %vm191_vm0, %v4647_v53  ;;  %v3950_v38 = vpop.f32.mrb[19].mxu1  ;;  %v4258_v25 = vmul.f32 %v4647_v53, %v4647_v53  ;;  %v4370_v16 = vsel %vm191_vm0, %v4257_v4, 0.0  ;;  %v4175_v11 = vsel %vm191_vm0, %v4647_v53, 0.0 }
 0x365   : > { %v4366_v35 = vsel %vm191_vm0, %v4255_v15, 0.0  ;;  %4059 = vst.msk [vmem:[%s8672_s16 + $0x188] sm:$0xff] %vm191_vm0, %v3950_v38  ;;  %v4171_v49 = vsel %vm191_vm0, %v3950_v38, 0.0  ;;  %v4256_v44 = vmul.f32 %v3950_v38, %v3950_v38 }
 0x366   : > { %v4367_v24 = vadd.f32 %v4366_v35, %v4365_v7  ;;  %v4172_v33 = vadd.f32 %v4171_v49, %v4170_v58  ;;  %v4372_v2 = vsel %vm191_vm0, %v4258_v25, 0.0 }
 0x367   : > { %v4368_v12 = vsel %vm191_vm0, %v4256_v44, 0.0 }
 0x368   : > { %v4174_v1 = vadd.f32 %v4173_v5, %v4172_v33  ;;  %v4369_v26 = vadd.f32 %v4368_v12, %v4367_v24 }
 0x36a   : > { %v4371_v56 = vadd.f32 %v4370_v16, %v4369_v26  ;;  %v4176_v22 = vadd.f32 %v4175_v11, %v4174_v1 }
 0x36c   : > { %v4373_v39 = vadd.f32 %v4372_v2, %v4371_v56 }
 0x371   : > { %v4650_v63 = vpop.f32.mrb[20].mxu1 }
 0x372   : > { %4064 = vst.msk [vmem:[%s8672_s16 + $0x1b0] sm:$0xff] %vm191_vm0, %v4650_v63  ;;  %v3963_v45 = vpop.f32.mrb[21].mxu1  ;;  %v4261_v3 = vmul.f32 %v4650_v63, %v4650_v63  ;;  %v4181_v31 = vsel %vm191_vm0, %v4650_v63, 0.0 }
 0x373   : > { %4062 = vst.msk [vmem:[%s8672_s16 + $0x1a0] sm:$0xff] %vm191_vm0, %v3963_v45  ;;  %v4177_v46 = vsel %vm191_vm0, %v3963_v45, 0.0  ;;  %v4259_v30 = vmul.f32 %v3963_v45, %v3963_v45  ;;  %v4651_v42 = vpop.f32.mrb[22].mxu1 }
 0x374   : > { %v4178_v14 = vadd.f32 %v4177_v46, %v4176_v22  ;;  %4065 = vst.msk [vmem:[%s8672_s16 + $0x1b8] sm:$0xff] %vm191_vm0, %v4651_v42  ;;  %v3966_v9 = vpop.f32.mrb[23].mxu1  ;;  %v4262_v19 = vmul.f32 %v4651_v42, %v4651_v42  ;;  %v4378_v37 = vsel %vm191_vm0, %v4261_v3, 0.0  ;;  %v4183_v57 = vsel %vm191_vm0, %v4651_v42, 0.0 }
 0x375   : > { %v4374_v41 = vsel %vm191_vm0, %v4259_v30, 0.0  ;;  %4063 = vst.msk [vmem:[%s8672_s16 + $0x1a8] sm:$0xff] %vm191_vm0, %v3966_v9  ;;  %v4179_v48 = vsel %vm191_vm0, %v3966_v9, 0.0  ;;  %v4260_v0 = vmul.f32 %v3966_v9, %v3966_v9 }
 0x376   : > { %v4375_v60 = vadd.f32 %v4374_v41, %v4373_v39  ;;  %v4180_v8 = vadd.f32 %v4179_v48, %v4178_v14  ;;  %v4380_v40 = vsel %vm191_vm0, %v4262_v19, 0.0 }
 0x377   : > { %v4376_v55 = vsel %vm191_vm0, %v4260_v0, 0.0 }
 0x378   : > { %v4182_v6 = vadd.f32 %v4181_v31, %v4180_v8  ;;  %v4377_v62 = vadd.f32 %v4376_v55, %v4375_v60 }
 0x37a   : > { %v4379_v32 = vadd.f32 %v4378_v37, %v4377_v62  ;;  %v4184_v50 = vadd.f32 %v4183_v57, %v4182_v6 }
 0x37c   : > { %v4381_v61 = vadd.f32 %v4380_v40, %v4379_v32 }
 0x381   : > { %v4654_v17 = vpop.f32.mrb[24].mxu1 }
 0x382   : > { %4068 = vst.msk [vmem:[%s8672_s16 + $0x1d0] sm:$0xff] %vm191_vm0, %v4654_v17  ;;  %v3979_v23 = vpop.f32.mrb[25].mxu1  ;;  %v4265_v13 = vmul.f32 %v4654_v17, %v4654_v17  ;;  %v4189_v43 = vsel %vm191_vm0, %v4654_v17, 0.0 }
 0x383   : > { %4066 = vst.msk [vmem:[%s8672_s16 + $0x1c0] sm:$0xff] %vm191_vm0, %v3979_v23  ;;  %v4185_v28 = vsel %vm191_vm0, %v3979_v23, 0.0  ;;  %v4263_v29 = vmul.f32 %v3979_v23, %v3979_v23  ;;  %v4655_v18 = vpop.f32.mrb[26].mxu1 }
 0x384   : > { %v4186_v21 = vadd.f32 %v4185_v28, %v4184_v50  ;;  %4069 = vst.msk [vmem:[%s8672_s16 + $0x1d8] sm:$0xff] %vm191_vm0, %v4655_v18  ;;  %v3982_v47 = vpop.f32.mrb[27].mxu1  ;;  %v4266_v59 = vmul.f32 %v4655_v18, %v4655_v18  ;;  %v4386_v36 = vsel %vm191_vm0, %v4265_v13, 0.0  ;;  %v4191_v15 = vsel %vm191_vm0, %v4655_v18, 0.0 }
 0x385   : > { %v4382_v54 = vsel %vm191_vm0, %v4263_v29, 0.0  ;;  %4067 = vst.msk [vmem:[%s8672_s16 + $0x1c8] sm:$0xff] %vm191_vm0, %v3982_v47  ;;  %v4187_v52 = vsel %vm191_vm0, %v3982_v47, 0.0  ;;  %v4264_v27 = vmul.f32 %v3982_v47, %v3982_v47 }
 0x386   : > { %v4383_v10 = vadd.f32 %v4382_v54, %v4381_v61  ;;  %v4188_v51 = vadd.f32 %v4187_v52, %v4186_v21  ;;  %v4388_v38 = vsel %vm191_vm0, %v4266_v59, 0.0 }
 0x387   : > { %v4384_v7 = vsel %vm191_vm0, %v4264_v27, 0.0 }
 0x388   : > { %v4190_v34 = vadd.f32 %v4189_v43, %v4188_v51  ;;  %v4385_v20 = vadd.f32 %v4384_v7, %v4383_v10 }
 0x38a   : > { %v4387_v53 = vadd.f32 %v4386_v36, %v4385_v20  ;;  %v4192_v58 = vadd.f32 %v4191_v15, %v4190_v34 }
 0x38c   : > { %v4389_v4 = vadd.f32 %v4388_v38, %v4387_v53 }
 0x391   : > { %v4658_v35 = vpop.f32.mrb[28].mxu1 }
 0x392   : > { %4072 = vst.msk [vmem:[%s8672_s16 + $0x1f0] sm:$0xff] %vm191_vm0, %v4658_v35  ;;  %v3995_v49 = vpop.f32.mrb[29].mxu1  ;;  %v4269_v12 = vmul.f32 %v4658_v35, %v4658_v35  ;;  %v4197_v22 = vsel %vm191_vm0, %v4658_v35, 0.0 }
 0x393   : > { %4070 = vst.msk [vmem:[%s8672_s16 + $0x1e0] sm:$0xff] %vm191_vm0, %v3995_v49  ;;  %v4193_v44 = vsel %vm191_vm0, %v3995_v49, 0.0  ;;  %v4267_v24 = vmul.f32 %v3995_v49, %v3995_v49  ;;  %v4659_v33 = vpop.f32.mrb[30].mxu1 }
 0x394   : > { %v4194_v5 = vadd.f32 %v4193_v44, %v4192_v58  ;;  %4073 = vst.msk [vmem:[%s8672_s16 + $0x1f8] sm:$0xff] %vm191_vm0, %v4659_v33  ;;  %v3998_v25 = vpop.f32.mrb[31].mxu1  ;;  %v4270_v2 = vmul.f32 %v4659_v33, %v4659_v33  ;;  %v4394_v46 = vsel %vm191_vm0, %v4269_v12, 0.0  ;;  %v4199_v30 = vsel %vm191_vm0, %v4659_v33, 0.0 }
 0x395   : > { %v4390_v1 = vsel %vm191_vm0, %v4267_v24, 0.0  ;;  %4071 = vst.msk [vmem:[%s8672_s16 + $0x1e8] sm:$0xff] %vm191_vm0, %v3998_v25  ;;  %v4195_v26 = vsel %vm191_vm0, %v3998_v25, 0.0  ;;  %v4268_v16 = vmul.f32 %v3998_v25, %v3998_v25 }
 0x396   : > { %v4391_v11 = vadd.f32 %v4390_v1, %v4389_v4  ;;  %v4196_v56 = vadd.f32 %v4195_v26, %v4194_v5  ;;  %v4396_v9 = vsel %vm191_vm0, %v4270_v2, 0.0 }
 0x397   : > { %v4392_v39 = vsel %vm191_vm0, %v4268_v16, 0.0 }
 0x398   : > { %v4198_v63 = vadd.f32 %v4197_v22, %v4196_v56  ;;  %v4393_v45 = vadd.f32 %v4392_v39, %v4391_v11 }
 0x39a   : > { %v4200_v42 = vadd.f32 %v4199_v30, %v4198_v63  ;;  %v4395_v14 = vadd.f32 %v4394_v46, %v4393_v45 }
 0x39c   : > { %v4201_v3 = vrot.slane %v4200_v42, 4  ;;  %v4397_v41 = vadd.f32 %v4396_v9, %v4395_v14 }
 0x39e   : > { %v4202_v48 = vadd.f32 %v4201_v3, %v4200_v42  ;;  %v4398_v0 = vrot.slane %v4397_v41, 4 }
 0x3a0   : > { %v4203_v60 = vrot.slane %v4202_v48, 2  ;;  %v4399_v8 = vadd.f32 %v4398_v0, %v4397_v41 }
 0x3a2   : > { %v4204_v31 = vadd.f32 %v4203_v60, %v4202_v48  ;;  %v4400_v19 = vrot.slane %v4399_v8, 2 }
 0x3a4   : > { %v4205_v55 = vrot.slane %v4204_v31, 1  ;;  %v4401_v6 = vadd.f32 %v4400_v19, %v4399_v8 }
 0x3a6   : > { %v4402_v62 = vrot.slane %v4401_v6, 1  ;;  %v4206_v37 = vadd.f32 %v4205_v55, %v4204_v31 }
 0x3a8   : > { %v4403_v57 = vadd.f32 %v4402_v62, %v4401_v6 }
 0x3aa   : > { %v4405_v32 = vsel %vm4404_vm12, %v4206_v37, %v4403_v57 }
 0x3ab   : > { %4406 = vst.msk [vmem:[%s189_s18] sm:$0x3] %vm194_vm1, %v4405_v32 }
 0x3ac PF: > { %s14_s12 = sadd.s32 1, %s6004_s12  }
 0x3ad   : > { %p11_p5 = scmp.ge.s32.totalorder %s14_s12, 4  }
 0x3af   :  { %13 = sbr.rel (!%p11_p5) target bundleno = 1 (0x1), region = 73 }

// kernel: residual_block_forward.4
= control target key start
LH: loop header
LB: loop body
LE: loop exit
PB: predicated region body
PF: predicated region fallthrough
CT: control target
= control target key end

     0   :  { %s6307_s18 = smov 0   ;;  %s9364_s0 = inlined_call_operand.vmem [shape: f32[4,16,16,8], index: 0, kind: input, shape index: {}]   ;;  %s9365_s1 = inlined_call_operand.vmem [shape: f32[1,8], index: 1, kind: input, shape index: {}]   ;;  %s9366_s2 = inlined_call_operand.vmem [shape: f32[1,8], index: 2, kind: input, shape index: {}]   ;;  %s9367_s3 = inlined_call_operand.vmem [shape: bf16[72,8], index: 3, kind: input, shape index: {}]   ;;  %s9368_s4 = inlined_call_operand.vmem [shape: f32[4,16,16,8], index: 4, kind: output, shape index: {0}]   ;;  %s9369_s5 = inlined_call_operand.vmem [shape: f32[2,2,8], index: 5, kind: output, shape index: {1}]  }
   0x1 LB: > { %s6313_s19 = sadd.s32 4294967295, %s6266_s18   ;;  %p4760_p0 = scmp.ge.s32.totalorder %s6266_s18, 1  ;;  %s6266_s18 = sphi %s6307_s18, %s16_s18  }
   0x2   : > { %p192_p1 = scmp.lt.s32.totalorder %s6266_s18, 3 }
   0x4   : > { %p193_p2 = pnand %p4760_p0, %p192_p1 }
   0x6   : > { %196 = sbr.rel (%p193_p2) target bundleno = 940 (0x3ac), region = 36 }
   0xd   : > { %vm515_vm0 = vcmask 64512   ;;  %vm518_vm1 = vcmask 58368   ;;  %vm530_vm2 = vcmask 57344   ;;  %s4761_s20 = sshll.u32 %s6313_s19, 1  ;;  %v6268_v0 = vmov 0.0   ;;  %s6269_s29 = smov 8  }
   0xe   : > { %516 = vst.msk [vmem:[#allocation2] sm:$0xff] %vm515_vm0, %v6268_v0  ;;  %517 = vst.msk [vmem:[#allocation2 + $0x8] sm:$0xff] %vm515_vm0, %v6268_v0  ;;  %p227_p3 = scmp.lt.s32.totalorder %s4761_s20, 3  ;;  %v6496_v1 = vld [vmem:[%s9365_s1] ss:$0 sm:$0xff]  ;;  %s6270_s30 = smov 16  }
   0xf   : > { %519 = vst.msk [vmem:[#allocation2 + $0x10] sm:$0x3] %vm518_vm1, %v6268_v0  ;;  %522 = vst.msk [vmem:[#allocation2 + $0x1c0] sm:$0x3] %vm518_vm1, %v6268_v0  ;;  %v6508_v2 = vld [vmem:[%s9366_s2] ss:$0 sm:$0xff] }
  0x10   : > { %520 = vst.msk [vmem:[#allocation2 + $0x1b0] sm:$0xff] %vm515_vm0, %v6268_v0  ;;  %521 = vst.msk [vmem:[#allocation2 + $0x1b8] sm:$0xff] %vm515_vm0, %v6268_v0  ;;  %s9895_s20 = smov (!%p227_p3, %s4761_s20), 3  ;;  %s6271_s6 = smov 24   ;;  %vm3357_vm3 = vcmask 130048   ;;  %vm3422_vm4 = vcmask 195584  }
  0x11   : > { %524 = vst.msk [vmem:[#allocation2 + $0x198] sm:$0xff] %vm515_vm0, %v6268_v0  ;;  %525 = vst.msk [vmem:[#allocation2 + $0x1a0] sm:$0xff] %vm515_vm0, %v6268_v0  ;;  %s4809_s21 = sshll.u32 %s9895_s20, 8  ;;  %s6272_s7 = smov 32   ;;  %vm3977_vm5 = vcmask 1043456   ;;  %vm3487_vm6 = vcmask 261120  }
  0x12   : > { %526 = vst.msk [vmem:[#allocation2 + $0x1a8] sm:$0x3] %vm518_vm1, %v6268_v0  ;;  %529 = vst.msk [vmem:[#allocation2 + $0x358] sm:$0x3] %vm518_vm1, %v6268_v0  ;;  %s6503_s26 = scalar_lea.vmem %s9364_s0, %s4809_s21  ;;  %s6273_s8 = smov 40   ;;  %vm3552_vm7 = vcmask 326656  }
  0x13   : > { %527 = vst.msk [vmem:[#allocation2 + $0x348] sm:$0xff] %vm515_vm0, %v6268_v0  ;;  %528 = vst.msk [vmem:[#allocation2 + $0x350] sm:$0xff] %vm515_vm0, %v6268_v0  ;;  %v249_v3 = vld [vmem:[%s6503_s26 + $0x10] sm:$0xff]  ;;  %v250_v4 = vld [vmem:[%s6503_s26 + $0x18] sm:$0xff]  ;;  %s6274_s23 = smov 48   ;;  %s6275_s24 = smov 56  }
  0x14   : > { %532 = vst.msk [vmem:[#allocation2 + $0x18] sm:$0x1] %vm530_vm2, %v6268_v0  ;;  %533 = vst.msk [vmem:[#allocation2 + $0x30] sm:$0x1] %vm530_vm2, %v6268_v0  ;;  %v247_v5 = vld [vmem:[%s6503_s26] sm:$0xff]  ;;  %v319_v8 = vmul.f32 %v6496_v1, %v249_v3  ;;  %v320_v9 = vmul.f32 %v6496_v1, %v250_v4  ;;  %v248_v10 = vld [vmem:[%s6503_s26 + $0x8] sm:$0xff]  ;;  %s9097_s28 = scalar_lea.vmem %s9368_s4, %s4809_s21 }
  0x15   : > { %534 = vst.msk [vmem:[#allocation2 + $0x48] sm:$0x1] %vm530_vm2, %v6268_v0  ;;  %535 = vst.msk [vmem:[#allocation2 + $0x60] sm:$0x1] %vm530_vm2, %v6268_v0  ;;  %v732_v6 = vld [vmem:[#allocation2 + $0x1] sm:$0xff]  ;;  %v317_v11 = vmul.f32 %v6496_v1, %v247_v5  ;;  %v318_v13 = vmul.f32 %v6496_v1, %v248_v10  ;;  %v253_v16 = vld [vmem:[%s6503_s26 + $0x30] sm:$0xff] }
  0x16   : > { %536 = vst.msk [vmem:[#allocation2 + $0x78] sm:$0x1] %vm530_vm2, %v6268_v0  ;;  %537 = vst.msk [vmem:[#allocation2 + $0x90] sm:$0x1] %vm530_vm2, %v6268_v0  ;;  %v733_v7 = vld [vmem:[#allocation2 + $0x9] sm:$0xff]  ;;  %v251_v14 = vld [vmem:[%s6503_s26 + $0x20] sm:$0xff]  ;;  %v389_v17 = vadd.f32 %v6508_v2, %v319_v8  ;;  %v390_v18 = vadd.f32 %v6508_v2, %v320_v9  ;;  %v323_v24 = vmul.f32 %v6496_v1, %v253_v16 }
  0x17   : > { %538 = vst.msk [vmem:[#allocation2 + $0xa8] sm:$0x1] %vm530_vm2, %v6268_v0  ;;  %539 = vst.msk [vmem:[#allocation2 + $0xc0] sm:$0x1] %vm530_vm2, %v6268_v0  ;;  %v4951_v12 = vpack.i.bf16 %v733_v7, %v732_v6  ;;  %v252_v15 = vld [vmem:[%s6503_s26 + $0x28] sm:$0xff]  ;;  %v387_v19 = vadd.f32 %v6508_v2, %v317_v11  ;;  %v321_v20 = vmul.f32 %v6496_v1, %v251_v14  ;;  %v254_v21 = vld [vmem:[%s6503_s26 + $0x38] sm:$0xff] }
  0x18   : > { %540 = vst.msk [vmem:[#allocation2 + $0xd8] sm:$0x1] %vm530_vm2, %v6268_v0  ;;  %541 = vst.msk [vmem:[#allocation2 + $0xf0] sm:$0x1] %vm530_vm2, %v6268_v0  ;;  %v388_v22 = vadd.f32 %v6508_v2, %v318_v13  ;;  %v322_v23 = vmul.f32 %v6496_v1, %v252_v15  ;;  %v324_v25 = vmul.f32 %v6496_v1, %v254_v21  ;;  %v255_v26 = vld [vmem:[%s6503_s26 + $0x40] sm:$0xff]  ;;  %v256_v27 = vld [vmem:[%s6503_s26 + $0x48] sm:$0xff] }
  0x19   : > { %542 = vst.msk [vmem:[#allocation2 + $0x108] sm:$0x1] %vm530_vm2, %v6268_v0  ;;  %543 = vst.msk [vmem:[#allocation2 + $0x120] sm:$0x1] %vm530_vm2, %v6268_v0  ;;  %4952 = vrot.lane.b32.xlu0 %v4951_v12, %s6269_s29  ;;  %v257_v28 = vld [vmem:[%s6503_s26 + $0x50] sm:$0xff]  ;;  %v453_v29 = vmax.f32 %v389_v17, 0.0  ;;  %v391_v32 = vadd.f32 %v6508_v2, %v321_v20  ;;  %v393_v36 = vadd.f32 %v6508_v2, %v323_v24 }
  0x1a   : > { %544 = vst.msk [vmem:[#allocation2 + $0x138] sm:$0x1] %vm530_vm2, %v6268_v0  ;;  %545 = vst.msk [vmem:[#allocation2 + $0x150] sm:$0x1] %vm530_vm2, %v6268_v0  ;;  %v454_v30 = vmax.f32 %v390_v18, 0.0  ;;  %v451_v31 = vmax.f32 %v387_v19, 0.0  ;;  %v392_v35 = vadd.f32 %v6508_v2, %v322_v23  ;;  %v394_v37 = vadd.f32 %v6508_v2, %v324_v25 }
  0x1b   : > { %546 = vst.msk [vmem:[#allocation2 + $0x168] sm:$0x1] %vm530_vm2, %v6268_v0  ;;  %547 = vst.msk [vmem:[#allocation2 + $0x180] sm:$0x1] %vm530_vm2, %v6268_v0  ;;  %v258_v33 = vld [vmem:[%s6503_s26 + $0x58] sm:$0xff]  ;;  %v452_v34 = vmax.f32 %v388_v22, 0.0  ;;  %v325_v40 = vmul.f32 %v6496_v1, %v255_v26  ;;  %v326_v41 = vmul.f32 %v6496_v1, %v256_v27  ;;  %v327_v42 = vmul.f32 %v6496_v1, %v257_v28 }
  0x1c   : > { %550 = vst.msk [vmem:[#allocation2 + $0x1c8] sm:$0x1] %vm530_vm2, %v6268_v0  ;;  %551 = vst.msk [vmem:[#allocation2 + $0x1e0] sm:$0x1] %vm530_vm2, %v6268_v0  ;;  %v259_v38 = vld [vmem:[%s6503_s26 + $0x60] sm:$0xff]  ;;  %v455_v39 = vmax.f32 %v391_v32, 0.0  ;;  %v328_v49 = vmul.f32 %v6496_v1, %v258_v33 }
  0x1d   : > { %552 = vst.msk [vmem:[#allocation2 + $0x1f8] sm:$0x1] %vm530_vm2, %v6268_v0  ;;  %553 = vst.msk [vmem:[#allocation2 + $0x210] sm:$0x1] %vm530_vm2, %v6268_v0  ;;  %v260_v43 = vld [vmem:[%s6503_s26 + $0x68] sm:$0xff]  ;;  %v261_v44 = vld [vmem:[%s6503_s26 + $0x70] sm:$0xff]  ;;  %v395_v50 = vadd.f32 %v6508_v2, %v325_v40  ;;  %v396_v51 = vadd.f32 %v6508_v2, %v326_v41  ;;  %v397_v52 = vadd.f32 %v6508_v2, %v327_v42 }
  0x1e   : > { %554 = vst.msk [vmem:[#allocation2 + $0x228] sm:$0x1] %vm530_vm2, %v6268_v0  ;;  %555 = vst.msk [vmem:[#allocation2 + $0x240] sm:$0x1] %vm530_vm2, %v6268_v0  ;;  %v262_v45 = vld [vmem:[%s6503_s26 + $0x78] sm:$0xff]  ;;  %v456_v46 = vmax.f32 %v392_v35, 0.0  ;;  %v329_v53 = vmul.f32 %v6496_v1, %v259_v38  ;;  %v398_v54 = vadd.f32 %v6508_v2, %v328_v49  ;;  %v330_v55 = vmul.f32 %v6496_v1, %v260_v43 }
  0x1f   : > { %556 = vst.msk [vmem:[#allocation2 + $0x258] sm:$0x1] %vm530_vm2, %v6268_v0  ;;  %557 = vst.msk [vmem:[#allocation2 + $0x270] sm:$0x1] %vm530_vm2, %v6268_v0  ;;  %v457_v47 = vmax.f32 %v393_v36, 0.0  ;;  %v458_v48 = vmax.f32 %v394_v37, 0.0  ;;  %v331_v56 = vmul.f32 %v6496_v1, %v261_v44  ;;  %v332_v57 = vmul.f32 %v6496_v1, %v262_v45 }
  0x20   : > { %558 = vst.msk [vmem:[#allocation2 + $0x288] sm:$0x1] %vm530_vm2, %v6268_v0  ;;  %559 = vst.msk [vmem:[#allocation2 + $0x2a0] sm:$0x1] %vm530_vm2, %v6268_v0  ;;  %v263_v58 = vld [vmem:[%s6503_s26 + $0x80] sm:$0xff]  ;;  %v264_v59 = vld [vmem:[%s6503_s26 + $0x88] sm:$0xff]  ;;  %v400_v5 = vadd.f32 %v6508_v2, %v330_v55 }
  0x21   : > { %560 = vst.msk [vmem:[#allocation2 + $0x2b8] sm:$0x1] %vm530_vm2, %v6268_v0  ;;  %561 = vst.msk [vmem:[#allocation2 + $0x2d0] sm:$0x1] %vm530_vm2, %v6268_v0  ;;  %v265_v60 = vld [vmem:[%s6503_s26 + $0x90] sm:$0xff]  ;;  %v459_v61 = vmax.f32 %v395_v50, 0.0  ;;  %v401_v6 = vadd.f32 %v6508_v2, %v331_v56  ;;  %v402_v7 = vadd.f32 %v6508_v2, %v332_v57  ;;  %v333_v9 = vmul.f32 %v6496_v1, %v263_v58 }
  0x22   : > { %562 = vst.msk [vmem:[#allocation2 + $0x2e8] sm:$0x1] %vm530_vm2, %v6268_v0  ;;  %563 = vst.msk [vmem:[#allocation2 + $0x300] sm:$0x1] %vm530_vm2, %v6268_v0  ;;  %v460_v62 = vmax.f32 %v396_v51, 0.0  ;;  %v461_v63 = vmax.f32 %v397_v52, 0.0  ;;  %v334_v10 = vmul.f32 %v6496_v1, %v264_v59  ;;  %v335_v11 = vmul.f32 %v6496_v1, %v265_v60 }
  0x23   : > { %564 = vst.msk [vmem:[#allocation2 + $0x318] sm:$0x1] %vm530_vm2, %v6268_v0  ;;  %565 = vst.msk [vmem:[#allocation2 + $0x330] sm:$0x1] %vm530_vm2, %v6268_v0  ;;  %v266_v3 = vld [vmem:[%s6503_s26 + $0x98] sm:$0xff]  ;;  %v462_v4 = vmax.f32 %v398_v54, 0.0  ;;  %v403_v25 = vadd.f32 %v6508_v2, %v333_v9 }
  0x24   : > { %568 = vst.msk [vmem:[#allocation2 + $0x29] sm:$0x1] %vm530_vm2, %v6268_v0  ;;  %569 = vst.msk [vmem:[#allocation2 + $0x41] sm:$0x1] %vm530_vm2, %v6268_v0  ;;  %v267_v12 = vld [vmem:[%s6503_s26 + $0xa0] sm:$0xff]  ;;  %v268_v13 = vld [vmem:[%s6503_s26 + $0xa8] sm:$0xff]  ;;  %v336_v21 = vmul.f32 %v6496_v1, %v266_v3  ;;  %v404_v26 = vadd.f32 %v6508_v2, %v334_v10  ;;  %v405_v27 = vadd.f32 %v6508_v2, %v335_v11 }
  0x25   : > { %570 = vst.msk [vmem:[#allocation2 + $0x59] sm:$0x1] %vm530_vm2, %v6268_v0  ;;  %571 = vst.msk [vmem:[#allocation2 + $0x71] sm:$0x1] %vm530_vm2, %v6268_v0  ;;  %v269_v14 = vld [vmem:[%s6503_s26 + $0xb0] sm:$0xff]  ;;  %v464_v18 = vmax.f32 %v400_v5, 0.0  ;;  %v337_v33 = vmul.f32 %v6496_v1, %v267_v12 }
  0x26   : > { %572 = vst.msk [vmem:[#allocation2 + $0x89] sm:$0x1] %vm530_vm2, %v6268_v0  ;;  %573 = vst.msk [vmem:[#allocation2 + $0xa1] sm:$0x1] %vm530_vm2, %v6268_v0  ;;  %v465_v19 = vmax.f32 %v401_v6, 0.0  ;;  %v466_v20 = vmax.f32 %v402_v7, 0.0  ;;  %v406_v32 = vadd.f32 %v6508_v2, %v336_v21  ;;  %v339_v43 = vmul.f32 %v6496_v1, %v269_v14 }
  0x27   : > { %574 = vst.msk [vmem:[#allocation2 + $0xb9] sm:$0x1] %vm530_vm2, %v6268_v0  ;;  %575 = vst.msk [vmem:[#allocation2 + $0xd1] sm:$0x1] %vm530_vm2, %v6268_v0  ;;  %v270_v22 = vld [vmem:[%s6503_s26 + $0xb8] sm:$0xff]  ;;  %v271_v28 = vld [vmem:[%s6503_s26 + $0xc0] sm:$0xff] }
  0x28   : > { %576 = vst.msk [vmem:[#allocation2 + $0xe9] sm:$0x1] %vm530_vm2, %v6268_v0  ;;  %577 = vst.msk [vmem:[#allocation2 + $0x101] sm:$0x1] %vm530_vm2, %v6268_v0  ;;  %v273_v35 = vld [vmem:[%s6503_s26 + $0xd0] sm:$0xff]  ;;  %v274_v36 = vld [vmem:[%s6503_s26 + $0xd8] sm:$0xff]  ;;  %v340_v49 = vmul.f32 %v6496_v1, %v270_v22  ;;  %v409_v50 = vadd.f32 %v6508_v2, %v339_v43  ;;  %v341_v51 = vmul.f32 %v6496_v1, %v271_v28 }
  0x29   : > { %578 = vst.msk [vmem:[#allocation2 + $0x119] sm:$0x1] %vm530_vm2, %v6268_v0  ;;  %579 = vst.msk [vmem:[#allocation2 + $0x131] sm:$0x1] %vm530_vm2, %v6268_v0  ;;  %v467_v40 = vmax.f32 %v403_v25, 0.0  ;;  %v468_v41 = vmax.f32 %v404_v26, 0.0  ;;  %v343_v59 = vmul.f32 %v6496_v1, %v273_v35  ;;  %v344_v60 = vmul.f32 %v6496_v1, %v274_v36 }
  0x2a   : > { %580 = vst.msk [vmem:[#allocation2 + $0x149] sm:$0x1] %vm530_vm2, %v6268_v0  ;;  %581 = vst.msk [vmem:[#allocation2 + $0x161] sm:$0x1] %vm530_vm2, %v6268_v0  ;;  %v469_v42 = vmax.f32 %v405_v27, 0.0  ;;  %v275_v52 = vld [vmem:[%s6503_s26 + $0xe0] sm:$0xff]  ;;  %v411_v7 = vadd.f32 %v6508_v2, %v341_v51 }
  0x2b   : > { %582 = vst.msk [vmem:[#allocation2 + $0x179] sm:$0x1] %vm530_vm2, %v6268_v0  ;;  %583 = vst.msk [vmem:[#allocation2 + $0x191] sm:$0x1] %vm530_vm2, %v6268_v0  ;;  %v473_v3 = vmax.f32 %v409_v50, 0.0  ;;  %v413_v9 = vadd.f32 %v6508_v2, %v343_v59  ;;  %v280_v10 = vld [vmem:[%s6503_s26 + $0x108] sm:$0xff] }
  0x2c   : > { %586 = vst.msk [vmem:[#allocation2 + $0x1d9] sm:$0x1] %vm530_vm2, %v6268_v0  ;;  %587 = vst.msk [vmem:[#allocation2 + $0x1f1] sm:$0x1] %vm530_vm2, %v6268_v0  ;;  %v281_v11 = vld [vmem:[%s6503_s26 + $0x110] sm:$0xff]  ;;  %v282_v22 = vld [vmem:[%s6503_s26 + $0x118] sm:$0xff]  ;;  %v350_v35 = vmul.f32 %v6496_v1, %v280_v10 }
  0x2d   : > { %588 = vst.msk [vmem:[#allocation2 + $0x209] sm:$0x1] %vm530_vm2, %v6268_v0  ;;  %589 = vst.msk [vmem:[#allocation2 + $0x221] sm:$0x1] %vm530_vm2, %v6268_v0  ;;  %v283_v27 = vld [vmem:[%s6503_s26 + $0x120] sm:$0xff]  ;;  %v284_v28 = vld [vmem:[%s6503_s26 + $0x128] sm:$0xff]  ;;  %v351_v36 = vmul.f32 %v6496_v1, %v281_v11 }
  0x2e   : > { %590 = vst.msk [vmem:[#allocation2 + $0x239] sm:$0x1] %vm530_vm2, %v6268_v0  ;;  %591 = vst.msk [vmem:[#allocation2 + $0x251] sm:$0x1] %vm530_vm2, %v6268_v0  ;;  %v287_v51 = vld [vmem:[%s6503_s26 + $0x140] sm:$0xff]  ;;  %v289_v59 = vld [vmem:[%s6503_s26 + $0x150] sm:$0xff] }
  0x2f   : > { %592 = vst.msk [vmem:[#allocation2 + $0x269] sm:$0x1] %vm530_vm2, %v6268_v0  ;;  %593 = vst.msk [vmem:[#allocation2 + $0x281] sm:$0x1] %vm530_vm2, %v6268_v0  ;;  %s6276_s25 = smov 64   ;;  %vm3617_vm8 = vcmask 392192  }
  0x30   : > { %594 = vst.msk [vmem:[#allocation2 + $0x299] sm:$0x1] %vm530_vm2, %v6268_v0  ;;  %595 = vst.msk [vmem:[#allocation2 + $0x2b1] sm:$0x1] %vm530_vm2, %v6268_v0  ;;  %vm3682_vm9 = vcmask 457728   ;;  %vm3747_vm10 = vcmask 523264  }
  0x31   : > { %596 = vst.msk [vmem:[#allocation2 + $0x2c9] sm:$0x1] %vm530_vm2, %v6268_v0  ;;  %597 = vst.msk [vmem:[#allocation2 + $0x2e1] sm:$0x1] %vm530_vm2, %v6268_v0  ;;  %vm3880_vm11 = vcmask 588800   ;;  %p240_p4 = scmp.lt.s32.totalorder %s6313_s19, 1 }
  0x32   : > { %598 = vst.msk [vmem:[#allocation2 + $0x2f9] sm:$0x1] %vm530_vm2, %v6268_v0  ;;  %599 = vst.msk [vmem:[#allocation2 + $0x311] sm:$0x1] %vm530_vm2, %v6268_v0  ;;  %vm4664_vm12 = vcmask 1040384  }
  0x33   : > { %600 = vst.msk [vmem:[#allocation2 + $0x329] sm:$0x1] %vm530_vm2, %v6268_v0  ;;  %601 = vst.msk [vmem:[#allocation2 + $0x341] sm:$0x1] %vm530_vm2, %v6268_v0  ;;  %s9897_s19 = smov (!%p240_p4, %s6313_s19), 1 }
  0x34   : > { %567 = vst.msk [vmem:[#allocation2 + $0x11] sm:$0x1] %vm530_vm2, %v6268_v0  ;;  %531 = vst.msk [vmem:[#allocation2] sm:$0x1] %vm530_vm2, %v6268_v0  ;;  %s4767_s20 = sshll.u32 %s9897_s19, 1 }
  0x35   : > { %548 = vst.msk [vmem:[#allocation2 + $0x198] sm:$0x1] %vm530_vm2, %v6268_v0  ;;  %549 = vst.msk [vmem:[#allocation2 + $0x1b0] sm:$0x1] %vm530_vm2, %v6268_v0 }
  0x36   : > { %566 = vst.msk [vmem:[#allocation2 + $0x348] sm:$0x1] %vm530_vm2, %v6268_v0  ;;  %584 = vst.msk [vmem:[#allocation2 + $0x1a9] sm:$0x1] %vm530_vm2, %v6268_v0 }
  0x37   : > { %585 = vst.msk [vmem:[#allocation2 + $0x1c1] sm:$0x1] %vm530_vm2, %v6268_v0  ;;  %602 = vst.msk [vmem:[#allocation2 + $0x359] sm:$0x1] %vm530_vm2, %v6268_v0  ;;  %v399_v0 = vadd.f32 %v6508_v2, %v329_v53  ;;  %v276_v53 = vld [vmem:[%s6503_s26 + $0xe8] sm:$0xff] }
  0x38   : > { %606 = vst.msk [vmem:[#allocation2 + $0x31] sm:$0xff] %vm515_vm0, %v453_v29  ;;  %607 = vst.msk [vmem:[#allocation2 + $0x39] sm:$0xff] %vm515_vm0, %v454_v30  ;;  %v272_v29 = vld [vmem:[%s6503_s26 + $0xc8] sm:$0xff] }
  0x39   : > { %604 = vst.msk [vmem:[#allocation2 + $0x19] sm:$0xff] %vm515_vm0, %v451_v31  ;;  %605 = vst.msk [vmem:[#allocation2 + $0x21] sm:$0xff] %vm515_vm0, %v452_v34  ;;  %v463_v8 = vmax.f32 %v399_v0, 0.0  ;;  %v338_v34 = vmul.f32 %v6496_v1, %v268_v13  ;;  %v342_v58 = vmul.f32 %v6496_v1, %v272_v29  ;;  %v410_v0 = vadd.f32 %v6508_v2, %v340_v49  ;;  %v285_v29 = vld [vmem:[%s6503_s26 + $0x130] sm:$0xff] }
  0x3a   : > { %608 = vst.msk [vmem:[#allocation2 + $0x49] sm:$0xff] %vm515_vm0, %v455_v39  ;;  %609 = vst.msk [vmem:[#allocation2 + $0x51] sm:$0xff] %vm515_vm0, %v456_v46  ;;  %v470_v46 = vmax.f32 %v406_v32, 0.0  ;;  %v354_v49 = vmul.f32 %v6496_v1, %v284_v28  ;;  %v355_v50 = vmul.f32 %v6496_v1, %v285_v29 }
  0x3b   : > { %610 = vst.msk [vmem:[#allocation2 + $0x61] sm:$0xff] %vm515_vm0, %v457_v47  ;;  %611 = vst.msk [vmem:[#allocation2 + $0x69] sm:$0xff] %vm515_vm0, %v458_v48  ;;  %v407_v47 = vadd.f32 %v6508_v2, %v337_v33  ;;  %v408_v48 = vadd.f32 %v6508_v2, %v338_v34 }
  0x3c   : > { %612 = vst.msk [vmem:[#allocation2 + $0x79] sm:$0xff] %vm515_vm0, %v459_v61  ;;  %613 = vst.msk [vmem:[#allocation2 + $0x81] sm:$0xff] %vm515_vm0, %v460_v62 }
  0x3d   : > { %614 = vst.msk [vmem:[#allocation2 + $0x91] sm:$0xff] %vm515_vm0, %v461_v63  ;;  %615 = vst.msk [vmem:[#allocation2 + $0x99] sm:$0xff] %vm515_vm0, %v462_v4  ;;  %v471_v57 = vmax.f32 %v407_v47, 0.0  ;;  %v472_v63 = vmax.f32 %v408_v48, 0.0  ;;  %v279_v4 = vld [vmem:[%s6503_s26 + $0x100] sm:$0xff]  ;;  %v353_v48 = vmul.f32 %v6496_v1, %v283_v27  ;;  %v294_v27 = vld [vmem:[%s6503_s26 + $0x178] sm:$0xff] }
  0x3e   : > { %616 = vst.msk [vmem:[#allocation2 + $0xa9] sm:$0xff] %vm515_vm0, %v463_v8  ;;  %617 = vst.msk [vmem:[#allocation2 + $0xb1] sm:$0xff] %vm515_vm0, %v464_v18  ;;  %v412_v8 = vadd.f32 %v6508_v2, %v342_v58  ;;  %v346_v18 = vmul.f32 %v6496_v1, %v276_v53  ;;  %v349_v34 = vmul.f32 %v6496_v1, %v279_v4 }
  0x3f   : > { %v736_v15 = vld [vmem:[#allocation2 + $0x31] sm:$0xff]  ;;  %v737_v16 = vld [vmem:[#allocation2 + $0x39] sm:$0xff]  ;;  %618 = vst.msk [vmem:[#allocation2 + $0xc1] sm:$0xff] %vm515_vm0, %v465_v19  ;;  %619 = vst.msk [vmem:[#allocation2 + $0xc9] sm:$0xff] %vm515_vm0, %v466_v20  ;;  %v475_v20 = vmax.f32 %v411_v7, 0.0  ;;  %v425_v4 = vadd.f32 %v6508_v2, %v355_v50 }
  0x40   : > { %v734_v17 = vld [vmem:[#allocation2 + $0x19] sm:$0xff]  ;;  %v4961_v23 = vpack.i.bf16 %v737_v16, %v736_v15  ;;  %v735_v24 = vld [vmem:[#allocation2 + $0x21] sm:$0xff]  ;;  %620 = vst.msk [vmem:[#allocation2 + $0xd9] sm:$0xff] %vm515_vm0, %v467_v40  ;;  %621 = vst.msk [vmem:[#allocation2 + $0xe1] sm:$0xff] %vm515_vm0, %v468_v41  ;;  %v474_v15 = vmax.f32 %v410_v0, 0.0  ;;  %v414_v16 = vadd.f32 %v6508_v2, %v344_v60  ;;  %v476_v21 = vmax.f32 %v412_v8, 0.0 }
  0x41   : > { %v4956_v30 = vpack.i.bf16 %v735_v24, %v734_v17  ;;  %v738_v31 = vld [vmem:[#allocation2 + $0x49] sm:$0xff]  ;;  %v739_v37 = vld [vmem:[#allocation2 + $0x51] sm:$0xff]  ;;  %622 = vst.msk [vmem:[#allocation2 + $0xf1] sm:$0xff] %vm515_vm0, %v469_v42  ;;  %623 = vst.msk [vmem:[#allocation2 + $0xf9] sm:$0xff] %vm515_vm0, %v470_v46  ;;  %v345_v17 = vmul.f32 %v6496_v1, %v275_v52  ;;  %v416_v26 = vadd.f32 %v6508_v2, %v346_v18 }
  0x42   : > { %4962 = vrot.lane.b32.xlu1 %v4961_v23, %s6269_s29  ;;  %v740_v38 = vld [vmem:[#allocation2 + $0x61] sm:$0xff]  ;;  %v741_v39 = vld [vmem:[#allocation2 + $0x69] sm:$0xff]  ;;  %v4966_v44 = vpack.i.bf16 %v739_v37, %v738_v31  ;;  %624 = vst.msk [vmem:[#allocation2 + $0x109] sm:$0xff] %vm515_vm0, %v471_v57  ;;  %625 = vst.msk [vmem:[#allocation2 + $0x111] sm:$0xff] %vm515_vm0, %v472_v63  ;;  %v477_v23 = vmax.f32 %v413_v9, 0.0  ;;  %v478_v24 = vmax.f32 %v414_v16, 0.0  ;;  %v352_v41 = vmul.f32 %v6496_v1, %v282_v22 }
  0x43   : > { %4957 = vrot.lane.b32.xlu0 %v4956_v30, %s6269_s29  ;;  %v4971_v45 = vpack.i.bf16 %v741_v39, %v740_v38  ;;  %v742_v54 = vld [vmem:[#allocation2 + $0x79] sm:$0xff]  ;;  %v743_v55 = vld [vmem:[#allocation2 + $0x81] sm:$0xff]  ;;  %626 = vst.msk [vmem:[#allocation2 + $0x121] sm:$0xff] %vm515_vm0, %v473_v3  ;;  %627 = vst.msk [vmem:[#allocation2 + $0x129] sm:$0xff] %vm515_vm0, %v474_v15  ;;  %v415_v25 = vadd.f32 %v6508_v2, %v345_v17  ;;  %v480_v40 = vmax.f32 %v416_v26, 0.0 }
  0x44   : > { %v744_v56 = vld [vmem:[#allocation2 + $0x91] sm:$0xff]  ;;  %v4976_v61 = vpack.i.bf16 %v743_v55, %v742_v54  ;;  %v745_v62 = vld [vmem:[#allocation2 + $0x99] sm:$0xff]  ;;  %628 = vst.msk [vmem:[#allocation2 + $0x139] sm:$0xff] %vm515_vm0, %v475_v20  ;;  %629 = vst.msk [vmem:[#allocation2 + $0x141] sm:$0xff] %vm515_vm0, %v476_v21  ;;  %v421_v46 = vadd.f32 %v6508_v2, %v351_v36  ;;  %v422_v47 = vadd.f32 %v6508_v2, %v352_v41  ;;  %v489_v20 = vmax.f32 %v425_v4, 0.0 }
  0x45   : > { %v4981_v5 = vpack.i.bf16 %v745_v62, %v744_v56  ;;  %v746_v6 = vld [vmem:[#allocation2 + $0xa9] sm:$0xff]  ;;  %v747_v12 = vld [vmem:[#allocation2 + $0xb1] sm:$0xff]  ;;  %630 = vst.msk [vmem:[#allocation2 + $0x151] sm:$0xff] %vm515_vm0, %v477_v23  ;;  %631 = vst.msk [vmem:[#allocation2 + $0x159] sm:$0xff] %vm515_vm0, %v478_v24  ;;  %v479_v39 = vmax.f32 %v415_v25, 0.0  ;;  %v423_v62 = vadd.f32 %v6508_v2, %v353_v48  ;;  %v424_v63 = vadd.f32 %v6508_v2, %v354_v49 }
  0x46   : > { %4967 = vrot.lane.b32.xlu1 %v4966_v44, %s6269_s29  ;;  %v748_v13 = vld [vmem:[#allocation2 + $0xc1] sm:$0xff]  ;;  %v749_v14 = vld [vmem:[#allocation2 + $0xc9] sm:$0xff]  ;;  %v4986_v19 = vpack.i.bf16 %v747_v12, %v746_v6  ;;  %v286_v42 = vld [vmem:[%s6503_s26 + $0x138] sm:$0xff]  ;;  %v419_v44 = vadd.f32 %v6508_v2, %v349_v34  ;;  %633 = vst.msk [vmem:[#allocation2 + $0x171] sm:$0xff] %vm515_vm0, %v480_v40  ;;  %v485_v57 = vmax.f32 %v421_v46, 0.0  ;;  %v357_v6 = vmul.f32 %v6496_v1, %v287_v51 }
  0x47   : > { %4972 = vrot.lane.b32.xlu0 %v4971_v45, %s6269_s29  ;;  %v4991_v30 = vpack.i.bf16 %v749_v14, %v748_v13  ;;  %v750_v31 = vld [vmem:[#allocation2 + $0xd9] sm:$0xff]  ;;  %v751_v32 = vld [vmem:[#allocation2 + $0xe1] sm:$0xff]  ;;  %v420_v45 = vadd.f32 %v6508_v2, %v350_v35  ;;  %632 = vst.msk [vmem:[#allocation2 + $0x169] sm:$0xff] %vm515_vm0, %v479_v39  ;;  %v356_v58 = vmul.f32 %v6496_v1, %v286_v42  ;;  %v487_v13 = vmax.f32 %v423_v62, 0.0  ;;  %v293_v16 = vld [vmem:[%s6503_s26 + $0x170] sm:$0xff] }
  0x48   : > { %v752_v33 = vld [vmem:[#allocation2 + $0xf1] sm:$0xff]  ;;  %v4996_v37 = vpack.i.bf16 %v751_v32, %v750_v31  ;;  %v753_v38 = vld [vmem:[#allocation2 + $0xf9] sm:$0xff]  ;;  %v288_v52 = vld [vmem:[%s6503_s26 + $0x148] sm:$0xff]  ;;  %v483_v55 = vmax.f32 %v419_v44, 0.0  ;;  %638 = vst.msk [vmem:[#allocation2 + $0x1e1] sm:$0xff] %vm515_vm0, %v485_v57  ;;  %v488_v14 = vmax.f32 %v424_v63, 0.0  ;;  %v359_v15 = vmul.f32 %v6496_v1, %v289_v59 }
  0x49   : > { %v5001_v43 = vpack.i.bf16 %v753_v38, %v752_v33  ;;  %v754_v53 = vld [vmem:[#allocation2 + $0x109] sm:$0xff]  ;;  %v755_v54 = vld [vmem:[#allocation2 + $0x111] sm:$0xff]  ;;  %v484_v56 = vmax.f32 %v420_v45, 0.0  ;;  %v358_v7 = vmul.f32 %v6496_v1, %v288_v52  ;;  %v291_v8 = vld [vmem:[%s6503_s26 + $0x160] sm:$0xff]  ;;  %v427_v22 = vadd.f32 %v6508_v2, %v357_v6  ;;  %640 = vst.msk [vmem:[#allocation2 + $0x1f9] sm:$0xff] %vm515_vm0, %v487_v13 }
  0x4a   : > { %4977 = vrot.lane.b32.xlu1 %v4976_v61, %s6269_s29  ;;  %v756_v60 = vld [vmem:[#allocation2 + $0x121] sm:$0xff]  ;;  %v486_v61 = vmax.f32 %v422_v47, 0.0  ;;  %v290_v0 = vld [vmem:[%s6503_s26 + $0x158] sm:$0xff]  ;;  %v757_v3 = vld [vmem:[#allocation2 + $0x129] sm:$0xff]  ;;  %636 = vst.msk [vmem:[#allocation2 + $0x1c9] sm:$0xff] %vm515_vm0, %v483_v55  ;;  %v5006_v10 = vpack.i.bf16 %v755_v54, %v754_v53  ;;  %v429_v26 = vadd.f32 %v6508_v2, %v359_v15  ;;  %v361_v29 = vmul.f32 %v6496_v1, %v291_v8 }
  0x4b   : > { %4982 = vrot.lane.b32.xlu0 %v4981_v5, %s6269_s29  ;;  %637 = vst.msk [vmem:[#allocation2 + $0x1d1] sm:$0xff] %vm515_vm0, %v484_v56  ;;  %v426_v5 = vadd.f32 %v6508_v2, %v356_v58  ;;  %v292_v9 = vld [vmem:[%s6503_s26 + $0x168] sm:$0xff]  ;;  %v758_v11 = vld [vmem:[#allocation2 + $0x139] sm:$0xff]  ;;  %v5011_v17 = vpack.i.bf16 %v757_v3, %v756_v60  ;;  %641 = vst.msk [vmem:[#allocation2 + $0x201] sm:$0xff] %vm515_vm0, %v488_v14  ;;  %v428_v24 = vadd.f32 %v6508_v2, %v358_v7 }
  0x4c   : > { %v759_v12 = vld [vmem:[#allocation2 + $0x141] sm:$0xff]  ;;  %639 = vst.msk [vmem:[#allocation2 + $0x1e9] sm:$0xff] %vm515_vm0, %v486_v61  ;;  %v760_v18 = vld [vmem:[#allocation2 + $0x151] sm:$0xff]  ;;  %v360_v25 = vmul.f32 %v6496_v1, %v290_v0  ;;  %642 = vst.msk [vmem:[#allocation2 + $0x211] sm:$0xff] %vm515_vm0, %v489_v20  ;;  %v491_v28 = vmax.f32 %v427_v22, 0.0  ;;  %v363_v31 = vmul.f32 %v6496_v1, %v293_v16  ;;  %v493_v40 = vmax.f32 %v429_v26, 0.0 }
  0x4d   : > { %v490_v21 = vmax.f32 %v426_v5, 0.0  ;;  %v5016_v23 = vpack.i.bf16 %v759_v12, %v758_v11  ;;  %v295_v32 = vld [vmem:[%s6503_s26 + $0x180] sm:$0xff]  ;;  %v296_v33 = vld [vmem:[%s6503_s26 + $0x188] sm:$0xff]  ;;  %v297_v34 = vld [vmem:[%s6503_s26 + $0x190] sm:$0xff]  ;;  %v492_v38 = vmax.f32 %v428_v24, 0.0  ;;  %v364_v45 = vmul.f32 %v6496_v1, %v294_v27 }
  0x4e   : > { %4987 = vrot.lane.b32.xlu1 %v4986_v19, %s6269_s29  ;;  %v761_v19 = vld [vmem:[#allocation2 + $0x159] sm:$0xff]  ;;  %v6695_v36 = vld [vmem:[#allocation2 + $0x1b1] sm:$0xff]  ;;  %v430_v39 = vadd.f32 %v6508_v2, %v360_v25  ;;  %v762_v41 = vld [vmem:[#allocation2 + $0x169] sm:$0xff]  ;;  %644 = vst.msk [vmem:[#allocation2 + $0x229] sm:$0xff] %vm515_vm0, %v491_v28  ;;  %v433_v46 = vadd.f32 %v6508_v2, %v363_v31  ;;  %v365_v48 = vmul.f32 %v6496_v1, %v295_v32 }
  0x4f   : > { %4992 = vrot.lane.b32.xlu0 %v4991_v30, %s6269_s29  ;;  %643 = vst.msk [vmem:[#allocation2 + $0x219] sm:$0xff] %vm515_vm0, %v490_v21  ;;  %v362_v30 = vmul.f32 %v6496_v1, %v292_v9  ;;  %v5021_v35 = vpack.i.bf16 %v761_v19, %v760_v18  ;;  %v763_v42 = vld [vmem:[#allocation2 + $0x171] sm:$0xff]  ;;  %645 = vst.msk [vmem:[#allocation2 + $0x231] sm:$0xff] %vm515_vm0, %v492_v38  ;;  %v366_v49 = vmul.f32 %v6496_v1, %v296_v33  ;;  %v299_v52 = vld [vmem:[%s6503_s26 + $0x1a0] sm:$0xff] }
  0x50   : > { %v494_v47 = vmax.f32 %v430_v39, 0.0  ;;  %646 = vst.msk [vmem:[#allocation2 + $0x241] sm:$0xff] %vm515_vm0, %v493_v40  ;;  %v298_v50 = vld [vmem:[%s6503_s26 + $0x198] sm:$0xff]  ;;  %v367_v51 = vmul.f32 %v6496_v1, %v297_v34  ;;  %v434_v58 = vadd.f32 %v6508_v2, %v364_v45  ;;  %v300_v59 = vld [vmem:[%s6503_s26 + $0x1a8] sm:$0xff]  ;;  %v5026_v60 = vpack.i.bf16 %v763_v42, %v762_v41  ;;  %v301_v8 = vld [vmem:[%s6503_s26 + $0x1b0] sm:$0xff] }
  0x51   : > { %v432_v44 = vadd.f32 %v6508_v2, %v362_v30  ;;  %v6715_v54 = vld [vmem:[#allocation2 + $0x1c9] sm:$0xff]  ;;  %v6722_v61 = vld [vmem:[#allocation2 + $0x1e1] sm:$0xff]  ;;  %v497_v63 = vmax.f32 %v433_v46, 0.0  ;;  %v435_v0 = vadd.f32 %v6508_v2, %v365_v48  ;;  %v436_v3 = vadd.f32 %v6508_v2, %v366_v49  ;;  %v302_v9 = vld [vmem:[%s6503_s26 + $0x1b8] sm:$0xff] }
  0x52   : > { %4997 = vrot.lane.b32.xlu1 %v4996_v37, %s6269_s29  ;;  %v6697_v37 = vld [vmem:[#allocation2 + $0x1b9] sm:$0xff]  ;;  %v6717_v55 = vld [vmem:[#allocation2 + $0x1d1] sm:$0xff]  ;;  %647 = vst.msk [vmem:[#allocation2 + $0x249] sm:$0xff] %vm515_vm0, %v494_v47  ;;  %v498_v4 = vmax.f32 %v434_v58, 0.0  ;;  %v368_v5 = vmul.f32 %v6496_v1, %v298_v50  ;;  %v437_v6 = vadd.f32 %v6508_v2, %v367_v51  ;;  %v369_v7 = vmul.f32 %v6496_v1, %v299_v52  ;;  %v304_v15 = vld [vmem:[%s6503_s26 + $0x1c8] sm:$0xff] }
  0x53   : > { %5002 = vrot.lane.b32.xlu0 %v5001_v43, %s6269_s29  ;;  %v431_v43 = vadd.f32 %v6508_v2, %v361_v29  ;;  %v5031_v53 = vpack.i.bf16 %v6697_v37, %v6695_v36  ;;  %v496_v57 = vmax.f32 %v432_v44, 0.0  ;;  %v769_v62 = vld [vmem:[#allocation2 + $0x1e9] sm:$0xff]  ;;  %v5036_v11 = vpack.i.bf16 %v6717_v55, %v6715_v54  ;;  %650 = vst.msk [vmem:[#allocation2 + $0x271] sm:$0xff] %vm515_vm0, %v497_v63  ;;  %v306_v25 = vld [vmem:[%s6503_s26 + $0x1d8] sm:$0xff]  ;;  %v771_v27 = vld [vmem:[#allocation2 + $0x201] sm:$0xff] }
  0x54   : > { %v499_v12 = vmax.f32 %v435_v0, 0.0  ;;  %v500_v13 = vmax.f32 %v436_v3, 0.0  ;;  %v370_v14 = vmul.f32 %v6496_v1, %v300_v59  ;;  %v305_v16 = vld [vmem:[%s6503_s26 + $0x1d0] sm:$0xff]  ;;  %651 = vst.msk [vmem:[#allocation2 + $0x279] sm:$0xff] %vm515_vm0, %v498_v4  ;;  %v438_v18 = vadd.f32 %v6508_v2, %v368_v5  ;;  %v770_v26 = vld [vmem:[#allocation2 + $0x1f9] sm:$0xff]  ;;  %v308_v42 = vld [vmem:[%s6503_s26 + $0x1e8] sm:$0xff] }
  0x55   : > { %v495_v56 = vmax.f32 %v431_v43, 0.0  ;;  %649 = vst.msk [vmem:[#allocation2 + $0x261] sm:$0xff] %vm515_vm0, %v496_v57  ;;  %v501_v19 = vmax.f32 %v437_v6, 0.0  ;;  %v439_v20 = vadd.f32 %v6508_v2, %v369_v7  ;;  %v371_v22 = vmul.f32 %v6496_v1, %v301_v8  ;;  %v307_v32 = vld [vmem:[%s6503_s26 + $0x1e0] sm:$0xff]  ;;  %v772_v33 = vld [vmem:[#allocation2 + $0x211] sm:$0xff]  ;;  %v774_v48 = vld [vmem:[#allocation2 + $0x229] sm:$0xff] }
  0x56   : > { %5007 = vrot.lane.b32.xlu1 %v5006_v10, %s6269_s29  ;;  %v303_v10 = vld [vmem:[%s6503_s26 + $0x1c0] sm:$0xff]  ;;  %652 = vst.msk [vmem:[#allocation2 + $0x289] sm:$0xff] %vm515_vm0, %v499_v12  ;;  %653 = vst.msk [vmem:[#allocation2 + $0x291] sm:$0xff] %vm515_vm0, %v500_v13  ;;  %v440_v21 = vadd.f32 %v6508_v2, %v370_v14  ;;  %v502_v28 = vmax.f32 %v438_v18, 0.0  ;;  %v374_v30 = vmul.f32 %v6496_v1, %v304_v15  ;;  %v775_v49 = vld [vmem:[#allocation2 + $0x231] sm:$0xff] }
  0x57   : > { %5012 = vrot.lane.b32.xlu0 %v5011_v17, %s6269_s29  ;;  %648 = vst.msk [vmem:[#allocation2 + $0x259] sm:$0xff] %vm515_vm0, %v495_v56  ;;  %v5041_v17 = vpack.i.bf16 %v769_v62, %v6722_v61  ;;  %v373_v24 = vmul.f32 %v6496_v1, %v303_v10  ;;  %654 = vst.msk [vmem:[#allocation2 + $0x2a1] sm:$0xff] %vm515_vm0, %v501_v19  ;;  %v503_v29 = vmax.f32 %v439_v20, 0.0  ;;  %v773_v34 = vld [vmem:[#allocation2 + $0x219] sm:$0xff] }
  0x58   : > { %v375_v31 = vmul.f32 %v6496_v1, %v305_v16  ;;  %v441_v36 = vadd.f32 %v6508_v2, %v371_v22  ;;  %655 = vst.msk [vmem:[#allocation2 + $0x2a9] sm:$0xff] %vm515_vm0, %v502_v28  ;;  %v444_v39 = vadd.f32 %v6508_v2, %v374_v30  ;;  %v376_v40 = vmul.f32 %v6496_v1, %v306_v25  ;;  %v796_v28 = vld [vmem:[#allocation2 + $0x2] sm:$0xff] }
  0x59   : > { %656 = vst.msk [vmem:[#allocation2 + $0x2b9] sm:$0xff] %vm515_vm0, %v503_v29  ;;  %v443_v38 = vadd.f32 %v6508_v2, %v373_v24  ;;  %v5046_v43 = vpack.i.bf16 %v771_v27, %v770_v26  ;;  %v377_v46 = vmul.f32 %v6496_v1, %v307_v32  ;;  %v5051_v47 = vpack.i.bf16 %v773_v34, %v772_v33  ;;  %v777_v54 = vld [vmem:[#allocation2 + $0x249] sm:$0xff]  ;;  %v798_v32 = vld [vmem:[#allocation2 + $0x1a] sm:$0xff]  ;;  %v800_v34 = vld [vmem:[#allocation2 + $0x32] sm:$0xff] }
  0x5a   : > { %5017 = vrot.lane.b32.xlu1 %v5016_v23, %s6269_s29  ;;  %v372_v23 = vmul.f32 %v6496_v1, %v302_v9  ;;  %v445_v41 = vadd.f32 %v6508_v2, %v375_v31  ;;  %v505_v44 = vmax.f32 %v441_v36, 0.0  ;;  %v508_v51 = vmax.f32 %v444_v39, 0.0  ;;  %v780_v3 = vld [vmem:[#allocation2 + $0x271] sm:$0xff]  ;;  %v799_v33 = vld [vmem:[#allocation2 + $0x22] sm:$0xff] }
  0x5b   : > { %5022 = vrot.lane.b32.xlu0 %v5021_v35, %s6269_s29  ;;  %v504_v35 = vmax.f32 %v440_v21, 0.0  ;;  %v507_v50 = vmax.f32 %v443_v38, 0.0  ;;  %v446_v52 = vadd.f32 %v6508_v2, %v376_v40  ;;  %v378_v56 = vmul.f32 %v6496_v1, %v308_v42  ;;  %v781_v4 = vld [vmem:[#allocation2 + $0x279] sm:$0xff]  ;;  %v797_v29 = vld [vmem:[#allocation2 + $0xa] sm:$0xff]  ;;  %v804_v42 = vld [vmem:[#allocation2 + $0x62] sm:$0xff] }
  0x5c   : > { %v442_v37 = vadd.f32 %v6508_v2, %v372_v23  ;;  %658 = vst.msk [vmem:[#allocation2 + $0x2d1] sm:$0xff] %vm515_vm0, %v505_v44  ;;  %v509_v55 = vmax.f32 %v445_v41, 0.0  ;;  %v447_v57 = vadd.f32 %v6508_v2, %v377_v46  ;;  %661 = vst.msk [vmem:[#allocation2 + $0x2f1] sm:$0xff] %vm515_vm0, %v508_v51  ;;  %v5056_v59 = vpack.i.bf16 %v775_v49, %v774_v48  ;;  %v779_v0 = vld [vmem:[#allocation2 + $0x261] sm:$0xff]  ;;  %v803_v39 = vld [vmem:[#allocation2 + $0x52] sm:$0xff] }
  0x5d   : > { %657 = vst.msk [vmem:[#allocation2 + $0x2c1] sm:$0xff] %vm515_vm0, %v504_v35  ;;  %660 = vst.msk [vmem:[#allocation2 + $0x2e9] sm:$0xff] %vm515_vm0, %v507_v50  ;;  %v510_v58 = vmax.f32 %v446_v52, 0.0  ;;  %v5071_v7 = vpack.i.bf16 %v781_v4, %v780_v3  ;;  %v782_v8 = vld [vmem:[#allocation2 + $0x289] sm:$0xff]  ;;  %v783_v9 = vld [vmem:[#allocation2 + $0x291] sm:$0xff]  ;;  %v5111_v31 = vpack.i.bf16 %v797_v29, %v796_v28  ;;  %v5116_v36 = vpack.i.bf16 %v799_v33, %v798_v32 }
  0x5e   : > { %5027 = vrot.lane.b32.xlu1 %v5026_v60, %s6269_s29  ;;  %v506_v45 = vmax.f32 %v442_v37, 0.0  ;;  %662 = vst.msk [vmem:[#allocation2 + $0x301] sm:$0xff] %vm515_vm0, %v509_v55  ;;  %v448_v60 = vadd.f32 %v6508_v2, %v378_v56  ;;  %v511_v61 = vmax.f32 %v447_v57, 0.0  ;;  %v778_v63 = vld [vmem:[#allocation2 + $0x259] sm:$0xff]  ;;  %v784_v10 = vld [vmem:[#allocation2 + $0x2a1] sm:$0xff]  ;;  %v5076_v12 = vpack.i.bf16 %v783_v9, %v782_v8  ;;  %v802_v37 = vld [vmem:[#allocation2 + $0x4a] sm:$0xff] }
  0x5f   : > { %5032 = vrot.lane.b32.xlu0 %v5031_v53, %s6269_s29  ;;  %v776_v53 = vld [vmem:[#allocation2 + $0x241] sm:$0xff]  ;;  %663 = vst.msk [vmem:[#allocation2 + $0x309] sm:$0xff] %vm515_vm0, %v510_v58  ;;  %v5066_v6 = vpack.i.bf16 %v779_v0, %v778_v63  ;;  %v277_v40 = vld [vmem:[%s6503_s26 + $0xf0] sm:$0xff]  ;;  %v278_v41 = vld [vmem:[%s6503_s26 + $0xf8] sm:$0xff]  ;;  %v5126_v46 = vpack.i.bf16 %v803_v39, %v802_v37 }
  0x60   : > { %659 = vst.msk [vmem:[#allocation2 + $0x2d9] sm:$0xff] %vm515_vm0, %v506_v45  ;;  %v5061_v62 = vpack.i.bf16 %v777_v54, %v776_v53  ;;  %v512_v5 = vmax.f32 %v448_v60, 0.0  ;;  %664 = vst.msk [vmem:[#allocation2 + $0x319] sm:$0xff] %vm515_vm0, %v511_v61  ;;  %v786_v14 = vld [vmem:[#allocation2 + $0x2b9] sm:$0xff]  ;;  %v347_v44 = vmul.f32 %v6496_v1, %v277_v40  ;;  %v348_v45 = vmul.f32 %v6496_v1, %v278_v41  ;;  %v807_v51 = vld [vmem:[#allocation2 + $0x82] sm:$0xff] }
  0x61   : > { %v801_v35 = vld [vmem:[#allocation2 + $0x3a] sm:$0xff]  ;;  %v808_v52 = vld [vmem:[#allocation2 + $0x92] sm:$0xff]  ;;  %v810_v61 = vld [vmem:[#allocation2 + $0xaa] sm:$0xff] }
  0x62   : > { %5037 = vrot.lane.b32.xlu1 %v5036_v11, %s6269_s29  ;;  %665 = vst.msk [vmem:[#allocation2 + $0x321] sm:$0xff] %vm515_vm0, %v512_v5  ;;  %v785_v11 = vld [vmem:[#allocation2 + $0x2a9] sm:$0xff]  ;;  %v5121_v38 = vpack.i.bf16 %v801_v35, %v800_v34  ;;  %v418_v48 = vadd.f32 %v6508_v2, %v348_v45  ;;  %v806_v50 = vld [vmem:[#allocation2 + $0x7a] sm:$0xff]  ;;  %v828_v28 = vld [vmem:[#allocation2 + $0x1b2] sm:$0xff] }
  0x63   : > { %5042 = vrot.lane.b32.xlu0 %v5041_v17, %s6269_s29  ;;  %v5081_v13 = vpack.i.bf16 %v785_v11, %v784_v10  ;;  %v788_v16 = vld [vmem:[#allocation2 + $0x2d1] sm:$0xff]  ;;  %v809_v53 = vld [vmem:[#allocation2 + $0x9a] sm:$0xff]  ;;  %v5136_v57 = vpack.i.bf16 %v807_v51, %v806_v50  ;;  %v812_v0 = vld [vmem:[#allocation2 + $0xc2] sm:$0xff] }
  0x64   : > { %v787_v15 = vld [vmem:[#allocation2 + $0x2c1] sm:$0xff]  ;;  %v790_v20 = vld [vmem:[#allocation2 + $0x2e9] sm:$0xff]  ;;  %v791_v21 = vld [vmem:[#allocation2 + $0x2f1] sm:$0xff]  ;;  %v482_v55 = vmax.f32 %v418_v48, 0.0  ;;  %v5141_v60 = vpack.i.bf16 %v809_v53, %v808_v52 }
  0x65   : > { %v5086_v18 = vpack.i.bf16 %v787_v15, %v786_v14  ;;  %v792_v22 = vld [vmem:[#allocation2 + $0x301] sm:$0xff]  ;;  %v5096_v24 = vpack.i.bf16 %v791_v21, %v790_v20  ;;  %v309_v56 = vld [vmem:[%s6503_s26 + $0x1f0] sm:$0xff]  ;;  %v310_v58 = vld [vmem:[%s6503_s26 + $0x1f8] sm:$0xff] }
  0x66   : > { %5047 = vrot.lane.b32.xlu1 %v5046_v43, %s6269_s29  ;;  %v793_v23 = vld [vmem:[#allocation2 + $0x309] sm:$0xff]  ;;  %635 = vst.msk [vmem:[#allocation2 + $0x189] sm:$0xff] %vm515_vm0, %v482_v55  ;;  %v380_v63 = vmul.f32 %v6496_v1, %v310_v58  ;;  %v814_v9 = vld [vmem:[#allocation2 + $0xda] sm:$0xff]  ;;  %v819_v15 = vld [vmem:[#allocation2 + $0x112] sm:$0xff] }
  0x67   : > { %5052 = vrot.lane.b32.xlu0 %v5051_v47, %s6269_s29  ;;  %v789_v17 = vld [vmem:[#allocation2 + $0x2d9] sm:$0xff]  ;;  %v5101_v25 = vpack.i.bf16 %v793_v23, %v792_v22  ;;  %v805_v43 = vld [vmem:[#allocation2 + $0x6a] sm:$0xff]  ;;  %v417_v47 = vadd.f32 %v6508_v2, %v347_v44  ;;  %v815_v10 = vld [vmem:[#allocation2 + $0xe2] sm:$0xff] }
  0x68   : > { %v5091_v19 = vpack.i.bf16 %v789_v17, %v788_v16  ;;  %v794_v26 = vld [vmem:[#allocation2 + $0x319] sm:$0xff]  ;;  %v5131_v49 = vpack.i.bf16 %v805_v43, %v804_v42  ;;  %v813_v3 = vld [vmem:[#allocation2 + $0xca] sm:$0xff]  ;;  %v450_v5 = vadd.f32 %v6508_v2, %v380_v63  ;;  %v820_v16 = vld [vmem:[#allocation2 + $0x122] sm:$0xff] }
  0x69   : > { %v795_v27 = vld [vmem:[#allocation2 + $0x321] sm:$0xff]  ;;  %v481_v54 = vmax.f32 %v417_v47, 0.0  ;;  %v5151_v8 = vpack.i.bf16 %v813_v3, %v812_v0  ;;  %v818_v14 = vld [vmem:[#allocation2 + $0x10a] sm:$0xff]  ;;  %v824_v22 = vld [vmem:[#allocation2 + $0x152] sm:$0xff] }
  0x6a   : > { %5057 = vrot.lane.b32.xlu1 %v5056_v59, %s6269_s29  ;;  %v5106_v30 = vpack.i.bf16 %v795_v27, %v794_v26  ;;  %v379_v59 = vmul.f32 %v6496_v1, %v309_v56  ;;  %v514_v11 = vmax.f32 %v450_v5, 0.0  ;;  %v5156_v1 = vpack.i.bf16 %v815_v10, %v814_v9  ;;  %v821_v17 = vld [vmem:[#allocation2 + $0x12a] sm:$0xff]  ;;  %v822_v20 = vld [vmem:[#allocation2 + $0x13a] sm:$0xff]  ;;  %v823_v21 = vld [vmem:[#allocation2 + $0x142] sm:$0xff] }
  0x6b   : > { %5062 = vrot.lane.b32.xlu0 %v5061_v62, %s6269_s29  ;;  %634 = vst.msk [vmem:[#allocation2 + $0x181] sm:$0xff] %vm515_vm0, %v481_v54  ;;  %v811_v62 = vld [vmem:[#allocation2 + $0xb2] sm:$0xff]  ;;  %v825_v23 = vld [vmem:[#allocation2 + $0x15a] sm:$0xff]  ;;  %v826_v26 = vld [vmem:[#allocation2 + $0x16a] sm:$0xff] }
  0x6c   : > { %v449_v4 = vadd.f32 %v6508_v2, %v379_v59  ;;  %667 = vst.msk [vmem:[#allocation2 + $0x339] sm:$0xff] %vm515_vm0, %v514_v11  ;;  %v827_v27 = vld [vmem:[#allocation2 + $0x172] sm:$0xff]  ;;  %v829_v29 = vld [vmem:[#allocation2 + $0x1ba] sm:$0xff]  ;;  %v830_v32 = vld [vmem:[#allocation2 + $0x1ca] sm:$0xff] }
  0x6d   : > { %v831_v33 = vld [vmem:[#allocation2 + $0x1d2] sm:$0xff]  ;;  %v832_v34 = vld [vmem:[#allocation2 + $0x1e2] sm:$0xff]  ;;  %v833_v35 = vld [vmem:[#allocation2 + $0x1ea] sm:$0xff] }
  0x6e   : > { %5067 = vrot.lane.b32.xlu1 %v5066_v6, %s6269_s29  ;;  %v5146_v6 = vpack.i.bf16 %v811_v62, %v810_v61  ;;  %v5201_v37 = vpack.i.bf16 %v833_v35, %v832_v34  ;;  %v835_v39 = vld [vmem:[#allocation2 + $0x202] sm:$0xff]  ;;  %v836_v40 = vld [vmem:[#allocation2 + $0x212] sm:$0xff]  ;;  %v837_v41 = vld [vmem:[#allocation2 + $0x21a] sm:$0xff] }
  0x6f   : > { %5072 = vrot.lane.b32.xlu0 %v5071_v7, %s6269_s29  ;;  %v513_v7 = vmax.f32 %v449_v4, 0.0  ;;  %v5211_v43 = vpack.i.bf16 %v837_v41, %v836_v40  ;;  %v838_v44 = vld [vmem:[#allocation2 + $0x22a] sm:$0xff]  ;;  %v839_v45 = vld [vmem:[#allocation2 + $0x232] sm:$0xff]  ;;  %v842_v50 = vld [vmem:[#allocation2 + $0x25a] sm:$0xff] }
  0x70   : > { %v841_v47 = vld [vmem:[#allocation2 + $0x24a] sm:$0xff]  ;;  %v5216_v48 = vpack.i.bf16 %v839_v45, %v838_v44  ;;  %v843_v51 = vld [vmem:[#allocation2 + $0x262] sm:$0xff]  ;;  %v844_v52 = vld [vmem:[#allocation2 + $0x272] sm:$0xff] }
  0x71   : > { %666 = vst.msk [vmem:[#allocation2 + $0x331] sm:$0xff] %vm515_vm0, %v513_v7  ;;  %v845_v53 = vld [vmem:[#allocation2 + $0x27a] sm:$0xff]  ;;  %v5226_v54 = vpack.i.bf16 %v843_v51, %v842_v50  ;;  %v846_v56 = vld [vmem:[#allocation2 + $0x28a] sm:$0xff]  ;;  %v848_v58 = vld [vmem:[#allocation2 + $0x2a2] sm:$0xff] }
  0x72   : > { %5077 = vrot.lane.b32.xlu1 %v5076_v12, %s6269_s29  ;;  %v816_v12 = vld [vmem:[#allocation2 + $0xf2] sm:$0xff]  ;;  %v5231_v55 = vpack.i.bf16 %v845_v53, %v844_v52  ;;  %v849_v59 = vld [vmem:[#allocation2 + $0x2aa] sm:$0xff]  ;;  %v850_v63 = vld [vmem:[#allocation2 + $0x2ba] sm:$0xff] }
  0x73   : > { %5082 = vrot.lane.b32.xlu0 %v5081_v13, %s6269_s29  ;;  %v817_v13 = vld [vmem:[#allocation2 + $0xfa] sm:$0xff]  ;;  %v5241_v62 = vpack.i.bf16 %v849_v59, %v848_v58  ;;  %v851_v0 = vld [vmem:[#allocation2 + $0x2c2] sm:$0xff]  ;;  %v852_v3 = vld [vmem:[#allocation2 + $0x2d2] sm:$0xff] }
  0x74   : > { %v5161_v2 = vpack.i.bf16 %v817_v13, %v816_v12  ;;  %v853_v4 = vld [vmem:[#allocation2 + $0x2da] sm:$0xff]  ;;  %v5246_v5 = vpack.i.bf16 %v851_v0, %v850_v63  ;;  %v854_v7 = vld [vmem:[#allocation2 + $0x2ea] sm:$0xff]  ;;  %v856_v10 = vld [vmem:[#allocation2 + $0x302] sm:$0xff] }
  0x75   : > { %v857_v11 = vld [vmem:[#allocation2 + $0x30a] sm:$0xff]  ;;  %v679_v34 = vld [vmem:[#allocation2 + $0x80] sm:$0xff] }
  0x76   : > { %5087 = vrot.lane.b32.xlu1 %v5086_v18, %s6269_s29  ;;  %v5166_v18 = vpack.i.bf16 %v819_v15, %v818_v14  ;;  %v859_v14 = vld [vmem:[#allocation2 + $0x322] sm:$0xff]  ;;  %v691_v58 = vld [vmem:[#allocation2 + $0x110] sm:$0xff] }
  0x77   : > { %5092 = vrot.lane.b32.xlu0 %v5091_v19, %s6269_s29  ;;  %v5171_v19 = vpack.i.bf16 %v821_v17, %v820_v16  ;;  %v670_v17 = vld [vmem:[#allocation2 + $0x18] sm:$0xff]  ;;  %v682_v41 = vld [vmem:[#allocation2 + $0xa8] sm:$0xff]  ;;  %v687_v50 = vld [vmem:[#allocation2 + $0xe0] sm:$0xff] }
  0x78   : > { %v6886_v63 = vld [vmem:[#allocation2 + $0x120] sm:$0xff]  ;;  %v6888_v0 = vld [vmem:[#allocation2 + $0x128] sm:$0xff] }
  0x7a   : > { %5097 = vrot.lane.b32.xlu1 %v5096_v24, %s6269_s29  ;;  %v5176_v24 = vpack.i.bf16 %v823_v21, %v822_v20 }
  0x7b   : > { %5102 = vrot.lane.b32.xlu0 %v5101_v25, %s6269_s29  ;;  %v5181_v25 = vpack.i.bf16 %v825_v23, %v824_v22  ;;  %v672_v22 = vld [vmem:[#allocation2 + $0x30] sm:$0xff]  ;;  %v673_v23 = vld [vmem:[#allocation2 + $0x38] sm:$0xff] }
  0x7e   : > { %5107 = vrot.lane.b32.xlu1 %v5106_v30, %s6269_s29  ;;  %v5186_v30 = vpack.i.bf16 %v827_v27, %v826_v26  ;;  %v675_v26 = vld [vmem:[#allocation2 + $0x50] sm:$0xff]  ;;  %v5276_v27 = vpack.i.bf16 %v673_v23, %v672_v22  ;;  %v6924_v23 = vld [vmem:[#allocation2 + $0x1c8] sm:$0xff] }
  0x7f   : > { %5112 = vrot.lane.b32.xlu0 %v5111_v31, %s6270_s30  ;;  %v5191_v31 = vpack.i.bf16 %v829_v29, %v828_v28 }
  0x82   : > { %5117 = vrot.lane.b32.xlu1 %v5116_v36, %s6270_s30  ;;  %v5196_v36 = vpack.i.bf16 %v831_v33, %v830_v32  ;;  %v678_v33 = vld [vmem:[#allocation2 + $0x78] sm:$0xff] }
  0x83   : > { %5122 = vrot.lane.b32.xlu0 %v5121_v38, %s6270_s30  ;;  %v834_v38 = vld [vmem:[#allocation2 + $0x1fa] sm:$0xff] }
  0x84   : > { %v5206_v42 = vpack.i.bf16 %v835_v39, %v834_v38  ;;  %v680_v38 = vld [vmem:[#allocation2 + $0x90] sm:$0xff]  ;;  %v681_v39 = vld [vmem:[#allocation2 + $0x98] sm:$0xff] }
  0x86   : > { %5127 = vrot.lane.b32.xlu1 %v5126_v46, %s6270_s30  ;;  %v840_v46 = vld [vmem:[#allocation2 + $0x242] sm:$0xff] }
  0x87   : > { %5132 = vrot.lane.b32.xlu0 %v5131_v49, %s6270_s30  ;;  %v5221_v49 = vpack.i.bf16 %v841_v47, %v840_v46  ;;  %v684_v46 = vld [vmem:[#allocation2 + $0xc0] sm:$0xff]  ;;  %v685_v47 = vld [vmem:[#allocation2 + $0xc8] sm:$0xff] }
  0x88   : > { %v5306_v51 = vpack.i.bf16 %v685_v47, %v684_v46  ;;  %v6960_v46 = vld [vmem:[#allocation2 + $0x230] sm:$0xff] }
  0x89   : > { %9520 = vst [vmem:[#allocation18_spill] sm:$0xff] %v6960_v46 }
  0x8a   : > { %5137 = vrot.lane.b32.xlu1 %v5136_v57, %s6270_s30  ;;  %v847_v57 = vld [vmem:[#allocation2 + $0x292] sm:$0xff] }
  0x8b   : > { %5142 = vrot.lane.b32.xlu0 %v5141_v60, %s6270_s30  ;;  %v5236_v60 = vpack.i.bf16 %v847_v57, %v846_v56  ;;  %v6838_v61 = vpop.permute.xlu0 %4952  ;;  %v690_v57 = vld [vmem:[#allocation2 + $0x108] sm:$0xff] }
  0x8c   : > { %9505 = vst [vmem:[#allocation3_spill] sm:$0xff] %v6838_v61  ;;  %v731_v61 = vld [vmem:[#allocation2 + $0x320] sm:$0xff] }
  0x8e   : > { %5147 = vrot.lane.b32.xlu1 %v5146_v6, %s6270_s30  ;;  %v5251_v6 = vpack.i.bf16 %v853_v4, %v852_v3  ;;  %v6892_v4 = vld [vmem:[#allocation2 + $0x138] sm:$0xff] }
  0x8f   : > { %5152 = vrot.lane.b32.xlu0 %v5151_v8, %s6270_s30  ;;  %v855_v8 = vld [vmem:[#allocation2 + $0x2f2] sm:$0xff] }
  0x90   : > { %v5256_v13 = vpack.i.bf16 %v855_v8, %v854_v7 }
  0x92   : > { %5157 = vrot.lane.b32.xlu1 %v5156_v1, %s6270_s30  ;;  %v5261_v1 = vpack.i.bf16 %v857_v11, %v856_v10  ;;  %v6904_v10 = vld [vmem:[#allocation2 + $0x150] sm:$0xff]  ;;  %v6906_v11 = vld [vmem:[#allocation2 + $0x158] sm:$0xff] }
  0x93   : > { %5162 = vrot.lane.b32.xlu0 %v5161_v2, %s6270_s30  ;;  %v858_v2 = vld [vmem:[#allocation2 + $0x31a] sm:$0xff] }
  0x96   : > { %5167 = vrot.lane.b32.xlu1 %v5166_v18, %s6270_s30  ;;  %v671_v18 = vld [vmem:[#allocation2 + $0x20] sm:$0xff] }
  0x97   : > { %5172 = vrot.lane.b32.xlu0 %v5171_v19, %s6270_s30  ;;  %v5266_v19 = vpack.i.bf16 %v859_v14, %v858_v2  ;;  %v5271_v20 = vpack.i.bf16 %v671_v18, %v670_v17  ;;  %v6912_v2 = vld [vmem:[#allocation2 + $0x170] sm:$0xff]  ;;  %v5336_v14 = vpack.i.bf16 %v6906_v11, %v6904_v10  ;;  %v890_v18 = vld [vmem:[#allocation2 + $0x180] sm:$0xff] }
  0x9a   : > { %5177 = vrot.lane.b32.xlu1 %v5176_v24, %s6270_s30 }
  0x9b   : > { %5182 = vrot.lane.b32.xlu0 %v5181_v25, %s6270_s30  ;;  %v674_v25 = vld [vmem:[#allocation2 + $0x48] sm:$0xff] }
  0x9c   : > { %v5281_v28 = vpack.i.bf16 %v675_v26, %v674_v25  ;;  %v6926_v25 = vld [vmem:[#allocation2 + $0x1d0] sm:$0xff] }
  0x9e   : > { %5187 = vrot.lane.b32.xlu1 %v5186_v30, %s6270_s30  ;;  %v676_v30 = vld [vmem:[#allocation2 + $0x60] sm:$0xff] }
  0x9f   : > { %5192 = vrot.lane.b32.xlu0 %v5191_v31, %s6270_s30  ;;  %v677_v31 = vld [vmem:[#allocation2 + $0x68] sm:$0xff] }
  0xa0   : > { %v5286_v35 = vpack.i.bf16 %v677_v31, %v676_v30  ;;  %v6934_v30 = vld [vmem:[#allocation2 + $0x1e0] sm:$0xff]  ;;  %v6936_v31 = vld [vmem:[#allocation2 + $0x1e8] sm:$0xff] }
  0xa2   : > { %5197 = vrot.lane.b32.xlu1 %v5196_v36, %s6270_s30  ;;  %v5291_v36 = vpack.i.bf16 %v679_v34, %v678_v33  ;;  %v6940_v34 = vld [vmem:[#allocation2 + $0x1f8] sm:$0xff] }
  0xa3   : > { %5202 = vrot.lane.b32.xlu0 %v5201_v37, %s6270_s30 }
  0xa6   : > { %5207 = vrot.lane.b32.xlu1 %v5206_v42, %s6270_s30  ;;  %v683_v42 = vld [vmem:[#allocation2 + $0xb0] sm:$0xff] }
  0xa7   : > { %5212 = vrot.lane.b32.xlu0 %v5211_v43, %s6270_s30  ;;  %v5296_v43 = vpack.i.bf16 %v681_v39, %v680_v38  ;;  %v5301_v44 = vpack.i.bf16 %v683_v42, %v682_v41  ;;  %v6952_v41 = vld [vmem:[#allocation2 + $0x210] sm:$0xff]  ;;  %v6954_v42 = vld [vmem:[#allocation2 + $0x218] sm:$0xff] }
  0xa8   : > { %v5366_v47 = vpack.i.bf16 %v6954_v42, %v6952_v41 }
  0xaa   : > { %5217 = vrot.lane.b32.xlu1 %v5216_v48, %s6270_s30 }
  0xab   : > { %5222 = vrot.lane.b32.xlu0 %v5221_v49, %s6270_s30  ;;  %v686_v49 = vld [vmem:[#allocation2 + $0xd8] sm:$0xff] }
  0xac   : > { %v5311_v52 = vpack.i.bf16 %v687_v50, %v686_v49 }
  0xae   : > { %5227 = vrot.lane.b32.xlu1 %v5226_v54, %s6270_s30  ;;  %v688_v54 = vld [vmem:[#allocation2 + $0xf0] sm:$0xff] }
  0xaf   : > { %5232 = vrot.lane.b32.xlu0 %v5231_v55, %s6270_s30  ;;  %v689_v55 = vld [vmem:[#allocation2 + $0xf8] sm:$0xff] }
  0xb0   : > { %v5316_v59 = vpack.i.bf16 %v689_v55, %v688_v54  ;;  %v6976_v55 = vld [vmem:[#allocation2 + $0x258] sm:$0xff] }
  0xb1   : > { %9525 = vst [vmem:[#allocation23_spill] sm:$0xff] %v6976_v55 }
  0xb2   : > { %5237 = vrot.lane.b32.xlu1 %v5236_v60, %s6270_s30  ;;  %v5321_v60 = vpack.i.bf16 %v691_v58, %v690_v57  ;;  %v6978_v57 = vld [vmem:[#allocation2 + $0x260] sm:$0xff] }
  0xb3   : > { %5242 = vrot.lane.b32.xlu0 %v5241_v62, %s6270_s30  ;;  %9526 = vst [vmem:[#allocation24_spill] sm:$0xff] %v6978_v57 }
  0xb4   : > { %v6842_v9 = vpop.permute.xlu1 %4962 }
  0xb5   : > { %9506 = vst [vmem:[#allocation4_spill] sm:$0xff] %v6842_v9  ;;  %v6844_v12 = vpop.permute.xlu0 %4957  ;;  %v730_v9 = vld [vmem:[#allocation2 + $0x318] sm:$0xff] }
  0xb6   : > { %9507 = vst [vmem:[#allocation5_spill] sm:$0xff] %v6844_v12  ;;  %5247 = vrot.lane.b32.xlu1 %v5246_v5, %s6270_s30  ;;  %v6894_v5 = vld [vmem:[#allocation2 + $0x140] sm:$0xff]  ;;  %v7044_v12 = vld [vmem:[#allocation2 + $0x308] sm:$0xff] }
  0xb7   : > { %5252 = vrot.lane.b32.xlu0 %v5251_v6, %s6270_s30  ;;  %v5326_v6 = vpack.i.bf16 %v6888_v0, %v6886_v63  ;;  %v5331_v7 = vpack.i.bf16 %v6894_v5, %v6892_v4  ;;  %9547 = vst [vmem:[#allocation45_spill] sm:$0xff] %v7044_v12 }
  0xb8   : > { %v6848_v15 = vpop.permute.xlu1 %4967 }
  0xb9   : > { %9508 = vst [vmem:[#allocation6_spill] sm:$0xff] %v6848_v15  ;;  %v6850_v16 = vpop.permute.xlu0 %4972  ;;  %v7042_v15 = vld [vmem:[#allocation2 + $0x300] sm:$0xff] }
  0xba   : > { %9509 = vst [vmem:[#allocation7_spill] sm:$0xff] %v6850_v16  ;;  %5257 = vrot.lane.b32.xlu1 %v5256_v13, %s6270_s30  ;;  %9546 = vst [vmem:[#allocation44_spill] sm:$0xff] %v7042_v15 }
  0xbb   : > { %5262 = vrot.lane.b32.xlu0 %v5261_v1, %s6270_s30  ;;  %v6910_v1 = vld [vmem:[#allocation2 + $0x168] sm:$0xff] }
  0xbc   : > { %v6854_v21 = vpop.permute.xlu1 %4977  ;;  %v5341_v17 = vpack.i.bf16 %v6912_v2, %v6910_v1 }
  0xbd   : > { %9510 = vst [vmem:[#allocation8_spill] sm:$0xff] %v6854_v21  ;;  %v6856_v24 = vpop.permute.xlu0 %4982  ;;  %v7032_v21 = vld [vmem:[#allocation2 + $0x2f0] sm:$0xff] }
  0xbe   : > { %9511 = vst [vmem:[#allocation9_spill] sm:$0xff] %v6856_v24  ;;  %5267 = vrot.lane.b32.xlu1 %v5266_v19, %s6270_s30  ;;  %v891_v19 = vld [vmem:[#allocation2 + $0x188] sm:$0xff]  ;;  %9544 = vst [vmem:[#allocation42_spill] sm:$0xff] %v7032_v21  ;;  %s243_s30 = scalar_lea.vmem %s9369_s5, %s4767_s20 }
  0xbf   : > { %5272 = vrot.lane.b32.xlu0 %v5271_v20, %s6271_s6  ;;  %v5346_v26 = vpack.i.bf16 %v891_v19, %v890_v18  ;;  %v6996_v18 = vld [vmem:[#allocation2 + $0x290] sm:$0xff]  ;;  %v7030_v24 = vld [vmem:[#allocation2 + $0x2e8] sm:$0xff] }
  0xc0   : > { %v6860_v29 = vpop.permute.xlu1 %4987  ;;  %9532 = vst [vmem:[#allocation30_spill] sm:$0xff] %v6996_v18  ;;  %9543 = vst [vmem:[#allocation41_spill] sm:$0xff] %v7030_v24 }
  0xc1   : > { %9512 = vst [vmem:[#allocation10_spill] sm:$0xff] %v6860_v29  ;;  %v6862_v32 = vpop.permute.xlu0 %4992 }
  0xc2   : > { %9513 = vst [vmem:[#allocation11_spill] sm:$0xff] %v6862_v32  ;;  %5277 = vrot.lane.b32.xlu1 %v5276_v27, %s6271_s6  ;;  %v5351_v27 = vpack.i.bf16 %v6926_v25, %v6924_v23  ;;  %v7026_v32 = vld [vmem:[#allocation2 + $0x2d8] sm:$0xff] }
  0xc3   : > { %5282 = vrot.lane.b32.xlu0 %v5281_v28, %s6271_s6  ;;  %9541 = vst [vmem:[#allocation39_spill] sm:$0xff] %v7026_v32 }
  0xc4   : > { %v6866_v37 = vpop.permute.xlu1 %4997 }
  0xc5   : > { %9514 = vst [vmem:[#allocation12_spill] sm:$0xff] %v6866_v37  ;;  %v6868_v40 = vpop.permute.xlu0 %5002  ;;  %v7024_v37 = vld [vmem:[#allocation2 + $0x2d0] sm:$0xff] }
  0xc6   : > { %9515 = vst [vmem:[#allocation13_spill] sm:$0xff] %v6868_v40  ;;  %5287 = vrot.lane.b32.xlu1 %v5286_v35, %s6271_s6  ;;  %v6942_v35 = vld [vmem:[#allocation2 + $0x200] sm:$0xff]  ;;  %9540 = vst [vmem:[#allocation38_spill] sm:$0xff] %v7024_v37 }
  0xc7   : > { %5292 = vrot.lane.b32.xlu0 %v5291_v36, %s6271_s6  ;;  %v5356_v36 = vpack.i.bf16 %v6936_v31, %v6934_v30  ;;  %v5361_v38 = vpack.i.bf16 %v6942_v35, %v6940_v34 }
  0xc8   : > { %v6872_v45 = vpop.permute.xlu1 %5007 }
  0xc9   : > { %9516 = vst [vmem:[#allocation14_spill] sm:$0xff] %v6872_v45  ;;  %v6874_v48 = vpop.permute.xlu0 %5012  ;;  %v7014_v45 = vld [vmem:[#allocation2 + $0x2c0] sm:$0xff] }
  0xca   : > { %5297 = vrot.lane.b32.xlu1 %v5296_v43, %s6271_s6  ;;  %9538 = vst [vmem:[#allocation36_spill] sm:$0xff] %v7014_v45 }
  0xcb   : > { %5302 = vrot.lane.b32.xlu0 %v5301_v44, %s6271_s6  ;;  %v6958_v44 = vld [vmem:[#allocation2 + $0x228] sm:$0xff] }
  0xcc   : > { %v6878_v53 = vpop.permute.xlu1 %5017  ;;  %9519 = vst [vmem:[#allocation17_spill] sm:$0xff] %v6958_v44  ;;  %v5371_v49 = vpack.i.bf16 %v6960_v46, %v6958_v44  ;;  %v1002_v44 = vld [vmem:[#allocation2 + $0xc2] sm:$0xff] }
  0xcd   : > { %v6880_v56 = vpop.permute.xlu0 %5022 }
  0xce   : > { %5307 = vrot.lane.b32.xlu1 %v5306_v51, %s6271_s6  ;;  %v6970_v51 = vld [vmem:[#allocation2 + $0x240] sm:$0xff]  ;;  %v5025_v46 = vunpack.i.h.bf16 %v6880_v56 }
  0xcf   : > { %5312 = vrot.lane.b32.xlu0 %v5311_v52, %s6271_s6  ;;  %9522 = vst [vmem:[#allocation20_spill] sm:$0xff] %v6970_v51  ;;  %v6972_v52 = vld [vmem:[#allocation2 + $0x248] sm:$0xff] }
  0xd0   : > { %v6884_v62 = vpop.permute.xlu1 %5027  ;;  %9523 = vst [vmem:[#allocation21_spill] sm:$0xff] %v6972_v52  ;;  %v5376_v58 = vpack.i.bf16 %v6972_v52, %v6970_v51  ;;  %v998_v51 = vld [vmem:[#allocation2 + $0x92] sm:$0xff]  ;;  %v5014_v52 = vunpack.i.l.bf16 %v6874_v48 }
  0xd1   : > { %v6890_v3 = vpop.permute.xlu0 %5032 }
  0xd2   : > { %5317 = vrot.lane.b32.xlu1 %v5316_v59, %s6271_s6  ;;  %v5381_v59 = vpack.i.bf16 %v6978_v57, %v6976_v55  ;;  %v994_v55 = vld [vmem:[#allocation2 + $0x62] sm:$0xff]  ;;  %v995_v57 = vld [vmem:[#allocation2 + $0x6a] sm:$0xff] }
  0xd3   : > { %5322 = vrot.lane.b32.xlu0 %v5321_v60, %s6271_s6 }
  0xd4   : > { %v6902_v8 = vpop.permute.xlu1 %5037 }
  0xd5   : > { %v6908_v13 = vpop.permute.xlu0 %5042 }
  0xd6   : > { %5327 = vrot.lane.b32.xlu1 %v5326_v6, %s6271_s6  ;;  %v6988_v6 = vld [vmem:[#allocation2 + $0x270] sm:$0xff] }
  0xd7   : > { %5332 = vrot.lane.b32.xlu0 %v5331_v7, %s6271_s6  ;;  %9528 = vst [vmem:[#allocation26_spill] sm:$0xff] %v6988_v6  ;;  %v6990_v7 = vld [vmem:[#allocation2 + $0x278] sm:$0xff] }
  0xd8   : > { %v6920_v20 = vpop.permute.xlu1 %5047  ;;  %9529 = vst [vmem:[#allocation27_spill] sm:$0xff] %v6990_v7  ;;  %v5386_v19 = vpack.i.bf16 %v6990_v7, %v6988_v6  ;;  %v993_v7 = vld [vmem:[#allocation2 + $0x52] sm:$0xff] }
  0xd9   : > { %v6922_v22 = vpop.permute.xlu0 %5052 }
  0xda   : > { %5337 = vrot.lane.b32.xlu1 %v5336_v14, %s6271_s6 }
  0xdb   : > { %5342 = vrot.lane.b32.xlu0 %v5341_v17, %s6271_s6  ;;  %v6994_v17 = vld [vmem:[#allocation2 + $0x288] sm:$0xff] }
  0xdc   : > { %v6932_v28 = vpop.permute.xlu1 %5057  ;;  %9531 = vst [vmem:[#allocation29_spill] sm:$0xff] %v6994_v17 }
  0xdd   : > { %v6938_v33 = vpop.permute.xlu0 %5062 }
  0xde   : > { %5347 = vrot.lane.b32.xlu1 %v5346_v26, %s6271_s6  ;;  %v5391_v26 = vpack.i.bf16 %v6996_v18, %v6994_v17  ;;  %v7158_v17 = vld [vmem:[#allocation2 + $0x339] sm:$0xff] }
  0xdf   : > { %5352 = vrot.lane.b32.xlu0 %v5351_v27, %s6271_s6  ;;  %v7160_v18 = vld [vmem:[#allocation2 + $0x1a] sm:$0xff] }
  0xe0   : > { %v6950_v39 = vpop.permute.xlu1 %5067 }
  0xe1   : > { %9517 = vst [vmem:[#allocation15_spill] sm:$0xff] %v6950_v39  ;;  %v6956_v43 = vpop.permute.xlu0 %5072  ;;  %v1003_v39 = vld [vmem:[#allocation2 + $0xca] sm:$0xff] }
  0xe2   : > { %9518 = vst [vmem:[#allocation16_spill] sm:$0xff] %v6956_v43  ;;  %5357 = vrot.lane.b32.xlu1 %v5356_v36, %s6271_s6  ;;  %v7006_v36 = vld [vmem:[#allocation2 + $0x2a0] sm:$0xff]  ;;  %v5024_v43 = vunpack.i.l.bf16 %v6880_v56  ;;  %v7213_v56 = vsel %vm515_vm0, %v6886_v63, %v5014_v52  ;;  %v1008_v63 = vld [vmem:[#allocation2 + $0x10a] sm:$0xff]  ;;  %v1009_v52 = vld [vmem:[#allocation2 + $0x112] sm:$0xff] }
  0xe3   : > { %5362 = vrot.lane.b32.xlu0 %v5361_v38, %s6271_s6  ;;  %9534 = vst [vmem:[#allocation32_spill] sm:$0xff] %v7006_v36  ;;  %v7008_v38 = vld [vmem:[#allocation2 + $0x2a8] sm:$0xff] }
  0xe4   : > { %v6968_v50 = vpop.permute.xlu1 %5077  ;;  %9535 = vst [vmem:[#allocation33_spill] sm:$0xff] %v7008_v38 }
  0xe5   : > { %9521 = vst [vmem:[#allocation19_spill] sm:$0xff] %v6968_v50  ;;  %v6974_v54 = vpop.permute.xlu0 %5082  ;;  %v997_v50 = vld [vmem:[#allocation2 + $0x82] sm:$0xff] }
  0xe6   : > { %9524 = vst [vmem:[#allocation22_spill] sm:$0xff] %v6974_v54  ;;  %5367 = vrot.lane.b32.xlu1 %v5366_v47, %s6271_s6  ;;  %v996_v54 = vld [vmem:[#allocation2 + $0x7a] sm:$0xff] }
  0xe7   : > { %5372 = vrot.lane.b32.xlu0 %v5371_v49, %s6271_s6  ;;  %v7012_v49 = vld [vmem:[#allocation2 + $0x2b8] sm:$0xff] }
  0xe8   : > { %v6986_v60 = vpop.permute.xlu1 %5087  ;;  %9537 = vst [vmem:[#allocation35_spill] sm:$0xff] %v7012_v49 }
  0xe9   : > { %9527 = vst [vmem:[#allocation25_spill] sm:$0xff] %v6986_v60  ;;  %v6992_v14 = vpop.permute.xlu0 %5092  ;;  %v992_v60 = vld [vmem:[#allocation2 + $0x4a] sm:$0xff] }
  0xea   : > { %9530 = vst [vmem:[#allocation28_spill] sm:$0xff] %v6992_v14  ;;  %5377 = vrot.lane.b32.xlu1 %v5376_v58, %s6271_s6  ;;  %v5396_v58 = vpack.i.bf16 %v7008_v38, %v7006_v36  ;;  %v7136_v36 = vld [vmem:[#allocation2 + $0x2c1] sm:$0xff]  ;;  %v7156_v38 = vld [vmem:[#allocation2 + $0x331] sm:$0xff] }
  0xeb   : > { %5382 = vrot.lane.b32.xlu0 %v5381_v59, %s6271_s6  ;;  %v5401_v59 = vpack.i.bf16 %v7014_v45, %v7012_v49  ;;  %v926_v49 = vld [vmem:[#allocation2 + $0x31] sm:$0xff]  ;;  %v927_v45 = vld [vmem:[#allocation2 + $0x39] sm:$0xff]  ;;  %9577 = vst [vmem:[#allocation75_spill] sm:$0xff] %v7156_v38  ;;  %v7162_v14 = vld [vmem:[#allocation2 + $0x22] sm:$0xff] }
  0xec   : > { %v7004_v27 = vpop.permute.xlu1 %5097  ;;  %v1005_v38 = vld [vmem:[#allocation2 + $0xe2] sm:$0xff] }
  0xed   : > { %9533 = vst [vmem:[#allocation31_spill] sm:$0xff] %v7004_v27  ;;  %v7010_v47 = vpop.permute.xlu0 %5102 }
  0xee   : > { %9536 = vst [vmem:[#allocation34_spill] sm:$0xff] %v7010_v47  ;;  %5387 = vrot.lane.b32.xlu1 %v5386_v19, %s6271_s6  ;;  %v5406_v19 = vpack.i.bf16 %v7026_v32, %v7024_v37  ;;  %v925_v37 = vld [vmem:[#allocation2 + $0x21] sm:$0xff]  ;;  %v7134_v47 = vld [vmem:[#allocation2 + $0x2b9] sm:$0xff] }
  0xef   : > { %5392 = vrot.lane.b32.xlu0 %v5391_v26, %s6271_s6  ;;  %v5411_v26 = vpack.i.bf16 %v7032_v21, %v7030_v24  ;;  %v923_v24 = vld [vmem:[#allocation2 + $0x338] sm:$0xff] }
  0xf0   : > { %v7022_v40 = vpop.permute.xlu1 %5107 }
  0xf1   : > { %9539 = vst [vmem:[#allocation37_spill] sm:$0xff] %v7022_v40  ;;  %v7028_v29 = vpop.permute.xlu0 %5112  ;;  %v922_v40 = vld [vmem:[#allocation2 + $0x330] sm:$0xff] }
  0xf2   : > { %9542 = vst [vmem:[#allocation40_spill] sm:$0xff] %v7028_v29  ;;  %5397 = vrot.lane.b32.xlu1 %v5396_v58, %s6271_s6  ;;  %v5416_v58 = vpack.i.bf16 %v7044_v12, %v7042_v15  ;;  %v942_v12 = vld [vmem:[#allocation2 + $0xf1] sm:$0xff] }
  0xf3   : > { %5402 = vrot.lane.b32.xlu0 %v5401_v59, %s6271_s6  ;;  %v5421_v59 = vpack.i.bf16 %v731_v61, %v730_v9  ;;  %v929_v61 = vld [vmem:[#allocation2 + $0x51] sm:$0xff] }
  0xf4   : > { %v7040_v16 = vpop.permute.xlu1 %5117 }
  0xf5   : > { %9545 = vst [vmem:[#allocation43_spill] sm:$0xff] %v7040_v16  ;;  %v7046_v29 = vpop.permute.xlu0 %5122  ;;  %v924_v16 = vld [vmem:[#allocation2 + $0x19] sm:$0xff] }
  0xf6   : > { %9548 = vst [vmem:[#allocation46_spill] sm:$0xff] %v7046_v29  ;;  %5407 = vrot.lane.b32.xlu1 %v5406_v19, %s6271_s6  ;;  %v5426_v29 = vpack.i.bf16 %v923_v24, %v922_v40  ;;  %v5431_v19 = vpack.i.bf16 %v925_v37, %v924_v16  ;;  %v930_v24 = vld [vmem:[#allocation2 + $0x61] sm:$0xff]  ;;  %v931_v40 = vld [vmem:[#allocation2 + $0x69] sm:$0xff]  ;;  %v932_v37 = vld [vmem:[#allocation2 + $0x79] sm:$0xff] }
  0xf7   : > { %5412 = vrot.lane.b32.xlu0 %v5411_v26, %s6271_s6  ;;  %v928_v26 = vld [vmem:[#allocation2 + $0x49] sm:$0xff] }
  0xf8   : > { %v7052_v21 = vpop.permute.xlu1 %5127 }
  0xf9   : > { %9549 = vst [vmem:[#allocation47_spill] sm:$0xff] %v7052_v21  ;;  %v7054_v32 = vpop.permute.xlu0 %5132  ;;  %v7063_v21 = vpack.i.bf16 %v927_v45, %v926_v49  ;;  %v934_v45 = vld [vmem:[#allocation2 + $0x91] sm:$0xff]  ;;  %v935_v49 = vld [vmem:[#allocation2 + $0x99] sm:$0xff] }
  0xfa   : > { %9550 = vst [vmem:[#allocation48_spill] sm:$0xff] %v7054_v32  ;;  %5417 = vrot.lane.b32.xlu1 %v5416_v58, %s6271_s6  ;;  %v7066_v58 = vpack.i.bf16 %v929_v61, %v928_v26  ;;  %v936_v26 = vld [vmem:[#allocation2 + $0xa9] sm:$0xff]  ;;  %v937_v61 = vld [vmem:[#allocation2 + $0xb1] sm:$0xff] }
  0xfb   : > { %5422 = vrot.lane.b32.xlu0 %v5421_v59, %s6271_s6  ;;  %9553 = vst [vmem:[#allocation51_spill] sm:$0xff] %v7063_v21  ;;  %v933_v59 = vld [vmem:[#allocation2 + $0x81] sm:$0xff] }
  0xfc   : > { %v7058_v15 = vpop.permute.xlu1 %5137  ;;  %9554 = vst [vmem:[#allocation52_spill] sm:$0xff] %v7066_v58 }
  0xfd   : > { %9551 = vst [vmem:[#allocation49_spill] sm:$0xff] %v7058_v15  ;;  %v7060_v9 = vpop.permute.xlu0 %5142 }
  0xfe   : > { %9552 = vst [vmem:[#allocation50_spill] sm:$0xff] %v7060_v9  ;;  %5427 = vrot.lane.b32.xlu1 %v5426_v29, %s6271_s6  ;;  %v5446_v9 = vpack.i.bf16 %v931_v40, %v930_v24  ;;  %v5451_v29 = vpack.i.bf16 %v933_v59, %v932_v37  ;;  %v939_v24 = vld [vmem:[#allocation2 + $0xc9] sm:$0xff]  ;;  %v941_v37 = vld [vmem:[#allocation2 + $0xe1] sm:$0xff] }
  0xff   : > { %5432 = vrot.lane.b32.xlu0 %v5431_v19, %s6272_s7 }
 0x100   : > { %v7068_v16 = vpop.permute.xlu1 %5147 }
 0x101   : > { %9555 = vst [vmem:[#allocation53_spill] sm:$0xff] %v7068_v16  ;;  %v7070_v15 = vpop.permute.xlu0 %5152  ;;  %v5456_v16 = vpack.i.bf16 %v935_v49, %v934_v45  ;;  %v945_v49 = vld [vmem:[#allocation2 + $0x111] sm:$0xff] }
 0x102   : > { %9556 = vst [vmem:[#allocation54_spill] sm:$0xff] %v7070_v15  ;;  %5437 = vrot.lane.b32.xlu1 %v7063_v21, %s6272_s7  ;;  %v5461_v15 = vpack.i.bf16 %v937_v61, %v936_v26  ;;  %v938_v21 = vld [vmem:[#allocation2 + $0xc1] sm:$0xff] }
 0x103   : > { %5442 = vrot.lane.b32.xlu0 %v7066_v58, %s6272_s7  ;;  %v940_v58 = vld [vmem:[#allocation2 + $0xd9] sm:$0xff] }
 0x104   : > { %v7076_v19 = vpop.permute.xlu1 %5157 }
 0x105   : > { %9557 = vst [vmem:[#allocation55_spill] sm:$0xff] %v7076_v19  ;;  %v7078_v32 = vpop.permute.xlu0 %5162  ;;  %v5466_v19 = vpack.i.bf16 %v939_v24, %v938_v21 }
 0x106   : > { %9558 = vst [vmem:[#allocation56_spill] sm:$0xff] %v7078_v32  ;;  %5447 = vrot.lane.b32.xlu1 %v5446_v9, %s6272_s7  ;;  %v5471_v32 = vpack.i.bf16 %v941_v37, %v940_v58  ;;  %v943_v9 = vld [vmem:[#allocation2 + $0xf9] sm:$0xff]  ;;  %v949_v58 = vld [vmem:[#allocation2 + $0x141] sm:$0xff] }
 0x107   : > { %5452 = vrot.lane.b32.xlu0 %v5451_v29, %s6272_s7  ;;  %v944_v29 = vld [vmem:[#allocation2 + $0x109] sm:$0xff]  ;;  %v5476_v61 = vpack.i.bf16 %v943_v9, %v942_v12  ;;  %v953_v9 = vld [vmem:[#allocation2 + $0x171] sm:$0xff] }
 0x108   : > { %v7082_v40 = vpop.permute.xlu1 %5167 }
 0x109   : > { %9559 = vst [vmem:[#allocation57_spill] sm:$0xff] %v7082_v40  ;;  %v7084_v59 = vpop.permute.xlu0 %5172  ;;  %v5481_v40 = vpack.i.bf16 %v945_v49, %v944_v29 }
 0x10a   : > { %9560 = vst [vmem:[#allocation58_spill] sm:$0xff] %v7084_v59  ;;  %5457 = vrot.lane.b32.xlu1 %v5456_v16, %s6272_s7  ;;  %v946_v59 = vld [vmem:[#allocation2 + $0x121] sm:$0xff]  ;;  %v947_v16 = vld [vmem:[#allocation2 + $0x129] sm:$0xff] }
 0x10b   : > { %5462 = vrot.lane.b32.xlu0 %v5461_v15, %s6272_s7  ;;  %v948_v15 = vld [vmem:[#allocation2 + $0x139] sm:$0xff]  ;;  %v5486_v37 = vpack.i.bf16 %v947_v16, %v946_v59  ;;  %v957_v16 = vld [vmem:[#allocation2 + $0x1d1] sm:$0xff] }
 0x10c   : > { %v7088_v45 = vpop.permute.xlu1 %5177 }
 0x10d   : > { %9561 = vst [vmem:[#allocation59_spill] sm:$0xff] %v7088_v45  ;;  %v7090_v26 = vpop.permute.xlu0 %5182  ;;  %v950_v45 = vld [vmem:[#allocation2 + $0x151] sm:$0xff] }
 0x10e   : > { %9562 = vst [vmem:[#allocation60_spill] sm:$0xff] %v7090_v26  ;;  %5467 = vrot.lane.b32.xlu1 %v5466_v19, %s6272_s7  ;;  %v5491_v26 = vpack.i.bf16 %v949_v58, %v948_v15  ;;  %v951_v19 = vld [vmem:[#allocation2 + $0x159] sm:$0xff] }
 0x10f   : > { %5472 = vrot.lane.b32.xlu0 %v5471_v32, %s6272_s7  ;;  %v952_v32 = vld [vmem:[#allocation2 + $0x169] sm:$0xff]  ;;  %v5496_v49 = vpack.i.bf16 %v951_v19, %v950_v45  ;;  %v961_v19 = vld [vmem:[#allocation2 + $0x201] sm:$0xff] }
 0x110   : > { %v7094_v21 = vpop.permute.xlu1 %5187 }
 0x111   : > { %9563 = vst [vmem:[#allocation61_spill] sm:$0xff] %v7094_v21  ;;  %v7096_v24 = vpop.permute.xlu0 %5192  ;;  %v954_v21 = vld [vmem:[#allocation2 + $0x181] sm:$0xff] }
 0x112   : > { %9564 = vst [vmem:[#allocation62_spill] sm:$0xff] %v7096_v24  ;;  %5477 = vrot.lane.b32.xlu1 %v5476_v61, %s6272_s7  ;;  %v5501_v24 = vpack.i.bf16 %v953_v9, %v952_v32  ;;  %v955_v61 = vld [vmem:[#allocation2 + $0x189] sm:$0xff] }
 0x113   : > { %5482 = vrot.lane.b32.xlu0 %v5481_v40, %s6272_s7  ;;  %v956_v40 = vld [vmem:[#allocation2 + $0x1c9] sm:$0xff]  ;;  %v5506_v58 = vpack.i.bf16 %v955_v61, %v954_v21  ;;  %v965_v61 = vld [vmem:[#allocation2 + $0x231] sm:$0xff] }
 0x114   : > { %v7100_v12 = vpop.permute.xlu1 %5197 }
 0x115   : > { %9565 = vst [vmem:[#allocation63_spill] sm:$0xff] %v7100_v12  ;;  %v7102_v29 = vpop.permute.xlu0 %5202  ;;  %v958_v12 = vld [vmem:[#allocation2 + $0x1e1] sm:$0xff] }
 0x116   : > { %9566 = vst [vmem:[#allocation64_spill] sm:$0xff] %v7102_v29  ;;  %5487 = vrot.lane.b32.xlu1 %v5486_v37, %s6272_s7  ;;  %v5511_v29 = vpack.i.bf16 %v957_v16, %v956_v40  ;;  %v959_v37 = vld [vmem:[#allocation2 + $0x1e9] sm:$0xff] }
 0x117   : > { %5492 = vrot.lane.b32.xlu0 %v5491_v26, %s6272_s7  ;;  %v960_v26 = vld [vmem:[#allocation2 + $0x1f9] sm:$0xff]  ;;  %v5516_v9 = vpack.i.bf16 %v959_v37, %v958_v12  ;;  %v969_v37 = vld [vmem:[#allocation2 + $0x261] sm:$0xff] }
 0x118   : > { %v7106_v59 = vpop.permute.xlu1 %5207 }
 0x119   : > { %9567 = vst [vmem:[#allocation65_spill] sm:$0xff] %v7106_v59  ;;  %v7108_v15 = vpop.permute.xlu0 %5212  ;;  %v962_v59 = vld [vmem:[#allocation2 + $0x211] sm:$0xff] }
 0x11a   : > { %9568 = vst [vmem:[#allocation66_spill] sm:$0xff] %v7108_v15  ;;  %5497 = vrot.lane.b32.xlu1 %v5496_v49, %s6272_s7  ;;  %v5521_v15 = vpack.i.bf16 %v961_v19, %v960_v26  ;;  %v963_v49 = vld [vmem:[#allocation2 + $0x219] sm:$0xff] }
 0x11b   : > { %5502 = vrot.lane.b32.xlu0 %v5501_v24, %s6272_s7  ;;  %v964_v24 = vld [vmem:[#allocation2 + $0x229] sm:$0xff]  ;;  %v5526_v16 = vpack.i.bf16 %v963_v49, %v962_v59  ;;  %v973_v49 = vld [vmem:[#allocation2 + $0x291] sm:$0xff] }
 0x11c   : > { %v7112_v45 = vpop.permute.xlu1 %5217 }
 0x11d   : > { %9569 = vst [vmem:[#allocation67_spill] sm:$0xff] %v7112_v45  ;;  %v7114_v32 = vpop.permute.xlu0 %5222  ;;  %v966_v45 = vld [vmem:[#allocation2 + $0x241] sm:$0xff] }
 0x11e   : > { %9570 = vst [vmem:[#allocation68_spill] sm:$0xff] %v7114_v32  ;;  %5507 = vrot.lane.b32.xlu1 %v5506_v58, %s6272_s7  ;;  %v5531_v32 = vpack.i.bf16 %v965_v61, %v964_v24  ;;  %v967_v58 = vld [vmem:[#allocation2 + $0x249] sm:$0xff]  ;;  %v974_v61 = vld [vmem:[#allocation2 + $0x2a1] sm:$0xff] }
 0x11f   : > { %5512 = vrot.lane.b32.xlu0 %v5511_v29, %s6272_s7  ;;  %v968_v29 = vld [vmem:[#allocation2 + $0x259] sm:$0xff]  ;;  %v5536_v19 = vpack.i.bf16 %v967_v58, %v966_v45 }
 0x120   : > { %v7118_v21 = vpop.permute.xlu1 %5227  ;;  %v7140_v45 = vld [vmem:[#allocation2 + $0x2d9] sm:$0xff] }
 0x121   : > { %9571 = vst [vmem:[#allocation69_spill] sm:$0xff] %v7118_v21  ;;  %v7120_v40 = vpop.permute.xlu0 %5232  ;;  %v970_v21 = vld [vmem:[#allocation2 + $0x271] sm:$0xff] }
 0x122   : > { %9572 = vst [vmem:[#allocation70_spill] sm:$0xff] %v7120_v40  ;;  %5517 = vrot.lane.b32.xlu1 %v5516_v9, %s6272_s7  ;;  %v5541_v40 = vpack.i.bf16 %v969_v37, %v968_v29  ;;  %v971_v9 = vld [vmem:[#allocation2 + $0x279] sm:$0xff]  ;;  %v7147_v29 = vld [vmem:[#allocation2 + $0x301] sm:$0xff]  ;;  %v7149_v37 = vld [vmem:[#allocation2 + $0x309] sm:$0xff] }
 0x123   : > { %5522 = vrot.lane.b32.xlu0 %v5521_v15, %s6272_s7  ;;  %v972_v15 = vld [vmem:[#allocation2 + $0x289] sm:$0xff]  ;;  %v5546_v58 = vpack.i.bf16 %v971_v9, %v970_v21  ;;  %v991_v9 = vld [vmem:[#allocation2 + $0x3a] sm:$0xff] }
 0x124   : > { %v7124_v12 = vpop.permute.xlu1 %5237  ;;  %v5551_v27 = vpack.i.bf16 %v973_v49, %v972_v15  ;;  %v5561_v15 = vpack.i.bf16 %v7136_v36, %v7134_v47  ;;  %v999_v47 = vld [vmem:[#allocation2 + $0x9a] sm:$0xff]  ;;  %v5019_v36 = vunpack.i.l.bf16 %v6878_v53 }
 0x125   : > { %9573 = vst [vmem:[#allocation71_spill] sm:$0xff] %v7124_v12  ;;  %v7126_v26 = vpop.permute.xlu0 %5242  ;;  %v975_v12 = vld [vmem:[#allocation2 + $0x2a9] sm:$0xff] }
 0x126   : > { %9574 = vst [vmem:[#allocation72_spill] sm:$0xff] %v7126_v26  ;;  %5527 = vrot.lane.b32.xlu1 %v5526_v16, %s6272_s7  ;;  %v7138_v26 = vld [vmem:[#allocation2 + $0x2d1] sm:$0xff] }
 0x127   : > { %5532 = vrot.lane.b32.xlu0 %v5531_v32, %s6272_s7  ;;  %v7142_v32 = vld [vmem:[#allocation2 + $0x2e9] sm:$0xff]  ;;  %v7144_v16 = vld [vmem:[#allocation2 + $0x2f1] sm:$0xff]  ;;  %v5566_v49 = vpack.i.bf16 %v7140_v45, %v7138_v26 }
 0x128   : > { %v7130_v59 = vpop.permute.xlu1 %5247  ;;  %v1000_v26 = vld [vmem:[#allocation2 + $0xaa] sm:$0xff] }
 0x129   : > { %9575 = vst [vmem:[#allocation73_spill] sm:$0xff] %v7130_v59  ;;  %v7132_v24 = vpop.permute.xlu0 %5252  ;;  %v7153_v59 = vld [vmem:[#allocation2 + $0x321] sm:$0xff] }
 0x12a   : > { %9576 = vst [vmem:[#allocation74_spill] sm:$0xff] %v7132_v24  ;;  %5537 = vrot.lane.b32.xlu1 %v5536_v19, %s6272_s7  ;;  %v7151_v24 = vld [vmem:[#allocation2 + $0x319] sm:$0xff] }
 0x12b   : > { %5542 = vrot.lane.b32.xlu0 %v5541_v40, %s6272_s7  ;;  %v990_v19 = vld [vmem:[#allocation2 + $0x32] sm:$0xff]  ;;  %v5556_v40 = vpack.i.bf16 %v975_v12, %v974_v61  ;;  %v5020_v12 = vunpack.i.h.bf16 %v6878_v53 }
 0x12c   : > { %v7164_v21 = vpop.permute.xlu1 %5257  ;;  %v1001_v61 = vld [vmem:[#allocation2 + $0xb2] sm:$0xff] }
 0x12d   : > { %9578 = vst [vmem:[#allocation76_spill] sm:$0xff] %v7164_v21  ;;  %v7166_v6 = vpop.permute.xlu0 %5262  ;;  %v5030_v21 = vunpack.i.h.bf16 %v6884_v62 }
 0x12e   : > { %9579 = vst [vmem:[#allocation77_spill] sm:$0xff] %v7166_v6  ;;  %5547 = vrot.lane.b32.xlu1 %v5546_v58, %s6272_s7  ;;  %v5015_v6 = vunpack.i.h.bf16 %v6874_v48  ;;  %v7188_v48 = vpack.i.bf16 %v991_v9, %v990_v19  ;;  %v1004_v58 = vld [vmem:[#allocation2 + $0xda] sm:$0xff]  ;;  %v7199_v19 = vpack.i.bf16 %v995_v57, %v994_v55  ;;  %v7205_v9 = vpack.i.bf16 %v1001_v61, %v1000_v26  ;;  %v1010_v26 = vld [vmem:[#allocation2 + $0x122] sm:$0xff] }
 0x12f   : > { %5552 = vrot.lane.b32.xlu0 %v5551_v27, %s6272_s7  ;;  %v7190_v27 = vpack.i.bf16 %v993_v7, %v992_v60  ;;  %v7201_v60 = vpack.i.bf16 %v997_v50, %v996_v54  ;;  %v7203_v7 = vpack.i.bf16 %v999_v47, %v998_v51  ;;  %v1006_v50 = vld [vmem:[#allocation2 + $0xf2] sm:$0xff]  ;;  %v5035_v51 = vunpack.i.h.bf16 %v6890_v3  ;;  %v1013_v61 = vld [vmem:[#allocation2 + $0x142] sm:$0xff] }
 0x130   : > { %v7182_v45 = vpop.permute.xlu1 %5267  ;;  %9581 = vst [vmem:[#allocation79_spill] sm:$0xff] %v7188_v48  ;;  %9584 = vst [vmem:[#allocation82_spill] sm:$0xff] %v7199_v19  ;;  %v7209_v53 = vsel %vm515_vm0, %v6888_v0, %v5015_v6  ;;  %v5034_v54 = vunpack.i.l.bf16 %v6890_v3  ;;  %v7222_v57 = vpack.i.bf16 %v1003_v39, %v1002_v44  ;;  %v7224_v0 = vpack.i.bf16 %v1005_v38, %v1004_v58  ;;  %v1007_v6 = vld [vmem:[#allocation2 + $0xfa] sm:$0xff]  ;;  %v700_v44 = vld [vmem:[#allocation2 + $0x1b0] sm:$0xff] }
 0x131   : > { %9580 = vst [vmem:[#allocation78_spill] sm:$0xff] %v7182_v45  ;;  %9582 = vst [vmem:[#allocation80_spill] sm:$0xff] %v7190_v27  ;;  %v7196_v45 = vpop.permute.xlu0 %5272  ;;  %v7228_v47 = vsel %vm515_vm0, %v6894_v5, %v5020_v12  ;;  %v7236_v3 = vsel %vm515_vm0, %v6906_v11, %v5025_v46  ;;  %v7240_v39 = vsel %vm515_vm0, %v6904_v10, %v5024_v43  ;;  %v701_v38 = vld [vmem:[#allocation2 + $0x1b8] sm:$0xff]  ;;  %v5040_v5 = vunpack.i.h.bf16 %v6902_v8  ;;  %v1011_v11 = vld [vmem:[#allocation2 + $0x12a] sm:$0xff] }
 0x132   : > { %9583 = vst [vmem:[#allocation81_spill] sm:$0xff] %v7196_v45  ;;  %5557 = vrot.lane.b32.xlu1 %v5556_v40, %s6272_s7  ;;  %9585 = vst [vmem:[#allocation83_spill] sm:$0xff] %v7201_v60  ;;  %v5029_v40 = vunpack.i.l.bf16 %v6884_v62  ;;  %v7232_v62 = vsel %vm515_vm0, %v6892_v4, %v5019_v36  ;;  %v5039_v12 = vunpack.i.l.bf16 %v6902_v8  ;;  %v5045_v4 = vunpack.i.h.bf16 %v6908_v13  ;;  %v1012_v46 = vld [vmem:[#allocation2 + $0x13a] sm:$0xff] }
 0x133   : > { %9586 = vst [vmem:[#allocation84_spill] sm:$0xff] %v7203_v7  ;;  %9587 = vst [vmem:[#allocation85_spill] sm:$0xff] %v7205_v9  ;;  %5562 = vrot.lane.b32.xlu0 %v5561_v15, %s6272_s7  ;;  %v5044_v36 = vunpack.i.l.bf16 %v6908_v13  ;;  %v7251_v10 = vsel %vm515_vm0, %v6912_v2, %v5030_v21  ;;  %v9590_v8 = vpack.i.bf16 %v7144_v16, %v7142_v32  ;;  %v5050_v2 = vunpack.i.h.bf16 %v6920_v20 }
 0x134   : > { %v7220_v55 = vpop.permute.xlu1 %5277  ;;  %v7255_v43 = vsel %vm515_vm0, %v6910_v1, %v5029_v40  ;;  %v7261_v58 = vpack.i.bf16 %v1007_v6, %v1006_v50  ;;  %v7263_v13 = vpack.i.bf16 %v1009_v52, %v1008_v63  ;;  %v5049_v1 = vunpack.i.l.bf16 %v6920_v20  ;;  %v1014_v40 = vld [vmem:[#allocation2 + $0x152] sm:$0xff]  ;;  %v1015_v63 = vld [vmem:[#allocation2 + $0x15a] sm:$0xff] }
 0x135   : > { %9588 = vst [vmem:[#allocation86_spill] sm:$0xff] %v7220_v55  ;;  %v7242_v15 = vpop.permute.xlu0 %5282  ;;  %v5055_v32 = vunpack.i.h.bf16 %v6922_v22  ;;  %v5054_v16 = vunpack.i.l.bf16 %v6922_v22  ;;  %v7279_v6 = vpack.i.bf16 %v1011_v11, %v1010_v26  ;;  %v1017_v52 = vld [vmem:[#allocation2 + $0x172] sm:$0xff]  ;;  %v7289_v20 = vsel %vm515_vm0, %v6924_v23, %v5039_v12  ;;  %v1018_v11 = vld [vmem:[#allocation2 + $0x182] sm:$0xff] }
 0x136   : > { %9589 = vst [vmem:[#allocation87_spill] sm:$0xff] %v7242_v15  ;;  %5567 = vrot.lane.b32.xlu1 %v5566_v49, %s6272_s7  ;;  %v7266_v49 = vsel %vm515_vm0, %v701_v38, %v5035_v51  ;;  %v7269_v15 = vsel %vm515_vm0, %v700_v44, %v5034_v54  ;;  %v7281_v51 = vpack.i.bf16 %v1013_v61, %v1012_v46  ;;  %v1016_v54 = vld [vmem:[#allocation2 + $0x16a] sm:$0xff]  ;;  %v5065_v23 = vunpack.i.h.bf16 %v6938_v33  ;;  %v9625_v55 = vld [vmem:[#allocation27_spill] sm:$0xff] }
 0x137   : > { %5572 = vrot.lane.b32.xlu0 %v9590_v8, %s6272_s7  ;;  %9593 = vst [vmem:[#allocation90_spill] sm:$0xff] %v7279_v6  ;;  %v7285_v44 = vsel %vm515_vm0, %v6926_v25, %v5040_v5  ;;  %v7293_v22 = vsel %vm515_vm0, %v6936_v31, %v5045_v4  ;;  %v7297_v38 = vsel %vm515_vm0, %v6934_v30, %v5044_v36  ;;  %v5060_v25 = vunpack.i.h.bf16 %v6932_v28  ;;  %v1019_v30 = vld [vmem:[#allocation2 + $0x18a] sm:$0xff]  ;;  %v7313_v36 = vld [vmem:[#allocation2 + $0x1d2] sm:$0xff] }
 0x138   : > { %v7273_v21 = vpop.permute.xlu1 %5287  ;;  %9594 = vst [vmem:[#allocation91_spill] sm:$0xff] %v7281_v51  ;;  %v9595_v26 = vpack.i.bf16 %v7149_v37, %v7147_v29  ;;  %v5059_v5 = vunpack.i.l.bf16 %v6932_v28  ;;  %v5064_v12 = vunpack.i.l.bf16 %v6938_v33  ;;  %v9596_v31 = vpack.i.bf16 %v7153_v59, %v7151_v24  ;;  %v7311_v4 = vld [vmem:[#allocation2 + $0x1ca] sm:$0xff] }
 0x139   : > { %9591 = vst [vmem:[#allocation88_spill] sm:$0xff] %v7273_v21  ;;  %v7277_v50 = vpop.permute.xlu0 %5292  ;;  %v7317_v29 = vsel %vm515_vm0, %v6942_v35, %v5050_v2  ;;  %v7321_v28 = vsel %vm515_vm0, %v6940_v34, %v5049_v1  ;;  %v7325_v33 = vpack.i.bf16 %v1015_v63, %v1014_v40  ;;  %v7327_v46 = vpack.i.bf16 %v1017_v52, %v1016_v54  ;;  %v9600_v35 = vld [vmem:[#allocation15_spill] sm:$0xff]  ;;  %v7343_v1 = vld [vmem:[#allocation2 + $0x1ea] sm:$0xff] }
 0x13a   : > { %9592 = vst [vmem:[#allocation89_spill] sm:$0xff] %v7277_v50  ;;  %5577 = vrot.lane.b32.xlu1 %v9595_v26, %s6272_s7  ;;  %v7331_v59 = vsel %vm515_vm0, %v6954_v42, %v5055_v32  ;;  %v7335_v24 = vsel %vm515_vm0, %v6952_v41, %v5054_v16  ;;  %v5070_v61 = vunpack.i.h.bf16 %v9600_v35  ;;  %v5069_v8 = vunpack.i.l.bf16 %v9600_v35  ;;  %v7341_v2 = vld [vmem:[#allocation2 + $0x1e2] sm:$0xff]  ;;  %9603 = vst [vmem:[#allocation96_spill] sm:$0xff] %v7343_v1  ;;  %v7355_v52 = vld [vmem:[#allocation2 + $0x1fa] sm:$0xff] }
 0x13b   : > { %5582 = vrot.lane.b32.xlu0 %v9596_v31, %s6272_s7  ;;  %9598 = vst [vmem:[#allocation93_spill] sm:$0xff] %v7325_v33  ;;  %9599 = vst [vmem:[#allocation94_spill] sm:$0xff] %v7327_v46  ;;  %v9604_v40 = vld [vmem:[#allocation16_spill] sm:$0xff]  ;;  %v9605_v42 = vld [vmem:[#allocation75_spill] sm:$0xff]  ;;  %v7351_v41 = vpack.i.bf16 %v1019_v30, %v1018_v11 }
 0x13c   : > { %v7323_v37 = vpop.permute.xlu1 %5297  ;;  %9602 = vst [vmem:[#allocation95_spill] sm:$0xff] %v7341_v2  ;;  %v5075_v63 = vunpack.i.h.bf16 %v9604_v40  ;;  %v5074_v54 = vunpack.i.l.bf16 %v9604_v40  ;;  %v9606_v32 = vpack.i.bf16 %v7158_v17, %v9605_v42  ;;  %9608 = vst [vmem:[#allocation75_spill] sm:$0xff] %v7355_v52  ;;  %v7357_v26 = vld [vmem:[#allocation2 + $0x202] sm:$0xff]  ;;  %v9610_v31 = vld [vmem:[#allocation18_spill] sm:$0xff]  ;;  %v9614_v42 = vpack.i.bf16 %v7162_v14, %v7160_v18 }
 0x13d   : > { %9597 = vst [vmem:[#allocation92_spill] sm:$0xff] %v7323_v37  ;;  %v7339_v34 = vpop.permute.xlu0 %5302  ;;  %9607 = vst [vmem:[#allocation16_spill] sm:$0xff] %v7351_v41  ;;  %v7361_v35 = vsel %vm515_vm0, %v9610_v31, %v5060_v25  ;;  %v9612_v37 = vld [vmem:[#allocation21_spill] sm:$0xff]  ;;  %v9613_v11 = vld [vmem:[#allocation20_spill] sm:$0xff] }
 0x13e   : > { %9601 = vst [vmem:[#allocation15_spill] sm:$0xff] %v7339_v34  ;;  %5587 = vrot.lane.b32.xlu1 %v9606_v32, %s6272_s7  ;;  %9609 = vst [vmem:[#allocation97_spill] sm:$0xff] %v7357_v26  ;;  %v9611_v34 = vld [vmem:[#allocation17_spill] sm:$0xff]  ;;  %v7369_v17 = vsel %vm515_vm0, %v9612_v37, %v5065_v23  ;;  %v7373_v30 = vsel %vm515_vm0, %v9613_v11, %v5064_v12  ;;  %v9616_v32 = vld [vmem:[#allocation19_spill] sm:$0xff]  ;;  %v7409_v45 = vsel %vm515_vm0, %v9625_v55, %v5075_v63 }
 0x13f   : > { %v7365_v40 = vsel %vm515_vm0, %v9611_v34, %v5059_v5  ;;  %5592 = vrot.lane.b32.xlu0 %v9614_v42, %s6273_s8  ;;  %v7379_v25 = vld [vmem:[#allocation2 + $0x212] sm:$0xff]  ;;  %v5080_v31 = vunpack.i.h.bf16 %v9616_v32  ;;  %v5079_v5 = vunpack.i.l.bf16 %v9616_v32  ;;  %v7388_v37 = vld [vmem:[#allocation2 + $0x21a] sm:$0xff]  ;;  %v7390_v11 = vld [vmem:[#allocation2 + $0x22a] sm:$0xff] }
 0x140   : > { %9615 = vst [vmem:[#allocation18_spill] sm:$0xff] %v7379_v25  ;;  %v9617_v34 = vld [vmem:[#allocation22_spill] sm:$0xff]  ;;  %v7384_v23 = vpop.permute.xlu1 %5307  ;;  %9619 = vst [vmem:[#allocation21_spill] sm:$0xff] %v7388_v37  ;;  %v9622_v14 = vld [vmem:[#allocation24_spill] sm:$0xff] }
 0x141   : > { %v5085_v16 = vunpack.i.h.bf16 %v9617_v34  ;;  %9618 = vst [vmem:[#allocation17_spill] sm:$0xff] %v7384_v23  ;;  %9620 = vst [vmem:[#allocation20_spill] sm:$0xff] %v7390_v11  ;;  %v7392_v50 = vld [vmem:[#allocation2 + $0x232] sm:$0xff]  ;;  %v7396_v18 = vsel %vm515_vm0, %v9622_v14, %v5070_v61  ;;  %v9623_v42 = vld [vmem:[#allocation23_spill] sm:$0xff]  ;;  %v5084_v21 = vunpack.i.l.bf16 %v9617_v34  ;;  %v7403_v23 = vpop.permute.xlu0 %5312 }
 0x142   : > { %9621 = vst [vmem:[#allocation19_spill] sm:$0xff] %v7392_v50  ;;  %v7400_v32 = vsel %vm515_vm0, %v9623_v42, %v5069_v8  ;;  %9624 = vst [vmem:[#allocation22_spill] sm:$0xff] %v7403_v23  ;;  %v9627_v2 = vld [vmem:[#allocation26_spill] sm:$0xff]  ;;  %v9628_v61 = vld [vmem:[#allocation25_spill] sm:$0xff]  ;;  %5597 = vrot.lane.b32.xlu1 %v7188_v48, %s6273_s8 }
 0x143   : > { %9626 = vst [vmem:[#allocation24_spill] sm:$0xff] %v7409_v45  ;;  %v7413_v1 = vsel %vm515_vm0, %v9627_v2, %v5074_v54  ;;  %v5090_v14 = vunpack.i.h.bf16 %v9628_v61  ;;  %v5089_v8 = vunpack.i.l.bf16 %v9628_v61  ;;  %v7419_v34 = vld [vmem:[#allocation2 + $0x242] sm:$0xff]  ;;  %v7421_v42 = vld [vmem:[#allocation2 + $0x24a] sm:$0xff]  ;;  %5602 = vrot.lane.b32.xlu0 %v7190_v27, %s6273_s8  ;;  %v7431_v54 = vld [vmem:[#allocation2 + $0x25a] sm:$0xff] }
 0x144   : > { %9629 = vst [vmem:[#allocation23_spill] sm:$0xff] %v7419_v34  ;;  %9630 = vst [vmem:[#allocation27_spill] sm:$0xff] %v7421_v42  ;;  %v9631_v12 = vld [vmem:[#allocation28_spill] sm:$0xff]  ;;  %v9634_v48 = vld [vmem:[#allocation30_spill] sm:$0xff]  ;;  %v7448_v37 = vpop.permute.xlu1 %5317 }
 0x145   : > { %v5095_v23 = vunpack.i.h.bf16 %v9631_v12  ;;  %v5094_v55 = vunpack.i.l.bf16 %v9631_v12  ;;  %9632 = vst [vmem:[#allocation26_spill] sm:$0xff] %v7431_v54  ;;  %v7433_v61 = vld [vmem:[#allocation2 + $0x262] sm:$0xff]  ;;  %v7437_v52 = vsel %vm515_vm0, %v9634_v48, %v5080_v31  ;;  %v9636_v26 = vld [vmem:[#allocation29_spill] sm:$0xff]  ;;  %v9643_v31 = vld [vmem:[#allocation34_spill] sm:$0xff] }
 0x146   : > { %9633 = vst [vmem:[#allocation25_spill] sm:$0xff] %v7433_v61  ;;  %9635 = vst [vmem:[#allocation28_spill] sm:$0xff] %v7437_v52  ;;  %v7441_v12 = vsel %vm515_vm0, %v9636_v26, %v5079_v5  ;;  %v9638_v45 = vld [vmem:[#allocation33_spill] sm:$0xff]  ;;  %v9640_v2 = vld [vmem:[#allocation31_spill] sm:$0xff]  ;;  %v5105_v52 = vunpack.i.h.bf16 %v9643_v31  ;;  %v7458_v26 = vpop.permute.xlu0 %5322  ;;  %5607 = vrot.lane.b32.xlu1 %v7199_v19, %s6273_s8 }
 0x147   : > { %9637 = vst [vmem:[#allocation30_spill] sm:$0xff] %v7441_v12  ;;  %v7445_v27 = vsel %vm515_vm0, %v9638_v45, %v5085_v16  ;;  %v5100_v25 = vunpack.i.h.bf16 %v9640_v2  ;;  %9641 = vst [vmem:[#allocation33_spill] sm:$0xff] %v7448_v37  ;;  %v7450_v63 = vld [vmem:[#allocation2 + $0x30] sm:$0xff]  ;;  %v9642_v11 = vld [vmem:[#allocation32_spill] sm:$0xff]  ;;  %v5099_v48 = vunpack.i.l.bf16 %v9640_v2  ;;  %v5104_v2 = vunpack.i.l.bf16 %v9643_v31  ;;  %5612 = vrot.lane.b32.xlu0 %v7201_v60, %s6273_s8 }
 0x148   : > { %9639 = vst [vmem:[#allocation29_spill] sm:$0xff] %v7445_v27  ;;  %v7454_v50 = vsel %vm515_vm0, %v9642_v11, %v5084_v21  ;;  %9644 = vst [vmem:[#allocation31_spill] sm:$0xff] %v7458_v26  ;;  %v7462_v16 = vld [vmem:[#allocation2 + $0x38] sm:$0xff]  ;;  %v7464_v5 = vld [vmem:[#allocation2 + $0x48] sm:$0xff]  ;;  %v7498_v54 = vpop.permute.xlu1 %5327 }
 0x149   : > { %9645 = vst [vmem:[#allocation32_spill] sm:$0xff] %v7464_v5  ;;  %v7466_v37 = vld [vmem:[#allocation2 + $0x50] sm:$0xff]  ;;  %v9646_v27 = vld [vmem:[#allocation36_spill] sm:$0xff]  ;;  %v9648_v21 = vld [vmem:[#allocation35_spill] sm:$0xff] }
 0x14a   : > { %v7470_v12 = vsel %vm515_vm0, %v9646_v27, %v5090_v14  ;;  %v7474_v11 = vsel %vm515_vm0, %v9648_v21, %v5089_v8  ;;  %v9649_v26 = vld [vmem:[#allocation39_spill] sm:$0xff]  ;;  %v9651_v42 = vld [vmem:[#allocation38_spill] sm:$0xff]  ;;  %v5333_v61 = vpop.permute.xlu0 %5332  ;;  %5617 = vrot.lane.b32.xlu1 %v7203_v7, %s6273_s8 }
 0x14b   : > { %9647 = vst [vmem:[#allocation34_spill] sm:$0xff] %v7470_v12  ;;  %v7483_v34 = vsel %vm515_vm0, %v9649_v26, %v5095_v23  ;;  %v7487_v27 = vsel %vm515_vm0, %v9651_v42, %v5094_v55  ;;  %v9652_v14 = vld [vmem:[#allocation58_spill] sm:$0xff]  ;;  %v9655_v45 = vld [vmem:[#allocation59_spill] sm:$0xff]  ;;  %9656 = vst [vmem:[#allocation39_spill] sm:$0xff] %v7498_v54  ;;  %v5335_v42 = vunpack.i.h.bf16 %v5333_v61  ;;  %v5334_v5 = vunpack.i.l.bf16 %v5333_v61  ;;  %5622 = vrot.lane.b32.xlu0 %v7205_v9, %s6273_s8 }
 0x14c   : > { %9650 = vst [vmem:[#allocation36_spill] sm:$0xff] %v7483_v34  ;;  %v5175_v12 = vunpack.i.h.bf16 %v9652_v14  ;;  %v5174_v8 = vunpack.i.l.bf16 %v9652_v14  ;;  %v9653_v31 = vld [vmem:[#allocation42_spill] sm:$0xff]  ;;  %v5180_v19 = vunpack.i.h.bf16 %v9655_v45  ;;  %v9657_v55 = vld [vmem:[#allocation41_spill] sm:$0xff]  ;;  %v9660_v54 = vld [vmem:[#allocation44_spill] sm:$0xff] }
 0x14d   : > { %v7495_v21 = vsel %vm515_vm0, %v9653_v31, %v5100_v25  ;;  %v7506_v26 = vsel %vm515_vm0, %v9657_v55, %v5099_v48  ;;  %v9658_v14 = vld [vmem:[#allocation45_spill] sm:$0xff]  ;;  %v5179_v25 = vunpack.i.l.bf16 %v9655_v45  ;;  %v9659_v31 = vld [vmem:[#allocation60_spill] sm:$0xff]  ;;  %v7516_v34 = vsel %vm515_vm0, %v9660_v54, %v5104_v2  ;;  %v9662_v61 = vld [vmem:[#allocation62_spill] sm:$0xff] }
 0x14e   : > { %9654 = vst [vmem:[#allocation35_spill] sm:$0xff] %v7495_v21  ;;  %v7510_v60 = vsel %vm515_vm0, %v9658_v14, %v5105_v52  ;;  %v5184_v21 = vunpack.i.l.bf16 %v9659_v31  ;;  %v5185_v23 = vunpack.i.h.bf16 %v9659_v31  ;;  %v3382_v52 = vsel %vm3357_vm3, %v7213_v56, %v5174_v8  ;;  %v9661_v45 = vld [vmem:[#allocation61_spill] sm:$0xff]  ;;  %v5338_v8 = vpop.permute.xlu1 %5337  ;;  %v5343_v7 = vpop.permute.xlu0 %5342  ;;  %5627 = vrot.lane.b32.xlu1 %v7222_v57, %s6273_s8 }
 0x14f   : > { %v3383_v48 = vsel %vm3357_vm3, %v7209_v53, %v5175_v12  ;;  %v5190_v55 = vunpack.i.h.bf16 %v9661_v45  ;;  %v5189_v14 = vunpack.i.l.bf16 %v9661_v45  ;;  %v3385_v54 = vsel %vm3357_vm3, %v7228_v47, %v5180_v19  ;;  %5632 = vrot.lane.b32.xlu0 %v7224_v0, %s6273_s8 }
 0x150   : > { %v5194_v2 = vunpack.i.l.bf16 %v9662_v61  ;;  %v7533_v31 = vsel %vm3422_vm4, %v3382_v52, %v5334_v5  ;;  %v7536_v56 = vsel %vm3422_vm4, %v3383_v48, %v5335_v42  ;;  %v3384_v53 = vsel %vm3357_vm3, %v7232_v62, %v5179_v25  ;;  %v9664_v48 = vld [vmem:[#allocation64_spill] sm:$0xff] }
 0x151   : > { %v3386_v12 = vsel %vm3357_vm3, %v7240_v39, %v5184_v21  ;;  %v5340_v45 = vunpack.i.h.bf16 %v5338_v8  ;;  %v5339_v9 = vunpack.i.l.bf16 %v5338_v8  ;;  %v3387_v19 = vsel %vm3357_vm3, %v7236_v3, %v5185_v23  ;;  %v9663_v3 = vld [vmem:[#allocation63_spill] sm:$0xff] }
 0x152   : > { %v5195_v47 = vunpack.i.h.bf16 %v9662_v61  ;;  %v5345_v5 = vunpack.i.h.bf16 %v5343_v7  ;;  %v5344_v52 = vunpack.i.l.bf16 %v5343_v7  ;;  %v3389_v42 = vsel %vm3357_vm3, %v7251_v10, %v5190_v55  ;;  %v5353_v61 = vpop.permute.xlu0 %5352  ;;  %5637 = vrot.lane.b32.xlu1 %v7261_v58, %s6273_s8 }
 0x153   : > { %v3388_v62 = vsel %vm3357_vm3, %v7255_v43, %v5189_v14  ;;  %v7552_v39 = vsel %vm3422_vm4, %v3384_v53, %v5339_v9  ;;  %v7555_v21 = vsel %vm3422_vm4, %v3385_v54, %v5340_v45  ;;  %v3390_v7 = vsel %vm3357_vm3, %v7269_v15, %v5194_v2  ;;  %v5348_v43 = vpop.permute.xlu1 %5347  ;;  %5642 = vrot.lane.b32.xlu0 %v7263_v13, %s6273_s8 }
 0x154   : > { %v5200_v23 = vunpack.i.h.bf16 %v9663_v3  ;;  %v7563_v25 = vsel %vm3422_vm4, %v3386_v12, %v5344_v52  ;;  %v7566_v10 = vsel %vm3422_vm4, %v3387_v19, %v5345_v5  ;;  %v5199_v9 = vunpack.i.l.bf16 %v9663_v3  ;;  %v9665_v12 = vld [vmem:[#allocation65_spill] sm:$0xff] }
 0x155   : > { %v5204_v55 = vunpack.i.l.bf16 %v9664_v48  ;;  %v5350_v14 = vunpack.i.h.bf16 %v5348_v43  ;;  %v5349_v54 = vunpack.i.l.bf16 %v5348_v43  ;;  %v3391_v8 = vsel %vm3357_vm3, %v7266_v49, %v5195_v47  ;;  %v9666_v47 = vld [vmem:[#allocation66_spill] sm:$0xff] }
 0x156   : > { %v5205_v15 = vunpack.i.h.bf16 %v9664_v48  ;;  %v5355_v2 = vunpack.i.h.bf16 %v5353_v61  ;;  %v5354_v53 = vunpack.i.l.bf16 %v5353_v61  ;;  %v5210_v45 = vunpack.i.h.bf16 %v9665_v12  ;;  %5647 = vrot.lane.b32.xlu1 %v7279_v6, %s6273_s8 }
 0x157   : > { %v5209_v19 = vunpack.i.l.bf16 %v9665_v12  ;;  %v7578_v5 = vsel %vm3422_vm4, %v3388_v62, %v5349_v54  ;;  %v7581_v52 = vsel %vm3422_vm4, %v3389_v42, %v5350_v14  ;;  %v3393_v49 = vsel %vm3357_vm3, %v7285_v44, %v5200_v23  ;;  %v5358_v61 = vpop.permute.xlu1 %5357  ;;  %v5363_v12 = vpop.permute.xlu0 %5362  ;;  %5652 = vrot.lane.b32.xlu0 %v7281_v51, %s6273_s8 }
 0x158   : > { %v5214_v3 = vunpack.i.l.bf16 %v9666_v47  ;;  %v7589_v43 = vsel %vm3422_vm4, %v3390_v7, %v5354_v53  ;;  %v7592_v48 = vsel %vm3422_vm4, %v3391_v8, %v5355_v2  ;;  %v3392_v62 = vsel %vm3357_vm3, %v7289_v20, %v5199_v9 }
 0x159   : > { %v3394_v42 = vsel %vm3357_vm3, %v7297_v38, %v5204_v55  ;;  %v5360_v14 = vunpack.i.h.bf16 %v5358_v61  ;;  %v5359_v54 = vunpack.i.l.bf16 %v5358_v61  ;;  %v3395_v44 = vsel %vm3357_vm3, %v7293_v22, %v5205_v15  ;;  %v9667_v55 = vld [vmem:[#allocation67_spill] sm:$0xff] }
 0x15a   : > { %v5215_v23 = vunpack.i.h.bf16 %v9666_v47  ;;  %v5365_v7 = vunpack.i.h.bf16 %v5363_v12  ;;  %v5364_v53 = vunpack.i.l.bf16 %v5363_v12  ;;  %v3397_v8 = vsel %vm3357_vm3, %v7317_v29, %v5210_v45  ;;  %5657 = vrot.lane.b32.xlu1 %v7325_v33, %s6273_s8  ;;  %v9669_v12 = vld [vmem:[#allocation69_spill] sm:$0xff]  ;;  %v9687_v33 = vld [vmem:[#allocation18_spill] sm:$0xff] }
 0x15b   : > { %v3396_v20 = vsel %vm3357_vm3, %v7321_v28, %v5209_v19  ;;  %v7608_v38 = vsel %vm3422_vm4, %v3392_v62, %v5359_v54  ;;  %v7611_v9 = vsel %vm3422_vm4, %v3393_v49, %v5360_v14  ;;  %v3398_v22 = vsel %vm3357_vm3, %v7335_v24, %v5214_v3  ;;  %v5368_v28 = vpop.permute.xlu1 %5367  ;;  %v9668_v19 = vld [vmem:[#allocation68_spill] sm:$0xff]  ;;  %v5373_v62 = vpop.permute.xlu0 %5372  ;;  %5662 = vrot.lane.b32.xlu0 %v7327_v46, %s6273_s8 }
 0x15c   : > { %v5220_v15 = vunpack.i.h.bf16 %v9667_v55  ;;  %v7619_v2 = vsel %vm3422_vm4, %v3394_v42, %v5364_v53  ;;  %v7622_v29 = vsel %vm3422_vm4, %v3395_v44, %v5365_v7  ;;  %v5219_v45 = vunpack.i.l.bf16 %v9667_v55  ;;  %v6231_v42 = vld [vmem:[%s9367_s3] sm:$0xff]   ;;  %v9670_v55 = vld [vmem:[#allocation70_spill] sm:$0xff] }
 0x15d   : > { %v5224_v49 = vunpack.i.l.bf16 %v9668_v19  ;;  %v5370_v47 = vunpack.i.h.bf16 %v5368_v28  ;;  %v5369_v61 = vunpack.i.l.bf16 %v5368_v28  ;;  %v3399_v14 = vsel %vm3357_vm3, %v7331_v59, %v5215_v23  ;;  %4848 = vmatprep.subr.bf16.mxu0 %v6231_v42  ;;  %4922 = vmatprep.subr.bf16.mxu1 %v6231_v42 }
 0x15e   : > { %v5225_v24 = vunpack.i.h.bf16 %v9668_v19  ;;  %v5375_v3 = vunpack.i.h.bf16 %v5373_v62  ;;  %v5374_v54 = vunpack.i.l.bf16 %v5373_v62  ;;  %v5230_v44 = vunpack.i.h.bf16 %v9669_v12  ;;  %4849 = vmatpush3.bf16.msra.mxu0 %v6231_v42  ;;  %4927 = vmatpush3.bf16.msra.mxu1 %v6231_v42  ;;  %v9672_v42 = vld [vmem:[#allocation71_spill] sm:$0xff] }
 0x15f   : > { %v5229_v7 = vunpack.i.l.bf16 %v9669_v12  ;;  %v7637_v53 = vsel %vm3422_vm4, %v3396_v20, %v5369_v61  ;;  %v7640_v59 = vsel %vm3422_vm4, %v3397_v8, %v5370_v47  ;;  %v3401_v23 = vsel %vm3357_vm3, %v7361_v35, %v5220_v15  ;;  %v5378_v12 = vpop.permute.xlu1 %5377  ;;  %v5383_v35 = vpop.permute.xlu0 %5382  ;;  %5667 = vrot.lane.b32.xlu1 %v7351_v41, %s6273_s8 }
 0x160   : > { %v5234_v28 = vunpack.i.l.bf16 %v9670_v55  ;;  %v7648_v19 = vsel %vm3422_vm4, %v3398_v22, %v5374_v54  ;;  %v7651_v62 = vsel %vm3422_vm4, %v3399_v14, %v5375_v3  ;;  %v3400_v8 = vsel %vm3357_vm3, %v7365_v40, %v5219_v45  ;;  %v6232_v40 = vld [vmem:[%s9367_s3 + $0x8] sm:$0xff]  }
 0x161   : > { %v3402_v20 = vsel %vm3357_vm3, %v7373_v30, %v5224_v49  ;;  %v5380_v47 = vunpack.i.h.bf16 %v5378_v12  ;;  %v5379_v61 = vunpack.i.l.bf16 %v5378_v12  ;;  %v3403_v22 = vsel %vm3357_vm3, %v7369_v17, %v5225_v24  ;;  %4850 = vmatprep.subr.bf16.mxu0 %v6232_v40  ;;  %4923 = vmatprep.subr.bf16.mxu1 %v6232_v40 }
 0x162   : > { %v5235_v15 = vunpack.i.h.bf16 %v9670_v55  ;;  %v5385_v14 = vunpack.i.h.bf16 %v5383_v35  ;;  %v5384_v3 = vunpack.i.l.bf16 %v5383_v35  ;;  %v3405_v30 = vsel %vm3357_vm3, %v7396_v18, %v5230_v44  ;;  %4851 = vmatpush3.bf16.msra.mxu0 %v6232_v40  ;;  %4928 = vmatpush3.bf16.msra.mxu1 %v6232_v40  ;;  %v9675_v35 = vld [vmem:[#allocation96_spill] sm:$0xff] }
 0x163   : > { %v3404_v45 = vsel %vm3357_vm3, %v7400_v32, %v5229_v7  ;;  %v7670_v49 = vsel %vm3422_vm4, %v3400_v8, %v5379_v61  ;;  %v7673_v17 = vsel %vm3422_vm4, %v3401_v23, %v5380_v47  ;;  %v9671_v24 = vpack.i.bf16 %v7313_v36, %v7311_v4  ;;  %v5388_v44 = vpop.permute.xlu1 %5387  ;;  %v9673_v23 = vld [vmem:[#allocation72_spill] sm:$0xff]  ;;  %v5393_v8 = vpop.permute.xlu0 %5392 }
 0x164   : > { %v3406_v54 = vsel %vm3357_vm3, %v7413_v1, %v5234_v28  ;;  %v5240_v55 = vunpack.i.h.bf16 %v9672_v42  ;;  %v7683_v18 = vsel %vm3422_vm4, %v3402_v20, %v5384_v3  ;;  %v7686_v32 = vsel %vm3422_vm4, %v3403_v22, %v5385_v14  ;;  %v9674_v1 = vld [vmem:[#allocation24_spill] sm:$0xff]  ;;  %v9676_v22 = vld [vmem:[#allocation95_spill] sm:$0xff]  ;;  %v6233_v3 = vld [vmem:[%s9367_s3 + $0x10] sm:$0xff]  }
 0x165   : > { %5672 = vrot.lane.b32.xlu0 %v9671_v24, %s6273_s8  ;;  %v5239_v7 = vunpack.i.l.bf16 %v9672_v42  ;;  %v5244_v12 = vunpack.i.l.bf16 %v9673_v23  ;;  %v5390_v4 = vunpack.i.h.bf16 %v5388_v44  ;;  %v5389_v36 = vunpack.i.l.bf16 %v5388_v44  ;;  %v9678_v24 = vld [vmem:[#allocation73_spill] sm:$0xff]  ;;  %4852 = vmatprep.subr.bf16.mxu0 %v6233_v3 }
 0x166   : > { %v3407_v28 = vsel %vm3357_vm3, %v9674_v1, %v5235_v15  ;;  %v5245_v20 = vunpack.i.h.bf16 %v9673_v23  ;;  %v5395_v47 = vunpack.i.h.bf16 %v5393_v8  ;;  %v5394_v61 = vunpack.i.l.bf16 %v5393_v8  ;;  %v9679_v23 = vld [vmem:[#allocation97_spill] sm:$0xff]  ;;  %v9680_v8 = vld [vmem:[#allocation75_spill] sm:$0xff]  ;;  %4924 = vmatprep.subr.bf16.mxu1 %v6233_v3  ;;  %4853 = vmatpush3.bf16.msra.mxu0 %v6233_v3 }
 0x167   : > { %v9677_v14 = vpack.i.bf16 %v9675_v35, %v9676_v22  ;;  %v5250_v42 = vunpack.i.h.bf16 %v9678_v24  ;;  %v5249_v40 = vunpack.i.l.bf16 %v9678_v24  ;;  %v7703_v44 = vsel %vm3422_vm4, %v3404_v45, %v5389_v36  ;;  %v9682_v35 = vld [vmem:[#allocation28_spill] sm:$0xff]  ;;  %v5398_v45 = vpop.permute.xlu1 %5397  ;;  %4929 = vmatpush3.bf16.msra.mxu1 %v6233_v3 }
 0x168   : > { %v7706_v15 = vsel %vm3422_vm4, %v3405_v30, %v5390_v4  ;;  %v9681_v1 = vpack.i.bf16 %v9679_v23, %v9680_v8  ;;  %v3409_v22 = vsel %vm3357_vm3, %v9682_v35, %v5240_v55  ;;  %v7716_v46 = vsel %vm3422_vm4, %v3406_v54, %v5394_v61  ;;  %v9684_v30 = vld [vmem:[#allocation30_spill] sm:$0xff]  ;;  %v5403_v55 = vpop.permute.xlu0 %5402  ;;  %v9686_v35 = vld [vmem:[#allocation21_spill] sm:$0xff] }
 0x169   : > { %5677 = vrot.lane.b32.xlu1 %v9677_v14, %s6273_s8  ;;  %v9683_v14 = vld [vmem:[#allocation74_spill] sm:$0xff]  ;;  %v7719_v24 = vsel %vm3422_vm4, %v3407_v28, %v5395_v47  ;;  %v3408_v4 = vsel %vm3357_vm3, %v9684_v30, %v5239_v7  ;;  %v3410_v36 = vsel %vm3357_vm3, %v7454_v50, %v5244_v12  ;;  %v5400_v23 = vunpack.i.h.bf16 %v5398_v45  ;;  %v9693_v30 = vld [vmem:[#allocation37_spill] sm:$0xff] }
 0x16a   : > { %5682 = vrot.lane.b32.xlu0 %v9681_v1, %s6273_s8  ;;  %v5254_v41 = vunpack.i.l.bf16 %v9683_v14  ;;  %v5399_v8 = vunpack.i.l.bf16 %v5398_v45  ;;  %v9685_v1 = vld [vmem:[#allocation29_spill] sm:$0xff]  ;;  %v5255_v28 = vunpack.i.h.bf16 %v9683_v14  ;;  %v5405_v47 = vunpack.i.h.bf16 %v5403_v55  ;;  %v6234_v50 = vld [vmem:[%s9367_s3 + $0x18] sm:$0xff]   ;;  %v9690_v45 = vld [vmem:[#allocation19_spill] sm:$0xff] }
 0x16b   : > { %v3411_v54 = vsel %vm3357_vm3, %v9685_v1, %v5245_v20  ;;  %v5404_v61 = vunpack.i.l.bf16 %v5403_v55  ;;  %v9688_v51 = vpack.i.bf16 %v9686_v35, %v9687_v33  ;;  %v9689_v7 = vld [vmem:[#allocation34_spill] sm:$0xff]  ;;  %v3412_v3 = vsel %vm3357_vm3, %v7474_v11, %v5249_v40  ;;  %v9691_v33 = vld [vmem:[#allocation20_spill] sm:$0xff]  ;;  %v5408_v40 = vpop.permute.xlu1 %5407  ;;  %4854 = vmatprep.subr.bf16.mxu0 %v6234_v50  ;;  %4925 = vmatprep.subr.bf16.mxu1 %v6234_v50 }
 0x16c   : > { %v3413_v12 = vsel %vm3357_vm3, %v9689_v7, %v5250_v42  ;;  %v7740_v20 = vsel %vm3422_vm4, %v3408_v4, %v5399_v8  ;;  %v7743_v14 = vsel %vm3422_vm4, %v3409_v22, %v5400_v23  ;;  %v5110_v55 = vunpack.i.h.bf16 %v9693_v30  ;;  %v9694_v22 = vld [vmem:[#allocation76_spill] sm:$0xff]  ;;  %v5413_v7 = vpop.permute.xlu0 %5412  ;;  %4855 = vmatpush3.bf16.msra.mxu0 %v6234_v50  ;;  %4930 = vmatpush3.bf16.msra.mxu1 %v6234_v50 }
 0x16d   : > { %5687 = vrot.lane.b32.xlu1 %v9688_v51, %s6273_s8  ;;  %v9692_v51 = vpack.i.bf16 %v9690_v45, %v9691_v33  ;;  %v3414_v1 = vsel %vm3357_vm3, %v7487_v27, %v5254_v41  ;;  %v7753_v42 = vsel %vm3422_vm4, %v3410_v36, %v5404_v61  ;;  %v7756_v11 = vsel %vm3422_vm4, %v3411_v54, %v5405_v47  ;;  %v9695_v45 = vld [vmem:[#allocation36_spill] sm:$0xff]  ;;  %v9696_v27 = vld [vmem:[#allocation77_spill] sm:$0xff]  ;;  %v9697_v47 = vld [vmem:[#allocation27_spill] sm:$0xff] }
 0x16e   : > { %v5260_v4 = vunpack.i.h.bf16 %v9694_v22  ;;  %v5259_v23 = vunpack.i.l.bf16 %v9694_v22  ;;  %v5410_v8 = vunpack.i.h.bf16 %v5408_v40  ;;  %v5409_v35 = vunpack.i.l.bf16 %v5408_v40  ;;  %v9698_v33 = vld [vmem:[#allocation23_spill] sm:$0xff] }
 0x16f   : > { %5692 = vrot.lane.b32.xlu0 %v9692_v51, %s6273_s8  ;;  %v3415_v41 = vsel %vm3357_vm3, %v9695_v45, %v5255_v28  ;;  %v5265_v36 = vunpack.i.h.bf16 %v9696_v27  ;;  %v5415_v61 = vunpack.i.h.bf16 %v5413_v7  ;;  %v5414_v54 = vunpack.i.l.bf16 %v5413_v7  ;;  %v6235_v22 = vld [vmem:[%s9367_s3 + $0x20] ss:$0 sps:$4 sm:$0xff]   ;;  %v9700_v45 = vld [vmem:[#allocation25_spill] sm:$0xff]  ;;  %v9701_v7 = vld [vmem:[#allocation26_spill] sm:$0xff] }
 0x170   : > { %v9699_v51 = vpack.i.bf16 %v9697_v47, %v9698_v33  ;;  %v5264_v40 = vunpack.i.l.bf16 %v9696_v27  ;;  %v7772_v50 = vsel %vm3422_vm4, %v3412_v3, %v5409_v35  ;;  %v7775_v28 = vsel %vm3422_vm4, %v3413_v12, %v5410_v8  ;;  %v5418_v27 = vpop.permute.xlu1 %5417  ;;  %4932 = vmatprep.subr.msk.bf16.mxu0 %vm3977_vm5, %v6235_v22  ;;  %4933 = vmatprep.subr.msk.bf16.mxu1 %vm3977_vm5, %v6235_v22  ;;  %v9703_v12 = vld [vmem:[#allocation35_spill] sm:$0xff] }
 0x171   : > { %v9702_v6 = vpack.i.bf16 %v9700_v45, %v9701_v7  ;;  %v5109_v47 = vunpack.i.l.bf16 %v9693_v30  ;;  %v7783_v33 = vsel %vm3422_vm4, %v3414_v1, %v5414_v54  ;;  %v3979_v3 = vsel %vm3977_vm5, %v6235_v22, 0  ;;  %v5423_v7 = vpop.permute.xlu0 %5422  ;;  %v9704_v30 = vld [vmem:[#allocation78_spill] sm:$0xff] }
 0x172   : > { %5697 = vrot.lane.b32.xlu1 %v9699_v51, %s6273_s8  ;;  %v7786_v51 = vsel %vm3422_vm4, %v3415_v41, %v5415_v61  ;;  %v3417_v8 = vsel %vm3357_vm3, %v9703_v12, %v5260_v4  ;;  %v3416_v35 = vsel %vm3357_vm3, %v7506_v26, %v5259_v23  ;;  %v5419_v45 = vunpack.i.l.bf16 %v5418_v27  ;;  %4857 = vmatpush3.bf16.msra.mxu0 %v3979_v3 }
 0x173   : > { %5702 = vrot.lane.b32.xlu0 %v9702_v6, %s6273_s8  ;;  %v5420_v6 = vunpack.i.h.bf16 %v5418_v27  ;;  %4931 = vmatpush3.bf16.msra.mxu1 %v3979_v3  ;;  %v5270_v1 = vunpack.i.h.bf16 %v9704_v30  ;;  %v5269_v41 = vunpack.i.l.bf16 %v9704_v30  ;;  %v5425_v61 = vunpack.i.h.bf16 %v5423_v7  ;;  %v9706_v3 = vld [vmem:[#allocation32_spill] sm:$0xff]  ;;  %v9708_v30 = vld [vmem:[#allocation51_spill] sm:$0xff] }
 0x174   : > { %v5424_v54 = vunpack.i.l.bf16 %v5423_v7  ;;  %v9705_v22 = vpack.i.bf16 %v7462_v16, %v7450_v63  ;;  %v3418_v26 = vsel %vm3357_vm3, %v7516_v34, %v5264_v40  ;;  %v3419_v4 = vsel %vm3357_vm3, %v7510_v60, %v5265_v36  ;;  %v5428_v34 = vpop.permute.xlu1 %5427  ;;  %v6236_v40 = vld [vmem:[#allocation2 + $0x320] sm:$0xff]  ;;  %v6237_v36 = vld [vmem:[#allocation2 + $0x318] sm:$0xff] }
 0x175   : > { %v7803_v23 = vsel %vm3422_vm4, %v3416_v35, %v5419_v45  ;;  %v7806_v27 = vsel %vm3422_vm4, %v3417_v8, %v5420_v6  ;;  %v9707_v12 = vpack.i.bf16 %v7466_v37, %v9706_v3  ;;  %v7816_v16 = vsel %vm3422_vm4, %v3419_v4, %v5425_v61  ;;  %v7820_v45 = vpop.permute.xlu0 %5432  ;;  %v1060_v4 = vld [vmem:[#allocation2 + $0x80] sm:$0xff] }
 0x176   : > { %5707 = vrot.lane.b32.xlu1 %v9705_v22, %s6274_s23  ;;  %v7813_v63 = vsel %vm3422_vm4, %v3418_v26, %v5424_v54  ;;  %v3356_v60 = vsel %vm515_vm0, %v6236_v40, %v5110_v55  ;;  %v3355_v35 = vsel %vm515_vm0, %v6237_v36, %v5109_v47  ;;  %v5430_v8 = vunpack.i.h.bf16 %v5428_v34  ;;  %v9709_v47 = vld [vmem:[#allocation52_spill] sm:$0xff]  ;;  %v1057_v54 = vld [vmem:[#allocation2 + $0x60] sm:$0xff] }
 0x177   : > { %5712 = vrot.lane.b32.xlu0 %v9707_v12, %s6274_s23  ;;  %v5429_v6 = vunpack.i.l.bf16 %v5428_v34  ;;  %v3421_v37 = vsel %vm3357_vm3, %v3356_v60, %v5270_v1  ;;  %v3420_v7 = vsel %vm3357_vm3, %v3355_v35, %v5269_v41  ;;  %v1058_v22 = vld [vmem:[#allocation2 + $0x68] sm:$0xff]  ;;  %v1059_v1 = vld [vmem:[#allocation2 + $0x78] sm:$0xff]  ;;  %v9710_v3 = vld [vmem:[#allocation79_spill] sm:$0xff] }
 0x178   : > { %v7830_v55 = vsel %vm3422_vm4, %v3421_v37, %v5430_v8  ;;  %v7834_v26 = vpop.permute.xlu1 %5437  ;;  %v5736_v12 = vpack.i.bf16 %v1058_v22, %v1057_v54  ;;  %v9711_v34 = vld [vmem:[#allocation80_spill] sm:$0xff]  ;;  %v5741_v40 = vpack.i.bf16 %v1060_v4, %v1059_v1  ;;  %v1123_v8 = vld [vmem:[#allocation2 + $0x79] sm:$0xff]  ;;  %v1061_v22 = vld [vmem:[#allocation2 + $0x90] sm:$0xff] }
 0x179   : > { %v7827_v61 = vsel %vm3422_vm4, %v3420_v7, %v5429_v6  ;;  %v7836_v41 = vpop.permute.xlu0 %5442  ;;  %v1121_v60 = vld [vmem:[#allocation2 + $0x61] sm:$0xff]  ;;  %v1122_v36 = vld [vmem:[#allocation2 + $0x69] sm:$0xff]  ;;  %v1062_v1 = vld [vmem:[#allocation2 + $0x98] sm:$0xff] }
 0x17a   : > { %5717 = vrot.lane.b32.xlu1 %v9708_v30, %s6275_s24  ;;  %v1124_v6 = vld [vmem:[#allocation2 + $0x81] sm:$0xff]  ;;  %v5746_v7 = vpack.i.bf16 %v1122_v36, %v1121_v60 }
 0x17b   : > { %5722 = vrot.lane.b32.xlu0 %v9709_v47, %s6275_s24  ;;  %v5751_v30 = vpack.i.bf16 %v1124_v6, %v1123_v8  ;;  %v9718_v60 = vld [vmem:[#allocation83_spill] sm:$0xff]  ;;  %v1125_v8 = vld [vmem:[#allocation2 + $0x91] sm:$0xff] }
 0x17c   : > { %v7842_v35 = vpop.permute.xlu1 %5447  ;;  %v1126_v6 = vld [vmem:[#allocation2 + $0x99] sm:$0xff] }
 0x17d   : > { %v7844_v37 = vpop.permute.xlu0 %5452 }
 0x17e   : > { %5727 = vrot.lane.b32.xlu1 %v9710_v3, %s6276_s25  ;;  %9712 = vst [vmem:[#allocation38_spill] sm:$0xff] %v7844_v37  ;;  %v1063_v3 = vld [vmem:[#allocation2 + $0xa8] sm:$0xff] }
 0x17f   : > { %5732 = vrot.lane.b32.xlu0 %v9711_v34, %s6276_s25  ;;  %v1064_v34 = vld [vmem:[#allocation2 + $0xb0] sm:$0xff] }
 0x180   : > { %v7848_v47 = vpop.permute.xlu1 %5457  ;;  %v5771_v36 = vpack.i.bf16 %v1064_v34, %v1063_v3  ;;  %v1065_v3 = vld [vmem:[#allocation2 + $0xc0] sm:$0xff]  ;;  %v1066_v34 = vld [vmem:[#allocation2 + $0xc8] sm:$0xff] }
 0x181   : > { %9713 = vst [vmem:[#allocation58_spill] sm:$0xff] %v7848_v47  ;;  %v7850_v54 = vpop.permute.xlu0 %5462 }
 0x182   : > { %5737 = vrot.lane.b32.xlu1 %v5736_v12, %s6274_s23  ;;  %9714 = vst [vmem:[#allocation42_spill] sm:$0xff] %v7850_v54  ;;  %v9717_v12 = vld [vmem:[#allocation82_spill] sm:$0xff] }
 0x183   : > { %5742 = vrot.lane.b32.xlu0 %v5741_v40, %s6274_s23  ;;  %v5766_v40 = vpack.i.bf16 %v1062_v1, %v1061_v22  ;;  %v1128_v54 = vld [vmem:[#allocation2 + $0xb1] sm:$0xff] }
 0x184   : > { %v7854_v4 = vpop.permute.xlu1 %5467 }
 0x185   : > { %9715 = vst [vmem:[#allocation59_spill] sm:$0xff] %v7854_v4  ;;  %v7856_v37 = vpop.permute.xlu0 %5472  ;;  %v5776_v4 = vpack.i.bf16 %v1126_v6, %v1125_v8  ;;  %v1068_v8 = vld [vmem:[#allocation2 + $0xe0] sm:$0xff] }
 0x186   : > { %5747 = vrot.lane.b32.xlu1 %v5746_v7, %s6275_s24  ;;  %9716 = vst [vmem:[#allocation41_spill] sm:$0xff] %v7856_v37 }
 0x187   : > { %5752 = vrot.lane.b32.xlu0 %v5751_v30, %s6275_s24  ;;  %v1127_v30 = vld [vmem:[#allocation2 + $0xa9] sm:$0xff] }
 0x188   : > { %v7862_v7 = vpop.permute.xlu1 %5477  ;;  %v5781_v37 = vpack.i.bf16 %v1128_v54, %v1127_v30 }
 0x189   : > { %9719 = vst [vmem:[#allocation45_spill] sm:$0xff] %v7862_v7  ;;  %v7864_v47 = vpop.permute.xlu0 %5482  ;;  %v5796_v7 = vpack.i.bf16 %v1066_v34, %v1065_v3  ;;  %v1131_v34 = vld [vmem:[#allocation2 + $0xd9] sm:$0xff] }
 0x18a   : > { %5757 = vrot.lane.b32.xlu1 %v9717_v12, %s6276_s25  ;;  %9720 = vst [vmem:[#allocation60_spill] sm:$0xff] %v7864_v47 }
 0x18b   : > { %5762 = vrot.lane.b32.xlu0 %v9718_v60, %s6276_s25 }
 0x18c   : > { %v7868_v12 = vpop.permute.xlu1 %5487 }
 0x18d   : > { %9721 = vst [vmem:[#allocation44_spill] sm:$0xff] %v7868_v12  ;;  %v5493_v22 = vpop.permute.xlu0 %5492 }
 0x18e   : > { %5767 = vrot.lane.b32.xlu1 %v5766_v40, %s6274_s23  ;;  %v5495_v1 = vunpack.i.h.bf16 %v5493_v22  ;;  %v5494_v60 = vunpack.i.l.bf16 %v5493_v22 }
 0x18f   : > { %5772 = vrot.lane.b32.xlu0 %v5771_v36, %s6274_s23  ;;  %v1067_v36 = vld [vmem:[#allocation2 + $0xd8] sm:$0xff] }
 0x190   : > { %v7874_v47 = vsel %vm3487_vm6, %v7533_v31, %v5494_v60  ;;  %v7878_v40 = vsel %vm3487_vm6, %v7536_v56, %v5495_v1  ;;  %v5498_v54 = vpop.permute.xlu1 %5497  ;;  %v9727_v1 = vld [vmem:[#allocation85_spill] sm:$0xff]  ;;  %v5801_v60 = vpack.i.bf16 %v1068_v8, %v1067_v36 }
 0x191   : > { %9722 = vst [vmem:[#allocation61_spill] sm:$0xff] %v7874_v47  ;;  %9723 = vst [vmem:[#allocation62_spill] sm:$0xff] %v7878_v40  ;;  %v5500_v6 = vunpack.i.h.bf16 %v5498_v54  ;;  %v5499_v30 = vunpack.i.l.bf16 %v5498_v54  ;;  %v5503_v22 = vpop.permute.xlu0 %5502  ;;  %v1129_v54 = vld [vmem:[#allocation2 + $0xc1] sm:$0xff]  ;;  %v1130_v40 = vld [vmem:[#allocation2 + $0xc9] sm:$0xff] }
 0x192   : > { %5777 = vrot.lane.b32.xlu1 %v5776_v4, %s6275_s24  ;;  %v5505_v4 = vunpack.i.h.bf16 %v5503_v22  ;;  %v5504_v12 = vunpack.i.l.bf16 %v5503_v22  ;;  %v5806_v36 = vpack.i.bf16 %v1130_v40, %v1129_v54 }
 0x193   : > { %5782 = vrot.lane.b32.xlu0 %v5781_v37, %s6275_s24  ;;  %v9724_v37 = vld [vmem:[#allocation84_spill] sm:$0xff]  ;;  %v7884_v31 = vsel %vm3487_vm6, %v7552_v39, %v5499_v30  ;;  %v7888_v56 = vsel %vm3487_vm6, %v7555_v21, %v5500_v6 }
 0x194   : > { %9725 = vst [vmem:[#allocation63_spill] sm:$0xff] %v7884_v31  ;;  %9726 = vst [vmem:[#allocation64_spill] sm:$0xff] %v7888_v56  ;;  %v7894_v22 = vsel %vm3487_vm6, %v7563_v25, %v5504_v12  ;;  %v7898_v3 = vsel %vm3487_vm6, %v7566_v10, %v5505_v4  ;;  %v5508_v39 = vpop.permute.xlu1 %5507  ;;  %v1132_v30 = vld [vmem:[#allocation2 + $0xe1] sm:$0xff] }
 0x195   : > { %9728 = vst [vmem:[#allocation65_spill] sm:$0xff] %v7894_v22  ;;  %9729 = vst [vmem:[#allocation66_spill] sm:$0xff] %v7898_v3  ;;  %v5509_v21 = vunpack.i.l.bf16 %v5508_v39  ;;  %v5513_v6 = vpop.permute.xlu0 %5512  ;;  %v5811_v10 = vpack.i.bf16 %v1132_v30, %v1131_v34  ;;  %v1071_v30 = vld [vmem:[#allocation2 + $0x108] sm:$0xff]  ;;  %v9791_v22 = vld [vmem:[#allocation50_spill] sm:$0xff] }
 0x196   : > { %5787 = vrot.lane.b32.xlu1 %v9724_v37, %s6276_s25  ;;  %v5510_v37 = vunpack.i.h.bf16 %v5508_v39  ;;  %v5515_v56 = vunpack.i.h.bf16 %v5513_v6  ;;  %v5514_v31 = vunpack.i.l.bf16 %v5513_v6  ;;  %v5145_v47 = vunpack.i.h.bf16 %v9791_v22 }
 0x197   : > { %5792 = vrot.lane.b32.xlu0 %v9727_v1, %s6276_s25  ;;  %v7903_v8 = vsel %vm3487_vm6, %v7578_v5, %v5509_v21 }
 0x198   : > { %9730 = vst [vmem:[#allocation67_spill] sm:$0xff] %v7903_v8  ;;  %v7907_v25 = vsel %vm3487_vm6, %v7581_v52, %v5510_v37  ;;  %v7912_v12 = vsel %vm3487_vm6, %v7589_v43, %v5514_v31  ;;  %v7916_v4 = vsel %vm3487_vm6, %v7592_v48, %v5515_v56  ;;  %v1069_v48 = vld [vmem:[#allocation2 + $0xf0] sm:$0xff]  ;;  %v1070_v31 = vld [vmem:[#allocation2 + $0xf8] sm:$0xff]  ;;  %v1088_v8 = vld [vmem:[#allocation2 + $0x200] sm:$0xff] }
 0x199   : > { %9731 = vst [vmem:[#allocation68_spill] sm:$0xff] %v7907_v25  ;;  %9732 = vst [vmem:[#allocation69_spill] sm:$0xff] %v7912_v12  ;;  %v5523_v5 = vpop.permute.xlu0 %5522  ;;  %v1087_v25 = vld [vmem:[#allocation2 + $0x1f8] sm:$0xff] }
 0x19a   : > { %5797 = vrot.lane.b32.xlu1 %v5796_v7, %s6274_s23  ;;  %9733 = vst [vmem:[#allocation70_spill] sm:$0xff] %v7916_v4  ;;  %v5518_v7 = vpop.permute.xlu1 %5517  ;;  %v5525_v54 = vunpack.i.h.bf16 %v5523_v5  ;;  %v5524_v39 = vunpack.i.l.bf16 %v5523_v5  ;;  %v9786_v4 = vld [vmem:[#allocation47_spill] sm:$0xff] }
 0x19b   : > { %5802 = vrot.lane.b32.xlu0 %v5801_v60, %s6274_s23  ;;  %v5520_v40 = vunpack.i.h.bf16 %v5518_v7  ;;  %v5519_v1 = vunpack.i.l.bf16 %v5518_v7 }
 0x19c   : > { %v7930_v56 = vsel %vm3487_vm6, %v7619_v2, %v5524_v39  ;;  %v7934_v60 = vsel %vm3487_vm6, %v7622_v29, %v5525_v54  ;;  %v1135_v54 = vld [vmem:[#allocation2 + $0x109] sm:$0xff]  ;;  %v1136_v39 = vld [vmem:[#allocation2 + $0x111] sm:$0xff] }
 0x19d   : > { %v7921_v52 = vsel %vm3487_vm6, %v7608_v38, %v5519_v1  ;;  %v7925_v43 = vsel %vm3487_vm6, %v7611_v9, %v5520_v40  ;;  %9736 = vst [vmem:[#allocation24_spill] sm:$0xff] %v7930_v56  ;;  %9737 = vst [vmem:[#allocation96_spill] sm:$0xff] %v7934_v60  ;;  %v1072_v38 = vld [vmem:[#allocation2 + $0x110] sm:$0xff]  ;;  %v5533_v6 = vpop.permute.xlu0 %5532  ;;  %v1134_v1 = vld [vmem:[#allocation2 + $0xf9] sm:$0xff] }
 0x19e   : > { %5807 = vrot.lane.b32.xlu1 %v5806_v36, %s6275_s24  ;;  %9734 = vst [vmem:[#allocation71_spill] sm:$0xff] %v7921_v52  ;;  %9735 = vst [vmem:[#allocation72_spill] sm:$0xff] %v7925_v43  ;;  %v5528_v34 = vpop.permute.xlu1 %5527  ;;  %v5535_v9 = vunpack.i.h.bf16 %v5533_v6  ;;  %v5534_v36 = vunpack.i.l.bf16 %v5533_v6  ;;  %v5831_v7 = vpack.i.bf16 %v1072_v38, %v1071_v30  ;;  %v1133_v40 = vld [vmem:[#allocation2 + $0xf1] sm:$0xff] }
 0x19f   : > { %5812 = vrot.lane.b32.xlu0 %v5811_v10, %s6275_s24  ;;  %v5530_v37 = vunpack.i.h.bf16 %v5528_v34  ;;  %v5529_v21 = vunpack.i.l.bf16 %v5528_v34  ;;  %v5826_v10 = vpack.i.bf16 %v1070_v31, %v1069_v48  ;;  %v6258_v60 = vld [vmem:[#allocation2 + $0x110] sm:$0xff]  ;;  %v9785_v43 = vld [vmem:[#allocation46_spill] sm:$0xff] }
 0x1a0   : > { %v7950_v5 = vsel %vm3487_vm6, %v7648_v19, %v5534_v36  ;;  %v5125_v52 = vunpack.i.h.bf16 %v9785_v43 }
 0x1a1   : > { %v7940_v2 = vsel %vm3487_vm6, %v7637_v53, %v5529_v21  ;;  %v7944_v29 = vsel %vm3487_vm6, %v7640_v59, %v5530_v37  ;;  %9740 = vst [vmem:[#allocation97_spill] sm:$0xff] %v7950_v5  ;;  %v5543_v31 = vpop.permute.xlu0 %5542  ;;  %v6249_v5 = vld [vmem:[#allocation2 + $0x90] sm:$0xff] }
 0x1a2   : > { %5817 = vrot.lane.b32.xlu1 %v7222_v57, %s6276_s25  ;;  %9738 = vst [vmem:[#allocation95_spill] sm:$0xff] %v7940_v2  ;;  %9739 = vst [vmem:[#allocation73_spill] sm:$0xff] %v7944_v29  ;;  %v7954_v57 = vsel %vm3487_vm6, %v7651_v62, %v5535_v9  ;;  %v5538_v53 = vpop.permute.xlu1 %5537  ;;  %v5545_v34 = vunpack.i.h.bf16 %v5543_v31  ;;  %v5544_v37 = vunpack.i.l.bf16 %v5543_v31  ;;  %v5841_v62 = vpack.i.bf16 %v1136_v39, %v1135_v54  ;;  %v1075_v39 = vld [vmem:[#allocation2 + $0x138] sm:$0xff]  ;;  %v6250_v2 = vld [vmem:[#allocation2 + $0xb0] sm:$0xff] }
 0x1a3   : > { %5822 = vrot.lane.b32.xlu0 %v7224_v0, %s6276_s25  ;;  %9741 = vst [vmem:[#allocation75_spill] sm:$0xff] %v7954_v57  ;;  %v5540_v48 = vunpack.i.h.bf16 %v5538_v53  ;;  %v5539_v59 = vunpack.i.l.bf16 %v5538_v53  ;;  %v5836_v0 = vpack.i.bf16 %v1134_v1, %v1133_v40  ;;  %v6247_v57 = vld [vmem:[#allocation2 + $0x78] sm:$0xff] }
 0x1a4   : > { %v7968_v38 = vsel %vm3487_vm6, %v7683_v18, %v5544_v37  ;;  %v7972_v21 = vsel %vm3487_vm6, %v7686_v32, %v5545_v34  ;;  %v1073_v32 = vld [vmem:[#allocation2 + $0x120] sm:$0xff] }
 0x1a5   : > { %v7959_v30 = vsel %vm3487_vm6, %v7670_v49, %v5539_v59  ;;  %v7963_v19 = vsel %vm3487_vm6, %v7673_v17, %v5540_v48  ;;  %9744 = vst [vmem:[#allocation30_spill] sm:$0xff] %v7968_v38  ;;  %9745 = vst [vmem:[#allocation29_spill] sm:$0xff] %v7972_v21  ;;  %v5553_v49 = vpop.permute.xlu0 %5552  ;;  %v9780_v38 = vld [vmem:[#allocation14_spill] sm:$0xff] }
 0x1a6   : > { %5827 = vrot.lane.b32.xlu1 %v5826_v10, %s6274_s23  ;;  %9742 = vst [vmem:[#allocation28_spill] sm:$0xff] %v7959_v30  ;;  %9743 = vst [vmem:[#allocation74_spill] sm:$0xff] %v7963_v19  ;;  %v5548_v6 = vpop.permute.xlu1 %5547  ;;  %v5555_v10 = vunpack.i.h.bf16 %v5553_v49  ;;  %v5554_v40 = vunpack.i.l.bf16 %v5553_v49  ;;  %v1140_v49 = vld [vmem:[#allocation2 + $0x141] sm:$0xff]  ;;  %v5009_v19 = vunpack.i.l.bf16 %v9780_v38 }
 0x1a7   : > { %5832 = vrot.lane.b32.xlu0 %v5831_v7, %s6274_s23  ;;  %v5550_v9 = vunpack.i.h.bf16 %v5548_v6  ;;  %v5549_v36 = vunpack.i.l.bf16 %v5548_v6  ;;  %v1074_v7 = vld [vmem:[#allocation2 + $0x128] sm:$0xff] }
 0x1a8   : > { %v7986_v1 = vsel %vm3487_vm6, %v7716_v46, %v5554_v40  ;;  %v7990_v53 = vsel %vm3487_vm6, %v7719_v24, %v5555_v10  ;;  %v5856_v37 = vpack.i.bf16 %v1074_v7, %v1073_v32  ;;  %v1138_v6 = vld [vmem:[#allocation2 + $0x129] sm:$0xff] }
 0x1a9   : > { %v7977_v17 = vsel %vm3487_vm6, %v7703_v44, %v5549_v36  ;;  %v7981_v18 = vsel %vm3487_vm6, %v7706_v15, %v5550_v9  ;;  %9748 = vst [vmem:[#allocation34_spill] sm:$0xff] %v7986_v1  ;;  %9749 = vst [vmem:[#allocation19_spill] sm:$0xff] %v7990_v53  ;;  %v1076_v44 = vld [vmem:[#allocation2 + $0x140] sm:$0xff]  ;;  %v5563_v31 = vpop.permute.xlu0 %5562 }
 0x1aa   : > { %5837 = vrot.lane.b32.xlu1 %v5836_v0, %s6275_s24  ;;  %9746 = vst [vmem:[#allocation21_spill] sm:$0xff] %v7977_v17  ;;  %9747 = vst [vmem:[#allocation18_spill] sm:$0xff] %v7981_v18  ;;  %v5558_v54 = vpop.permute.xlu1 %5557  ;;  %v5565_v15 = vunpack.i.h.bf16 %v5563_v31  ;;  %v5564_v34 = vunpack.i.l.bf16 %v5563_v31  ;;  %v5861_v0 = vpack.i.bf16 %v1076_v44, %v1075_v39  ;;  %v1139_v36 = vld [vmem:[#allocation2 + $0x139] sm:$0xff]  ;;  %v9778_v18 = vld [vmem:[#allocation13_spill] sm:$0xff] }
 0x1ab   : > { %5842 = vrot.lane.b32.xlu0 %v5841_v62, %s6275_s24  ;;  %v5560_v48 = vunpack.i.h.bf16 %v5558_v54  ;;  %v5559_v59 = vunpack.i.l.bf16 %v5558_v54  ;;  %v1137_v62 = vld [vmem:[#allocation2 + $0x121] sm:$0xff]  ;;  %v5005_v17 = vunpack.i.h.bf16 %v9778_v18 }
 0x1ac   : > { %v8006_v9 = vsel %vm3487_vm6, %v7753_v42, %v5564_v34  ;;  %v6246_v1 = vld [vmem:[#allocation2 + $0x80] sm:$0xff] }
 0x1ad   : > { %v7996_v46 = vsel %vm3487_vm6, %v7740_v20, %v5559_v59  ;;  %v8000_v24 = vsel %vm3487_vm6, %v7743_v14, %v5560_v48  ;;  %9752 = vst [vmem:[#allocation76_spill] sm:$0xff] %v8006_v9  ;;  %v5573_v40 = vpop.permute.xlu0 %5572 }
 0x1ae   : > { %5847 = vrot.lane.b32.xlu1 %v7261_v58, %s6276_s25  ;;  %9750 = vst [vmem:[#allocation20_spill] sm:$0xff] %v7996_v46  ;;  %9751 = vst [vmem:[#allocation37_spill] sm:$0xff] %v8000_v24  ;;  %v8010_v58 = vsel %vm3487_vm6, %v7756_v11, %v5565_v15  ;;  %v5568_v20 = vpop.permute.xlu1 %5567  ;;  %v5575_v32 = vunpack.i.h.bf16 %v5573_v40  ;;  %v5574_v7 = vunpack.i.l.bf16 %v5573_v40  ;;  %v5871_v11 = vpack.i.bf16 %v1140_v49, %v1139_v36  ;;  %v9775_v24 = vld [vmem:[#allocation10_spill] sm:$0xff] }
 0x1af   : > { %5852 = vrot.lane.b32.xlu0 %v7263_v13, %s6276_s25  ;;  %9753 = vst [vmem:[#allocation36_spill] sm:$0xff] %v8010_v58  ;;  %v5570_v10 = vunpack.i.h.bf16 %v5568_v20  ;;  %v5569_v14 = vunpack.i.l.bf16 %v5568_v20  ;;  %v5866_v13 = vpack.i.bf16 %v1138_v6, %v1137_v62  ;;  %v1079_v20 = vld [vmem:[#allocation2 + $0x168] sm:$0xff]  ;;  %v4990_v46 = vunpack.i.h.bf16 %v9775_v24 }
 0x1b0   : > { %v8024_v39 = vsel %vm3487_vm6, %v7783_v33, %v5574_v7  ;;  %v8028_v44 = vsel %vm3487_vm6, %v7786_v51, %v5575_v32  ;;  %v1077_v51 = vld [vmem:[#allocation2 + $0x150] sm:$0xff] }
 0x1b1   : > { %v8015_v54 = vsel %vm3487_vm6, %v7772_v50, %v5569_v14  ;;  %v8019_v42 = vsel %vm3487_vm6, %v7775_v28, %v5570_v10  ;;  %9756 = vst [vmem:[#allocation23_spill] sm:$0xff] %v8024_v39  ;;  %9757 = vst [vmem:[#allocation25_spill] sm:$0xff] %v8028_v44  ;;  %v5583_v50 = vpop.permute.xlu0 %5582  ;;  %v1141_v7 = vld [vmem:[#allocation2 + $0x151] sm:$0xff] }
 0x1b2   : > { %5857 = vrot.lane.b32.xlu1 %v5856_v37, %s6274_s23  ;;  %9754 = vst [vmem:[#allocation77_spill] sm:$0xff] %v8015_v54  ;;  %9755 = vst [vmem:[#allocation27_spill] sm:$0xff] %v8019_v42  ;;  %v5578_v48 = vpop.permute.xlu1 %5577  ;;  %v5585_v15 = vunpack.i.h.bf16 %v5583_v50  ;;  %v5584_v34 = vunpack.i.l.bf16 %v5583_v50  ;;  %v1078_v37 = vld [vmem:[#allocation2 + $0x158] sm:$0xff]  ;;  %v6244_v42 = vld [vmem:[#allocation2 + $0x68] sm:$0xff] }
 0x1b3   : > { %5862 = vrot.lane.b32.xlu0 %v5861_v0, %s6274_s23  ;;  %v5580_v59 = vunpack.i.h.bf16 %v5578_v48  ;;  %v5579_v31 = vunpack.i.l.bf16 %v5578_v48  ;;  %v5886_v14 = vpack.i.bf16 %v1078_v37, %v1077_v51  ;;  %v1143_v48 = vld [vmem:[#allocation2 + $0x169] sm:$0xff] }
 0x1b4   : > { %v8042_v0 = vsel %vm3487_vm6, %v7813_v63, %v5584_v34  ;;  %v8046_v62 = vsel %vm3487_vm6, %v7816_v16, %v5585_v15  ;;  %v9765_v16 = vld [vmem:[#allocation91_spill] sm:$0xff]  ;;  %v9767_v51 = vld [vmem:[#allocation4_spill] sm:$0xff]  ;;  %v9773_v54 = vld [vmem:[#allocation9_spill] sm:$0xff] }
 0x1b5   : > { %v8033_v28 = vsel %vm3487_vm6, %v7803_v23, %v5579_v31  ;;  %v8037_v33 = vsel %vm3487_vm6, %v7806_v27, %v5580_v59  ;;  %9760 = vst [vmem:[#allocation78_spill] sm:$0xff] %v8042_v0  ;;  %9761 = vst [vmem:[#allocation32_spill] sm:$0xff] %v8046_v62  ;;  %v1080_v23 = vld [vmem:[#allocation2 + $0x170] sm:$0xff]  ;;  %v8048_v10 = vpop.permute.xlu0 %5592  ;;  %v9762_v27 = vld [vmem:[#allocation90_spill] sm:$0xff]  ;;  %v4965_v37 = vunpack.i.h.bf16 %v9767_v51  ;;  %v4985_v58 = vunpack.i.h.bf16 %v9773_v54 }
 0x1b6   : > { %5867 = vrot.lane.b32.xlu1 %v5866_v13, %s6275_s24  ;;  %9758 = vst [vmem:[#allocation26_spill] sm:$0xff] %v8033_v28  ;;  %9759 = vst [vmem:[#allocation35_spill] sm:$0xff] %v8037_v33  ;;  %v5588_v6 = vpop.permute.xlu1 %5587  ;;  %v5891_v32 = vpack.i.bf16 %v1080_v23, %v1079_v20  ;;  %v1142_v13 = vld [vmem:[#allocation2 + $0x159] sm:$0xff]  ;;  %v1144_v59 = vld [vmem:[#allocation2 + $0x171] sm:$0xff]  ;;  %v4984_v9 = vunpack.i.l.bf16 %v9773_v54 }
 0x1b7   : > { %5872 = vrot.lane.b32.xlu0 %v5871_v11, %s6275_s24  ;;  %v5590_v36 = vunpack.i.h.bf16 %v5588_v6  ;;  %v5589_v49 = vunpack.i.l.bf16 %v5588_v6  ;;  %v5901_v50 = vpack.i.bf16 %v1144_v59, %v1143_v48  ;;  %v4964_v6 = vunpack.i.l.bf16 %v9767_v51  ;;  %v669_v23 = vld [vmem:[#allocation2 + $0x8] sm:$0xff]  ;;  %v9770_v48 = vld [vmem:[#allocation7_spill] sm:$0xff]  ;;  %v6238_v62 = vld [vmem:[#allocation2 + $0x30] sm:$0xff] }
 0x1b8   : > { %v4975_v59 = vunpack.i.h.bf16 %v9770_v48  ;;  %v1081_v51 = vld [vmem:[#allocation2 + $0x180] sm:$0xff]  ;;  %v6240_v28 = vld [vmem:[#allocation2 + $0x18] sm:$0xff]  ;;  %v8151_v29 = vsel %vm515_vm0, %v6249_v5, %v4984_v9 }
 0x1b9   : > { %v8054_v40 = vsel %vm3487_vm6, %v7827_v61, %v5589_v49  ;;  %v8058_v63 = vsel %vm3487_vm6, %v7830_v55, %v5590_v36  ;;  %v8064_v31 = vpop.permute.xlu0 %5602  ;;  %v5896_v61 = vpack.i.bf16 %v1142_v13, %v1141_v7  ;;  %v9766_v55 = vld [vmem:[#allocation3_spill] sm:$0xff]  ;;  %v9768_v49 = vld [vmem:[#allocation5_spill] sm:$0xff]  ;;  %v8091_v0 = vsel %vm515_vm0, %v6238_v62, %v4964_v6  ;;  %v9771_v6 = vld [vmem:[#allocation8_spill] sm:$0xff] }
 0x1ba   : > { %5877 = vrot.lane.b32.xlu1 %v9762_v27, %s6276_s25  ;;  %9763 = vst [vmem:[#allocation51_spill] sm:$0xff] %v8054_v40  ;;  %9764 = vst [vmem:[#allocation52_spill] sm:$0xff] %v8058_v63  ;;  %v8062_v11 = vpop.permute.xlu1 %5597  ;;  %v4955_v15 = vunpack.i.h.bf16 %v9766_v55  ;;  %v4954_v34 = vunpack.i.l.bf16 %v9766_v55  ;;  %v668_v36 = vld [vmem:[#allocation2] sm:$0xff]  ;;  %v4960_v27 = vunpack.i.h.bf16 %v9768_v49  ;;  %v4974_v55 = vunpack.i.l.bf16 %v9770_v48  ;;  %v1082_v63 = vld [vmem:[#allocation2 + $0x188] sm:$0xff] }
 0x1bb   : > { %5882 = vrot.lane.b32.xlu0 %v9765_v16, %s6276_s25  ;;  %v9769_v16 = vld [vmem:[#allocation6_spill] sm:$0xff] }
 0x1bc   : > { %v4970_v7 = vunpack.i.h.bf16 %v9769_v16  ;;  %v4969_v13 = vunpack.i.l.bf16 %v9769_v16  ;;  %v8085_v40 = vsel %vm515_vm0, %v669_v23, %v4955_v15  ;;  %v6239_v16 = vld [vmem:[#allocation2 + $0x38] sm:$0xff]  ;;  %v6241_v15 = vld [vmem:[#allocation2 + $0x20] sm:$0xff]  ;;  %v6242_v23 = vld [vmem:[#allocation2 + $0x50] sm:$0xff] }
 0x1bd   : > { %v8094_v33 = vsel %vm515_vm0, %v6239_v16, %v4965_v37  ;;  %v6243_v16 = vld [vmem:[#allocation2 + $0x48] sm:$0xff]  ;;  %v1211_v9 = vld [vmem:[#allocation2 + $0x19a] sm:$0xff] }
 0x1be   : > { %5887 = vrot.lane.b32.xlu1 %v5886_v14, %s6274_s23  ;;  %v8072_v20 = vpop.permute.xlu1 %5607  ;;  %v4959_v14 = vunpack.i.l.bf16 %v9768_v49  ;;  %v8088_v49 = vsel %vm515_vm0, %v668_v36, %v4954_v34  ;;  %v8102_v34 = vsel %vm515_vm0, %v6241_v15, %v4960_v27  ;;  %v8105_v62 = vsel %vm515_vm0, %v6242_v23, %v4970_v7  ;;  %v9772_v15 = vld [vmem:[#allocation93_spill] sm:$0xff] }
 0x1bf   : > { %5892 = vrot.lane.b32.xlu0 %v5891_v32, %s6274_s23  ;;  %v8077_v32 = vpop.permute.xlu0 %5612  ;;  %v4980_v36 = vunpack.i.h.bf16 %v9771_v6  ;;  %v8111_v39 = vsel %vm515_vm0, %v6243_v16, %v4969_v13  ;;  %v5916_v7 = vpack.i.bf16 %v1082_v63, %v1081_v51  ;;  %v4979_v23 = vunpack.i.l.bf16 %v9771_v6  ;;  %v9774_v13 = vld [vmem:[#allocation94_spill] sm:$0xff] }
 0x1c0   : > { %v8099_v44 = vsel %vm515_vm0, %v6240_v28, %v4959_v14  ;;  %v8114_v28 = vsel %vm515_vm0, %v6244_v42, %v4975_v59  ;;  %v6245_v14 = vld [vmem:[#allocation2 + $0x60] sm:$0xff]  ;;  %v1146_v59 = vld [vmem:[#allocation2 + $0x189] sm:$0xff] }
 0x1c1   : > { %v8117_v27 = vsel %vm515_vm0, %v6245_v14, %v4974_v55  ;;  %v1145_v42 = vld [vmem:[#allocation2 + $0x181] sm:$0xff]  ;;  %v4989_v55 = vunpack.i.l.bf16 %v9775_v24  ;;  %v1147_v6 = vld [vmem:[#allocation2 + $0x199] sm:$0xff]  ;;  %v8133_v54 = vsel %vm515_vm0, %v6246_v1, %v4980_v36  ;;  %v5004_v24 = vunpack.i.l.bf16 %v9778_v18 }
 0x1c2   : > { %5897 = vrot.lane.b32.xlu1 %v5896_v61, %s6275_s24  ;;  %v8096_v48 = vpop.permute.xlu1 %5617  ;;  %v1083_v61 = vld [vmem:[#allocation2 + $0x198] sm:$0xff]  ;;  %v9776_v14 = vld [vmem:[#allocation11_spill] sm:$0xff]  ;;  %v5926_v30 = vpack.i.bf16 %v1146_v59, %v1145_v42  ;;  %v8145_v1 = vsel %vm515_vm0, %v6247_v57, %v4979_v23  ;;  %v6252_v57 = vld [vmem:[#allocation2 + $0xc8] sm:$0xff] }
 0x1c3   : > { %5902 = vrot.lane.b32.xlu0 %v5901_v50, %s6275_s24  ;;  %v1084_v50 = vld [vmem:[#allocation2 + $0x1a0] sm:$0xff]  ;;  %v8108_v37 = vpop.permute.xlu0 %5622  ;;  %v4995_v53 = vunpack.i.h.bf16 %v9776_v14  ;;  %v4994_v63 = vunpack.i.l.bf16 %v9776_v14  ;;  %v5010_v14 = vunpack.i.h.bf16 %v9780_v38  ;;  %v6248_v36 = vld [vmem:[#allocation2 + $0x98] sm:$0xff]  ;;  %v8155_v38 = vsel %vm515_vm0, %v6250_v2, %v4990_v46 }
 0x1c4   : > { %v5921_v16 = vpack.i.bf16 %v1084_v50, %v1083_v61  ;;  %v6255_v46 = vld [vmem:[#allocation2 + $0xd8] sm:$0xff] }
 0x1c5   : > { %v8161_v23 = vsel %vm515_vm0, %v6252_v57, %v4995_v53  ;;  %v6257_v57 = vld [vmem:[#allocation2 + $0xf0] sm:$0xff] }
 0x1c6   : > { %5907 = vrot.lane.b32.xlu1 %v9772_v15, %s6276_s25  ;;  %v8130_v51 = vpop.permute.xlu1 %5627  ;;  %v1148_v15 = vld [vmem:[#allocation2 + $0x1a1] sm:$0xff] }
 0x1c7   : > { %5912 = vrot.lane.b32.xlu0 %v9774_v13, %s6276_s25  ;;  %v9777_v13 = vld [vmem:[#allocation12_spill] sm:$0xff]  ;;  %v8138_v21 = vpop.permute.xlu0 %5632  ;;  %v5931_v18 = vpack.i.bf16 %v1148_v15, %v1147_v6  ;;  %v6254_v6 = vld [vmem:[#allocation2 + $0xe0] sm:$0xff]  ;;  %v6256_v15 = vld [vmem:[#allocation2 + $0xf8] sm:$0xff] }
 0x1c8   : > { %v5000_v61 = vunpack.i.h.bf16 %v9777_v13  ;;  %v4999_v50 = vunpack.i.l.bf16 %v9777_v13  ;;  %9779 = vst [vmem:[#allocation79_spill] sm:$0xff] %v8138_v21  ;;  %v8148_v13 = vsel %vm515_vm0, %v6248_v36, %v4985_v58  ;;  %v6253_v58 = vld [vmem:[#allocation2 + $0xc0] sm:$0xff]  ;;  %v8175_v53 = vsel %vm515_vm0, %v6256_v15, %v5005_v17  ;;  %v9782_v36 = vld [vmem:[#allocation40_spill] sm:$0xff] }
 0x1c9   : > { %v8164_v59 = vsel %vm515_vm0, %v6253_v58, %v4994_v63  ;;  %v8181_v58 = vsel %vm515_vm0, %v6257_v57, %v5004_v24  ;;  %v9784_v17 = vld [vmem:[#allocation43_spill] sm:$0xff] }
 0x1ca   : > { %5917 = vrot.lane.b32.xlu1 %v5916_v7, %s6274_s23  ;;  %v6251_v7 = vld [vmem:[#allocation2 + $0xa8] sm:$0xff]  ;;  %v8166_v5 = vpop.permute.xlu1 %5637  ;;  %v8169_v2 = vsel %vm515_vm0, %v6254_v6, %v5000_v61  ;;  %v8184_v61 = vsel %vm515_vm0, %v6258_v60, %v5010_v14  ;;  %v5120_v15 = vunpack.i.h.bf16 %v9784_v17  ;;  %v5119_v56 = vunpack.i.l.bf16 %v9784_v17  ;;  %v1085_v57 = vld [vmem:[#allocation2 + $0x1e0] sm:$0xff] }
 0x1cb   : > { %5922 = vrot.lane.b32.xlu0 %v5921_v16, %s6274_s23  ;;  %v8158_v42 = vsel %vm515_vm0, %v6251_v7, %v4989_v55  ;;  %9781 = vst [vmem:[#allocation80_spill] sm:$0xff] %v8166_v5  ;;  %v1212_v16 = vld [vmem:[#allocation2 + $0x1a2] sm:$0xff]  ;;  %v8172_v55 = vsel %vm515_vm0, %v6255_v46, %v4999_v50  ;;  %v5115_v7 = vunpack.i.h.bf16 %v9782_v36  ;;  %v8178_v63 = vpop.permute.xlu0 %5642  ;;  %v5114_v46 = vunpack.i.l.bf16 %v9782_v36 }
 0x1cc   : > { %9783 = vst [vmem:[#allocation82_spill] sm:$0xff] %v8178_v63  ;;  %v6259_v6 = vld [vmem:[#allocation2 + $0x108] sm:$0xff]  ;;  %v5941_v24 = vpack.i.bf16 %v1212_v16, %v1211_v9  ;;  %v5124_v14 = vunpack.i.l.bf16 %v9785_v43  ;;  %v9789_v9 = vld [vmem:[#allocation49_spill] sm:$0xff] }
 0x1cd   : > { %v8187_v50 = vsel %vm515_vm0, %v6259_v6, %v5009_v19  ;;  %v1086_v60 = vld [vmem:[#allocation2 + $0x1e8] sm:$0xff]  ;;  %v5130_v19 = vunpack.i.h.bf16 %v9786_v4  ;;  %v5129_v6 = vunpack.i.l.bf16 %v9786_v4  ;;  %v8203_v17 = vsel %vm3357_vm3, %v8085_v40, %v5115_v7 }
 0x1ce   : > { %5927 = vrot.lane.b32.xlu1 %v5926_v30, %s6275_s24  ;;  %v9787_v36 = vld [vmem:[#allocation48_spill] sm:$0xff]  ;;  %v8199_v30 = vpop.permute.xlu1 %5647  ;;  %v5140_v16 = vunpack.i.h.bf16 %v9789_v9  ;;  %v5139_v43 = vunpack.i.l.bf16 %v9789_v9  ;;  %v8212_v4 = vsel %vm3357_vm3, %v8088_v49, %v5114_v46  ;;  %v5946_v40 = vpack.i.bf16 %v1086_v60, %v1085_v57  ;;  %v9796_v57 = vld [vmem:[#allocation54_spill] sm:$0xff] }
 0x1cf   : > { %5932 = vrot.lane.b32.xlu0 %v5931_v18, %s6275_s24  ;;  %v5134_v12 = vunpack.i.l.bf16 %v9787_v36  ;;  %9788 = vst [vmem:[#allocation83_spill] sm:$0xff] %v8199_v30  ;;  %v5135_v18 = vunpack.i.h.bf16 %v9787_v36  ;;  %v8208_v3 = vpop.permute.xlu0 %5652  ;;  %v5144_v30 = vunpack.i.l.bf16 %v9791_v22  ;;  %v9792_v63 = vld [vmem:[#allocation16_spill] sm:$0xff]  ;;  %v8220_v7 = vsel %vm3357_vm3, %v8099_v44, %v5119_v56 }
 0x1d0   : > { %9790 = vst [vmem:[#allocation84_spill] sm:$0xff] %v8208_v3  ;;  %v8224_v36 = vsel %vm3357_vm3, %v8102_v34, %v5120_v15  ;;  %v8228_v49 = vsel %vm3357_vm3, %v8094_v33, %v5125_v52  ;;  %v5951_v46 = vpack.i.bf16 %v1088_v8, %v1087_v25  ;;  %v1149_v22 = vld [vmem:[#allocation2 + $0x1e1] sm:$0xff]  ;;  %v1150_v9 = vld [vmem:[#allocation2 + $0x1e9] sm:$0xff]  ;;  %v8237_v56 = vsel %vm3357_vm3, %v8105_v62, %v5130_v19  ;;  %v1151_v8 = vld [vmem:[#allocation2 + $0x1f9] sm:$0xff] }
 0x1d1   : > { %v8241_v44 = vsel %vm3357_vm3, %v8111_v39, %v5129_v6  ;;  %v8245_v52 = vsel %vm3357_vm3, %v8117_v27, %v5134_v12  ;;  %v1152_v25 = vld [vmem:[#allocation2 + $0x201] sm:$0xff]  ;;  %v8255_v34 = vsel %vm3357_vm3, %v8133_v54, %v5140_v16  ;;  %v8259_v39 = vsel %vm3357_vm3, %v8145_v1, %v5139_v43  ;;  %v9794_v62 = vld [vmem:[#allocation53_spill] sm:$0xff] }
 0x1d2   : > { %5937 = vrot.lane.b32.xlu1 %v9792_v63, %s6276_s25  ;;  %v8233_v63 = vsel %vm3357_vm3, %v8091_v0, %v5124_v14  ;;  %v8247_v33 = vpop.permute.xlu1 %5657  ;;  %v8251_v0 = vsel %vm3357_vm3, %v8114_v28, %v5135_v18  ;;  %v5150_v15 = vunpack.i.h.bf16 %v9794_v62  ;;  %v8266_v27 = vsel %vm3357_vm3, %v8151_v29, %v5144_v30  ;;  %v9797_v14 = vld [vmem:[#allocation55_spill] sm:$0xff]  ;;  %v1214_v30 = vld [vmem:[#allocation2 + $0x1ea] sm:$0xff] }
 0x1d3   : > { %5942 = vrot.lane.b32.xlu0 %v5941_v24, %s6276_s25  ;;  %9793 = vst [vmem:[#allocation85_spill] sm:$0xff] %v8247_v33  ;;  %v8262_v12 = vpop.permute.xlu0 %5662  ;;  %v8270_v28 = vsel %vm3357_vm3, %v8148_v13, %v5145_v47  ;;  %v5149_v24 = vunpack.i.l.bf16 %v9794_v62  ;;  %v5956_v54 = vpack.i.bf16 %v1150_v9, %v1149_v22  ;;  %v5155_v1 = vunpack.i.h.bf16 %v9796_v57  ;;  %v1213_v29 = vld [vmem:[#allocation2 + $0x1e2] sm:$0xff]  ;;  %v9799_v43 = vld [vmem:[#allocation57_spill] sm:$0xff]  ;;  %v1215_v9 = vld [vmem:[#allocation2 + $0x1fa] sm:$0xff] }
 0x1d4   : > { %9795 = vst [vmem:[#allocation90_spill] sm:$0xff] %v8262_v12  ;;  %v5154_v60 = vunpack.i.l.bf16 %v9796_v57  ;;  %v5160_v19 = vunpack.i.h.bf16 %v9797_v14  ;;  %v5961_v6 = vpack.i.bf16 %v1152_v25, %v1151_v8  ;;  %v5159_v18 = vunpack.i.l.bf16 %v9797_v14  ;;  %v9798_v47 = vld [vmem:[#allocation56_spill] sm:$0xff]  ;;  %v9801_v8 = vld [vmem:[#allocation81_spill] sm:$0xff]  ;;  %v9803_v33 = vld [vmem:[#allocation86_spill] sm:$0xff] }
 0x1d5   : > { %v5165_v13 = vunpack.i.h.bf16 %v9798_v47  ;;  %v5164_v16 = vunpack.i.l.bf16 %v9798_v47  ;;  %v1216_v62 = vld [vmem:[#allocation2 + $0x202] sm:$0xff]  ;;  %v8286_v57 = vsel %vm3357_vm3, %v8155_v38, %v5150_v15  ;;  %v5275_v25 = vunpack.i.h.bf16 %v9801_v8 }
 0x1d6   : > { %5947 = vrot.lane.b32.xlu1 %v5946_v40, %s6274_s23  ;;  %v5170_v40 = vunpack.i.h.bf16 %v9799_v43  ;;  %v8282_v22 = vpop.permute.xlu1 %5667  ;;  %v5274_v14 = vunpack.i.l.bf16 %v9801_v8  ;;  %v8295_v47 = vsel %vm3357_vm3, %v8158_v42, %v5149_v24  ;;  %v5279_v3 = vunpack.i.l.bf16 %v9803_v33  ;;  %v1089_v24 = vld [vmem:[#allocation2 + $0x210] sm:$0xff] }
 0x1d7   : > { %5952 = vrot.lane.b32.xlu0 %v5951_v46, %s6274_s23  ;;  %9800 = vst [vmem:[#allocation91_spill] sm:$0xff] %v8282_v22  ;;  %v5169_v46 = vunpack.i.l.bf16 %v9799_v43  ;;  %v8291_v12 = vpop.permute.xlu0 %5672  ;;  %v5280_v22 = vunpack.i.h.bf16 %v9803_v33  ;;  %v5966_v38 = vpack.i.bf16 %v1214_v30, %v1213_v29  ;;  %v8302_v15 = vsel %vm3357_vm3, %v8164_v59, %v5154_v60  ;;  %v1090_v33 = vld [vmem:[#allocation2 + $0x218] sm:$0xff]  ;;  %v1091_v60 = vld [vmem:[#allocation2 + $0x228] sm:$0xff] }
 0x1d8   : > { %9802 = vst [vmem:[#allocation3_spill] sm:$0xff] %v8291_v12  ;;  %v8306_v43 = vsel %vm3357_vm3, %v8161_v23, %v5155_v1  ;;  %v8310_v8 = vsel %vm3357_vm3, %v8169_v2, %v5160_v19  ;;  %v5971_v42 = vpack.i.bf16 %v1216_v62, %v1215_v9  ;;  %v8319_v59 = vsel %vm3357_vm3, %v8181_v58, %v5164_v16  ;;  %v1092_v19 = vld [vmem:[#allocation2 + $0x230] sm:$0xff] }
 0x1d9   : > { %v8323_v23 = vsel %vm3357_vm3, %v8175_v53, %v5165_v13  ;;  %v8327_v2 = vsel %vm3357_vm3, %v8184_v61, %v5170_v40  ;;  %v8337_v58 = vsel %vm3422_vm4, %v8212_v4, %v5274_v14  ;;  %v8341_v53 = vsel %vm3422_vm4, %v8203_v17, %v5275_v25  ;;  %v9810_v13 = vld [vmem:[#allocation88_spill] sm:$0xff]  ;;  %v9811_v40 = vld [vmem:[#allocation89_spill] sm:$0xff]  ;;  %v9813_v14 = vld [vmem:[#allocation15_spill] sm:$0xff] }
 0x1da   : > { %5957 = vrot.lane.b32.xlu1 %v5956_v54, %s6275_s24  ;;  %v8315_v54 = vsel %vm3357_vm3, %v8172_v55, %v5159_v18  ;;  %9804 = vst [vmem:[#allocation4_spill] sm:$0xff] %v8323_v23  ;;  %9805 = vst [vmem:[#allocation5_spill] sm:$0xff] %v8327_v2  ;;  %v8333_v55 = vsel %vm3357_vm3, %v8187_v50, %v5169_v46  ;;  %v8348_v30 = vsel %vm3422_vm4, %v8220_v7, %v5279_v3  ;;  %v1153_v3 = vld [vmem:[#allocation2 + $0x211] sm:$0xff]  ;;  %v1154_v7 = vld [vmem:[#allocation2 + $0x219] sm:$0xff] }
 0x1db   : > { %5962 = vrot.lane.b32.xlu0 %v5961_v6, %s6275_s24  ;;  %v8329_v1 = vpop.permute.xlu1 %5677  ;;  %9807 = vst [vmem:[#allocation7_spill] sm:$0xff] %v8333_v55  ;;  %v9808_v6 = vld [vmem:[#allocation87_spill] sm:$0xff]  ;;  %v8352_v50 = vsel %vm3422_vm4, %v8224_v36, %v5280_v22  ;;  %v5976_v4 = vpack.i.bf16 %v1090_v33, %v1089_v24  ;;  %v5290_v17 = vunpack.i.h.bf16 %v9810_v13  ;;  %v5289_v16 = vunpack.i.l.bf16 %v9810_v13  ;;  %v9812_v36 = vld [vmem:[#allocation92_spill] sm:$0xff]  ;;  %v1220_v23 = vld [vmem:[#allocation2 + $0x232] sm:$0xff] }
 0x1dc   : > { %9806 = vst [vmem:[#allocation6_spill] sm:$0xff] %v8329_v1  ;;  %v5285_v29 = vunpack.i.h.bf16 %v9808_v6  ;;  %v8344_v61 = vpop.permute.xlu0 %5682  ;;  %v5284_v18 = vunpack.i.l.bf16 %v9808_v6  ;;  %v5294_v9 = vunpack.i.l.bf16 %v9811_v40  ;;  %v5981_v62 = vpack.i.bf16 %v1092_v19, %v1091_v60  ;;  %v1155_v33 = vld [vmem:[#allocation2 + $0x229] sm:$0xff]  ;;  %v1156_v6 = vld [vmem:[#allocation2 + $0x231] sm:$0xff] }
 0x1dd   : > { %9809 = vst [vmem:[#allocation8_spill] sm:$0xff] %v8344_v61  ;;  %v5295_v46 = vunpack.i.h.bf16 %v9811_v40  ;;  %v5300_v22 = vunpack.i.h.bf16 %v9812_v36  ;;  %v5299_v25 = vunpack.i.l.bf16 %v9812_v36  ;;  %v5305_v13 = vunpack.i.h.bf16 %v9813_v14  ;;  %v9815_v61 = vld [vmem:[#allocation17_spill] sm:$0xff]  ;;  %v9816_v60 = vld [vmem:[#allocation22_spill] sm:$0xff] }
 0x1de   : > { %5967 = vrot.lane.b32.xlu1 %v5966_v38, %s6276_s25  ;;  %v5304_v38 = vunpack.i.l.bf16 %v9813_v14  ;;  %v5310_v1 = vunpack.i.h.bf16 %v9815_v61  ;;  %v5314_v19 = vunpack.i.l.bf16 %v9816_v60  ;;  %v8372_v40 = vld [vmem:[#allocation2 + $0x212] sm:$0xff]  ;;  %v8376_v36 = vsel %vm3422_vm4, %v8233_v63, %v5284_v18  ;;  %v8384_v55 = vld [vmem:[#allocation2 + $0x22a] sm:$0xff]  ;;  %v8399_v18 = vld [vmem:[#allocation2 + $0x240] sm:$0xff] }
 0x1df   : > { %5972 = vrot.lane.b32.xlu0 %v5971_v42, %s6276_s25  ;;  %v8364_v24 = vpop.permute.xlu1 %5687  ;;  %v5309_v42 = vunpack.i.l.bf16 %v9815_v61  ;;  %v5315_v14 = vunpack.i.h.bf16 %v9816_v60  ;;  %v5986_v2 = vpack.i.bf16 %v1154_v7, %v1153_v3  ;;  %v1218_v61 = vld [vmem:[#allocation2 + $0x21a] sm:$0xff]  ;;  %v8392_v63 = vsel %vm3422_vm4, %v8237_v56, %v5290_v17 }
 0x1e0   : > { %9814 = vst [vmem:[#allocation93_spill] sm:$0xff] %v8364_v24  ;;  %v8380_v24 = vsel %vm3422_vm4, %v8228_v49, %v5285_v29  ;;  %v8396_v49 = vsel %vm3422_vm4, %v8245_v52, %v5294_v9  ;;  %v5991_v29 = vpack.i.bf16 %v1156_v6, %v1155_v33  ;;  %v8403_v3 = vld [vmem:[#allocation2 + $0x258] sm:$0xff]  ;;  %v8405_v7 = vld [vmem:[#allocation2 + $0x260] sm:$0xff]  ;;  %v8413_v56 = vsel %vm3422_vm4, %v8259_v39, %v5299_v25  ;;  %v9820_v33 = vld [vmem:[#allocation33_spill] sm:$0xff] }
 0x1e1   : > { %v8370_v12 = vpop.permute.xlu0 %5692  ;;  %v8417_v52 = vsel %vm3422_vm4, %v8255_v34, %v5300_v22  ;;  %v8421_v17 = vsel %vm3422_vm4, %v8266_v27, %v5304_v38  ;;  %v8425_v9 = vld [vmem:[#allocation2 + $0x241] sm:$0xff]  ;;  %v8433_v39 = vsel %vm3422_vm4, %v8270_v28, %v5305_v13  ;;  %v8437_v34 = vsel %vm3422_vm4, %v8295_v47, %v5309_v42  ;;  %v8453_v28 = vld [vmem:[#allocation2 + $0x24a] sm:$0xff]  ;;  %v1034_v42 = vld [vmem:[#allocation2 + $0x272] sm:$0xff] }
 0x1e2   : > { %9817 = vst [vmem:[#allocation9_spill] sm:$0xff] %v8370_v12  ;;  %5977 = vrot.lane.b32.xlu1 %v5976_v4, %s6274_s23  ;;  %v8388_v12 = vsel %vm3422_vm4, %v8241_v44, %v5289_v16  ;;  %v8401_v4 = vld [vmem:[#allocation2 + $0x248] sm:$0xff]  ;;  %v8409_v44 = vsel %vm3422_vm4, %v8251_v0, %v5295_v46  ;;  %v8429_v0 = vld [vmem:[#allocation2 + $0x259] sm:$0xff]  ;;  %v8441_v27 = vsel %vm3422_vm4, %v8286_v57, %v5310_v1  ;;  %v5435_v60 = vunpack.i.h.bf16 %v7820_v45  ;;  %v8471_v6 = vld [vmem:[#allocation2 + $0x270] sm:$0xff] }
 0x1e3   : > { %5982 = vrot.lane.b32.xlu0 %v5981_v62, %s6274_s23  ;;  %v8427_v62 = vld [vmem:[#allocation2 + $0x249] sm:$0xff]  ;;  %v8445_v46 = vsel %vm3422_vm4, %v8302_v15, %v5314_v19  ;;  %v8449_v25 = vld [vmem:[#allocation2 + $0x261] sm:$0xff]  ;;  %v8457_v47 = vsel %vm3422_vm4, %v8306_v43, %v5315_v14  ;;  %v5996_v15 = vpack.i.bf16 %v1218_v61, %v8372_v40  ;;  %v5434_v19 = vunpack.i.l.bf16 %v7820_v45 }
 0x1e4   : > { %v8423_v16 = vpop.permute.xlu1 %5697  ;;  %v8451_v38 = vld [vmem:[#allocation2 + $0x242] sm:$0xff]  ;;  %v8463_v1 = vld [vmem:[#allocation2 + $0x25a] sm:$0xff]  ;;  %v6001_v43 = vpack.i.bf16 %v1220_v23, %v8384_v55  ;;  %v6006_v61 = vpack.i.bf16 %v8401_v4, %v8399_v18  ;;  %v6011_v57 = vpack.i.bf16 %v8405_v7, %v8403_v3  ;;  %v6021_v23 = vpack.i.bf16 %v8449_v25, %v8429_v0 }
 0x1e5   : > { %9818 = vst [vmem:[#allocation94_spill] sm:$0xff] %v8423_v16  ;;  %v8447_v22 = vpop.permute.xlu0 %5702  ;;  %v8465_v13 = vld [vmem:[#allocation2 + $0x262] sm:$0xff]  ;;  %v1035_v14 = vld [vmem:[#allocation2 + $0x27a] sm:$0xff]  ;;  %v5440_v16 = vunpack.i.h.bf16 %v7834_v26  ;;  %v5439_v18 = vunpack.i.l.bf16 %v7834_v26  ;;  %v3488_v7 = vsel %vm3487_vm6, %v8337_v58, %v5434_v19  ;;  %v5594_v0 = vunpack.i.l.bf16 %v8048_v10 }
 0x1e6   : > { %9819 = vst [vmem:[#allocation10_spill] sm:$0xff] %v8447_v22  ;;  %5987 = vrot.lane.b32.xlu1 %v5986_v2, %s6275_s24  ;;  %v8473_v2 = vld [vmem:[#allocation2 + $0x278] sm:$0xff]  ;;  %v8490_v4 = vpack.i.bf16 %v1035_v14, %v1034_v42  ;;  %v5600_v26 = vunpack.i.h.bf16 %v8062_v11  ;;  %v5599_v25 = vunpack.i.l.bf16 %v8062_v11  ;;  %v5445_v3 = vunpack.i.h.bf16 %v7836_v41 }
 0x1e7   : > { %5992 = vrot.lane.b32.xlu0 %v5991_v29, %s6275_s24  ;;  %v6016_v29 = vpack.i.bf16 %v8427_v62, %v8425_v9  ;;  %v3489_v9 = vsel %vm3487_vm6, %v8341_v53, %v5435_v60  ;;  %v5595_v62 = vunpack.i.h.bf16 %v8048_v10  ;;  %v5444_v58 = vunpack.i.l.bf16 %v7836_v41 }
 0x1e8   : > { %v5708_v40 = vpop.permute.xlu1 %5707  ;;  %v3490_v10 = vsel %vm3487_vm6, %v8348_v30, %v5439_v18  ;;  %v3553_v11 = vsel %vm3552_vm7, %v3488_v7, %v5594_v0 }
 0x1e9   : > { %v5713_v45 = vpop.permute.xlu0 %5712  ;;  %v5709_v42 = vunpack.i.l.bf16 %v5708_v40  ;;  %v3555_v41 = vsel %vm3552_vm7, %v3490_v10, %v5599_v25 }
 0x1ea   : > { %5997 = vrot.lane.b32.xlu1 %v5996_v15, %s6276_s25  ;;  %v5710_v15 = vunpack.i.h.bf16 %v5708_v40  ;;  %v5715_v19 = vunpack.i.h.bf16 %v5713_v45  ;;  %v5714_v53 = vunpack.i.l.bf16 %v5713_v45  ;;  %v3554_v40 = vsel %vm3552_vm7, %v3489_v9, %v5595_v62  ;;  %v8519_v62 = vld [vmem:[#allocation2 + $0x288] sm:$0xff] }
 0x1eb   : > { %6002 = vrot.lane.b32.xlu0 %v6001_v43, %s6276_s25  ;;  %v3491_v43 = vsel %vm3487_vm6, %v8352_v50, %v5440_v16  ;;  %v3618_v18 = vsel %vm3617_vm8, %v3553_v11, %v5709_v42  ;;  %v8535_v11 = vld [vmem:[#allocation2 + $0x289] sm:$0xff] }
 0x1ec   : > { %v5718_v14 = vpop.permute.xlu1 %5717  ;;  %v3556_v45 = vsel %vm3552_vm7, %v3491_v43, %v5600_v26  ;;  %v3619_v50 = vsel %vm3617_vm8, %v3554_v40, %v5710_v15  ;;  %v3620_v16 = vsel %vm3617_vm8, %v3555_v41, %v5714_v53  ;;  %v8526_v15 = vld [vmem:[#allocation2 + $0x271] sm:$0xff]  ;;  %v8528_v53 = vld [vmem:[#allocation2 + $0x279] sm:$0xff] }
 0x1ed   : > { %v5723_v60 = vpop.permute.xlu0 %5722  ;;  %v5720_v22 = vunpack.i.h.bf16 %v5718_v14  ;;  %v5719_v55 = vunpack.i.l.bf16 %v5718_v14  ;;  %v8521_v14 = vld [vmem:[#allocation2 + $0x290] sm:$0xff] }
 0x1ee   : > { %6007 = vrot.lane.b32.xlu1 %v6006_v61, %s6274_s23  ;;  %v5725_v5 = vunpack.i.h.bf16 %v5723_v60  ;;  %v5724_v21 = vunpack.i.l.bf16 %v5723_v60  ;;  %v3621_v61 = vsel %vm3617_vm8, %v3556_v45, %v5715_v19 }
 0x1ef   : > { %6012 = vrot.lane.b32.xlu0 %v6011_v57, %s6274_s23  ;;  %v3683_v26 = vsel %vm3682_vm9, %v3618_v18, %v5719_v55  ;;  %v3684_v42 = vsel %vm3682_vm9, %v3619_v50, %v5720_v22  ;;  %v6051_v18 = vpack.i.bf16 %v8528_v53, %v8526_v15  ;;  %v9821_v50 = vld [vmem:[#allocation31_spill] sm:$0xff] }
 0x1f0   : > { %v5728_v30 = vpop.permute.xlu1 %5727  ;;  %v3685_v19 = vsel %vm3682_vm9, %v3620_v16, %v5724_v21  ;;  %v3686_v60 = vsel %vm3682_vm9, %v3621_v61, %v5725_v5  ;;  %v6046_v21 = vpack.i.bf16 %v8521_v14, %v8519_v62  ;;  %v5450_v5 = vunpack.i.h.bf16 %v7842_v35 }
 0x1f1   : > { %v5730_v7 = vunpack.i.h.bf16 %v5728_v30  ;;  %v5729_v0 = vunpack.i.l.bf16 %v5728_v30  ;;  %v5733_v9 = vpop.permute.xlu0 %5732  ;;  %v5325_v16 = vunpack.i.h.bf16 %v9821_v50  ;;  %v3492_v61 = vsel %vm3487_vm6, %v8376_v36, %v5444_v58 }
 0x1f2   : > { %v5735_v57 = vunpack.i.h.bf16 %v5733_v9  ;;  %v5734_v25 = vunpack.i.l.bf16 %v5733_v9  ;;  %6017 = vrot.lane.b32.xlu1 %v6016_v29, %s6275_s24  ;;  %v8537_v29 = vld [vmem:[#allocation2 + $0x291] sm:$0xff]  ;;  %v5604_v36 = vunpack.i.l.bf16 %v8064_v31 }
 0x1f3   : > { %6022 = vrot.lane.b32.xlu0 %v6021_v23, %s6275_s24  ;;  %v3748_v10 = vsel %vm3747_vm10, %v3683_v26, %v5729_v0  ;;  %v3749_v43 = vsel %vm3747_vm10, %v3684_v42, %v5730_v7  ;;  %v5449_v23 = vunpack.i.l.bf16 %v7842_v35  ;;  %v3493_v7 = vsel %vm3487_vm6, %v8380_v24, %v5445_v3  ;;  %v9823_v9 = vld [vmem:[#allocation38_spill] sm:$0xff] }
 0x1f4   : > { %v3750_v22 = vsel %vm3747_vm10, %v3685_v19, %v5734_v25  ;;  %v3751_v55 = vsel %vm3747_vm10, %v3686_v60, %v5735_v57  ;;  %v5738_v40 = vpop.permute.xlu1 %5737  ;;  %v3812_v41 = vpack.c.bf16 %v3749_v43, %v3748_v10  ;;  %v9822_v0 = vpack.i.bf16 %v8453_v28, %v8451_v38 }
 0x1f5   : > { %v5743_v45 = vpop.permute.xlu0 %5742  ;;  %v3813_v30 = vpack.c.bf16 %v3751_v55, %v3750_v22  ;;  %v6056_v35 = vpack.i.bf16 %v8537_v29, %v8535_v11  ;;  %v5455_v62 = vunpack.i.h.bf16 %v9823_v9  ;;  %v5454_v14 = vunpack.i.l.bf16 %v9823_v9  ;;  %v1104_v11 = vld [vmem:[#allocation2 + $0x2c0] sm:$0xff] }
 0x1f6   : > { %6027 = vrot.lane.b32.xlu1 %v9822_v0, %s6276_s25  ;;  %4858 = vmatprep.mubr.msk.bf16.mxu0 %vm3880_vm11, %v3812_v41  ;;  %v5605_v57 = vunpack.i.h.bf16 %v8064_v31  ;;  %v9824_v24 = vpack.i.bf16 %v8465_v13, %v8463_v1  ;;  %v5610_v38 = vunpack.i.h.bf16 %v8072_v20  ;;  %v5609_v28 = vunpack.i.l.bf16 %v8072_v20  ;;  %v9825_v1 = vld [vmem:[#allocation58_spill] sm:$0xff]  ;;  %v8625_v29 = vld [vmem:[#allocation2 + $0x2a1] sm:$0xff] }
 0x1f7   : > { %4859 = vmatmul.mubr.msk.bf16.vlgmr.msra.gmra.mrb[0].mxu0 %vm3880_vm11, %v3813_v30  ;;  %v5740_v3 = vunpack.i.h.bf16 %v5738_v40  ;;  %v5739_v58 = vunpack.i.l.bf16 %v5738_v40  ;;  %v3494_v26 = vsel %vm3487_vm6, %v8388_v12, %v5449_v23  ;;  %v3495_v31 = vsel %vm3487_vm6, %v8392_v63, %v5450_v5 }
 0x1f8   : > { %6032 = vrot.lane.b32.xlu0 %v9824_v24, %s6276_s25  ;;  %v5748_v25 = vpop.permute.xlu1 %5747  ;;  %v5745_v42 = vunpack.i.h.bf16 %v5743_v45  ;;  %v5744_v15 = vunpack.i.l.bf16 %v5743_v45  ;;  %v5460_v13 = vunpack.i.h.bf16 %v9825_v1  ;;  %v5459_v19 = vunpack.i.l.bf16 %v9825_v1  ;;  %v1228_v24 = vld [vmem:[#allocation2 + $0x292] sm:$0xff] }
 0x1f9   : > { %v5753_v53 = vpop.permute.xlu0 %5752  ;;  %v5750_v60 = vunpack.i.h.bf16 %v5748_v25  ;;  %v5749_v10 = vunpack.i.l.bf16 %v5748_v25  ;;  %v3557_v20 = vsel %vm3552_vm7, %v3492_v61, %v5604_v36  ;;  %v3558_v43 = vsel %vm3552_vm7, %v3493_v7, %v5605_v57  ;;  %v1227_v36 = vld [vmem:[#allocation2 + $0x28a] sm:$0xff] }
 0x1fa   : > { %6037 = vrot.lane.b32.xlu1 %v8490_v4, %s6273_s8  ;;  %v5755_v12 = vunpack.i.h.bf16 %v5753_v53  ;;  %v5754_v22 = vunpack.i.l.bf16 %v5753_v53  ;;  %v9826_v63 = vpack.i.bf16 %v8473_v2, %v8471_v6  ;;  %v3559_v55 = vsel %vm3552_vm7, %v3494_v26, %v5609_v28 }
 0x1fb   : > { %v3560_v40 = vsel %vm3552_vm7, %v3495_v31, %v5610_v38  ;;  %v3622_v41 = vsel %vm3617_vm8, %v3557_v20, %v5739_v58  ;;  %v3623_v5 = vsel %vm3617_vm8, %v3558_v43, %v5740_v3  ;;  %v3624_v30 = vsel %vm3617_vm8, %v3559_v55, %v5744_v15  ;;  %v1038_v20 = vld [vmem:[#allocation2 + $0x2a2] sm:$0xff]  ;;  %v1039_v43 = vld [vmem:[#allocation2 + $0x2aa] sm:$0xff] }
 0x1fc   : > { %6042 = vrot.lane.b32.xlu0 %v9826_v63, %s6274_s23  ;;  %v5758_v23 = vpop.permute.xlu1 %5757  ;;  %v3625_v45 = vsel %vm3617_vm8, %v3560_v40, %v5745_v42  ;;  %v3687_v9 = vsel %vm3682_vm9, %v3622_v41, %v5749_v10  ;;  %v3688_v6 = vsel %vm3682_vm9, %v3623_v5, %v5750_v60  ;;  %v3689_v38 = vsel %vm3682_vm9, %v3624_v30, %v5754_v22  ;;  %v9827_v22 = vld [vmem:[#allocation42_spill] sm:$0xff] }
 0x1fd   : > { %v5760_v61 = vunpack.i.h.bf16 %v5758_v23  ;;  %v5759_v7 = vunpack.i.l.bf16 %v5758_v23  ;;  %v5763_v0 = vpop.permute.xlu0 %5762  ;;  %v3690_v28 = vsel %vm3682_vm9, %v3625_v45, %v5755_v12  ;;  %v5324_v25 = vunpack.i.l.bf16 %v9821_v50 }
 0x1fe   : > { %v5765_v2 = vunpack.i.h.bf16 %v5763_v0  ;;  %v5764_v57 = vunpack.i.l.bf16 %v5763_v0  ;;  %6047 = vrot.lane.b32.xlu1 %v6046_v21, %s6274_s23  ;;  %v3496_v15 = vsel %vm3487_vm6, %v8396_v49, %v5454_v14  ;;  %v3497_v53 = vsel %vm3487_vm6, %v8409_v44, %v5455_v62  ;;  %v1101_v49 = vld [vmem:[#allocation2 + $0x2a0] sm:$0xff]  ;;  %v1102_v44 = vld [vmem:[#allocation2 + $0x2a8] sm:$0xff]  ;;  %v8616_v62 = vld [vmem:[#allocation2 + $0x2b8] sm:$0xff] }
 0x1ff   : > { %v3752_v3 = vsel %vm3747_vm10, %v3687_v9, %v5759_v7  ;;  %v3753_v58 = vsel %vm3747_vm10, %v3688_v6, %v5760_v61  ;;  %v6066_v10 = vpack.i.bf16 %v1228_v24, %v1227_v36  ;;  %v3499_v12 = vsel %vm3487_vm6, %v8417_v52, %v5460_v13  ;;  %v9828_v14 = vld [vmem:[#allocation59_spill] sm:$0xff] }
 0x200   : > { %6052 = vrot.lane.b32.xlu0 %v6051_v18, %s6275_s24  ;;  %v3814_v26 = vpack.c.bf16 %v3753_v58, %v3752_v3  ;;  %v3754_v31 = vsel %vm3747_vm10, %v3689_v38, %v5764_v57  ;;  %v3755_v42 = vsel %vm3747_vm10, %v3690_v28, %v5765_v2  ;;  %v5768_v21 = vpop.permute.xlu1 %5767  ;;  %v3498_v18 = vsel %vm3487_vm6, %v8413_v56, %v5459_v19 }
 0x201   : > { %v3815_v1 = vpack.c.bf16 %v3755_v42, %v3754_v31  ;;  %v5773_v60 = vpop.permute.xlu0 %5772  ;;  %v5465_v63 = vunpack.i.h.bf16 %v9827_v22  ;;  %v5464_v55 = vunpack.i.l.bf16 %v9827_v22  ;;  %v5470_v56 = vunpack.i.h.bf16 %v9828_v14 }
 0x202   : > { %6057 = vrot.lane.b32.xlu1 %v6056_v35, %s6275_s24  ;;  %4862 = vmatprep.mubr.msk.bf16.mxu0 %vm3880_vm11, %v3814_v26  ;;  %v5469_v19 = vunpack.i.l.bf16 %v9828_v14  ;;  %v5615_v52 = vunpack.i.h.bf16 %v8077_v32  ;;  %v5614_v13 = vunpack.i.l.bf16 %v8077_v32  ;;  %v8627_v35 = vld [vmem:[#allocation2 + $0x2a9] sm:$0xff]  ;;  %v5620_v40 = vunpack.i.h.bf16 %v8096_v48 }
 0x203   : > { %4863 = vmatmul.mubr.msk.bf16.gmra.mrb[4].mxu0 %vm3880_vm11, %v3815_v1  ;;  %v5619_v41 = vunpack.i.l.bf16 %v8096_v48  ;;  %v5770_v5 = vunpack.i.h.bf16 %v5768_v21  ;;  %v5769_v23 = vunpack.i.l.bf16 %v5768_v21  ;;  %v5775_v30 = vunpack.i.h.bf16 %v5773_v60 }
 0x204   : > { %6062 = vrot.lane.b32.xlu0 %v8490_v4, %s6276_s25  ;;  %v5778_v45 = vpop.permute.xlu1 %5777  ;;  %v5774_v61 = vunpack.i.l.bf16 %v5773_v60  ;;  %v8631_v7 = vpack.i.bf16 %v1039_v43, %v1038_v20  ;;  %v6081_v4 = vpack.i.bf16 %v1102_v44, %v1101_v49  ;;  %v6086_v6 = vpack.i.bf16 %v1104_v11, %v8616_v62  ;;  %v1167_v44 = vld [vmem:[#allocation2 + $0x2b9] sm:$0xff]  ;;  %v1168_v62 = vld [vmem:[#allocation2 + $0x2c1] sm:$0xff] }
 0x205   : > { %v5783_v32 = vpop.permute.xlu0 %5782  ;;  %v5780_v0 = vunpack.i.h.bf16 %v5778_v45  ;;  %v5779_v9 = vunpack.i.l.bf16 %v5778_v45  ;;  %v6091_v2 = vpack.i.bf16 %v8627_v35, %v8625_v29  ;;  %v3561_v48 = vsel %vm3552_vm7, %v3496_v15, %v5614_v13 }
 0x206   : > { %6067 = vrot.lane.b32.xlu1 %v6066_v10, %s6276_s25  ;;  %v3562_v57 = vsel %vm3552_vm7, %v3497_v53, %v5615_v52  ;;  %v5785_v36 = vunpack.i.h.bf16 %v5783_v32  ;;  %v5784_v24 = vunpack.i.l.bf16 %v5783_v32  ;;  %v3563_v38 = vsel %vm3552_vm7, %v3498_v18, %v5619_v41 }
 0x207   : > { %v3564_v28 = vsel %vm3552_vm7, %v3499_v12, %v5620_v40  ;;  %v3626_v3 = vsel %vm3617_vm8, %v3561_v48, %v5769_v23  ;;  %v3627_v58 = vsel %vm3617_vm8, %v3562_v57, %v5770_v5  ;;  %v3628_v42 = vsel %vm3617_vm8, %v3563_v38, %v5774_v61 }
 0x208   : > { %6072 = vrot.lane.b32.xlu0 %v6066_v10, %s6273_s8  ;;  %v5788_v26 = vpop.permute.xlu1 %5787  ;;  %v3629_v31 = vsel %vm3617_vm8, %v3564_v28, %v5775_v30  ;;  %v3691_v1 = vsel %vm3682_vm9, %v3626_v3, %v5779_v9  ;;  %v3692_v60 = vsel %vm3682_vm9, %v3627_v58, %v5780_v0  ;;  %v3693_v43 = vsel %vm3682_vm9, %v3628_v42, %v5784_v24  ;;  %v1042_v0 = vld [vmem:[#allocation2 + $0x2d2] sm:$0xff] }
 0x209   : > { %v5790_v21 = vunpack.i.h.bf16 %v5788_v26  ;;  %v5789_v15 = vunpack.i.l.bf16 %v5788_v26  ;;  %v5793_v53 = vpop.permute.xlu0 %5792  ;;  %v3694_v18 = vsel %vm3682_vm9, %v3629_v31, %v5785_v36  ;;  %v9829_v52 = vunpack.i.l.bf16 %v9820_v33  ;;  %v8699_v9 = vld [vmem:[#allocation2 + $0x2d0] sm:$0xff] }
 0x20a   : > { %v5795_v10 = vunpack.i.h.bf16 %v5793_v53  ;;  %v5794_v20 = vunpack.i.l.bf16 %v5793_v53  ;;  %6077 = vrot.lane.b32.xlu1 %v8631_v7, %s6273_s8  ;;  %v9830_v41 = vunpack.i.h.bf16 %v9820_v33  ;;  %v8673_v23 = vsel %vm3422_vm4, %v8319_v59, %v5324_v25  ;;  %v1231_v25 = vld [vmem:[#allocation2 + $0x2ba] sm:$0xff] }
 0x20b   : > { %v3756_v12 = vsel %vm3747_vm10, %v3691_v1, %v5789_v15  ;;  %v3757_v49 = vsel %vm3747_vm10, %v3692_v60, %v5790_v21  ;;  %v8659_v13 = vsel %vm3422_vm4, %v8315_v54, %v9829_v52  ;;  %v3500_v54 = vsel %vm3487_vm6, %v8421_v17, %v5464_v55  ;;  %v1043_v55 = vld [vmem:[#allocation2 + $0x2da] sm:$0xff] }
 0x20c   : > { %6082 = vrot.lane.b32.xlu0 %v6081_v4, %s6274_s23  ;;  %v3816_v11 = vpack.c.bf16 %v3757_v49, %v3756_v12  ;;  %v3758_v29 = vsel %vm3747_vm10, %v3693_v43, %v5794_v20  ;;  %v3759_v35 = vsel %vm3747_vm10, %v3694_v18, %v5795_v10  ;;  %v5798_v40 = vpop.permute.xlu1 %5797  ;;  %v8667_v5 = vsel %vm3422_vm4, %v8310_v8, %v9830_v41  ;;  %v9831_v8 = vld [vmem:[#allocation41_spill] sm:$0xff]  ;;  %v1232_v4 = vld [vmem:[#allocation2 + $0x2c2] sm:$0xff] }
 0x20d   : > { %v3817_v45 = vpack.c.bf16 %v3759_v35, %v3758_v29  ;;  %v5803_v30 = vpop.permute.xlu0 %5802  ;;  %v3501_v33 = vsel %vm3487_vm6, %v8433_v39, %v5465_v63  ;;  %v5475_v61 = vunpack.i.h.bf16 %v9831_v8  ;;  %v5474_v32 = vunpack.i.l.bf16 %v9831_v8  ;;  %v1108_v41 = vld [vmem:[#allocation2 + $0x2f0] sm:$0xff] }
 0x20e   : > { %6087 = vrot.lane.b32.xlu1 %v6086_v6, %s6274_s23  ;;  %4866 = vmatprep.mubr.msk.bf16.mxu0 %vm3880_vm11, %v3816_v11  ;;  %v6096_v59 = vpack.i.bf16 %v1168_v62, %v1167_v44  ;;  %v3502_v17 = vsel %vm3487_vm6, %v8437_v34, %v5469_v19  ;;  %v3503_v39 = vsel %vm3487_vm6, %v8441_v27, %v5470_v56  ;;  %v5625_v22 = vunpack.i.h.bf16 %v8108_v37  ;;  %v8701_v6 = vld [vmem:[#allocation2 + $0x2d8] sm:$0xff]  ;;  %v9832_v56 = vld [vmem:[#allocation45_spill] sm:$0xff] }
 0x20f   : > { %v5624_v63 = vunpack.i.l.bf16 %v8108_v37  ;;  %4867 = vmatmul.mubr.msk.bf16.gmra.mrb[8].mxu0 %vm3880_vm11, %v3817_v45  ;;  %v5630_v34 = vunpack.i.h.bf16 %v8130_v51  ;;  %v5629_v14 = vunpack.i.l.bf16 %v8130_v51  ;;  %v5800_v19 = vunpack.i.h.bf16 %v5798_v40 }
 0x210   : > { %6092 = vrot.lane.b32.xlu0 %v6091_v2, %s6275_s24  ;;  %v5799_v48 = vunpack.i.l.bf16 %v5798_v40  ;;  %v5808_v27 = vpop.permute.xlu1 %5807  ;;  %v5479_v57 = vunpack.i.l.bf16 %v9832_v56  ;;  %v5805_v36 = vunpack.i.h.bf16 %v5803_v30  ;;  %v5804_v37 = vunpack.i.l.bf16 %v5803_v30  ;;  %v1107_v40 = vld [vmem:[#allocation2 + $0x2e8] sm:$0xff] }
 0x211   : > { %v5813_v24 = vpop.permute.xlu0 %5812  ;;  %v6106_v2 = vpack.i.bf16 %v1232_v4, %v1231_v25  ;;  %v5810_v38 = vunpack.i.h.bf16 %v5808_v27  ;;  %v5809_v28 = vunpack.i.l.bf16 %v5808_v27  ;;  %v8707_v3 = vpack.i.bf16 %v1043_v55, %v1042_v0  ;;  %v1169_v4 = vld [vmem:[#allocation2 + $0x2d1] sm:$0xff]  ;;  %v1170_v0 = vld [vmem:[#allocation2 + $0x2d9] sm:$0xff] }
 0x212   : > { %6097 = vrot.lane.b32.xlu1 %v6096_v59, %s6275_s24  ;;  %v6121_v58 = vpack.i.bf16 %v8701_v6, %v8699_v9  ;;  %v3565_v51 = vsel %vm3552_vm7, %v3500_v54, %v5624_v63  ;;  %v3566_v26 = vsel %vm3552_vm7, %v3501_v33, %v5625_v22  ;;  %v5815_v31 = vunpack.i.h.bf16 %v5813_v24  ;;  %v9833_v54 = vld [vmem:[#allocation39_spill] sm:$0xff]  ;;  %v9834_v6 = vld [vmem:[#allocation60_spill] sm:$0xff] }
 0x213   : > { %v5814_v42 = vunpack.i.l.bf16 %v5813_v24  ;;  %v3567_v21 = vsel %vm3552_vm7, %v3502_v17, %v5629_v14  ;;  %v3568_v15 = vsel %vm3552_vm7, %v3503_v39, %v5630_v34  ;;  %v3630_v53 = vsel %vm3617_vm8, %v3565_v51, %v5799_v48  ;;  %v9835_v48 = vld [vmem:[#allocation79_spill] sm:$0xff] }
 0x214   : > { %6102 = vrot.lane.b32.xlu0 %v8631_v7, %s6276_s25  ;;  %v3631_v1 = vsel %vm3617_vm8, %v3566_v26, %v5800_v19  ;;  %v5818_v60 = vpop.permute.xlu1 %5817  ;;  %v3633_v10 = vsel %vm3617_vm8, %v3568_v15, %v5805_v36  ;;  %v3632_v20 = vsel %vm3617_vm8, %v3567_v21, %v5804_v37  ;;  %v3695_v49 = vsel %vm3682_vm9, %v3630_v53, %v5809_v28  ;;  %v1236_v36 = vld [vmem:[#allocation2 + $0x2f2] sm:$0xff]  ;;  %v9836_v37 = vld [vmem:[#allocation80_spill] sm:$0xff] }
 0x215   : > { %v5820_v43 = vunpack.i.h.bf16 %v5818_v60  ;;  %v5819_v18 = vunpack.i.l.bf16 %v5818_v60  ;;  %v5823_v12 = vpop.permute.xlu0 %5822  ;;  %v3696_v7 = vsel %vm3682_vm9, %v3631_v1, %v5810_v38  ;;  %v3697_v52 = vsel %vm3682_vm9, %v3632_v20, %v5814_v42 }
 0x216   : > { %v5825_v44 = vunpack.i.h.bf16 %v5823_v12  ;;  %v5824_v62 = vunpack.i.l.bf16 %v5823_v12  ;;  %6107 = vrot.lane.b32.xlu1 %v6106_v2, %s6276_s25  ;;  %v3698_v11 = vsel %vm3682_vm9, %v3633_v10, %v5815_v31  ;;  %v5330_v45 = vunpack.i.h.bf16 %v9833_v54 }
 0x217   : > { %v3760_v29 = vsel %vm3747_vm10, %v3695_v49, %v5819_v18  ;;  %v3761_v35 = vsel %vm3747_vm10, %v3696_v7, %v5820_v43  ;;  %v5329_v17 = vunpack.i.l.bf16 %v9833_v54  ;;  %v3504_v39 = vsel %vm3487_vm6, %v8445_v46, %v5474_v32  ;;  %v1171_v46 = vld [vmem:[#allocation2 + $0x2e9] sm:$0xff] }
 0x218   : > { %6112 = vrot.lane.b32.xlu0 %v6106_v2, %s6273_s8  ;;  %v3818_v30 = vpack.c.bf16 %v3761_v35, %v3760_v29  ;;  %v3762_v33 = vsel %vm3747_vm10, %v3697_v52, %v5824_v62  ;;  %v3763_v59 = vsel %vm3747_vm10, %v3698_v11, %v5825_v44  ;;  %v5828_v25 = vpop.permute.xlu1 %5827  ;;  %v5480_v22 = vunpack.i.h.bf16 %v9832_v56  ;;  %v1235_v56 = vld [vmem:[#allocation2 + $0x2ea] sm:$0xff] }
 0x219   : > { %v3819_v63 = vpack.c.bf16 %v3763_v59, %v3762_v33  ;;  %v5833_v55 = vpop.permute.xlu0 %5832  ;;  %v3505_v9 = vsel %vm3487_vm6, %v8457_v47, %v5475_v61  ;;  %v5485_v34 = vunpack.i.h.bf16 %v9834_v6  ;;  %v5484_v14 = vunpack.i.l.bf16 %v9834_v6  ;;  %v1172_v61 = vld [vmem:[#allocation2 + $0x2f1] sm:$0xff]  ;;  %v1174_v6 = vld [vmem:[#allocation2 + $0x309] sm:$0xff] }
 0x21a   : > { %6117 = vrot.lane.b32.xlu1 %v8707_v3, %s6273_s8  ;;  %4870 = vmatprep.mubr.msk.bf16.mxu0 %vm3880_vm11, %v3818_v30  ;;  %v6126_v19 = vpack.i.bf16 %v1108_v41, %v1107_v40  ;;  %v3506_v32 = vsel %vm3487_vm6, %v8659_v13, %v5479_v57  ;;  %v5635_v27 = vunpack.i.h.bf16 %v9835_v48  ;;  %v5634_v8 = vunpack.i.l.bf16 %v9835_v48  ;;  %v9837_v57 = vld [vmem:[#allocation44_spill] sm:$0xff] }
 0x21b   : > { %4871 = vmatmul.mubr.msk.bf16.gmra.mrb[12].mxu0 %vm3880_vm11, %v3819_v63  ;;  %v6131_v47 = vpack.i.bf16 %v1170_v0, %v1169_v4  ;;  %v5640_v24 = vunpack.i.h.bf16 %v9836_v37  ;;  %v5639_v2 = vunpack.i.l.bf16 %v9836_v37  ;;  %v5830_v38 = vunpack.i.h.bf16 %v5828_v25  ;;  %v1046_v0 = vld [vmem:[#allocation2 + $0x302] sm:$0xff] }
 0x21c   : > { %6122 = vrot.lane.b32.xlu0 %v6121_v58, %s6274_s23  ;;  %v5829_v28 = vunpack.i.l.bf16 %v5828_v25  ;;  %v5838_v51 = vpop.permute.xlu1 %5837  ;;  %v3507_v13 = vsel %vm3487_vm6, %v8667_v5, %v5480_v22  ;;  %v5489_v26 = vunpack.i.l.bf16 %v9837_v57  ;;  %v5835_v31 = vunpack.i.h.bf16 %v5833_v55  ;;  %v9838_v22 = vld [vmem:[#allocation4_spill] sm:$0xff] }
 0x21d   : > { %v5834_v58 = vunpack.i.l.bf16 %v5833_v55  ;;  %v5843_v42 = vpop.permute.xlu0 %5842  ;;  %v5840_v21 = vunpack.i.h.bf16 %v5838_v51  ;;  %v5839_v15 = vunpack.i.l.bf16 %v5838_v51  ;;  %v6136_v53 = vpack.i.bf16 %v1172_v61, %v1171_v46  ;;  %v1110_v48 = vld [vmem:[#allocation2 + $0x308] sm:$0xff]  ;;  %v9842_v51 = vld [vmem:[#allocation83_spill] sm:$0xff] }
 0x21e   : > { %6127 = vrot.lane.b32.xlu1 %v6126_v19, %s6274_s23  ;;  %v6146_v1 = vpack.i.bf16 %v1236_v36, %v1235_v56  ;;  %v3569_v60 = vsel %vm3552_vm7, %v3504_v39, %v5634_v8  ;;  %v3570_v10 = vsel %vm3552_vm7, %v3505_v9, %v5635_v27  ;;  %v5845_v20 = vunpack.i.h.bf16 %v5843_v42  ;;  %v1047_v39 = vld [vmem:[#allocation2 + $0x30a] sm:$0xff]  ;;  %v9839_v27 = vld [vmem:[#allocation7_spill] sm:$0xff] }
 0x21f   : > { %v5844_v43 = vunpack.i.l.bf16 %v5843_v42  ;;  %v3571_v5 = vsel %vm3552_vm7, %v3506_v32, %v5639_v2  ;;  %v3572_v18 = vsel %vm3552_vm7, %v3507_v13, %v5640_v24  ;;  %v3634_v12 = vsel %vm3617_vm8, %v3569_v60, %v5829_v28  ;;  %v1109_v32 = vld [vmem:[#allocation2 + $0x300] sm:$0xff]  ;;  %v9840_v8 = vld [vmem:[#allocation5_spill] sm:$0xff]  ;;  %v9841_v2 = vld [vmem:[#allocation82_spill] sm:$0xff] }
 0x220   : > { %6132 = vrot.lane.b32.xlu0 %v6131_v47, %s6275_s24  ;;  %v3635_v49 = vsel %vm3617_vm8, %v3570_v10, %v5830_v38  ;;  %v5848_v7 = vpop.permute.xlu1 %5847  ;;  %v3637_v44 = vsel %vm3617_vm8, %v3572_v18, %v5835_v31  ;;  %v3636_v62 = vsel %vm3617_vm8, %v3571_v5, %v5834_v58  ;;  %v3699_v35 = vsel %vm3682_vm9, %v3634_v12, %v5839_v15  ;;  %v1173_v37 = vld [vmem:[#allocation2 + $0x301] sm:$0xff] }
 0x221   : > { %v5850_v52 = vunpack.i.h.bf16 %v5848_v7  ;;  %v5849_v11 = vunpack.i.l.bf16 %v5848_v7  ;;  %v5853_v29 = vpop.permute.xlu0 %5852  ;;  %v3700_v40 = vsel %vm3682_vm9, %v3635_v49, %v5840_v21  ;;  %v3701_v33 = vsel %vm3682_vm9, %v3636_v62, %v5844_v43 }
 0x222   : > { %v5855_v41 = vunpack.i.h.bf16 %v5853_v29  ;;  %v5854_v30 = vunpack.i.l.bf16 %v5853_v29  ;;  %6137 = vrot.lane.b32.xlu1 %v6136_v53, %s6275_s24  ;;  %v3702_v59 = vsel %vm3682_vm9, %v3637_v44, %v5845_v20  ;;  %v3444_v63 = vsel %vm3422_vm4, %v9838_v22, %v5325_v16 }
 0x223   : > { %v3764_v25 = vsel %vm3747_vm10, %v3699_v35, %v5849_v11  ;;  %v3765_v4 = vsel %vm3747_vm10, %v3700_v40, %v5850_v52  ;;  %v3446_v50 = vsel %vm3422_vm4, %v9840_v8, %v5330_v45  ;;  %v5490_v16 = vunpack.i.h.bf16 %v9837_v57  ;;  %v1111_v45 = vld [vmem:[#allocation2 + $0x318] sm:$0xff] }
 0x224   : > { %6142 = vrot.lane.b32.xlu0 %v8707_v3, %s6276_s25  ;;  %v3820_v55 = vpack.c.bf16 %v3765_v4, %v3764_v25  ;;  %v3766_v9 = vsel %vm3747_vm10, %v3701_v33, %v5854_v30  ;;  %v3767_v19 = vsel %vm3747_vm10, %v3702_v59, %v5855_v41  ;;  %v5858_v46 = vpop.permute.xlu1 %5857  ;;  %v3445_v3 = vsel %vm3422_vm4, %v9839_v27, %v5329_v17  ;;  %v1112_v17 = vld [vmem:[#allocation2 + $0x320] sm:$0xff]  ;;  %v1050_v8 = vld [vmem:[#allocation2 + $0x332] sm:$0xff] }
 0x225   : > { %v3821_v47 = vpack.c.bf16 %v3767_v19, %v3766_v9  ;;  %v5863_v61 = vpop.permute.xlu0 %5862  ;;  %v3508_v56 = vsel %vm3487_vm6, %v8673_v23, %v5484_v14  ;;  %v3509_v36 = vsel %vm3487_vm6, %v3444_v63, %v5485_v34  ;;  %v8801_v54 = vpack.i.bf16 %v1047_v39, %v1046_v0  ;;  %v1175_v34 = vld [vmem:[#allocation2 + $0x319] sm:$0xff]  ;;  %v1176_v14 = vld [vmem:[#allocation2 + $0x321] sm:$0xff] }
 0x226   : > { %6147 = vrot.lane.b32.xlu1 %v6146_v1, %s6276_s25  ;;  %4874 = vmatprep.mubr.msk.bf16.mxu0 %vm3880_vm11, %v3820_v55  ;;  %v3510_v24 = vsel %vm3487_vm6, %v3445_v3, %v5489_v26  ;;  %v5645_v38 = vunpack.i.h.bf16 %v9841_v2  ;;  %v5644_v28 = vunpack.i.l.bf16 %v9841_v2  ;;  %v6161_v23 = vpack.i.bf16 %v1110_v48, %v1109_v32  ;;  %v1239_v55 = vld [vmem:[#allocation2 + $0x31a] sm:$0xff]  ;;  %v1240_v9 = vld [vmem:[#allocation2 + $0x322] sm:$0xff] }
 0x227   : > { %4875 = vmatmul.mubr.msk.bf16.gmra.mrb[16].mxu0 %vm3880_vm11, %v3821_v47  ;;  %v5650_v13 = vunpack.i.h.bf16 %v9842_v51  ;;  %v5649_v57 = vunpack.i.l.bf16 %v9842_v51  ;;  %v5860_v31 = vunpack.i.h.bf16 %v5858_v46  ;;  %v5859_v58 = vunpack.i.l.bf16 %v5858_v46  ;;  %v1113_v47 = vld [vmem:[#allocation2 + $0x330] sm:$0xff]  ;;  %v1178_v2 = vld [vmem:[#allocation2 + $0x339] sm:$0xff] }
 0x228   : > { %6152 = vrot.lane.b32.xlu0 %v6146_v1, %s6273_s8  ;;  %v5868_v42 = vpop.permute.xlu1 %5867  ;;  %v3511_v26 = vsel %vm3487_vm6, %v3446_v50, %v5490_v16  ;;  %v5865_v21 = vunpack.i.h.bf16 %v5863_v61  ;;  %v5864_v15 = vunpack.i.l.bf16 %v5863_v61  ;;  %v6166_v60 = vpack.i.bf16 %v1112_v17, %v1111_v45  ;;  %v1051_v50 = vld [vmem:[#allocation2 + $0x33a] sm:$0xff] }
 0x229   : > { %v5873_v53 = vpop.permute.xlu0 %5872  ;;  %v5870_v1 = vunpack.i.h.bf16 %v5868_v42  ;;  %v5869_v10 = vunpack.i.l.bf16 %v5868_v42  ;;  %v6171_v20 = vpack.i.bf16 %v1174_v6, %v1173_v37  ;;  %v6176_v43 = vpack.i.bf16 %v1176_v14, %v1175_v34  ;;  %v1114_v61 = vld [vmem:[#allocation2 + $0x338] sm:$0xff]  ;;  %v1116_v37 = vld [vmem:[#allocation2 + $0x350] sm:$0xff] }
 0x22a   : > { %6157 = vrot.lane.b32.xlu1 %v8801_v54, %s6273_s8  ;;  %v3573_v5 = vsel %vm3552_vm7, %v3508_v56, %v5644_v28  ;;  %v3574_v18 = vsel %vm3552_vm7, %v3509_v36, %v5645_v38  ;;  %v5875_v12 = vunpack.i.h.bf16 %v5873_v53  ;;  %v5874_v49 = vunpack.i.l.bf16 %v5873_v53  ;;  %v1115_v56 = vld [vmem:[#allocation2 + $0x348] sm:$0xff]  ;;  %v9844_v38 = vld [vmem:[#allocation85_spill] sm:$0xff] }
 0x22b   : > { %v3575_v7 = vsel %vm3552_vm7, %v3510_v24, %v5649_v57  ;;  %v3576_v44 = vsel %vm3552_vm7, %v3511_v26, %v5650_v13  ;;  %v3638_v62 = vsel %vm3617_vm8, %v3573_v5, %v5859_v58  ;;  %v3639_v52 = vsel %vm3617_vm8, %v3574_v18, %v5860_v31  ;;  %v9843_v36 = vld [vmem:[#allocation84_spill] sm:$0xff]  ;;  %v1177_v24 = vld [vmem:[#allocation2 + $0x331] sm:$0xff] }
 0x22c   : > { %6162 = vrot.lane.b32.xlu0 %v6161_v23, %s6274_s23  ;;  %v5878_v11 = vpop.permute.xlu1 %5877  ;;  %v3641_v29 = vsel %vm3617_vm8, %v3576_v44, %v5865_v21  ;;  %v3640_v35 = vsel %vm3617_vm8, %v3575_v7, %v5864_v15  ;;  %v3703_v33 = vsel %vm3682_vm9, %v3638_v62, %v5869_v10  ;;  %v3704_v59 = vsel %vm3682_vm9, %v3639_v52, %v5870_v1  ;;  %v9845_v15 = vld [vmem:[#allocation61_spill] sm:$0xff]  ;;  %v9848_v18 = vld [vmem:[#allocation64_spill] sm:$0xff] }
 0x22d   : > { %v5880_v40 = vunpack.i.h.bf16 %v5878_v11  ;;  %v5879_v41 = vunpack.i.l.bf16 %v5878_v11  ;;  %v5883_v30 = vpop.permute.xlu0 %5882  ;;  %v3705_v0 = vsel %vm3682_vm9, %v3640_v35, %v5874_v49  ;;  %v3706_v39 = vsel %vm3682_vm9, %v3641_v29, %v5875_v12 }
 0x22e   : > { %v5885_v25 = vunpack.i.h.bf16 %v5883_v30  ;;  %v5884_v4 = vunpack.i.l.bf16 %v5883_v30  ;;  %6167 = vrot.lane.b32.xlu1 %v6166_v60, %s6274_s23  ;;  %v6186_v16 = vpack.i.bf16 %v1240_v9, %v1239_v55  ;;  %v5655_v45 = vunpack.i.h.bf16 %v9843_v36  ;;  %v9846_v60 = vld [vmem:[#allocation62_spill] sm:$0xff] }
 0x22f   : > { %v3768_v22 = vsel %vm3747_vm10, %v3703_v33, %v5879_v41  ;;  %v3769_v63 = vsel %vm3747_vm10, %v3704_v59, %v5880_v40  ;;  %v5654_v17 = vunpack.i.l.bf16 %v9843_v36  ;;  %v5660_v28 = vunpack.i.h.bf16 %v9844_v38 }
 0x230   : > { %6172 = vrot.lane.b32.xlu0 %v6171_v20, %s6275_s24  ;;  %v3822_v19 = vpack.c.bf16 %v3769_v63, %v3768_v22  ;;  %v3770_v46 = vsel %vm3747_vm10, %v3705_v0, %v5884_v4  ;;  %v3771_v32 = vsel %vm3747_vm10, %v3706_v39, %v5885_v25  ;;  %v5888_v48 = vpop.permute.xlu1 %5887  ;;  %v5659_v23 = vunpack.i.l.bf16 %v9844_v38  ;;  %v1179_v39 = vld [vmem:[#allocation2 + $0x349] sm:$0xff]  ;;  %v1180_v22 = vld [vmem:[#allocation2 + $0x351] sm:$0xff] }
 0x231   : > { %v3823_v27 = vpack.c.bf16 %v3771_v32, %v3770_v46  ;;  %v5893_v3 = vpop.permute.xlu0 %5892  ;;  %v5890_v6 = vunpack.i.h.bf16 %v5888_v48  ;;  %v5889_v34 = vunpack.i.l.bf16 %v5888_v48  ;;  %v8841_v31 = vpack.i.bf16 %v1051_v50, %v1050_v8  ;;  %v1243_v50 = vld [vmem:[#allocation2 + $0x34a] sm:$0xff] }
 0x232   : > { %6177 = vrot.lane.b32.xlu1 %v6176_v43, %s6275_s24  ;;  %4878 = vmatprep.mubr.msk.bf16.mxu0 %vm3880_vm11, %v3822_v19  ;;  %v5895_v51 = vunpack.i.h.bf16 %v5893_v3  ;;  %v5894_v13 = vunpack.i.l.bf16 %v5893_v3  ;;  %v6201_v58 = vpack.i.bf16 %v1114_v61, %v1113_v47  ;;  %v6206_v26 = vpack.i.bf16 %v1116_v37, %v1115_v56  ;;  %v9847_v43 = vld [vmem:[#allocation63_spill] sm:$0xff] }
 0x233   : > { %4879 = vmatmul.mubr.msk.bf16.gmra.mrb[20].mxu0 %vm3880_vm11, %v3823_v27  ;;  %v6211_v21 = vpack.i.bf16 %v1178_v2, %v1177_v24  ;;  %v3577_v53 = vsel %vm3552_vm7, %v9845_v15, %v5654_v17  ;;  %v3578_v1 = vsel %vm3552_vm7, %v9846_v60, %v5655_v45  ;;  %v3579_v5 = vsel %vm3552_vm7, %v9847_v43, %v5659_v23  ;;  %v9849_v27 = vld [vmem:[#allocation90_spill] sm:$0xff]  ;;  %v9850_v47 = vld [vmem:[#allocation91_spill] sm:$0xff] }
 0x234   : > { %6182 = vrot.lane.b32.xlu0 %v8801_v54, %s6276_s25  ;;  %v5898_v14 = vpop.permute.xlu1 %5897  ;;  %v3580_v12 = vsel %vm3552_vm7, %v9848_v18, %v5660_v28  ;;  %v3642_v49 = vsel %vm3617_vm8, %v3577_v53, %v5889_v34  ;;  %v3643_v7 = vsel %vm3617_vm8, %v3578_v1, %v5890_v6  ;;  %v3644_v52 = vsel %vm3617_vm8, %v3579_v5, %v5894_v13  ;;  %v9851_v6 = vld [vmem:[#allocation65_spill] sm:$0xff] }
 0x235   : > { %v5903_v57 = vpop.permute.xlu0 %5902  ;;  %v5900_v42 = vunpack.i.h.bf16 %v5898_v14  ;;  %v5899_v54 = vunpack.i.l.bf16 %v5898_v14  ;;  %v3645_v62 = vsel %vm3617_vm8, %v3580_v12, %v5895_v51  ;;  %v6216_v48 = vpack.i.bf16 %v1180_v22, %v1179_v39  ;;  %v9852_v14 = vld [vmem:[#allocation66_spill] sm:$0xff] }
 0x236   : > { %6187 = vrot.lane.b32.xlu1 %v6186_v16, %s6276_s25  ;;  %v5905_v10 = vunpack.i.h.bf16 %v5903_v57  ;;  %v5904_v20 = vunpack.i.l.bf16 %v5903_v57  ;;  %v5665_v3 = vunpack.i.h.bf16 %v9849_v27  ;;  %v5664_v8 = vunpack.i.l.bf16 %v9849_v27 }
 0x237   : > { %v3707_v40 = vsel %vm3682_vm9, %v3642_v49, %v5899_v54  ;;  %v3708_v41 = vsel %vm3682_vm9, %v3643_v7, %v5900_v42  ;;  %v5670_v61 = vunpack.i.h.bf16 %v9850_v47  ;;  %v5669_v56 = vunpack.i.l.bf16 %v9850_v47  ;;  %v9854_v54 = vld [vmem:[#allocation68_spill] sm:$0xff]  ;;  %v9859_v47 = vld [vmem:[#allocation71_spill] sm:$0xff] }
 0x238   : > { %6192 = vrot.lane.b32.xlu0 %v6186_v16, %s6273_s8  ;;  %v5908_v44 = vpop.permute.xlu1 %5907  ;;  %v3709_v59 = vsel %vm3682_vm9, %v3644_v52, %v5904_v20  ;;  %v3710_v25 = vsel %vm3682_vm9, %v3645_v62, %v5905_v10  ;;  %v1244_v16 = vld [vmem:[#allocation2 + $0x352] sm:$0xff]  ;;  %v3581_v34 = vsel %vm3552_vm7, %v9851_v6, %v5664_v8  ;;  %v3582_v51 = vsel %vm3552_vm7, %v9852_v14, %v5665_v3 }
 0x239   : > { %v5910_v11 = vunpack.i.h.bf16 %v5908_v44  ;;  %v5909_v29 = vunpack.i.l.bf16 %v5908_v44  ;;  %v5913_v35 = vpop.permute.xlu0 %5912  ;;  %v6226_v23 = vpack.i.bf16 %v1244_v16, %v1243_v50  ;;  %v9858_v3 = vld [vmem:[#allocation70_spill] sm:$0xff] }
 0x23a   : > { %v5915_v30 = vunpack.i.h.bf16 %v5913_v35  ;;  %v5914_v33 = vunpack.i.l.bf16 %v5913_v35  ;;  %6197 = vrot.lane.b32.xlu1 %v8841_v31, %s6273_s8 }
 0x23b   : > { %v3772_v4 = vsel %vm3747_vm10, %v3707_v40, %v5909_v29  ;;  %v3773_v0 = vsel %vm3747_vm10, %v3708_v41, %v5910_v11 }
 0x23c   : > { %6202 = vrot.lane.b32.xlu0 %v6201_v58, %s6274_s23  ;;  %v3824_v63 = vpack.c.bf16 %v3773_v0, %v3772_v4  ;;  %v3774_v55 = vsel %vm3747_vm10, %v3709_v59, %v5914_v33  ;;  %v3775_v9 = vsel %vm3747_vm10, %v3710_v25, %v5915_v30  ;;  %v5918_v19 = vpop.permute.xlu1 %5917  ;;  %v9853_v58 = vld [vmem:[#allocation67_spill] sm:$0xff]  ;;  %v9856_v25 = vld [vmem:[#allocation6_spill] sm:$0xff] }
 0x23d   : > { %v3825_v46 = vpack.c.bf16 %v3775_v9, %v3774_v55  ;;  %v5923_v32 = vpop.permute.xlu0 %5922  ;;  %v5920_v36 = vunpack.i.h.bf16 %v5918_v19  ;;  %v5919_v45 = vunpack.i.l.bf16 %v5918_v19  ;;  %v3583_v42 = vsel %vm3552_vm7, %v9853_v58, %v5669_v56  ;;  %v9855_v30 = vld [vmem:[#allocation3_spill] sm:$0xff]  ;;  %v9860_v56 = vld [vmem:[#allocation72_spill] sm:$0xff] }
 0x23e   : > { %6207 = vrot.lane.b32.xlu1 %v6206_v26, %s6274_s23  ;;  %4882 = vmatprep.mubr.msk.bf16.mxu0 %vm3880_vm11, %v3824_v63  ;;  %v5925_v37 = vunpack.i.h.bf16 %v5923_v32  ;;  %v5924_v24 = vunpack.i.l.bf16 %v5923_v32  ;;  %v3584_v26 = vsel %vm3552_vm7, %v9854_v54, %v5670_v61  ;;  %v5675_v33 = vunpack.i.h.bf16 %v9855_v30 }
 0x23f   : > { %4883 = vmatmul.mubr.msk.bf16.gmra.mrb[24].mxu0 %vm3880_vm11, %v3825_v46  ;;  %v3647_v15 = vsel %vm3617_vm8, %v3582_v51, %v5920_v36  ;;  %v5674_v59 = vunpack.i.l.bf16 %v9855_v30  ;;  %v5680_v4 = vunpack.i.h.bf16 %v9856_v25  ;;  %v5679_v0 = vunpack.i.l.bf16 %v9856_v25 }
 0x240   : > { %6212 = vrot.lane.b32.xlu0 %v6211_v21, %s6275_s24  ;;  %v5928_v17 = vpop.permute.xlu1 %5927  ;;  %v3646_v21 = vsel %vm3617_vm8, %v3581_v34, %v5919_v45  ;;  %v3649_v60 = vsel %vm3617_vm8, %v3584_v26, %v5925_v37  ;;  %v3648_v1 = vsel %vm3617_vm8, %v3583_v42, %v5924_v24  ;;  %v3586_v8 = vsel %vm3552_vm7, %v9858_v3, %v5675_v33 }
 0x241   : > { %v5933_v2 = vpop.permute.xlu0 %5932  ;;  %v5930_v38 = vunpack.i.h.bf16 %v5928_v17  ;;  %v5929_v28 = vunpack.i.l.bf16 %v5928_v17  ;;  %v3587_v61 = vsel %vm3552_vm7, %v9859_v47, %v5679_v0  ;;  %v3588_v36 = vsel %vm3552_vm7, %v9860_v56, %v5680_v4  ;;  %v9866_v4 = vld [vmem:[#allocation73_spill] sm:$0xff] }
 0x242   : > { %6217 = vrot.lane.b32.xlu1 %v6216_v48, %s6275_s24  ;;  %v5935_v13 = vunpack.i.h.bf16 %v5933_v2  ;;  %v5934_v57 = vunpack.i.l.bf16 %v5933_v2  ;;  %v9857_v48 = vld [vmem:[#allocation69_spill] sm:$0xff] }
 0x243   : > { %v3712_v5 = vsel %vm3682_vm9, %v3647_v15, %v5930_v38  ;;  %v3585_v27 = vsel %vm3552_vm7, %v9857_v48, %v5674_v59  ;;  %v9865_v59 = vld [vmem:[#allocation95_spill] sm:$0xff] }
 0x244   : > { %6222 = vrot.lane.b32.xlu0 %v8841_v31, %s6276_s25  ;;  %v5938_v53 = vpop.permute.xlu1 %5937  ;;  %v3711_v31 = vsel %vm3682_vm9, %v3646_v21, %v5929_v28  ;;  %v3713_v49 = vsel %vm3682_vm9, %v3648_v1, %v5934_v57  ;;  %v3714_v7 = vsel %vm3682_vm9, %v3649_v60, %v5935_v13  ;;  %v9861_v1 = vld [vmem:[#allocation8_spill] sm:$0xff] }
 0x245   : > { %v5940_v10 = vunpack.i.h.bf16 %v5938_v53  ;;  %v5939_v20 = vunpack.i.l.bf16 %v5938_v53  ;;  %v5943_v43 = vpop.permute.xlu0 %5942 }
 0x246   : > { %v5945_v18 = vunpack.i.h.bf16 %v5943_v43  ;;  %v5944_v12 = vunpack.i.l.bf16 %v5943_v43  ;;  %6227 = vrot.lane.b32.xlu1 %v6226_v23, %s6276_s25  ;;  %v9862_v43 = vld [vmem:[#allocation93_spill] sm:$0xff] }
 0x247   : > { %v3776_v44 = vsel %vm3747_vm10, %v3711_v31, %v5939_v20  ;;  %v3777_v62 = vsel %vm3747_vm10, %v3712_v5, %v5940_v10  ;;  %v5685_v10 = vunpack.i.h.bf16 %v9861_v1  ;;  %v5684_v20 = vunpack.i.l.bf16 %v9861_v1 }
 0x248   : > { %v3826_v52 = vpack.c.bf16 %v3777_v62, %v3776_v44  ;;  %v3778_v11 = vsel %vm3747_vm10, %v3713_v49, %v5944_v12  ;;  %v3779_v29 = vsel %vm3747_vm10, %v3714_v7, %v5945_v18  ;;  %v5948_v35 = vpop.permute.xlu1 %5947  ;;  %v5690_v31 = vunpack.i.h.bf16 %v9862_v43 }
 0x249   : > { %v3827_v40 = vpack.c.bf16 %v3779_v29, %v3778_v11  ;;  %v5953_v41 = vpop.permute.xlu0 %5952  ;;  %v5950_v39 = vunpack.i.h.bf16 %v5948_v35  ;;  %v5949_v22 = vunpack.i.l.bf16 %v5948_v35  ;;  %v5689_v5 = vunpack.i.l.bf16 %v9862_v43  ;;  %v9863_v29 = vld [vmem:[#allocation24_spill] sm:$0xff] }
 0x24a   : > { %4886 = vmatprep.mubr.msk.bf16.mxu0 %vm3880_vm11, %v3826_v52  ;;  %v5955_v55 = vunpack.i.h.bf16 %v5953_v41  ;;  %v5954_v9 = vunpack.i.l.bf16 %v5953_v41  ;;  %v3589_v35 = vsel %vm3552_vm7, %v9863_v29, %v5684_v20  ;;  %v3592_v0 = vsel %vm3552_vm7, %v9866_v4, %v5690_v31  ;;  %v9871_v20 = vld [vmem:[#allocation28_spill] sm:$0xff]  ;;  %v9872_v31 = vld [vmem:[#allocation74_spill] sm:$0xff] }
 0x24b   : > { %4887 = vmatmul.mubr.msk.bf16.gmra.mrb[28].mxu0 %vm3880_vm11, %v3827_v40  ;;  %v3650_v45 = vsel %vm3617_vm8, %v3585_v27, %v5949_v22  ;;  %v3651_v17 = vsel %vm3617_vm8, %v3586_v8, %v5950_v39  ;;  %v9864_v40 = vld [vmem:[#allocation96_spill] sm:$0xff]  ;;  %v3591_v25 = vsel %vm3552_vm7, %v9865_v59, %v5689_v5 }
 0x24c   : > { %v5958_v63 = vpop.permute.xlu1 %5957  ;;  %v3653_v24 = vsel %vm3617_vm8, %v3588_v36, %v5955_v55  ;;  %v3652_v2 = vsel %vm3617_vm8, %v3587_v61, %v5954_v9  ;;  %v3590_v41 = vsel %vm3552_vm7, %v9864_v40, %v5685_v10 }
 0x24d   : > { %v5963_v19 = vpop.permute.xlu0 %5962  ;;  %v5960_v46 = vunpack.i.h.bf16 %v5958_v63  ;;  %v5959_v32 = vunpack.i.l.bf16 %v5958_v63 }
 0x24e   : > { %v5965_v50 = vunpack.i.h.bf16 %v5963_v19  ;;  %v5964_v16 = vunpack.i.l.bf16 %v5963_v19 }
 0x24f   : > { %v3715_v14 = vsel %vm3682_vm9, %v3650_v45, %v5959_v32  ;;  %v3716_v51 = vsel %vm3682_vm9, %v3651_v17, %v5960_v46 }
 0x250   : > { %v5968_v37 = vpop.permute.xlu1 %5967  ;;  %v3717_v13 = vsel %vm3682_vm9, %v3652_v2, %v5964_v16  ;;  %v3718_v57 = vsel %vm3682_vm9, %v3653_v24, %v5965_v50  ;;  %v9867_v2 = vld [vmem:[#allocation9_spill] sm:$0xff] }
 0x251   : > { %v5970_v38 = vunpack.i.h.bf16 %v5968_v37  ;;  %v5969_v28 = vunpack.i.l.bf16 %v5968_v37  ;;  %v5973_v23 = vpop.permute.xlu0 %5972 }
 0x252   : > { %v5975_v6 = vunpack.i.h.bf16 %v5973_v23  ;;  %v5974_v34 = vunpack.i.l.bf16 %v5973_v23  ;;  %v9868_v23 = vld [vmem:[#allocation94_spill] sm:$0xff] }
 0x253   : > { %v3780_v58 = vsel %vm3747_vm10, %v3715_v14, %v5969_v28  ;;  %v3781_v42 = vsel %vm3747_vm10, %v3716_v51, %v5970_v38  ;;  %v5695_v38 = vunpack.i.h.bf16 %v9867_v2  ;;  %v5694_v28 = vunpack.i.l.bf16 %v9867_v2 }
 0x254   : > { %v3782_v54 = vsel %vm3747_vm10, %v3717_v13, %v5974_v34  ;;  %v3783_v26 = vsel %vm3747_vm10, %v3718_v57, %v5975_v6  ;;  %v5978_v21 = vpop.permute.xlu1 %5977  ;;  %v3828_v15 = vpack.c.bf16 %v3781_v42, %v3780_v58  ;;  %v5700_v6 = vunpack.i.h.bf16 %v9868_v23 }
 0x255   : > { %v3829_v53 = vpack.c.bf16 %v3783_v26, %v3782_v54  ;;  %v5983_v60 = vpop.permute.xlu0 %5982  ;;  %v5980_v18 = vunpack.i.h.bf16 %v5978_v21  ;;  %v5979_v12 = vunpack.i.l.bf16 %v5978_v21  ;;  %v5699_v34 = vunpack.i.l.bf16 %v9868_v23  ;;  %v9869_v21 = vld [vmem:[#allocation97_spill] sm:$0xff] }
 0x256   : > { %4890 = vmatprep.mubr.msk.bf16.mxu1 %vm3880_vm11, %v3828_v15  ;;  %v5985_v7 = vunpack.i.h.bf16 %v5983_v60  ;;  %v5984_v44 = vunpack.i.l.bf16 %v5983_v60  ;;  %v3593_v15 = vsel %vm3552_vm7, %v9869_v21, %v5694_v28  ;;  %v3596_v5 = vsel %vm3552_vm7, %v9872_v31, %v5700_v6 }
 0x257   : > { %4891 = vmatmul.mubr.msk.bf16.vlgmr.msra.gmra.mrb[0].mxu1 %vm3880_vm11, %v3829_v53  ;;  %v3654_v39 = vsel %vm3617_vm8, %v3589_v35, %v5979_v12  ;;  %v3655_v22 = vsel %vm3617_vm8, %v3590_v41, %v5980_v18  ;;  %v9870_v53 = vld [vmem:[#allocation75_spill] sm:$0xff]  ;;  %v3595_v43 = vsel %vm3552_vm7, %v9871_v20, %v5699_v34 }
 0x258   : > { %v5988_v49 = vpop.permute.xlu1 %5987  ;;  %v3657_v55 = vsel %vm3617_vm8, %v3592_v0, %v5985_v7  ;;  %v3656_v9 = vsel %vm3617_vm8, %v3591_v25, %v5984_v44  ;;  %v3594_v60 = vsel %vm3552_vm7, %v9870_v53, %v5695_v38 }
 0x259   : > { %v5993_v62 = vpop.permute.xlu0 %5992  ;;  %v5990_v52 = vunpack.i.h.bf16 %v5988_v49  ;;  %v5989_v11 = vunpack.i.l.bf16 %v5988_v49 }
 0x25a   : > { %v5995_v30 = vunpack.i.h.bf16 %v5993_v62  ;;  %v5994_v33 = vunpack.i.l.bf16 %v5993_v62 }
 0x25b   : > { %v3719_v48 = vsel %vm3682_vm9, %v3654_v39, %v5989_v11  ;;  %v3720_v27 = vsel %vm3682_vm9, %v3655_v22, %v5990_v52 }
 0x25c   : > { %v5998_v63 = vpop.permute.xlu1 %5997  ;;  %v3721_v50 = vsel %vm3682_vm9, %v3656_v9, %v5994_v33  ;;  %v3722_v16 = vsel %vm3682_vm9, %v3657_v55, %v5995_v30  ;;  %v9873_v9 = vld [vmem:[#allocation10_spill] sm:$0xff] }
 0x25d   : > { %v6000_v19 = vunpack.i.h.bf16 %v5998_v63  ;;  %v5999_v46 = vunpack.i.l.bf16 %v5998_v63  ;;  %v6003_v32 = vpop.permute.xlu0 %6002 }
 0x25e   : > { %v6005_v3 = vunpack.i.h.bf16 %v6003_v32  ;;  %v6004_v8 = vunpack.i.l.bf16 %v6003_v32 }
 0x25f   : > { %v3784_v47 = vsel %vm3747_vm10, %v3719_v48, %v5999_v46  ;;  %v3785_v61 = vsel %vm3747_vm10, %v3720_v27, %v6000_v19  ;;  %v5705_v19 = vunpack.i.h.bf16 %v9873_v9  ;;  %v5704_v46 = vunpack.i.l.bf16 %v9873_v9 }
 0x260   : > { %v3830_v56 = vpack.c.bf16 %v3785_v61, %v3784_v47  ;;  %v3786_v36 = vsel %vm3747_vm10, %v3721_v50, %v6004_v8  ;;  %v3787_v45 = vsel %vm3747_vm10, %v3722_v16, %v6005_v3  ;;  %v6008_v17 = vpop.permute.xlu1 %6007  ;;  %v9874_v47 = vld [vmem:[#allocation30_spill] sm:$0xff] }
 0x261   : > { %v3831_v37 = vpack.c.bf16 %v3787_v45, %v3786_v36  ;;  %v6013_v24 = vpop.permute.xlu0 %6012  ;;  %v6010_v14 = vunpack.i.h.bf16 %v6008_v17  ;;  %v6009_v51 = vunpack.i.l.bf16 %v6008_v17  ;;  %v3597_v61 = vsel %vm3552_vm7, %v9874_v47, %v5704_v46 }
 0x262   : > { %4894 = vmatprep.mubr.msk.bf16.mxu1 %vm3880_vm11, %v3830_v56  ;;  %v6015_v57 = vunpack.i.h.bf16 %v6013_v24  ;;  %v6014_v58 = vunpack.i.l.bf16 %v6013_v24  ;;  %v9875_v56 = vld [vmem:[#allocation29_spill] sm:$0xff] }
 0x263   : > { %4895 = vmatmul.mubr.msk.bf16.gmra.mrb[4].mxu1 %vm3880_vm11, %v3831_v37  ;;  %v3658_v18 = vsel %vm3617_vm8, %v3593_v15, %v6009_v51  ;;  %v3659_v12 = vsel %vm3617_vm8, %v3594_v60, %v6010_v14  ;;  %v3598_v36 = vsel %vm3552_vm7, %v9875_v56, %v5705_v19  ;;  %v9876_v51 = vld [vmem:[#allocation21_spill] sm:$0xff] }
 0x264   : > { %v6018_v13 = vpop.permute.xlu1 %6017  ;;  %v3661_v7 = vsel %vm3617_vm8, %v3596_v5, %v6015_v57  ;;  %v3660_v44 = vsel %vm3617_vm8, %v3595_v43, %v6014_v58 }
 0x265   : > { %v6023_v42 = vpop.permute.xlu0 %6022  ;;  %v6020_v54 = vunpack.i.h.bf16 %v6018_v13  ;;  %v6019_v26 = vunpack.i.l.bf16 %v6018_v13 }
 0x266   : > { %v6025_v1 = vunpack.i.h.bf16 %v6023_v42  ;;  %v6024_v10 = vunpack.i.l.bf16 %v6023_v42  ;;  %v9877_v42 = vld [vmem:[#allocation18_spill] sm:$0xff] }
 0x267   : > { %v3723_v29 = vsel %vm3682_vm9, %v3658_v18, %v6019_v26  ;;  %v3724_v35 = vsel %vm3682_vm9, %v3659_v12, %v6020_v54 }
 0x268   : > { %v6028_v49 = vpop.permute.xlu1 %6027  ;;  %v3725_v30 = vsel %vm3682_vm9, %v3660_v44, %v6024_v10  ;;  %v3726_v33 = vsel %vm3682_vm9, %v3661_v7, %v6025_v1 }
 0x269   : > { %v6030_v62 = vunpack.i.h.bf16 %v6028_v49  ;;  %v6029_v52 = vunpack.i.l.bf16 %v6028_v49 }
 0x26a   : > { %v6033_v11 = vpop.permute.xlu0 %6032 }
 0x26b   : > { %v6035_v40 = vunpack.i.h.bf16 %v6033_v11  ;;  %v6034_v41 = vunpack.i.l.bf16 %v6033_v11  ;;  %v3788_v59 = vsel %vm3747_vm10, %v3723_v29, %v6029_v52  ;;  %v3789_v25 = vsel %vm3747_vm10, %v3724_v35, %v6030_v62 }
 0x26c   : > { %v3832_v4 = vpack.c.bf16 %v3789_v25, %v3788_v59  ;;  %v6038_v22 = vpop.permute.xlu1 %6037  ;;  %v9878_v59 = vld [vmem:[#allocation34_spill] sm:$0xff] }
 0x26d   : > { %v3790_v0 = vsel %vm3747_vm10, %v3725_v30, %v6034_v41  ;;  %v3791_v39 = vsel %vm3747_vm10, %v3726_v33, %v6035_v40  ;;  %v6039_v8 = vunpack.i.l.bf16 %v6038_v22  ;;  %v6040_v45 = vunpack.i.h.bf16 %v6038_v22 }
 0x26e   : > { %v3833_v63 = vpack.c.bf16 %v3791_v39, %v3790_v0  ;;  %v6043_v55 = vpop.permute.xlu0 %6042  ;;  %4898 = vmatprep.mubr.msk.bf16.mxu1 %vm3880_vm11, %v3832_v4  ;;  %v9879_v4 = vld [vmem:[#allocation19_spill] sm:$0xff] }
 0x26f   : > { %v6045_v48 = vunpack.i.h.bf16 %v6043_v55  ;;  %v6044_v27 = vunpack.i.l.bf16 %v6043_v55  ;;  %v3599_v13 = vsel %vm3552_vm7, %v9876_v51, %v6039_v8  ;;  %v3600_v54 = vsel %vm3552_vm7, %v9877_v42, %v6040_v45  ;;  %v9880_v8 = vld [vmem:[#allocation20_spill] sm:$0xff] }
 0x270   : > { %4899 = vmatmul.mubr.msk.bf16.gmra.mrb[8].mxu1 %vm3880_vm11, %v3833_v63  ;;  %v6048_v32 = vpop.permute.xlu1 %6047 }
 0x271   : > { %v6049_v17 = vunpack.i.l.bf16 %v6048_v32  ;;  %v3662_v24 = vsel %vm3617_vm8, %v3597_v61, %v6044_v27  ;;  %v3663_v2 = vsel %vm3617_vm8, %v3598_v36, %v6045_v48  ;;  %v6050_v38 = vunpack.i.h.bf16 %v6048_v32  ;;  %v9881_v61 = vld [vmem:[#allocation37_spill] sm:$0xff] }
 0x272   : > { %v6053_v3 = vpop.permute.xlu0 %6052 }
 0x273   : > { %v6055_v50 = vunpack.i.h.bf16 %v6053_v3  ;;  %v6054_v16 = vunpack.i.l.bf16 %v6053_v3  ;;  %v3664_v26 = vsel %vm3617_vm8, %v3599_v13, %v6049_v17  ;;  %v3665_v60 = vsel %vm3617_vm8, %v3600_v54, %v6050_v38 }
 0x274   : > { %v6058_v37 = vpop.permute.xlu1 %6057 }
 0x275   : > { %v6060_v23 = vunpack.i.h.bf16 %v6058_v37  ;;  %v6059_v6 = vunpack.i.l.bf16 %v6058_v37  ;;  %v3727_v57 = vsel %vm3682_vm9, %v3662_v24, %v6054_v16  ;;  %v3728_v58 = vsel %vm3682_vm9, %v3663_v2, %v6055_v50 }
 0x276   : > { %v6063_v28 = vpop.permute.xlu0 %6062 }
 0x277   : > { %v6065_v34 = vunpack.i.h.bf16 %v6063_v28  ;;  %v6064_v14 = vunpack.i.l.bf16 %v6063_v28  ;;  %v3729_v31 = vsel %vm3682_vm9, %v3664_v26, %v6059_v6  ;;  %v3730_v5 = vsel %vm3682_vm9, %v3665_v60, %v6060_v23 }
 0x278   : > { %v6068_v53 = vpop.permute.xlu1 %6067 }
 0x279   : > { %v3792_v21 = vsel %vm3747_vm10, %v3727_v57, %v6064_v14  ;;  %v3793_v15 = vsel %vm3747_vm10, %v3728_v58, %v6065_v34  ;;  %v6070_v10 = vunpack.i.h.bf16 %v6068_v53  ;;  %v6069_v20 = vunpack.i.l.bf16 %v6068_v53 }
 0x27a   : > { %v3834_v1 = vpack.c.bf16 %v3793_v15, %v3792_v21  ;;  %v6073_v43 = vpop.permute.xlu0 %6072 }
 0x27b   : > { %v3794_v18 = vsel %vm3747_vm10, %v3729_v31, %v6069_v20  ;;  %v3795_v12 = vsel %vm3747_vm10, %v3730_v5, %v6070_v10  ;;  %v6075_v62 = vunpack.i.h.bf16 %v6073_v43  ;;  %v6074_v52 = vunpack.i.l.bf16 %v6073_v43  ;;  %v9882_v20 = vld [vmem:[#allocation76_spill] sm:$0xff] }
 0x27c   : > { %4902 = vmatprep.mubr.msk.bf16.mxu1 %vm3880_vm11, %v3834_v1  ;;  %v3835_v49 = vpack.c.bf16 %v3795_v12, %v3794_v18  ;;  %v6078_v7 = vpop.permute.xlu1 %6077  ;;  %v9883_v31 = vld [vmem:[#allocation36_spill] sm:$0xff] }
 0x27d   : > { %v6079_v41 = vunpack.i.l.bf16 %v6078_v7  ;;  %v3601_v25 = vsel %vm3552_vm7, %v9878_v59, %v6074_v52  ;;  %v3602_v0 = vsel %vm3552_vm7, %v9879_v4, %v6075_v62  ;;  %v6080_v39 = vunpack.i.h.bf16 %v6078_v7 }
 0x27e   : > { %v6083_v44 = vpop.permute.xlu0 %6082  ;;  %4903 = vmatmul.mubr.msk.bf16.gmra.mrb[12].mxu1 %vm3880_vm11, %v3835_v49 }
 0x27f   : > { %v6085_v29 = vunpack.i.h.bf16 %v6083_v44  ;;  %v6084_v35 = vunpack.i.l.bf16 %v6083_v44  ;;  %v3603_v50 = vsel %vm3552_vm7, %v9880_v8, %v6079_v41  ;;  %v3604_v56 = vsel %vm3552_vm7, %v9881_v61, %v6080_v39  ;;  %v9884_v41 = vld [vmem:[#allocation77_spill] sm:$0xff] }
 0x280   : > { %v6088_v11 = vpop.permute.xlu1 %6087 }
 0x281   : > { %v6089_v22 = vunpack.i.l.bf16 %v6088_v11  ;;  %v3666_v55 = vsel %vm3617_vm8, %v3601_v25, %v6084_v35  ;;  %v3667_v9 = vsel %vm3617_vm8, %v3602_v0, %v6085_v29  ;;  %v6090_v19 = vunpack.i.h.bf16 %v6088_v11  ;;  %v9885_v25 = vld [vmem:[#allocation27_spill] sm:$0xff] }
 0x282   : > { %v6093_v40 = vpop.permute.xlu0 %6092 }
 0x283   : > { %v6095_v30 = vunpack.i.h.bf16 %v6093_v40  ;;  %v6094_v33 = vunpack.i.l.bf16 %v6093_v40  ;;  %v3668_v36 = vsel %vm3617_vm8, %v3603_v50, %v6089_v22  ;;  %v3669_v24 = vsel %vm3617_vm8, %v3604_v56, %v6090_v19 }
 0x284   : > { %v6098_v63 = vpop.permute.xlu1 %6097 }
 0x285   : > { %v6100_v32 = vunpack.i.h.bf16 %v6098_v63  ;;  %v6099_v48 = vunpack.i.l.bf16 %v6098_v63  ;;  %v3731_v16 = vsel %vm3682_vm9, %v3666_v55, %v6094_v33  ;;  %v3732_v47 = vsel %vm3682_vm9, %v3667_v9, %v6095_v30 }
 0x286   : > { %v6103_v46 = vpop.permute.xlu0 %6102 }
 0x287   : > { %v6105_v27 = vunpack.i.h.bf16 %v6103_v46  ;;  %v6104_v3 = vunpack.i.l.bf16 %v6103_v46  ;;  %v3733_v6 = vsel %vm3682_vm9, %v3668_v36, %v6099_v48  ;;  %v3734_v34 = vsel %vm3682_vm9, %v3669_v24, %v6100_v32 }
 0x288   : > { %v6108_v37 = vpop.permute.xlu1 %6107 }
 0x289   : > { %v3796_v45 = vsel %vm3747_vm10, %v3731_v16, %v6104_v3  ;;  %v3797_v17 = vsel %vm3747_vm10, %v3732_v47, %v6105_v27  ;;  %v6110_v38 = vunpack.i.h.bf16 %v6108_v37  ;;  %v6109_v28 = vunpack.i.l.bf16 %v6108_v37 }
 0x28a   : > { %v3836_v2 = vpack.c.bf16 %v3797_v17, %v3796_v45  ;;  %v6113_v23 = vpop.permute.xlu0 %6112 }
 0x28b   : > { %v3798_v14 = vsel %vm3747_vm10, %v3733_v6, %v6109_v28  ;;  %v3799_v51 = vsel %vm3747_vm10, %v3734_v34, %v6110_v38  ;;  %v6115_v42 = vunpack.i.h.bf16 %v6113_v23  ;;  %v6114_v54 = vunpack.i.l.bf16 %v6113_v23  ;;  %v9886_v28 = vld [vmem:[#allocation23_spill] sm:$0xff]  ;;  %v9887_v6 = vld [vmem:[#allocation25_spill] sm:$0xff] }
 0x28c   : > { %4906 = vmatprep.mubr.msk.bf16.mxu1 %vm3880_vm11, %v3836_v2  ;;  %v3837_v13 = vpack.c.bf16 %v3799_v51, %v3798_v14  ;;  %v6118_v57 = vpop.permute.xlu1 %6117 }
 0x28d   : > { %v6119_v60 = vunpack.i.l.bf16 %v6118_v57  ;;  %v3605_v43 = vsel %vm3552_vm7, %v9882_v20, %v6114_v54  ;;  %v3606_v5 = vsel %vm3552_vm7, %v9883_v31, %v6115_v42  ;;  %v6120_v18 = vunpack.i.h.bf16 %v6118_v57 }
 0x28e   : > { %v6123_v58 = vpop.permute.xlu0 %6122  ;;  %4907 = vmatmul.mubr.msk.bf16.gmra.mrb[16].mxu1 %vm3880_vm11, %v3837_v13 }
 0x28f   : > { %v6125_v21 = vunpack.i.h.bf16 %v6123_v58  ;;  %v6124_v15 = vunpack.i.l.bf16 %v6123_v58  ;;  %v3607_v30 = vsel %vm3552_vm7, %v9884_v41, %v6119_v60  ;;  %v3608_v4 = vsel %vm3552_vm7, %v9885_v25, %v6120_v18  ;;  %v9888_v60 = vld [vmem:[#allocation26_spill] sm:$0xff] }
 0x290   : > { %v6128_v26 = vpop.permute.xlu1 %6127 }
 0x291   : > { %v6129_v12 = vunpack.i.l.bf16 %v6128_v26  ;;  %v3670_v7 = vsel %vm3617_vm8, %v3605_v43, %v6124_v15  ;;  %v3671_v44 = vsel %vm3617_vm8, %v3606_v5, %v6125_v21  ;;  %v6130_v62 = vunpack.i.h.bf16 %v6128_v26  ;;  %v9889_v43 = vld [vmem:[#allocation35_spill] sm:$0xff] }
 0x292   : > { %v6133_v53 = vpop.permute.xlu0 %6132 }
 0x293   : > { %v6135_v1 = vunpack.i.h.bf16 %v6133_v53  ;;  %v6134_v10 = vunpack.i.l.bf16 %v6133_v53  ;;  %v3672_v0 = vsel %vm3617_vm8, %v3607_v30, %v6129_v12  ;;  %v3673_v55 = vsel %vm3617_vm8, %v3608_v4, %v6130_v62 }
 0x294   : > { %v6138_v49 = vpop.permute.xlu1 %6137 }
 0x295   : > { %v6140_v11 = vunpack.i.h.bf16 %v6138_v49  ;;  %v6139_v29 = vunpack.i.l.bf16 %v6138_v49  ;;  %v3735_v33 = vsel %vm3682_vm9, %v3670_v7, %v6134_v10  ;;  %v3736_v59 = vsel %vm3682_vm9, %v3671_v44, %v6135_v1 }
 0x296   : > { %v6143_v52 = vpop.permute.xlu0 %6142 }
 0x297   : > { %v6145_v35 = vunpack.i.h.bf16 %v6143_v52  ;;  %v6144_v40 = vunpack.i.l.bf16 %v6143_v52  ;;  %v3737_v48 = vsel %vm3682_vm9, %v3672_v0, %v6139_v29  ;;  %v3738_v27 = vsel %vm3682_vm9, %v3673_v55, %v6140_v11 }
 0x298   : > { %v6148_v63 = vpop.permute.xlu1 %6147 }
 0x299   : > { %v3800_v39 = vsel %vm3747_vm10, %v3735_v33, %v6144_v40  ;;  %v3801_v22 = vsel %vm3747_vm10, %v3736_v59, %v6145_v35  ;;  %v6150_v19 = vunpack.i.h.bf16 %v6148_v63  ;;  %v6149_v46 = vunpack.i.l.bf16 %v6148_v63 }
 0x29a   : > { %v3838_v9 = vpack.c.bf16 %v3801_v22, %v3800_v39  ;;  %v6153_v32 = vpop.permute.xlu0 %6152 }
 0x29b   : > { %v3802_v3 = vsel %vm3747_vm10, %v3737_v48, %v6149_v46  ;;  %v3803_v8 = vsel %vm3747_vm10, %v3738_v27, %v6150_v19  ;;  %v6155_v61 = vunpack.i.h.bf16 %v6153_v32  ;;  %v6154_v56 = vunpack.i.l.bf16 %v6153_v32  ;;  %v9890_v46 = vld [vmem:[#allocation78_spill] sm:$0xff]  ;;  %v9891_v48 = vld [vmem:[#allocation32_spill] sm:$0xff] }
 0x29c   : > { %4910 = vmatprep.mubr.msk.bf16.mxu1 %vm3880_vm11, %v3838_v9  ;;  %v3839_v50 = vpack.c.bf16 %v3803_v8, %v3802_v3  ;;  %v6158_v16 = vpop.permute.xlu1 %6157 }
 0x29d   : > { %v6159_v24 = vunpack.i.l.bf16 %v6158_v16  ;;  %v3609_v23 = vsel %vm3552_vm7, %v9886_v28, %v6154_v56  ;;  %v3610_v34 = vsel %vm3552_vm7, %v9887_v6, %v6155_v61  ;;  %v6160_v14 = vunpack.i.h.bf16 %v6158_v16 }
 0x29e   : > { %v6163_v47 = vpop.permute.xlu0 %6162  ;;  %4911 = vmatmul.mubr.msk.bf16.gmra.mrb[20].mxu1 %vm3880_vm11, %v3839_v50 }
 0x29f   : > { %v6165_v45 = vunpack.i.h.bf16 %v6163_v47  ;;  %v6164_v17 = vunpack.i.l.bf16 %v6163_v47  ;;  %v3611_v1 = vsel %vm3552_vm7, %v9888_v60, %v6159_v24  ;;  %v3612_v31 = vsel %vm3552_vm7, %v9889_v43, %v6160_v14  ;;  %v9892_v24 = vld [vmem:[#allocation51_spill] sm:$0xff] }
 0x2a0   : > { %v6168_v36 = vpop.permute.xlu1 %6167 }
 0x2a1   : > { %v6169_v51 = vunpack.i.l.bf16 %v6168_v36  ;;  %v3674_v57 = vsel %vm3617_vm8, %v3609_v23, %v6164_v17  ;;  %v3675_v58 = vsel %vm3617_vm8, %v3610_v34, %v6165_v45  ;;  %v6170_v42 = vunpack.i.h.bf16 %v6168_v36  ;;  %v9893_v23 = vld [vmem:[#allocation52_spill] sm:$0xff] }
 0x2a2   : > { %v6173_v37 = vpop.permute.xlu0 %6172 }
 0x2a3   : > { %v6175_v2 = vunpack.i.h.bf16 %v6173_v37  ;;  %v6174_v38 = vunpack.i.l.bf16 %v6173_v37  ;;  %v3676_v5 = vsel %vm3617_vm8, %v3611_v1, %v6169_v51  ;;  %v3677_v7 = vsel %vm3617_vm8, %v3612_v31, %v6170_v42 }
 0x2a4   : > { %v6178_v13 = vpop.permute.xlu1 %6177 }
 0x2a5   : > { %v6180_v26 = vunpack.i.h.bf16 %v6178_v13  ;;  %v6179_v21 = vunpack.i.l.bf16 %v6178_v13  ;;  %v3739_v10 = vsel %vm3682_vm9, %v3674_v57, %v6174_v38  ;;  %v3740_v20 = vsel %vm3682_vm9, %v3675_v58, %v6175_v2 }
 0x2a6   : > { %v6183_v54 = vpop.permute.xlu0 %6182 }
 0x2a7   : > { %v6185_v15 = vunpack.i.h.bf16 %v6183_v54  ;;  %v6184_v53 = vunpack.i.l.bf16 %v6183_v54  ;;  %v3741_v29 = vsel %vm3682_vm9, %v3676_v5, %v6179_v21  ;;  %v3742_v35 = vsel %vm3682_vm9, %v3677_v7, %v6180_v26 }
 0x2a8   : > { %v6188_v49 = vpop.permute.xlu1 %6187 }
 0x2a9   : > { %v3804_v18 = vsel %vm3747_vm10, %v3739_v10, %v6184_v53  ;;  %v3805_v12 = vsel %vm3747_vm10, %v3740_v20, %v6185_v15  ;;  %v6190_v62 = vunpack.i.h.bf16 %v6188_v49  ;;  %v6189_v52 = vunpack.i.l.bf16 %v6188_v49 }
 0x2aa   : > { %v3840_v44 = vpack.c.bf16 %v3805_v12, %v3804_v18  ;;  %v6193_v11 = vpop.permute.xlu0 %6192 }
 0x2ab   : > { %v3806_v40 = vsel %vm3747_vm10, %v3741_v29, %v6189_v52  ;;  %v3807_v41 = vsel %vm3747_vm10, %v3742_v35, %v6190_v62  ;;  %v6195_v25 = vunpack.i.h.bf16 %v6193_v11  ;;  %v6194_v4 = vunpack.i.l.bf16 %v6193_v11 }
 0x2ac   : > { %4914 = vmatprep.mubr.msk.bf16.mxu1 %vm3880_vm11, %v3840_v44  ;;  %v3841_v30 = vpack.c.bf16 %v3807_v41, %v3806_v40  ;;  %v6198_v33 = vpop.permute.xlu1 %6197 }
 0x2ad   : > { %v6199_v55 = vunpack.i.l.bf16 %v6198_v33  ;;  %v3613_v32 = vsel %vm3552_vm7, %v9890_v46, %v6194_v4  ;;  %v3614_v27 = vsel %vm3552_vm7, %v9891_v48, %v6195_v25  ;;  %v6200_v3 = vunpack.i.h.bf16 %v6198_v33 }
 0x2ae   : > { %v6203_v59 = vpop.permute.xlu0 %6202  ;;  %4915 = vmatmul.mubr.msk.bf16.gmra.mrb[24].mxu1 %vm3880_vm11, %v3841_v30 }
 0x2af   : > { %v6205_v39 = vunpack.i.h.bf16 %v6203_v59  ;;  %v6204_v22 = vunpack.i.l.bf16 %v6203_v59  ;;  %v3615_v2 = vsel %vm3552_vm7, %v9892_v24, %v6199_v55  ;;  %v3616_v6 = vsel %vm3552_vm7, %v9893_v23, %v6200_v3 }
 0x2b0   : > { %v6208_v0 = vpop.permute.xlu1 %6207 }
 0x2b1   : > { %v6209_v8 = vunpack.i.l.bf16 %v6208_v0  ;;  %v3678_v16 = vsel %vm3617_vm8, %v3613_v32, %v6204_v22  ;;  %v3679_v47 = vsel %vm3617_vm8, %v3614_v27, %v6205_v39  ;;  %v6210_v61 = vunpack.i.h.bf16 %v6208_v0 }
 0x2b2   : > { %v6213_v63 = vpop.permute.xlu0 %6212 }
 0x2b3   : > { %v6215_v9 = vunpack.i.h.bf16 %v6213_v63  ;;  %v6214_v19 = vunpack.i.l.bf16 %v6213_v63  ;;  %v3680_v34 = vsel %vm3617_vm8, %v3615_v2, %v6209_v8  ;;  %v3681_v57 = vsel %vm3617_vm8, %v3616_v6, %v6210_v61 }
 0x2b4   : > { %v6218_v50 = vpop.permute.xlu1 %6217 }
 0x2b5   : > { %v6220_v36 = vunpack.i.h.bf16 %v6218_v50  ;;  %v6219_v45 = vunpack.i.l.bf16 %v6218_v50  ;;  %v3743_v38 = vsel %vm3682_vm9, %v3678_v16, %v6214_v19  ;;  %v3744_v28 = vsel %vm3682_vm9, %v3679_v47, %v6215_v9 }
 0x2b6   : > { %v6223_v56 = vpop.permute.xlu0 %6222 }
 0x2b7   : > { %v6225_v17 = vunpack.i.h.bf16 %v6223_v56  ;;  %v6224_v37 = vunpack.i.l.bf16 %v6223_v56  ;;  %v3745_v26 = vsel %vm3682_vm9, %v3680_v34, %v6219_v45  ;;  %v3746_v21 = vsel %vm3682_vm9, %v3681_v57, %v6220_v36 }
 0x2b8   : > { %v6228_v13 = vpop.permute.xlu1 %6227 }
 0x2b9   : > { %v3808_v14 = vsel %vm3747_vm10, %v3743_v38, %v6224_v37  ;;  %v3809_v51 = vsel %vm3747_vm10, %v3744_v28, %v6225_v17  ;;  %v6230_v42 = vunpack.i.h.bf16 %v6228_v13  ;;  %v6229_v54 = vunpack.i.l.bf16 %v6228_v13 }
 0x2ba   : > { %v3842_v58 = vpack.c.bf16 %v3809_v51, %v3808_v14 }
 0x2bb   : > { %v3810_v15 = vsel %vm3747_vm10, %v3745_v26, %v6229_v54  ;;  %v3811_v53 = vsel %vm3747_vm10, %v3746_v21, %v6230_v42 }
 0x2bc   : > { %4918 = vmatprep.mubr.msk.bf16.mxu1 %vm3880_vm11, %v3842_v58  ;;  %v3843_v60 = vpack.c.bf16 %v3811_v53, %v3810_v15 }
 0x2be   : > { %4919 = vmatmul.mubr.msk.bf16.gmra.mrb[28].mxu1 %vm3880_vm11, %v3843_v60 }
 0x2ca   : > { %v4860_v1 = vpop.f32.mrb[0].mxu0 }
 0x2cb   : > { %4272 = vst.msk [vmem:[%s9097_s28 + $0x10] sm:$0xff] %vm515_vm0, %v4860_v1  ;;  %v4015_v10 = vpop.f32.mrb[1].mxu0  ;;  %v4469_v5 = vmul.f32 %v4860_v1, %v4860_v1  ;;  %v4337_v44 = vsel %vm515_vm0, %v4860_v1, 0.0 }
 0x2cc   : > { %4270 = vst.msk [vmem:[%s9097_s28] sm:$0xff] %vm515_vm0, %v4015_v10  ;;  %v4467_v20 = vmul.f32 %v4015_v10, %v4015_v10  ;;  %v4861_v43 = vpop.f32.mrb[2].mxu0  ;;  %v4334_v18 = vsel %vm515_vm0, %v4015_v10, 0.0 }
 0x2cd   : > { %4273 = vst.msk [vmem:[%s9097_s28 + $0x18] sm:$0xff] %vm515_vm0, %v4861_v43  ;;  %v4018_v31 = vpop.f32.mrb[3].mxu0  ;;  %v4470_v52 = vmul.f32 %v4861_v43, %v4861_v43  ;;  %v4534_v40 = vsel %vm515_vm0, %v4469_v5, 0.0  ;;  %v4339_v41 = vsel %vm515_vm0, %v4861_v43, 0.0 }
 0x2ce   : > { %4271 = vst.msk [vmem:[%s9097_s28 + $0x8] sm:$0xff] %vm515_vm0, %v4018_v31  ;;  %v4335_v12 = vsel %vm515_vm0, %v4018_v31, 0.0  ;;  %v4468_v49 = vmul.f32 %v4018_v31, %v4018_v31  ;;  %v4531_v62 = vsel %vm515_vm0, %v4467_v20, 0.0 }
 0x2cf   : > { %v4336_v7 = vadd.f32 %v4335_v12, %v4334_v18  ;;  %v4536_v59 = vsel %vm515_vm0, %v4470_v52, 0.0 }
 0x2d0   : > { %v4532_v11 = vsel %vm515_vm0, %v4468_v49, 0.0 }
 0x2d1   : > { %v4338_v29 = vadd.f32 %v4337_v44, %v4336_v7  ;;  %v4533_v35 = vadd.f32 %v4532_v11, %v4531_v62 }
 0x2d3   : > { %v4535_v30 = vadd.f32 %v4534_v40, %v4533_v35  ;;  %v4340_v33 = vadd.f32 %v4339_v41, %v4338_v29 }
 0x2d5   : > { %v4537_v25 = vadd.f32 %v4536_v59, %v4535_v30 }
 0x2d6   : > { %v4864_v4 = vpop.f32.mrb[4].mxu0 }
 0x2d7   : > { %4276 = vst.msk [vmem:[%s9097_s28 + $0x30] sm:$0xff] %vm515_vm0, %v4864_v4  ;;  %v4031_v0 = vpop.f32.mrb[5].mxu0  ;;  %v4473_v19 = vmul.f32 %v4864_v4, %v4864_v4  ;;  %v4345_v8 = vsel %vm515_vm0, %v4864_v4, 0.0 }
 0x2d8   : > { %4274 = vst.msk [vmem:[%s9097_s28 + $0x20] sm:$0xff] %vm515_vm0, %v4031_v0  ;;  %v4341_v39 = vsel %vm515_vm0, %v4031_v0, 0.0  ;;  %v4471_v22 = vmul.f32 %v4031_v0, %v4031_v0  ;;  %v4865_v63 = vpop.f32.mrb[6].mxu0 }
 0x2d9   : > { %v4342_v55 = vadd.f32 %v4341_v39, %v4340_v33  ;;  %4277 = vst.msk [vmem:[%s9097_s28 + $0x38] sm:$0xff] %vm515_vm0, %v4865_v63  ;;  %v4034_v9 = vpop.f32.mrb[7].mxu0  ;;  %v4474_v50 = vmul.f32 %v4865_v63, %v4865_v63  ;;  %v4542_v56 = vsel %vm515_vm0, %v4473_v19, 0.0  ;;  %v4347_v36 = vsel %vm515_vm0, %v4865_v63, 0.0 }
 0x2da   : > { %v4538_v46 = vsel %vm515_vm0, %v4471_v22, 0.0  ;;  %4275 = vst.msk [vmem:[%s9097_s28 + $0x28] sm:$0xff] %vm515_vm0, %v4034_v9  ;;  %v4343_v32 = vsel %vm515_vm0, %v4034_v9, 0.0  ;;  %v4472_v48 = vmul.f32 %v4034_v9, %v4034_v9 }
 0x2db   : > { %v4539_v27 = vadd.f32 %v4538_v46, %v4537_v25  ;;  %v4344_v3 = vadd.f32 %v4343_v32, %v4342_v55  ;;  %v4544_v37 = vsel %vm515_vm0, %v4474_v50, 0.0 }
 0x2dc   : > { %v4540_v16 = vsel %vm515_vm0, %v4472_v48, 0.0 }
 0x2dd   : > { %v4346_v47 = vadd.f32 %v4345_v8, %v4344_v3  ;;  %v4541_v61 = vadd.f32 %v4540_v16, %v4539_v27 }
 0x2df   : > { %v4543_v45 = vadd.f32 %v4542_v56, %v4541_v61  ;;  %v4348_v17 = vadd.f32 %v4347_v36, %v4346_v47 }
 0x2e1   : > { %v4545_v24 = vadd.f32 %v4544_v37, %v4543_v45 }
 0x2e2   : > { %v4868_v2 = vpop.f32.mrb[8].mxu0 }
 0x2e3   : > { %4280 = vst.msk [vmem:[%s9097_s28 + $0x50] sm:$0xff] %vm515_vm0, %v4868_v2  ;;  %v4047_v38 = vpop.f32.mrb[9].mxu0  ;;  %v4477_v51 = vmul.f32 %v4868_v2, %v4868_v2  ;;  %v4353_v26 = vsel %vm515_vm0, %v4868_v2, 0.0 }
 0x2e4   : > { %4278 = vst.msk [vmem:[%s9097_s28 + $0x40] sm:$0xff] %vm515_vm0, %v4047_v38  ;;  %v4349_v28 = vsel %vm515_vm0, %v4047_v38, 0.0  ;;  %v4475_v23 = vmul.f32 %v4047_v38, %v4047_v38  ;;  %v4869_v6 = vpop.f32.mrb[10].mxu0 }
 0x2e5   : > { %v4350_v34 = vadd.f32 %v4349_v28, %v4348_v17  ;;  %4281 = vst.msk [vmem:[%s9097_s28 + $0x58] sm:$0xff] %vm515_vm0, %v4869_v6  ;;  %v4050_v14 = vpop.f32.mrb[11].mxu0  ;;  %v4478_v21 = vmul.f32 %v4869_v6, %v4869_v6  ;;  %v4550_v1 = vsel %vm515_vm0, %v4477_v51, 0.0  ;;  %v4355_v10 = vsel %vm515_vm0, %v4869_v6, 0.0 }
 0x2e6   : > { %v4546_v13 = vsel %vm515_vm0, %v4475_v23, 0.0  ;;  %4279 = vst.msk [vmem:[%s9097_s28 + $0x48] sm:$0xff] %vm515_vm0, %v4050_v14  ;;  %v4351_v57 = vsel %vm515_vm0, %v4050_v14, 0.0  ;;  %v4476_v58 = vmul.f32 %v4050_v14, %v4050_v14 }
 0x2e7   : > { %v4547_v42 = vadd.f32 %v4546_v13, %v4545_v24  ;;  %v4352_v54 = vadd.f32 %v4351_v57, %v4350_v34  ;;  %v4552_v31 = vsel %vm515_vm0, %v4478_v21, 0.0 }
 0x2e8   : > { %v4548_v15 = vsel %vm515_vm0, %v4476_v58, 0.0 }
 0x2e9   : > { %v4354_v53 = vadd.f32 %v4353_v26, %v4352_v54  ;;  %v4549_v60 = vadd.f32 %v4548_v15, %v4547_v42 }
 0x2eb   : > { %v4551_v20 = vadd.f32 %v4550_v1, %v4549_v60  ;;  %v4356_v43 = vadd.f32 %v4355_v10, %v4354_v53 }
 0x2ed   : > { %v4553_v5 = vadd.f32 %v4552_v31, %v4551_v20 }
 0x2ee   : > { %v4872_v18 = vpop.f32.mrb[12].mxu0 }
 0x2ef   : > { %4284 = vst.msk [vmem:[%s9097_s28 + $0x70] sm:$0xff] %vm515_vm0, %v4872_v18  ;;  %v4063_v12 = vpop.f32.mrb[13].mxu0  ;;  %v4481_v11 = vmul.f32 %v4872_v18, %v4872_v18  ;;  %v4361_v33 = vsel %vm515_vm0, %v4872_v18, 0.0 }
 0x2f0   : > { %4282 = vst.msk [vmem:[%s9097_s28 + $0x60] sm:$0xff] %vm515_vm0, %v4063_v12  ;;  %v4357_v49 = vsel %vm515_vm0, %v4063_v12, 0.0  ;;  %v4479_v7 = vmul.f32 %v4063_v12, %v4063_v12  ;;  %v4873_v44 = vpop.f32.mrb[14].mxu0 }
 0x2f1   : > { %v4358_v62 = vadd.f32 %v4357_v49, %v4356_v43  ;;  %4285 = vst.msk [vmem:[%s9097_s28 + $0x78] sm:$0xff] %vm515_vm0, %v4873_v44  ;;  %v4066_v52 = vpop.f32.mrb[15].mxu0  ;;  %v4482_v59 = vmul.f32 %v4873_v44, %v4873_v44  ;;  %v4558_v39 = vsel %vm515_vm0, %v4481_v11, 0.0  ;;  %v4363_v22 = vsel %vm515_vm0, %v4873_v44, 0.0 }
 0x2f2   : > { %v4554_v29 = vsel %vm515_vm0, %v4479_v7, 0.0  ;;  %4283 = vst.msk [vmem:[%s9097_s28 + $0x68] sm:$0xff] %vm515_vm0, %v4066_v52  ;;  %v4359_v35 = vsel %vm515_vm0, %v4066_v52, 0.0  ;;  %v4480_v40 = vmul.f32 %v4066_v52, %v4066_v52 }
 0x2f3   : > { %v4555_v41 = vadd.f32 %v4554_v29, %v4553_v5  ;;  %v4360_v30 = vadd.f32 %v4359_v35, %v4358_v62  ;;  %v4560_v9 = vsel %vm515_vm0, %v4482_v59, 0.0 }
 0x2f4   : > { %v4556_v25 = vsel %vm515_vm0, %v4480_v40, 0.0 }
 0x2f5   : > { %v4362_v4 = vadd.f32 %v4361_v33, %v4360_v30  ;;  %v4557_v0 = vadd.f32 %v4556_v25, %v4555_v41 }
 0x2f7   : > { %v4559_v63 = vadd.f32 %v4558_v39, %v4557_v0  ;;  %v4364_v55 = vadd.f32 %v4363_v22, %v4362_v4 }
 0x2f9   : > { %v4561_v19 = vadd.f32 %v4560_v9, %v4559_v63 }
 0x2fa   : > { %v4876_v46 = vpop.f32.mrb[16].mxu0 }
 0x2fb   : > { %4288 = vst.msk [vmem:[%s9097_s28 + $0x90] sm:$0xff] %vm515_vm0, %v4876_v46  ;;  %v4079_v32 = vpop.f32.mrb[17].mxu0  ;;  %v4485_v16 = vmul.f32 %v4876_v46, %v4876_v46  ;;  %v4369_v17 = vsel %vm515_vm0, %v4876_v46, 0.0 }
 0x2fc   : > { %4286 = vst.msk [vmem:[%s9097_s28 + $0x80] sm:$0xff] %vm515_vm0, %v4079_v32  ;;  %v4365_v48 = vsel %vm515_vm0, %v4079_v32, 0.0  ;;  %v4483_v27 = vmul.f32 %v4079_v32, %v4079_v32  ;;  %v4877_v3 = vpop.f32.mrb[18].mxu0 }
 0x2fd   : > { %v4366_v8 = vadd.f32 %v4365_v48, %v4364_v55  ;;  %4289 = vst.msk [vmem:[%s9097_s28 + $0x98] sm:$0xff] %vm515_vm0, %v4877_v3  ;;  %v4082_v50 = vpop.f32.mrb[19].mxu0  ;;  %v4486_v37 = vmul.f32 %v4877_v3, %v4877_v3  ;;  %v4566_v28 = vsel %vm515_vm0, %v4485_v16, 0.0  ;;  %v4371_v23 = vsel %vm515_vm0, %v4877_v3, 0.0 }
 0x2fe   : > { %v4562_v47 = vsel %vm515_vm0, %v4483_v27, 0.0  ;;  %4287 = vst.msk [vmem:[%s9097_s28 + $0x88] sm:$0xff] %vm515_vm0, %v4082_v50  ;;  %v4367_v61 = vsel %vm515_vm0, %v4082_v50, 0.0  ;;  %v4484_v56 = vmul.f32 %v4082_v50, %v4082_v50 }
 0x2ff   : > { %v4563_v36 = vadd.f32 %v4562_v47, %v4561_v19  ;;  %v4368_v45 = vadd.f32 %v4367_v61, %v4366_v8  ;;  %v4568_v14 = vsel %vm515_vm0, %v4486_v37, 0.0 }
 0x300   : > { %v4564_v24 = vsel %vm515_vm0, %v4484_v56, 0.0 }
 0x301   : > { %v4370_v2 = vadd.f32 %v4369_v17, %v4368_v45  ;;  %v4565_v38 = vadd.f32 %v4564_v24, %v4563_v36 }
 0x303   : > { %v4567_v6 = vadd.f32 %v4566_v28, %v4565_v38  ;;  %v4372_v34 = vadd.f32 %v4371_v23, %v4370_v2 }
 0x305   : > { %v4569_v51 = vadd.f32 %v4568_v14, %v4567_v6 }
 0x306   : > { %v4880_v13 = vpop.f32.mrb[20].mxu0 }
 0x307   : > { %4292 = vst.msk [vmem:[%s9097_s28 + $0xb0] sm:$0xff] %vm515_vm0, %v4880_v13  ;;  %v4095_v57 = vpop.f32.mrb[21].mxu0  ;;  %v4489_v15 = vmul.f32 %v4880_v13, %v4880_v13  ;;  %v4377_v43 = vsel %vm515_vm0, %v4880_v13, 0.0 }
 0x308   : > { %4290 = vst.msk [vmem:[%s9097_s28 + $0xa0] sm:$0xff] %vm515_vm0, %v4095_v57  ;;  %v4373_v58 = vsel %vm515_vm0, %v4095_v57, 0.0  ;;  %v4487_v42 = vmul.f32 %v4095_v57, %v4095_v57  ;;  %v4881_v54 = vpop.f32.mrb[22].mxu0 }
 0x309   : > { %v4374_v26 = vadd.f32 %v4373_v58, %v4372_v34  ;;  %4293 = vst.msk [vmem:[%s9097_s28 + $0xb8] sm:$0xff] %vm515_vm0, %v4881_v54  ;;  %v4098_v21 = vpop.f32.mrb[23].mxu0  ;;  %v4490_v31 = vmul.f32 %v4881_v54, %v4881_v54  ;;  %v4574_v49 = vsel %vm515_vm0, %v4489_v15, 0.0  ;;  %v4379_v7 = vsel %vm515_vm0, %v4881_v54, 0.0 }
 0x30a   : > { %v4570_v53 = vsel %vm515_vm0, %v4487_v42, 0.0  ;;  %4291 = vst.msk [vmem:[%s9097_s28 + $0xa8] sm:$0xff] %vm515_vm0, %v4098_v21  ;;  %v4375_v60 = vsel %vm515_vm0, %v4098_v21, 0.0  ;;  %v4488_v1 = vmul.f32 %v4098_v21, %v4098_v21 }
 0x30b   : > { %v4571_v10 = vadd.f32 %v4570_v53, %v4569_v51  ;;  %v4376_v20 = vadd.f32 %v4375_v60, %v4374_v26  ;;  %v4576_v52 = vsel %vm515_vm0, %v4490_v31, 0.0 }
 0x30c   : > { %v4572_v5 = vsel %vm515_vm0, %v4488_v1, 0.0 }
 0x30d   : > { %v4378_v18 = vadd.f32 %v4377_v43, %v4376_v20  ;;  %v4573_v12 = vadd.f32 %v4572_v5, %v4571_v10 }
 0x30f   : > { %v4575_v44 = vadd.f32 %v4574_v49, %v4573_v12  ;;  %v4380_v62 = vadd.f32 %v4379_v7, %v4378_v18 }
 0x311   : > { %v4577_v11 = vadd.f32 %v4576_v52, %v4575_v44 }
 0x312   : > { %v4884_v29 = vpop.f32.mrb[24].mxu0 }
 0x313   : > { %4296 = vst.msk [vmem:[%s9097_s28 + $0xd0] sm:$0xff] %vm515_vm0, %v4884_v29  ;;  %v4111_v35 = vpop.f32.mrb[25].mxu0  ;;  %v4493_v25 = vmul.f32 %v4884_v29, %v4884_v29  ;;  %v4385_v55 = vsel %vm515_vm0, %v4884_v29, 0.0 }
 0x314   : > { %4294 = vst.msk [vmem:[%s9097_s28 + $0xc0] sm:$0xff] %vm515_vm0, %v4111_v35  ;;  %v4381_v40 = vsel %vm515_vm0, %v4111_v35, 0.0  ;;  %v4491_v41 = vmul.f32 %v4111_v35, %v4111_v35  ;;  %v4885_v30 = vpop.f32.mrb[26].mxu0 }
 0x315   : > { %v4382_v33 = vadd.f32 %v4381_v40, %v4380_v62  ;;  %4297 = vst.msk [vmem:[%s9097_s28 + $0xd8] sm:$0xff] %vm515_vm0, %v4885_v30  ;;  %v4114_v59 = vpop.f32.mrb[27].mxu0  ;;  %v4494_v9 = vmul.f32 %v4885_v30, %v4885_v30  ;;  %v4582_v48 = vsel %vm515_vm0, %v4493_v25, 0.0  ;;  %v4387_v27 = vsel %vm515_vm0, %v4885_v30, 0.0 }
 0x316   : > { %v4578_v4 = vsel %vm515_vm0, %v4491_v41, 0.0  ;;  %4295 = vst.msk [vmem:[%s9097_s28 + $0xc8] sm:$0xff] %vm515_vm0, %v4114_v59  ;;  %v4383_v0 = vsel %vm515_vm0, %v4114_v59, 0.0  ;;  %v4492_v39 = vmul.f32 %v4114_v59, %v4114_v59 }
 0x317   : > { %v4579_v22 = vadd.f32 %v4578_v4, %v4577_v11  ;;  %v4384_v63 = vadd.f32 %v4383_v0, %v4382_v33  ;;  %v4584_v50 = vsel %vm515_vm0, %v4494_v9, 0.0 }
 0x318   : > { %v4580_v19 = vsel %vm515_vm0, %v4492_v39, 0.0 }
 0x319   : > { %v4386_v46 = vadd.f32 %v4385_v55, %v4384_v63  ;;  %v4581_v32 = vadd.f32 %v4580_v19, %v4579_v22 }
 0x31b   : > { %v4583_v3 = vadd.f32 %v4582_v48, %v4581_v32  ;;  %v4388_v8 = vadd.f32 %v4387_v27, %v4386_v46 }
 0x31d   : > { %v4585_v16 = vadd.f32 %v4584_v50, %v4583_v3 }
 0x31e   : > { %v4888_v47 = vpop.f32.mrb[28].mxu0 }
 0x31f   : > { %4300 = vst.msk [vmem:[%s9097_s28 + $0xf0] sm:$0xff] %vm515_vm0, %v4888_v47  ;;  %v4127_v61 = vpop.f32.mrb[29].mxu0  ;;  %v4497_v24 = vmul.f32 %v4888_v47, %v4888_v47  ;;  %v4393_v34 = vsel %vm515_vm0, %v4888_v47, 0.0 }
 0x320   : > { %4298 = vst.msk [vmem:[%s9097_s28 + $0xe0] sm:$0xff] %vm515_vm0, %v4127_v61  ;;  %v4389_v56 = vsel %vm515_vm0, %v4127_v61, 0.0  ;;  %v4495_v36 = vmul.f32 %v4127_v61, %v4127_v61  ;;  %v4889_v45 = vpop.f32.mrb[30].mxu0 }
 0x321   : > { %v4390_v17 = vadd.f32 %v4389_v56, %v4388_v8  ;;  %4301 = vst.msk [vmem:[%s9097_s28 + $0xf8] sm:$0xff] %vm515_vm0, %v4889_v45  ;;  %v4130_v37 = vpop.f32.mrb[31].mxu0  ;;  %v4498_v14 = vmul.f32 %v4889_v45, %v4889_v45  ;;  %v4590_v58 = vsel %vm515_vm0, %v4497_v24, 0.0  ;;  %v4395_v42 = vsel %vm515_vm0, %v4889_v45, 0.0 }
 0x322   : > { %v4586_v2 = vsel %vm515_vm0, %v4495_v36, 0.0  ;;  %4299 = vst.msk [vmem:[%s9097_s28 + $0xe8] sm:$0xff] %vm515_vm0, %v4130_v37  ;;  %v4391_v38 = vsel %vm515_vm0, %v4130_v37, 0.0  ;;  %v4496_v28 = vmul.f32 %v4130_v37, %v4130_v37 }
 0x323   : > { %v4587_v23 = vadd.f32 %v4586_v2, %v4585_v16  ;;  %v4392_v6 = vadd.f32 %v4391_v38, %v4390_v17  ;;  %v4592_v21 = vsel %vm515_vm0, %v4498_v14, 0.0 }
 0x324   : > { %v4588_v51 = vsel %vm515_vm0, %v4496_v28, 0.0 }
 0x325   : > { %v4394_v13 = vadd.f32 %v4393_v34, %v4392_v6  ;;  %v4589_v57 = vadd.f32 %v4588_v51, %v4587_v23 }
 0x327   : > { %v4591_v54 = vadd.f32 %v4590_v58, %v4589_v57  ;;  %v4396_v26 = vadd.f32 %v4395_v42, %v4394_v13 }
 0x329   : > { %v4593_v15 = vadd.f32 %v4592_v21, %v4591_v54 }
 0x32a   : > { %v4892_v53 = vpop.f32.mrb[0].mxu1 }
 0x32b   : > { %4304 = vst.msk [vmem:[%s9097_s28 + $0x110] sm:$0xff] %vm515_vm0, %v4892_v53  ;;  %v4143_v60 = vpop.f32.mrb[1].mxu1  ;;  %v4501_v5 = vmul.f32 %v4892_v53, %v4892_v53  ;;  %v4401_v62 = vsel %vm515_vm0, %v4892_v53, 0.0 }
 0x32c   : > { %4302 = vst.msk [vmem:[%s9097_s28 + $0x100] sm:$0xff] %vm515_vm0, %v4143_v60  ;;  %v4397_v1 = vsel %vm515_vm0, %v4143_v60, 0.0  ;;  %v4499_v10 = vmul.f32 %v4143_v60, %v4143_v60  ;;  %v4893_v20 = vpop.f32.mrb[2].mxu1 }
 0x32d   : > { %v4398_v43 = vadd.f32 %v4397_v1, %v4396_v26  ;;  %4305 = vst.msk [vmem:[%s9097_s28 + $0x118] sm:$0xff] %vm515_vm0, %v4893_v20  ;;  %v4146_v31 = vpop.f32.mrb[3].mxu1  ;;  %v4502_v52 = vmul.f32 %v4893_v20, %v4893_v20  ;;  %v4598_v40 = vsel %vm515_vm0, %v4501_v5, 0.0  ;;  %v4403_v41 = vsel %vm515_vm0, %v4893_v20, 0.0 }
 0x32e   : > { %v4594_v18 = vsel %vm515_vm0, %v4499_v10, 0.0  ;;  %4303 = vst.msk [vmem:[%s9097_s28 + $0x108] sm:$0xff] %vm515_vm0, %v4146_v31  ;;  %v4399_v12 = vsel %vm515_vm0, %v4146_v31, 0.0  ;;  %v4500_v49 = vmul.f32 %v4146_v31, %v4146_v31 }
 0x32f   : > { %v4595_v7 = vadd.f32 %v4594_v18, %v4593_v15  ;;  %v4400_v44 = vadd.f32 %v4399_v12, %v4398_v43  ;;  %v4600_v59 = vsel %vm515_vm0, %v4502_v52, 0.0 }
 0x330   : > { %v4596_v11 = vsel %vm515_vm0, %v4500_v49, 0.0 }
 0x331   : > { %v4402_v29 = vadd.f32 %v4401_v62, %v4400_v44  ;;  %v4597_v35 = vadd.f32 %v4596_v11, %v4595_v7 }
 0x333   : > { %v4599_v30 = vadd.f32 %v4598_v40, %v4597_v35  ;;  %v4404_v33 = vadd.f32 %v4403_v41, %v4402_v29 }
 0x335   : > { %v4601_v25 = vadd.f32 %v4600_v59, %v4599_v30 }
 0x336   : > { %v4896_v4 = vpop.f32.mrb[4].mxu1 }
 0x337   : > { %4308 = vst.msk [vmem:[%s9097_s28 + $0x130] sm:$0xff] %vm515_vm0, %v4896_v4  ;;  %v4159_v0 = vpop.f32.mrb[5].mxu1  ;;  %v4505_v19 = vmul.f32 %v4896_v4, %v4896_v4  ;;  %v4409_v8 = vsel %vm515_vm0, %v4896_v4, 0.0 }
 0x338   : > { %4306 = vst.msk [vmem:[%s9097_s28 + $0x120] sm:$0xff] %vm515_vm0, %v4159_v0  ;;  %v4405_v39 = vsel %vm515_vm0, %v4159_v0, 0.0  ;;  %v4503_v22 = vmul.f32 %v4159_v0, %v4159_v0  ;;  %v4897_v63 = vpop.f32.mrb[6].mxu1 }
 0x339   : > { %v4406_v55 = vadd.f32 %v4405_v39, %v4404_v33  ;;  %4309 = vst.msk [vmem:[%s9097_s28 + $0x138] sm:$0xff] %vm515_vm0, %v4897_v63  ;;  %v4162_v9 = vpop.f32.mrb[7].mxu1  ;;  %v4506_v50 = vmul.f32 %v4897_v63, %v4897_v63  ;;  %v4606_v56 = vsel %vm515_vm0, %v4505_v19, 0.0  ;;  %v4411_v36 = vsel %vm515_vm0, %v4897_v63, 0.0 }
 0x33a   : > { %v4602_v46 = vsel %vm515_vm0, %v4503_v22, 0.0  ;;  %4307 = vst.msk [vmem:[%s9097_s28 + $0x128] sm:$0xff] %vm515_vm0, %v4162_v9  ;;  %v4407_v32 = vsel %vm515_vm0, %v4162_v9, 0.0  ;;  %v4504_v48 = vmul.f32 %v4162_v9, %v4162_v9 }
 0x33b   : > { %v4603_v27 = vadd.f32 %v4602_v46, %v4601_v25  ;;  %v4408_v3 = vadd.f32 %v4407_v32, %v4406_v55  ;;  %v4608_v37 = vsel %vm515_vm0, %v4506_v50, 0.0 }
 0x33c   : > { %v4604_v16 = vsel %vm515_vm0, %v4504_v48, 0.0 }
 0x33d   : > { %v4410_v47 = vadd.f32 %v4409_v8, %v4408_v3  ;;  %v4605_v61 = vadd.f32 %v4604_v16, %v4603_v27 }
 0x33f   : > { %v4607_v45 = vadd.f32 %v4606_v56, %v4605_v61  ;;  %v4412_v17 = vadd.f32 %v4411_v36, %v4410_v47 }
 0x341   : > { %v4609_v24 = vadd.f32 %v4608_v37, %v4607_v45 }
 0x343   : > { %v4900_v2 = vpop.f32.mrb[8].mxu1 }
 0x344   : > { %4312 = vst.msk [vmem:[%s9097_s28 + $0x150] sm:$0xff] %vm515_vm0, %v4900_v2  ;;  %v4175_v38 = vpop.f32.mrb[9].mxu1  ;;  %v4509_v51 = vmul.f32 %v4900_v2, %v4900_v2  ;;  %v4417_v26 = vsel %vm515_vm0, %v4900_v2, 0.0 }
 0x345   : > { %4310 = vst.msk [vmem:[%s9097_s28 + $0x140] sm:$0xff] %vm515_vm0, %v4175_v38  ;;  %v4413_v28 = vsel %vm515_vm0, %v4175_v38, 0.0  ;;  %v4507_v23 = vmul.f32 %v4175_v38, %v4175_v38  ;;  %v4901_v6 = vpop.f32.mrb[10].mxu1 }
 0x346   : > { %v4414_v34 = vadd.f32 %v4413_v28, %v4412_v17  ;;  %4313 = vst.msk [vmem:[%s9097_s28 + $0x158] sm:$0xff] %vm515_vm0, %v4901_v6  ;;  %v4178_v14 = vpop.f32.mrb[11].mxu1  ;;  %v4510_v21 = vmul.f32 %v4901_v6, %v4901_v6  ;;  %v4614_v1 = vsel %vm515_vm0, %v4509_v51, 0.0  ;;  %v4419_v10 = vsel %vm515_vm0, %v4901_v6, 0.0 }
 0x347   : > { %v4610_v13 = vsel %vm515_vm0, %v4507_v23, 0.0  ;;  %4311 = vst.msk [vmem:[%s9097_s28 + $0x148] sm:$0xff] %vm515_vm0, %v4178_v14  ;;  %v4415_v57 = vsel %vm515_vm0, %v4178_v14, 0.0  ;;  %v4508_v58 = vmul.f32 %v4178_v14, %v4178_v14 }
 0x348   : > { %v4611_v42 = vadd.f32 %v4610_v13, %v4609_v24  ;;  %v4416_v54 = vadd.f32 %v4415_v57, %v4414_v34  ;;  %v4616_v31 = vsel %vm515_vm0, %v4510_v21, 0.0 }
 0x349   : > { %v4612_v15 = vsel %vm515_vm0, %v4508_v58, 0.0 }
 0x34a   : > { %v4418_v53 = vadd.f32 %v4417_v26, %v4416_v54  ;;  %v4613_v60 = vadd.f32 %v4612_v15, %v4611_v42 }
 0x34c   : > { %v4615_v20 = vadd.f32 %v4614_v1, %v4613_v60  ;;  %v4420_v43 = vadd.f32 %v4419_v10, %v4418_v53 }
 0x34e   : > { %v4617_v5 = vadd.f32 %v4616_v31, %v4615_v20 }
 0x351   : > { %v4904_v18 = vpop.f32.mrb[12].mxu1 }
 0x352   : > { %4316 = vst.msk [vmem:[%s9097_s28 + $0x170] sm:$0xff] %vm515_vm0, %v4904_v18  ;;  %v4191_v12 = vpop.f32.mrb[13].mxu1  ;;  %v4513_v11 = vmul.f32 %v4904_v18, %v4904_v18  ;;  %v4425_v33 = vsel %vm515_vm0, %v4904_v18, 0.0 }
 0x353   : > { %4314 = vst.msk [vmem:[%s9097_s28 + $0x160] sm:$0xff] %vm515_vm0, %v4191_v12  ;;  %v4421_v49 = vsel %vm515_vm0, %v4191_v12, 0.0  ;;  %v4511_v7 = vmul.f32 %v4191_v12, %v4191_v12  ;;  %v4905_v44 = vpop.f32.mrb[14].mxu1 }
 0x354   : > { %v4422_v62 = vadd.f32 %v4421_v49, %v4420_v43  ;;  %4317 = vst.msk [vmem:[%s9097_s28 + $0x178] sm:$0xff] %vm515_vm0, %v4905_v44  ;;  %v4194_v52 = vpop.f32.mrb[15].mxu1  ;;  %v4514_v59 = vmul.f32 %v4905_v44, %v4905_v44  ;;  %v4622_v39 = vsel %vm515_vm0, %v4513_v11, 0.0  ;;  %v4427_v22 = vsel %vm515_vm0, %v4905_v44, 0.0 }
 0x355   : > { %v4618_v29 = vsel %vm515_vm0, %v4511_v7, 0.0  ;;  %4315 = vst.msk [vmem:[%s9097_s28 + $0x168] sm:$0xff] %vm515_vm0, %v4194_v52  ;;  %v4423_v35 = vsel %vm515_vm0, %v4194_v52, 0.0  ;;  %v4512_v40 = vmul.f32 %v4194_v52, %v4194_v52 }
 0x356   : > { %v4619_v41 = vadd.f32 %v4618_v29, %v4617_v5  ;;  %v4424_v30 = vadd.f32 %v4423_v35, %v4422_v62  ;;  %v4624_v9 = vsel %vm515_vm0, %v4514_v59, 0.0 }
 0x357   : > { %v4620_v25 = vsel %vm515_vm0, %v4512_v40, 0.0 }
 0x358   : > { %v4426_v4 = vadd.f32 %v4425_v33, %v4424_v30  ;;  %v4621_v0 = vadd.f32 %v4620_v25, %v4619_v41 }
 0x35a   : > { %v4623_v63 = vadd.f32 %v4622_v39, %v4621_v0  ;;  %v4428_v55 = vadd.f32 %v4427_v22, %v4426_v4 }
 0x35c   : > { %v4625_v19 = vadd.f32 %v4624_v9, %v4623_v63 }
 0x361   : > { %v4908_v46 = vpop.f32.mrb[16].mxu1 }
 0x362   : > { %4320 = vst.msk [vmem:[%s9097_s28 + $0x190] sm:$0xff] %vm515_vm0, %v4908_v46  ;;  %v4207_v32 = vpop.f32.mrb[17].mxu1  ;;  %v4517_v16 = vmul.f32 %v4908_v46, %v4908_v46  ;;  %v4433_v17 = vsel %vm515_vm0, %v4908_v46, 0.0 }
 0x363   : > { %4318 = vst.msk [vmem:[%s9097_s28 + $0x180] sm:$0xff] %vm515_vm0, %v4207_v32  ;;  %v4429_v48 = vsel %vm515_vm0, %v4207_v32, 0.0  ;;  %v4515_v27 = vmul.f32 %v4207_v32, %v4207_v32  ;;  %v4909_v3 = vpop.f32.mrb[18].mxu1 }
 0x364   : > { %v4430_v8 = vadd.f32 %v4429_v48, %v4428_v55  ;;  %4321 = vst.msk [vmem:[%s9097_s28 + $0x198] sm:$0xff] %vm515_vm0, %v4909_v3  ;;  %v4210_v50 = vpop.f32.mrb[19].mxu1  ;;  %v4518_v37 = vmul.f32 %v4909_v3, %v4909_v3  ;;  %v4630_v28 = vsel %vm515_vm0, %v4517_v16, 0.0  ;;  %v4435_v23 = vsel %vm515_vm0, %v4909_v3, 0.0 }
 0x365   : > { %v4626_v47 = vsel %vm515_vm0, %v4515_v27, 0.0  ;;  %4319 = vst.msk [vmem:[%s9097_s28 + $0x188] sm:$0xff] %vm515_vm0, %v4210_v50  ;;  %v4431_v61 = vsel %vm515_vm0, %v4210_v50, 0.0  ;;  %v4516_v56 = vmul.f32 %v4210_v50, %v4210_v50 }
 0x366   : > { %v4627_v36 = vadd.f32 %v4626_v47, %v4625_v19  ;;  %v4432_v45 = vadd.f32 %v4431_v61, %v4430_v8  ;;  %v4632_v14 = vsel %vm515_vm0, %v4518_v37, 0.0 }
 0x367   : > { %v4628_v24 = vsel %vm515_vm0, %v4516_v56, 0.0 }
 0x368   : > { %v4434_v2 = vadd.f32 %v4433_v17, %v4432_v45  ;;  %v4629_v38 = vadd.f32 %v4628_v24, %v4627_v36 }
 0x36a   : > { %v4631_v6 = vadd.f32 %v4630_v28, %v4629_v38  ;;  %v4436_v34 = vadd.f32 %v4435_v23, %v4434_v2 }
 0x36c   : > { %v4633_v51 = vadd.f32 %v4632_v14, %v4631_v6 }
 0x371   : > { %v4912_v13 = vpop.f32.mrb[20].mxu1 }
 0x372   : > { %4324 = vst.msk [vmem:[%s9097_s28 + $0x1b0] sm:$0xff] %vm515_vm0, %v4912_v13  ;;  %v4223_v57 = vpop.f32.mrb[21].mxu1  ;;  %v4521_v15 = vmul.f32 %v4912_v13, %v4912_v13  ;;  %v4441_v43 = vsel %vm515_vm0, %v4912_v13, 0.0 }
 0x373   : > { %4322 = vst.msk [vmem:[%s9097_s28 + $0x1a0] sm:$0xff] %vm515_vm0, %v4223_v57  ;;  %v4437_v58 = vsel %vm515_vm0, %v4223_v57, 0.0  ;;  %v4519_v42 = vmul.f32 %v4223_v57, %v4223_v57  ;;  %v4913_v54 = vpop.f32.mrb[22].mxu1 }
 0x374   : > { %v4438_v26 = vadd.f32 %v4437_v58, %v4436_v34  ;;  %4325 = vst.msk [vmem:[%s9097_s28 + $0x1b8] sm:$0xff] %vm515_vm0, %v4913_v54  ;;  %v4226_v21 = vpop.f32.mrb[23].mxu1  ;;  %v4522_v31 = vmul.f32 %v4913_v54, %v4913_v54  ;;  %v4638_v49 = vsel %vm515_vm0, %v4521_v15, 0.0  ;;  %v4443_v7 = vsel %vm515_vm0, %v4913_v54, 0.0 }
 0x375   : > { %v4634_v53 = vsel %vm515_vm0, %v4519_v42, 0.0  ;;  %4323 = vst.msk [vmem:[%s9097_s28 + $0x1a8] sm:$0xff] %vm515_vm0, %v4226_v21  ;;  %v4439_v60 = vsel %vm515_vm0, %v4226_v21, 0.0  ;;  %v4520_v1 = vmul.f32 %v4226_v21, %v4226_v21 }
 0x376   : > { %v4635_v10 = vadd.f32 %v4634_v53, %v4633_v51  ;;  %v4440_v20 = vadd.f32 %v4439_v60, %v4438_v26  ;;  %v4640_v52 = vsel %vm515_vm0, %v4522_v31, 0.0 }
 0x377   : > { %v4636_v5 = vsel %vm515_vm0, %v4520_v1, 0.0 }
 0x378   : > { %v4442_v18 = vadd.f32 %v4441_v43, %v4440_v20  ;;  %v4637_v12 = vadd.f32 %v4636_v5, %v4635_v10 }
 0x37a   : > { %v4639_v44 = vadd.f32 %v4638_v49, %v4637_v12  ;;  %v4444_v62 = vadd.f32 %v4443_v7, %v4442_v18 }
 0x37c   : > { %v4641_v11 = vadd.f32 %v4640_v52, %v4639_v44 }
 0x381   : > { %v4916_v29 = vpop.f32.mrb[24].mxu1 }
 0x382   : > { %4328 = vst.msk [vmem:[%s9097_s28 + $0x1d0] sm:$0xff] %vm515_vm0, %v4916_v29  ;;  %v4239_v35 = vpop.f32.mrb[25].mxu1  ;;  %v4525_v25 = vmul.f32 %v4916_v29, %v4916_v29  ;;  %v4449_v55 = vsel %vm515_vm0, %v4916_v29, 0.0 }
 0x383   : > { %4326 = vst.msk [vmem:[%s9097_s28 + $0x1c0] sm:$0xff] %vm515_vm0, %v4239_v35  ;;  %v4445_v40 = vsel %vm515_vm0, %v4239_v35, 0.0  ;;  %v4523_v41 = vmul.f32 %v4239_v35, %v4239_v35  ;;  %v4917_v30 = vpop.f32.mrb[26].mxu1 }
 0x384   : > { %v4446_v33 = vadd.f32 %v4445_v40, %v4444_v62  ;;  %4329 = vst.msk [vmem:[%s9097_s28 + $0x1d8] sm:$0xff] %vm515_vm0, %v4917_v30  ;;  %v4242_v59 = vpop.f32.mrb[27].mxu1  ;;  %v4526_v9 = vmul.f32 %v4917_v30, %v4917_v30  ;;  %v4646_v48 = vsel %vm515_vm0, %v4525_v25, 0.0  ;;  %v4451_v27 = vsel %vm515_vm0, %v4917_v30, 0.0 }
 0x385   : > { %v4642_v4 = vsel %vm515_vm0, %v4523_v41, 0.0  ;;  %4327 = vst.msk [vmem:[%s9097_s28 + $0x1c8] sm:$0xff] %vm515_vm0, %v4242_v59  ;;  %v4447_v0 = vsel %vm515_vm0, %v4242_v59, 0.0  ;;  %v4524_v39 = vmul.f32 %v4242_v59, %v4242_v59 }
 0x386   : > { %v4643_v22 = vadd.f32 %v4642_v4, %v4641_v11  ;;  %v4448_v63 = vadd.f32 %v4447_v0, %v4446_v33  ;;  %v4648_v50 = vsel %vm515_vm0, %v4526_v9, 0.0 }
 0x387   : > { %v4644_v19 = vsel %vm515_vm0, %v4524_v39, 0.0 }
 0x388   : > { %v4450_v46 = vadd.f32 %v4449_v55, %v4448_v63  ;;  %v4645_v32 = vadd.f32 %v4644_v19, %v4643_v22 }
 0x38a   : > { %v4647_v3 = vadd.f32 %v4646_v48, %v4645_v32  ;;  %v4452_v8 = vadd.f32 %v4451_v27, %v4450_v46 }
 0x38c   : > { %v4649_v16 = vadd.f32 %v4648_v50, %v4647_v3 }
 0x391   : > { %v4920_v47 = vpop.f32.mrb[28].mxu1 }
 0x392   : > { %4332 = vst.msk [vmem:[%s9097_s28 + $0x1f0] sm:$0xff] %vm515_vm0, %v4920_v47  ;;  %v4255_v61 = vpop.f32.mrb[29].mxu1  ;;  %v4529_v24 = vmul.f32 %v4920_v47, %v4920_v47  ;;  %v4457_v34 = vsel %vm515_vm0, %v4920_v47, 0.0 }
 0x393   : > { %4330 = vst.msk [vmem:[%s9097_s28 + $0x1e0] sm:$0xff] %vm515_vm0, %v4255_v61  ;;  %v4453_v56 = vsel %vm515_vm0, %v4255_v61, 0.0  ;;  %v4527_v36 = vmul.f32 %v4255_v61, %v4255_v61  ;;  %v4921_v45 = vpop.f32.mrb[30].mxu1 }
 0x394   : > { %v4454_v17 = vadd.f32 %v4453_v56, %v4452_v8  ;;  %4333 = vst.msk [vmem:[%s9097_s28 + $0x1f8] sm:$0xff] %vm515_vm0, %v4921_v45  ;;  %v4258_v37 = vpop.f32.mrb[31].mxu1  ;;  %v4530_v14 = vmul.f32 %v4921_v45, %v4921_v45  ;;  %v4654_v58 = vsel %vm515_vm0, %v4529_v24, 0.0  ;;  %v4459_v42 = vsel %vm515_vm0, %v4921_v45, 0.0 }
 0x395   : > { %v4650_v2 = vsel %vm515_vm0, %v4527_v36, 0.0  ;;  %4331 = vst.msk [vmem:[%s9097_s28 + $0x1e8] sm:$0xff] %vm515_vm0, %v4258_v37  ;;  %v4455_v38 = vsel %vm515_vm0, %v4258_v37, 0.0  ;;  %v4528_v28 = vmul.f32 %v4258_v37, %v4258_v37 }
 0x396   : > { %v4651_v23 = vadd.f32 %v4650_v2, %v4649_v16  ;;  %v4456_v6 = vadd.f32 %v4455_v38, %v4454_v17  ;;  %v4656_v21 = vsel %vm515_vm0, %v4530_v14, 0.0 }
 0x397   : > { %v4652_v51 = vsel %vm515_vm0, %v4528_v28, 0.0 }
 0x398   : > { %v4458_v13 = vadd.f32 %v4457_v34, %v4456_v6  ;;  %v4653_v57 = vadd.f32 %v4652_v51, %v4651_v23 }
 0x39a   : > { %v4460_v54 = vadd.f32 %v4459_v42, %v4458_v13  ;;  %v4655_v26 = vadd.f32 %v4654_v58, %v4653_v57 }
 0x39c   : > { %v4461_v15 = vrot.slane %v4460_v54, 4  ;;  %v4657_v53 = vadd.f32 %v4656_v21, %v4655_v26 }
 0x39e   : > { %v4462_v60 = vadd.f32 %v4461_v15, %v4460_v54  ;;  %v4658_v1 = vrot.slane %v4657_v53, 4 }
 0x3a0   : > { %v4463_v10 = vrot.slane %v4462_v60, 2  ;;  %v4659_v20 = vadd.f32 %v4658_v1, %v4657_v53 }
 0x3a2   : > { %v4464_v43 = vadd.f32 %v4463_v10, %v4462_v60  ;;  %v4660_v31 = vrot.slane %v4659_v20, 2 }
 0x3a4   : > { %v4465_v5 = vrot.slane %v4464_v43, 1  ;;  %v4661_v18 = vadd.f32 %v4660_v31, %v4659_v20 }
 0x3a6   : > { %v4662_v12 = vrot.slane %v4661_v18, 1  ;;  %v4466_v49 = vadd.f32 %v4465_v5, %v4464_v43 }
 0x3a8   : > { %v4663_v7 = vadd.f32 %v4662_v12, %v4661_v18 }
 0x3aa   : > { %v4665_v44 = vsel %vm4664_vm12, %v4466_v49, %v4663_v7 }
 0x3ab   : > { %4666 = vst.msk [vmem:[%s243_s30] sm:$0x3] %vm518_vm1, %v4665_v44 }
 0x3ac PF: > { %s16_s18 = sadd.s32 1, %s6266_s18  }
 0x3ad   : > { %p13_p5 = scmp.ge.s32.totalorder %s16_s18, 4  }
 0x3af   :  { %15 = sbr.rel (!%p13_p5) target bundleno = 1 (0x1), region = 81 }

</bundles_post_ra>
